<compile_context>
chip_gen: v6e
topology: v6e:2x2x1
jax: 0.10.0
libtpu: 0.0.40
codegen_flags: <defaults>
</compile_context>

<pallas_src>
import jax
import jax.numpy as jnp
from jax.experimental import pallas as pl
from jax.experimental.pallas import tpu as pltpu

EPS = 1e-5  # nn.BatchNorm2d default eps


# ----------------------------------------------------------------------------
# Kernel
# ----------------------------------------------------------------------------
def _make_kernel(S, use_pool, Bt, H, W, Cin, Cout):
    Ho, Wo = H // S, W // S
    M = Bt * Ho * Wo

    def kernel(ph_ref, wdw_ref, w2_ref, bias_ref, *rest):
        if use_pool:
            w3_ref, out_ref = rest
        else:
            (out_ref,) = rest

        # Single full-block load; activations may travel bf16 over HBM and are
        # upcast exactly once here (all VPU tap math is f32 -> v5e-safe).
        phv = ph_ref[...].astype(jnp.float32)        # (Bt, S, S, HpS, WpS, Cin)

        # ---- branch1: depthwise 5x5, stride S (BN1 scale folded into weights)
        # kw-outer: the un-8-aligned sublane shift `b` is applied once per
        # column view and reused by all 5 kh taps (leading-dim slices = free).
        acc = None
        for kw in range(5):
            q, b = kw % S, kw // S
            bview = phv[:, :, q, :, b:b + Wo, :]      # (Bt, S, HpS, Wo, Cin)
            for kh in range(5):
                p, a = kh % S, kh // S
                patch = bview[:, p, a:a + Ho, :, :]   # (Bt, Ho, Wo, Cin)
                term = patch * wdw_ref[kh, kw]        # (1, Cin) broadcast
                acc = term if acc is None else acc + term  # tap 0 inits acc

        # ---- branch1: 1x1 conv on the MXU.  BN2 scale folded into w2; every
        # bias/shift of the block pre-summed into one per-Cout vector.
        # reshape keeps the minor (lane) dim -> cheap, guaranteed lowering.
        y = acc.reshape(M, Cin).astype(w2_ref.dtype)
        out = jnp.dot(y, w2_ref[...], preferred_element_type=jnp.float32)
        out = out + bias_ref[...]

        # ---- shortcut
        if use_pool:
            # MaxPool(k=S, s=S): x[S*i+p, S*j+q] == ph[p, q, i+1, j+1]
            xp = phv[:, 0, 0, 1:1 + Ho, 1:1 + Wo, :]
            for p in range(S):
                for q in range(S):
                    if p == 0 and q == 0:
                        continue
                    xp = jnp.maximum(xp, phv[:, p, q, 1:1 + Ho, 1:1 + Wo, :])
            xpf = xp.reshape(M, Cin).astype(w3_ref.dtype)
            # A single K-concatenated dot ([y|xp] @ [[W2];[W3]]) was considered,
            # but a lane-dim concat of Cin(=4..96)-wide operands is a risky
            # relayout; a second tiny dot only costs one extra MXU weight push.
            out = out + jnp.dot(xpf, w3_ref[...],
                                preferred_element_type=jnp.float32)
        else:
            # identity shortcut: x[i, j] == xpad[i+2, j+2]
            out = out + phv[:, 0, 0, 2:2 + H, 2:2 + W, :].reshape(M, Cin)

        out_ref[...] = out.astype(out_ref.dtype)

    return kernel


# ----------------------------------------------------------------------------
# Glue
# ----------------------------------------------------------------------------
def _bn_fold(gamma, beta, mean, var):
    """Eval-mode BatchNorm -> per-channel (scale, shift)."""
    s = gamma / jnp.sqrt(var + EPS)
    return s, beta - mean * s


def blaze_block_pallas(x_nchw, params, stride=1, *, use_bf16=False,
                       batch_tile=None):
    assert stride in (1, 2)
    use_pool = stride > 1
    S = stride
    x = x_nchw.astype(jnp.float32)
    N, Cin, H, W = x.shape
    Cout = params["w_pw"].shape[1]
    if not use_pool:
        assert Cin == Cout, "identity shortcut requires in_channels == out_channels"
    assert H % S == 0 and W % S == 0
    Ho, Wo = H // S, W // S

    # ---- fold conv biases + BatchNorms (eval) into weights and ONE bias ----
    s1, t1 = _bn_fold(*params["bn1"])
    s2, t2 = _bn_fold(*params["bn2"])
    w_dw_f = (params["w_dw"] * s1).reshape(5, 5, 1, Cin).astype(jnp.float32)
    c1 = params["b_dw"] * s1 + t1                       # per-Cin, post-BN1
    w2f = params["w_pw"] * s2[None, :]                  # (Cin, Cout)
    bias = c1 @ w2f + (params["b_pw"] * s2 + t2)        # (Cout,)
    if use_pool:
        s3, t3 = _bn_fold(*params["bn3"])
        w3f = params["w_sc"] * s3[None, :]
        bias = bias + (params["b_sc"] * s3 + t3)
    bias = bias.reshape(1, Cout).astype(jnp.float32)

    mm_dtype = jnp.bfloat16 if use_bf16 else jnp.float32
    act_dtype = jnp.bfloat16 if use_bf16 else jnp.float32
    w2f = w2f.astype(mm_dtype)
    if use_pool:
        w3f = w3f.astype(mm_dtype)

    # ---- input path: pad + ONE fused transpose into phase layout ----
    Hp, Wp = H + 4, W + 4
    HpS, WpS = Hp // S, Wp // S
    xpad = jnp.pad(x, ((0, 0), (0, 0), (2, 2), (2, 2)))
    if S == 1:
        phases = jnp.transpose(xpad, (0, 2, 3, 1)).reshape(N, 1, 1, Hp, Wp, Cin)
    else:
        # ph[n, p, q, a, b, c] = xpad[n, c, S*a+p, S*b+q]
        phases = jnp.transpose(
            xpad.reshape(N, Cin, HpS, S, WpS, S), (0, 3, 5, 2, 4, 1))
    phases = phases.astype(act_dtype)

    # ---- batch tiling: Bt images per grid step (fills MXU M, amortizes the
    # ~0.35us/step overhead); keep >=2 steps when N>=2 so both v7x TCs work.
    if batch_tile is None:
        batch_tile = 1 if N <= 2 else min(4, pl.cdiv(N, 2))
    Bt = max(1, min(batch_tile, N))
    G = pl.cdiv(N, Bt)
    Npad = G * Bt
    if Npad != N:
        phases = jnp.pad(phases, ((0, Npad - N),) + ((0, 0),) * 5)

    M = Bt * Ho * Wo

    in_specs = [
        pl.BlockSpec((Bt, S, S, HpS, WpS, Cin), lambda g: (g, 0, 0, 0, 0, 0)),
        pl.BlockSpec((5, 5, 1, Cin), lambda g: (0, 0, 0, 0)),
        pl.BlockSpec((Cin, Cout), lambda g: (0, 0)),
        pl.BlockSpec((1, Cout), lambda g: (0, 0)),
    ]
    inputs = [phases, w_dw_f, w2f, bias]
    if use_pool:
        in_specs.append(pl.BlockSpec((Cin, Cout), lambda g: (0, 0)))
        inputs.append(w3f)

    kernel = _make_kernel(S, use_pool, Bt, H, W, Cin, Cout)

    out2d = pl.pallas_call(
        kernel,
        out_shape=jax.ShapeDtypeStruct((Npad * Ho * Wo, Cout), jnp.float32),
        grid=(G,),
        in_specs=in_specs,
        out_specs=pl.BlockSpec((M, Cout), lambda g: (g, 0)),
        compiler_params=pltpu.CompilerParams(dimension_semantics=("parallel",)),
    )(*inputs)

    out = out2d.reshape(Npad, Ho, Wo, Cout)[:N]
    return jnp.transpose(out, (0, 3, 1, 2))          # back to NCHW


# ----------------------------------------------------------------------------
# Deterministic parameter init (shapes from BlazeBlock.__init__, mid = in)
# ----------------------------------------------------------------------------
def init_params(key, cin, cout, use_pool):
    def bn(k, c):
        kg, kb, km, kv = jax.random.split(k, 4)
        return (jax.random.uniform(kg, (c,), jnp.float32, 0.5, 1.5),   # gamma
                jax.random.normal(kb, (c,), jnp.float32) * 0.1,        # beta
                jax.random.normal(km, (c,), jnp.float32) * 0.1,        # running_mean
                jax.random.uniform(kv, (c,), jnp.float32, 0.5, 1.5))   # running_var

    k = jax.random.split(key, 9)
    params = {
        "w_dw": jax.random.normal(k[0], (5, 5, cin), jnp.float32) * 0.2,
        "b_dw": jax.random.normal(k[1], (cin,), jnp.float32) * 0.1,
        "bn1": bn(k[2], cin),
        "w_pw": jax.random.normal(k[3], (cin, cout), jnp.float32) * 0.2,
        "b_pw": jax.random.normal(k[4], (cout,), jnp.float32) * 0.1,
        "bn2": bn(k[5], cout),
    }
    if use_pool:
        params["w_sc"] = jax.random.normal(k[6], (cin, cout), jnp.float32) * 0.2
        params["b_sc"] = jax.random.normal(k[7], (cout,), jnp.float32) * 0.1
        params["bn3"] = bn(k[8], cout)
    return params


# ----------------------------------------------------------------------------
# Pure-JAX reference (for verification only)
# ----------------------------------------------------------------------------
def _bn_eval(x, gamma, beta, mean, var):
    return (x - mean) / jnp.sqrt(var + EPS) * gamma + beta


def ref_blaze_block(x_nchw, params, stride):
    x = jnp.transpose(x_nchw, (0, 2, 3, 1)).astype(jnp.float32)
    N, H, W, Cin = x.shape
    use_pool = stride > 1
    w_dw = params["w_dw"].reshape(5, 5, 1, Cin)
    dw = jax.lax.conv_general_dilated(
        x, w_dw, window_strides=(stride, stride), padding=((2, 2), (2, 2)),
        dimension_numbers=("NHWC", "HWIO", "NHWC"),
        feature_group_count=Cin) + params["b_dw"]
    dw = _bn_eval(dw, *params["bn1"])
    pw = jnp.einsum("nhwc,cd->nhwd", dw, params["w_pw"]) + params["b_pw"]
    pw = _bn_eval(pw, *params["bn2"])
    if use_pool:
        mp = jax.lax.reduce_window(x, -jnp.inf, jax.lax.max,
                                   (1, stride, stride, 1),
                                   (1, stride, stride, 1), "VALID")
        sc = jnp.einsum("nhwc,cd->nhwd", mp, params["w_sc"]) + params["b_sc"]
        sc = _bn_eval(sc, *params["bn3"])
    else:
        sc = x
    return jnp.transpose(pw + sc, (0, 3, 1, 2))


def _rel_l2(a, b):
    return jnp.linalg.norm((a - b).ravel()) / (jnp.linalg.norm(b.ravel()) + 1e-12)


# ----------------------------------------------------------------------------
if __name__ == "__main__":
    key = jax.random.PRNGKey(0)
    kx1, kx2, kp1, kp2 = jax.random.split(key, 4)

    # Case 1: stride=1 (identity shortcut), in=out=4, 16x16 spatial, batch=2
    x1 = jax.random.normal(kx1, (2, 4, 16, 16), jnp.float32)
    p1 = init_params(kp1, 4, 4, use_pool=False)
    out1 = jax.block_until_ready(blaze_block_pallas(x1, p1, stride=1))
    ref1 = ref_blaze_block(x1, p1, 1)
    assert out1.shape == (2, 4, 16, 16)
    assert jnp.allclose(out1, ref1, atol=1e-4, rtol=1e-4), "stride=1 mismatch"

    # Case 2: stride=2 (MaxPool + 1x1 conv shortcut), in=4 -> out=8
    x2 = jax.random.normal(kx2, (2, 4, 16, 16), jnp.float32)
    p2 = init_params(kp2, 4, 8, use_pool=True)
    out2 = jax.block_until_ready(blaze_block_pallas(x2, p2, stride=2))
    ref2 = ref_blaze_block(x2, p2, 2)
    assert out2.shape == (2, 8, 8, 8)
    assert jnp.allclose(out2, ref2, atol=1e-4, rtol=1e-4), "stride=2 mismatch"

    # bf16-over-HBM variants (half the activation DMA bytes, bf16 MXU dots);
    # loose statistical check -- the f32 path above is the strict one.
    out1b = jax.block_until_ready(
        blaze_block_pallas(x1, p1, stride=1, use_bf16=True))
    assert float(_rel_l2(out1b, ref1)) < 5e-2, "bf16 stride=1 mismatch"
    out2b = jax.block_until_ready(
        blaze_block_pallas(x2, p2, stride=2, use_bf16=True))
    assert float(_rel_l2(out2b, ref2)) < 5e-2, "bf16 stride=2 mismatch"

    print("KERNEL_OK")
</pallas_src>

<mosaic_0001>
module attributes {stable_mosaic.version = 11 : i64} {
  func.func @kernel(%arg0: i32, %arg1: memref<1x1x1x20x20x4xf32, #tpu.memory_space<vmem>>, %arg2: memref<5x5x1x4xf32, #tpu.memory_space<vmem>>, %arg3: memref<4x4xf32, #tpu.memory_space<vmem>>, %arg4: memref<1x4xf32, #tpu.memory_space<vmem>>, %arg5: memref<256x4xf32, #tpu.memory_space<vmem>>) attributes {dimension_semantics = [#tpu.dimension_semantics<parallel>], iteration_bounds = array<i64: 2>, scalar_prefetch = 0 : i64, scratch_operands = 0 : i64, tpu.core_type = #tpu.core_type<tc>, window_params = [{transform_indices = @transform_0, window_bounds = array<i64: 1, 1, 1, 20, 20, 4>}, {pipeline_mode = #tpu.pipeline_mode<synchronous>, transform_indices = @transform_1, window_bounds = array<i64: 5, 5, 1, 4>}, {pipeline_mode = #tpu.pipeline_mode<synchronous>, transform_indices = @transform_2, window_bounds = array<i64: 4, 4>}, {pipeline_mode = #tpu.pipeline_mode<synchronous>, transform_indices = @transform_3, window_bounds = array<i64: 1, 4>}, {transform_indices = @transform_4, window_bounds = array<i64: 256, 4>}]} {
    %c0 = arith.constant 0 : index
    %c0_0 = arith.constant 0 : index
    %c0_1 = arith.constant 0 : index
    %c0_2 = arith.constant 0 : index
    %c0_3 = arith.constant 0 : index
    %c0_4 = arith.constant 0 : index
    %0 = vector.load %arg1[%c0, %c0_0, %c0_1, %c0_2, %c0_3, %c0_4] : memref<1x1x1x20x20x4xf32, #tpu.memory_space<vmem>>, vector<1x1x1x20x20x4xf32>
    %1 = vector.extract_strided_slice %0 {offsets = [0, 0, 0, 0, 0, 0], sizes = [1, 1, 1, 20, 16, 4], strides = [1, 1, 1, 1, 1, 1]} : vector<1x1x1x20x20x4xf32> to vector<1x1x1x20x16x4xf32>
    %2 = vector.shape_cast %1 : vector<1x1x1x20x16x4xf32> to vector<1x1x20x16x4xf32>
    %3 = vector.extract_strided_slice %2 {offsets = [0, 0, 0, 0, 0], sizes = [1, 1, 16, 16, 4], strides = [1, 1, 1, 1, 1]} : vector<1x1x20x16x4xf32> to vector<1x1x16x16x4xf32>
    %4 = vector.shape_cast %3 : vector<1x1x16x16x4xf32> to vector<1x16x16x4xf32>
    %c0_5 = arith.constant 0 : index
    %c0_6 = arith.constant 0 : index
    %c0_7 = arith.constant 0 : index
    %c0_8 = arith.constant 0 : index
    %5 = vector.load %arg2[%c0_5, %c0_6, %c0_7, %c0_8] : memref<5x5x1x4xf32, #tpu.memory_space<vmem>>, vector<1x1x1x4xf32>
    %6 = vector.shape_cast %5 : vector<1x1x1x4xf32> to vector<1x4xf32>
    %7 = vector.shape_cast %6 : vector<1x4xf32> to vector<1x1x1x4xf32>
    %8 = vector.broadcast %7 : vector<1x1x1x4xf32> to vector<1x16x16x4xf32>
    %9 = arith.mulf %4, %8 : vector<1x16x16x4xf32>
    %10 = vector.extract_strided_slice %2 {offsets = [0, 0, 1, 0, 0], sizes = [1, 1, 16, 16, 4], strides = [1, 1, 1, 1, 1]} : vector<1x1x20x16x4xf32> to vector<1x1x16x16x4xf32>
    %11 = vector.shape_cast %10 : vector<1x1x16x16x4xf32> to vector<1x16x16x4xf32>
    %c1 = arith.constant 1 : index
    %c0_9 = arith.constant 0 : index
    %c0_10 = arith.constant 0 : index
    %c0_11 = arith.constant 0 : index
    %12 = vector.load %arg2[%c1, %c0_9, %c0_10, %c0_11] : memref<5x5x1x4xf32, #tpu.memory_space<vmem>>, vector<1x1x1x4xf32>
    %13 = vector.shape_cast %12 : vector<1x1x1x4xf32> to vector<1x4xf32>
    %14 = vector.shape_cast %13 : vector<1x4xf32> to vector<1x1x1x4xf32>
    %15 = vector.broadcast %14 : vector<1x1x1x4xf32> to vector<1x16x16x4xf32>
    %16 = arith.mulf %11, %15 : vector<1x16x16x4xf32>
    %17 = arith.addf %9, %16 : vector<1x16x16x4xf32>
    %18 = vector.extract_strided_slice %2 {offsets = [0, 0, 2, 0, 0], sizes = [1, 1, 16, 16, 4], strides = [1, 1, 1, 1, 1]} : vector<1x1x20x16x4xf32> to vector<1x1x16x16x4xf32>
    %19 = vector.shape_cast %18 : vector<1x1x16x16x4xf32> to vector<1x16x16x4xf32>
    %c2 = arith.constant 2 : index
    %c0_12 = arith.constant 0 : index
    %c0_13 = arith.constant 0 : index
    %c0_14 = arith.constant 0 : index
    %20 = vector.load %arg2[%c2, %c0_12, %c0_13, %c0_14] : memref<5x5x1x4xf32, #tpu.memory_space<vmem>>, vector<1x1x1x4xf32>
    %21 = vector.shape_cast %20 : vector<1x1x1x4xf32> to vector<1x4xf32>
    %22 = vector.shape_cast %21 : vector<1x4xf32> to vector<1x1x1x4xf32>
    %23 = vector.broadcast %22 : vector<1x1x1x4xf32> to vector<1x16x16x4xf32>
    %24 = arith.mulf %19, %23 : vector<1x16x16x4xf32>
    %25 = arith.addf %17, %24 : vector<1x16x16x4xf32>
    %26 = vector.extract_strided_slice %2 {offsets = [0, 0, 3, 0, 0], sizes = [1, 1, 16, 16, 4], strides = [1, 1, 1, 1, 1]} : vector<1x1x20x16x4xf32> to vector<1x1x16x16x4xf32>
    %27 = vector.shape_cast %26 : vector<1x1x16x16x4xf32> to vector<1x16x16x4xf32>
    %c3 = arith.constant 3 : index
    %c0_15 = arith.constant 0 : index
    %c0_16 = arith.constant 0 : index
    %c0_17 = arith.constant 0 : index
    %28 = vector.load %arg2[%c3, %c0_15, %c0_16, %c0_17] : memref<5x5x1x4xf32, #tpu.memory_space<vmem>>, vector<1x1x1x4xf32>
    %29 = vector.shape_cast %28 : vector<1x1x1x4xf32> to vector<1x4xf32>
    %30 = vector.shape_cast %29 : vector<1x4xf32> to vector<1x1x1x4xf32>
    %31 = vector.broadcast %30 : vector<1x1x1x4xf32> to vector<1x16x16x4xf32>
    %32 = arith.mulf %27, %31 : vector<1x16x16x4xf32>
    %33 = arith.addf %25, %32 : vector<1x16x16x4xf32>
    %34 = vector.extract_strided_slice %2 {offsets = [0, 0, 4, 0, 0], sizes = [1, 1, 16, 16, 4], strides = [1, 1, 1, 1, 1]} : vector<1x1x20x16x4xf32> to vector<1x1x16x16x4xf32>
    %35 = vector.shape_cast %34 : vector<1x1x16x16x4xf32> to vector<1x16x16x4xf32>
    %c4 = arith.constant 4 : index
    %c0_18 = arith.constant 0 : index
    %c0_19 = arith.constant 0 : index
    %c0_20 = arith.constant 0 : index
    %36 = vector.load %arg2[%c4, %c0_18, %c0_19, %c0_20] : memref<5x5x1x4xf32, #tpu.memory_space<vmem>>, vector<1x1x1x4xf32>
    %37 = vector.shape_cast %36 : vector<1x1x1x4xf32> to vector<1x4xf32>
    %38 = vector.shape_cast %37 : vector<1x4xf32> to vector<1x1x1x4xf32>
    %39 = vector.broadcast %38 : vector<1x1x1x4xf32> to vector<1x16x16x4xf32>
    %40 = arith.mulf %35, %39 : vector<1x16x16x4xf32>
    %41 = arith.addf %33, %40 : vector<1x16x16x4xf32>
    %42 = vector.extract_strided_slice %0 {offsets = [0, 0, 0, 0, 1, 0], sizes = [1, 1, 1, 20, 16, 4], strides = [1, 1, 1, 1, 1, 1]} : vector<1x1x1x20x20x4xf32> to vector<1x1x1x20x16x4xf32>
    %43 = vector.shape_cast %42 : vector<1x1x1x20x16x4xf32> to vector<1x1x20x16x4xf32>
    %44 = vector.extract_strided_slice %43 {offsets = [0, 0, 0, 0, 0], sizes = [1, 1, 16, 16, 4], strides = [1, 1, 1, 1, 1]} : vector<1x1x20x16x4xf32> to vector<1x1x16x16x4xf32>
    %45 = vector.shape_cast %44 : vector<1x1x16x16x4xf32> to vector<1x16x16x4xf32>
    %c0_21 = arith.constant 0 : index
    %c1_22 = arith.constant 1 : index
    %c0_23 = arith.constant 0 : index
    %c0_24 = arith.constant 0 : index
    %46 = vector.load %arg2[%c0_21, %c1_22, %c0_23, %c0_24] : memref<5x5x1x4xf32, #tpu.memory_space<vmem>>, vector<1x1x1x4xf32>
    %47 = vector.shape_cast %46 : vector<1x1x1x4xf32> to vector<1x4xf32>
    %48 = vector.shape_cast %47 : vector<1x4xf32> to vector<1x1x1x4xf32>
    %49 = vector.broadcast %48 : vector<1x1x1x4xf32> to vector<1x16x16x4xf32>
    %50 = arith.mulf %45, %49 : vector<1x16x16x4xf32>
    %51 = arith.addf %41, %50 : vector<1x16x16x4xf32>
    %52 = vector.extract_strided_slice %43 {offsets = [0, 0, 1, 0, 0], sizes = [1, 1, 16, 16, 4], strides = [1, 1, 1, 1, 1]} : vector<1x1x20x16x4xf32> to vector<1x1x16x16x4xf32>
    %53 = vector.shape_cast %52 : vector<1x1x16x16x4xf32> to vector<1x16x16x4xf32>
    %c1_25 = arith.constant 1 : index
    %c1_26 = arith.constant 1 : index
    %c0_27 = arith.constant 0 : index
    %c0_28 = arith.constant 0 : index
    %54 = vector.load %arg2[%c1_25, %c1_26, %c0_27, %c0_28] : memref<5x5x1x4xf32, #tpu.memory_space<vmem>>, vector<1x1x1x4xf32>
    %55 = vector.shape_cast %54 : vector<1x1x1x4xf32> to vector<1x4xf32>
    %56 = vector.shape_cast %55 : vector<1x4xf32> to vector<1x1x1x4xf32>
    %57 = vector.broadcast %56 : vector<1x1x1x4xf32> to vector<1x16x16x4xf32>
    %58 = arith.mulf %53, %57 : vector<1x16x16x4xf32>
    %59 = arith.addf %51, %58 : vector<1x16x16x4xf32>
    %60 = vector.extract_strided_slice %43 {offsets = [0, 0, 2, 0, 0], sizes = [1, 1, 16, 16, 4], strides = [1, 1, 1, 1, 1]} : vector<1x1x20x16x4xf32> to vector<1x1x16x16x4xf32>
    %61 = vector.shape_cast %60 : vector<1x1x16x16x4xf32> to vector<1x16x16x4xf32>
    %c2_29 = arith.constant 2 : index
    %c1_30 = arith.constant 1 : index
    %c0_31 = arith.constant 0 : index
    %c0_32 = arith.constant 0 : index
    %62 = vector.load %arg2[%c2_29, %c1_30, %c0_31, %c0_32] : memref<5x5x1x4xf32, #tpu.memory_space<vmem>>, vector<1x1x1x4xf32>
    %63 = vector.shape_cast %62 : vector<1x1x1x4xf32> to vector<1x4xf32>
    %64 = vector.shape_cast %63 : vector<1x4xf32> to vector<1x1x1x4xf32>
    %65 = vector.broadcast %64 : vector<1x1x1x4xf32> to vector<1x16x16x4xf32>
    %66 = arith.mulf %61, %65 : vector<1x16x16x4xf32>
    %67 = arith.addf %59, %66 : vector<1x16x16x4xf32>
    %68 = vector.extract_strided_slice %43 {offsets = [0, 0, 3, 0, 0], sizes = [1, 1, 16, 16, 4], strides = [1, 1, 1, 1, 1]} : vector<1x1x20x16x4xf32> to vector<1x1x16x16x4xf32>
    %69 = vector.shape_cast %68 : vector<1x1x16x16x4xf32> to vector<1x16x16x4xf32>
    %c3_33 = arith.constant 3 : index
    %c1_34 = arith.constant 1 : index
    %c0_35 = arith.constant 0 : index
    %c0_36 = arith.constant 0 : index
    %70 = vector.load %arg2[%c3_33, %c1_34, %c0_35, %c0_36] : memref<5x5x1x4xf32, #tpu.memory_space<vmem>>, vector<1x1x1x4xf32>
    %71 = vector.shape_cast %70 : vector<1x1x1x4xf32> to vector<1x4xf32>
    %72 = vector.shape_cast %71 : vector<1x4xf32> to vector<1x1x1x4xf32>
    %73 = vector.broadcast %72 : vector<1x1x1x4xf32> to vector<1x16x16x4xf32>
    %74 = arith.mulf %69, %73 : vector<1x16x16x4xf32>
    %75 = arith.addf %67, %74 : vector<1x16x16x4xf32>
    %76 = vector.extract_strided_slice %43 {offsets = [0, 0, 4, 0, 0], sizes = [1, 1, 16, 16, 4], strides = [1, 1, 1, 1, 1]} : vector<1x1x20x16x4xf32> to vector<1x1x16x16x4xf32>
    %77 = vector.shape_cast %76 : vector<1x1x16x16x4xf32> to vector<1x16x16x4xf32>
    %c4_37 = arith.constant 4 : index
    %c1_38 = arith.constant 1 : index
    %c0_39 = arith.constant 0 : index
    %c0_40 = arith.constant 0 : index
    %78 = vector.load %arg2[%c4_37, %c1_38, %c0_39, %c0_40] : memref<5x5x1x4xf32, #tpu.memory_space<vmem>>, vector<1x1x1x4xf32>
    %79 = vector.shape_cast %78 : vector<1x1x1x4xf32> to vector<1x4xf32>
    %80 = vector.shape_cast %79 : vector<1x4xf32> to vector<1x1x1x4xf32>
    %81 = vector.broadcast %80 : vector<1x1x1x4xf32> to vector<1x16x16x4xf32>
    %82 = arith.mulf %77, %81 : vector<1x16x16x4xf32>
    %83 = arith.addf %75, %82 : vector<1x16x16x4xf32>
    %84 = vector.extract_strided_slice %0 {offsets = [0, 0, 0, 0, 2, 0], sizes = [1, 1, 1, 20, 16, 4], strides = [1, 1, 1, 1, 1, 1]} : vector<1x1x1x20x20x4xf32> to vector<1x1x1x20x16x4xf32>
    %85 = vector.shape_cast %84 : vector<1x1x1x20x16x4xf32> to vector<1x1x20x16x4xf32>
    %86 = vector.extract_strided_slice %85 {offsets = [0, 0, 0, 0, 0], sizes = [1, 1, 16, 16, 4], strides = [1, 1, 1, 1, 1]} : vector<1x1x20x16x4xf32> to vector<1x1x16x16x4xf32>
    %87 = vector.shape_cast %86 : vector<1x1x16x16x4xf32> to vector<1x16x16x4xf32>
    %c0_41 = arith.constant 0 : index
    %c2_42 = arith.constant 2 : index
    %c0_43 = arith.constant 0 : index
    %c0_44 = arith.constant 0 : index
    %88 = vector.load %arg2[%c0_41, %c2_42, %c0_43, %c0_44] : memref<5x5x1x4xf32, #tpu.memory_space<vmem>>, vector<1x1x1x4xf32>
    %89 = vector.shape_cast %88 : vector<1x1x1x4xf32> to vector<1x4xf32>
    %90 = vector.shape_cast %89 : vector<1x4xf32> to vector<1x1x1x4xf32>
    %91 = vector.broadcast %90 : vector<1x1x1x4xf32> to vector<1x16x16x4xf32>
    %92 = arith.mulf %87, %91 : vector<1x16x16x4xf32>
    %93 = arith.addf %83, %92 : vector<1x16x16x4xf32>
    %94 = vector.extract_strided_slice %85 {offsets = [0, 0, 1, 0, 0], sizes = [1, 1, 16, 16, 4], strides = [1, 1, 1, 1, 1]} : vector<1x1x20x16x4xf32> to vector<1x1x16x16x4xf32>
    %95 = vector.shape_cast %94 : vector<1x1x16x16x4xf32> to vector<1x16x16x4xf32>
    %c1_45 = arith.constant 1 : index
    %c2_46 = arith.constant 2 : index
    %c0_47 = arith.constant 0 : index
    %c0_48 = arith.constant 0 : index
    %96 = vector.load %arg2[%c1_45, %c2_46, %c0_47, %c0_48] : memref<5x5x1x4xf32, #tpu.memory_space<vmem>>, vector<1x1x1x4xf32>
    %97 = vector.shape_cast %96 : vector<1x1x1x4xf32> to vector<1x4xf32>
    %98 = vector.shape_cast %97 : vector<1x4xf32> to vector<1x1x1x4xf32>
    %99 = vector.broadcast %98 : vector<1x1x1x4xf32> to vector<1x16x16x4xf32>
    %100 = arith.mulf %95, %99 : vector<1x16x16x4xf32>
    %101 = arith.addf %93, %100 : vector<1x16x16x4xf32>
    %102 = vector.extract_strided_slice %85 {offsets = [0, 0, 2, 0, 0], sizes = [1, 1, 16, 16, 4], strides = [1, 1, 1, 1, 1]} : vector<1x1x20x16x4xf32> to vector<1x1x16x16x4xf32>
    %103 = vector.shape_cast %102 : vector<1x1x16x16x4xf32> to vector<1x16x16x4xf32>
    %c2_49 = arith.constant 2 : index
    %c2_50 = arith.constant 2 : index
    %c0_51 = arith.constant 0 : index
    %c0_52 = arith.constant 0 : index
    %104 = vector.load %arg2[%c2_49, %c2_50, %c0_51, %c0_52] : memref<5x5x1x4xf32, #tpu.memory_space<vmem>>, vector<1x1x1x4xf32>
    %105 = vector.shape_cast %104 : vector<1x1x1x4xf32> to vector<1x4xf32>
    %106 = vector.shape_cast %105 : vector<1x4xf32> to vector<1x1x1x4xf32>
    %107 = vector.broadcast %106 : vector<1x1x1x4xf32> to vector<1x16x16x4xf32>
    %108 = arith.mulf %103, %107 : vector<1x16x16x4xf32>
    %109 = arith.addf %101, %108 : vector<1x16x16x4xf32>
    %110 = vector.extract_strided_slice %85 {offsets = [0, 0, 3, 0, 0], sizes = [1, 1, 16, 16, 4], strides = [1, 1, 1, 1, 1]} : vector<1x1x20x16x4xf32> to vector<1x1x16x16x4xf32>
    %111 = vector.shape_cast %110 : vector<1x1x16x16x4xf32> to vector<1x16x16x4xf32>
    %c3_53 = arith.constant 3 : index
    %c2_54 = arith.constant 2 : index
    %c0_55 = arith.constant 0 : index
    %c0_56 = arith.constant 0 : index
    %112 = vector.load %arg2[%c3_53, %c2_54, %c0_55, %c0_56] : memref<5x5x1x4xf32, #tpu.memory_space<vmem>>, vector<1x1x1x4xf32>
    %113 = vector.shape_cast %112 : vector<1x1x1x4xf32> to vector<1x4xf32>
    %114 = vector.shape_cast %113 : vector<1x4xf32> to vector<1x1x1x4xf32>
    %115 = vector.broadcast %114 : vector<1x1x1x4xf32> to vector<1x16x16x4xf32>
    %116 = arith.mulf %111, %115 : vector<1x16x16x4xf32>
    %117 = arith.addf %109, %116 : vector<1x16x16x4xf32>
    %118 = vector.extract_strided_slice %85 {offsets = [0, 0, 4, 0, 0], sizes = [1, 1, 16, 16, 4], strides = [1, 1, 1, 1, 1]} : vector<1x1x20x16x4xf32> to vector<1x1x16x16x4xf32>
    %119 = vector.shape_cast %118 : vector<1x1x16x16x4xf32> to vector<1x16x16x4xf32>
    %c4_57 = arith.constant 4 : index
    %c2_58 = arith.constant 2 : index
    %c0_59 = arith.constant 0 : index
    %c0_60 = arith.constant 0 : index
    %120 = vector.load %arg2[%c4_57, %c2_58, %c0_59, %c0_60] : memref<5x5x1x4xf32, #tpu.memory_space<vmem>>, vector<1x1x1x4xf32>
    %121 = vector.shape_cast %120 : vector<1x1x1x4xf32> to vector<1x4xf32>
    %122 = vector.shape_cast %121 : vector<1x4xf32> to vector<1x1x1x4xf32>
    %123 = vector.broadcast %122 : vector<1x1x1x4xf32> to vector<1x16x16x4xf32>
    %124 = arith.mulf %119, %123 : vector<1x16x16x4xf32>
    %125 = arith.addf %117, %124 : vector<1x16x16x4xf32>
    %126 = vector.extract_strided_slice %0 {offsets = [0, 0, 0, 0, 3, 0], sizes = [1, 1, 1, 20, 16, 4], strides = [1, 1, 1, 1, 1, 1]} : vector<1x1x1x20x20x4xf32> to vector<1x1x1x20x16x4xf32>
    %127 = vector.shape_cast %126 : vector<1x1x1x20x16x4xf32> to vector<1x1x20x16x4xf32>
    %128 = vector.extract_strided_slice %127 {offsets = [0, 0, 0, 0, 0], sizes = [1, 1, 16, 16, 4], strides = [1, 1, 1, 1, 1]} : vector<1x1x20x16x4xf32> to vector<1x1x16x16x4xf32>
    %129 = vector.shape_cast %128 : vector<1x1x16x16x4xf32> to vector<1x16x16x4xf32>
    %c0_61 = arith.constant 0 : index
    %c3_62 = arith.constant 3 : index
    %c0_63 = arith.constant 0 : index
    %c0_64 = arith.constant 0 : index
    %130 = vector.load %arg2[%c0_61, %c3_62, %c0_63, %c0_64] : memref<5x5x1x4xf32, #tpu.memory_space<vmem>>, vector<1x1x1x4xf32>
    %131 = vector.shape_cast %130 : vector<1x1x1x4xf32> to vector<1x4xf32>
    %132 = vector.shape_cast %131 : vector<1x4xf32> to vector<1x1x1x4xf32>
    %133 = vector.broadcast %132 : vector<1x1x1x4xf32> to vector<1x16x16x4xf32>
    %134 = arith.mulf %129, %133 : vector<1x16x16x4xf32>
    %135 = arith.addf %125, %134 : vector<1x16x16x4xf32>
    %136 = vector.extract_strided_slice %127 {offsets = [0, 0, 1, 0, 0], sizes = [1, 1, 16, 16, 4], strides = [1, 1, 1, 1, 1]} : vector<1x1x20x16x4xf32> to vector<1x1x16x16x4xf32>
    %137 = vector.shape_cast %136 : vector<1x1x16x16x4xf32> to vector<1x16x16x4xf32>
    %c1_65 = arith.constant 1 : index
    %c3_66 = arith.constant 3 : index
    %c0_67 = arith.constant 0 : index
    %c0_68 = arith.constant 0 : index
    %138 = vector.load %arg2[%c1_65, %c3_66, %c0_67, %c0_68] : memref<5x5x1x4xf32, #tpu.memory_space<vmem>>, vector<1x1x1x4xf32>
    %139 = vector.shape_cast %138 : vector<1x1x1x4xf32> to vector<1x4xf32>
    %140 = vector.shape_cast %139 : vector<1x4xf32> to vector<1x1x1x4xf32>
    %141 = vector.broadcast %140 : vector<1x1x1x4xf32> to vector<1x16x16x4xf32>
    %142 = arith.mulf %137, %141 : vector<1x16x16x4xf32>
    %143 = arith.addf %135, %142 : vector<1x16x16x4xf32>
    %144 = vector.extract_strided_slice %127 {offsets = [0, 0, 2, 0, 0], sizes = [1, 1, 16, 16, 4], strides = [1, 1, 1, 1, 1]} : vector<1x1x20x16x4xf32> to vector<1x1x16x16x4xf32>
    %145 = vector.shape_cast %144 : vector<1x1x16x16x4xf32> to vector<1x16x16x4xf32>
    %c2_69 = arith.constant 2 : index
    %c3_70 = arith.constant 3 : index
    %c0_71 = arith.constant 0 : index
    %c0_72 = arith.constant 0 : index
    %146 = vector.load %arg2[%c2_69, %c3_70, %c0_71, %c0_72] : memref<5x5x1x4xf32, #tpu.memory_space<vmem>>, vector<1x1x1x4xf32>
    %147 = vector.shape_cast %146 : vector<1x1x1x4xf32> to vector<1x4xf32>
    %148 = vector.shape_cast %147 : vector<1x4xf32> to vector<1x1x1x4xf32>
    %149 = vector.broadcast %148 : vector<1x1x1x4xf32> to vector<1x16x16x4xf32>
    %150 = arith.mulf %145, %149 : vector<1x16x16x4xf32>
    %151 = arith.addf %143, %150 : vector<1x16x16x4xf32>
    %152 = vector.extract_strided_slice %127 {offsets = [0, 0, 3, 0, 0], sizes = [1, 1, 16, 16, 4], strides = [1, 1, 1, 1, 1]} : vector<1x1x20x16x4xf32> to vector<1x1x16x16x4xf32>
    %153 = vector.shape_cast %152 : vector<1x1x16x16x4xf32> to vector<1x16x16x4xf32>
    %c3_73 = arith.constant 3 : index
    %c3_74 = arith.constant 3 : index
    %c0_75 = arith.constant 0 : index
    %c0_76 = arith.constant 0 : index
    %154 = vector.load %arg2[%c3_73, %c3_74, %c0_75, %c0_76] : memref<5x5x1x4xf32, #tpu.memory_space<vmem>>, vector<1x1x1x4xf32>
    %155 = vector.shape_cast %154 : vector<1x1x1x4xf32> to vector<1x4xf32>
    %156 = vector.shape_cast %155 : vector<1x4xf32> to vector<1x1x1x4xf32>
    %157 = vector.broadcast %156 : vector<1x1x1x4xf32> to vector<1x16x16x4xf32>
    %158 = arith.mulf %153, %157 : vector<1x16x16x4xf32>
    %159 = arith.addf %151, %158 : vector<1x16x16x4xf32>
    %160 = vector.extract_strided_slice %127 {offsets = [0, 0, 4, 0, 0], sizes = [1, 1, 16, 16, 4], strides = [1, 1, 1, 1, 1]} : vector<1x1x20x16x4xf32> to vector<1x1x16x16x4xf32>
    %161 = vector.shape_cast %160 : vector<1x1x16x16x4xf32> to vector<1x16x16x4xf32>
    %c4_77 = arith.constant 4 : index
    %c3_78 = arith.constant 3 : index
    %c0_79 = arith.constant 0 : index
    %c0_80 = arith.constant 0 : index
    %162 = vector.load %arg2[%c4_77, %c3_78, %c0_79, %c0_80] : memref<5x5x1x4xf32, #tpu.memory_space<vmem>>, vector<1x1x1x4xf32>
    %163 = vector.shape_cast %162 : vector<1x1x1x4xf32> to vector<1x4xf32>
    %164 = vector.shape_cast %163 : vector<1x4xf32> to vector<1x1x1x4xf32>
    %165 = vector.broadcast %164 : vector<1x1x1x4xf32> to vector<1x16x16x4xf32>
    %166 = arith.mulf %161, %165 : vector<1x16x16x4xf32>
    %167 = arith.addf %159, %166 : vector<1x16x16x4xf32>
    %168 = vector.extract_strided_slice %0 {offsets = [0, 0, 0, 0, 4, 0], sizes = [1, 1, 1, 20, 16, 4], strides = [1, 1, 1, 1, 1, 1]} : vector<1x1x1x20x20x4xf32> to vector<1x1x1x20x16x4xf32>
    %169 = vector.shape_cast %168 : vector<1x1x1x20x16x4xf32> to vector<1x1x20x16x4xf32>
    %170 = vector.extract_strided_slice %169 {offsets = [0, 0, 0, 0, 0], sizes = [1, 1, 16, 16, 4], strides = [1, 1, 1, 1, 1]} : vector<1x1x20x16x4xf32> to vector<1x1x16x16x4xf32>
    %171 = vector.shape_cast %170 : vector<1x1x16x16x4xf32> to vector<1x16x16x4xf32>
    %c0_81 = arith.constant 0 : index
    %c4_82 = arith.constant 4 : index
    %c0_83 = arith.constant 0 : index
    %c0_84 = arith.constant 0 : index
    %172 = vector.load %arg2[%c0_81, %c4_82, %c0_83, %c0_84] : memref<5x5x1x4xf32, #tpu.memory_space<vmem>>, vector<1x1x1x4xf32>
    %173 = vector.shape_cast %172 : vector<1x1x1x4xf32> to vector<1x4xf32>
    %174 = vector.shape_cast %173 : vector<1x4xf32> to vector<1x1x1x4xf32>
    %175 = vector.broadcast %174 : vector<1x1x1x4xf32> to vector<1x16x16x4xf32>
    %176 = arith.mulf %171, %175 : vector<1x16x16x4xf32>
    %177 = arith.addf %167, %176 : vector<1x16x16x4xf32>
    %178 = vector.extract_strided_slice %169 {offsets = [0, 0, 1, 0, 0], sizes = [1, 1, 16, 16, 4], strides = [1, 1, 1, 1, 1]} : vector<1x1x20x16x4xf32> to vector<1x1x16x16x4xf32>
    %179 = vector.shape_cast %178 : vector<1x1x16x16x4xf32> to vector<1x16x16x4xf32>
    %c1_85 = arith.constant 1 : index
    %c4_86 = arith.constant 4 : index
    %c0_87 = arith.constant 0 : index
    %c0_88 = arith.constant 0 : index
    %180 = vector.load %arg2[%c1_85, %c4_86, %c0_87, %c0_88] : memref<5x5x1x4xf32, #tpu.memory_space<vmem>>, vector<1x1x1x4xf32>
    %181 = vector.shape_cast %180 : vector<1x1x1x4xf32> to vector<1x4xf32>
    %182 = vector.shape_cast %181 : vector<1x4xf32> to vector<1x1x1x4xf32>
    %183 = vector.broadcast %182 : vector<1x1x1x4xf32> to vector<1x16x16x4xf32>
    %184 = arith.mulf %179, %183 : vector<1x16x16x4xf32>
    %185 = arith.addf %177, %184 : vector<1x16x16x4xf32>
    %186 = vector.extract_strided_slice %169 {offsets = [0, 0, 2, 0, 0], sizes = [1, 1, 16, 16, 4], strides = [1, 1, 1, 1, 1]} : vector<1x1x20x16x4xf32> to vector<1x1x16x16x4xf32>
    %187 = vector.shape_cast %186 : vector<1x1x16x16x4xf32> to vector<1x16x16x4xf32>
    %c2_89 = arith.constant 2 : index
    %c4_90 = arith.constant 4 : index
    %c0_91 = arith.constant 0 : index
    %c0_92 = arith.constant 0 : index
    %188 = vector.load %arg2[%c2_89, %c4_90, %c0_91, %c0_92] : memref<5x5x1x4xf32, #tpu.memory_space<vmem>>, vector<1x1x1x4xf32>
    %189 = vector.shape_cast %188 : vector<1x1x1x4xf32> to vector<1x4xf32>
    %190 = vector.shape_cast %189 : vector<1x4xf32> to vector<1x1x1x4xf32>
    %191 = vector.broadcast %190 : vector<1x1x1x4xf32> to vector<1x16x16x4xf32>
    %192 = arith.mulf %187, %191 : vector<1x16x16x4xf32>
    %193 = arith.addf %185, %192 : vector<1x16x16x4xf32>
    %194 = vector.extract_strided_slice %169 {offsets = [0, 0, 3, 0, 0], sizes = [1, 1, 16, 16, 4], strides = [1, 1, 1, 1, 1]} : vector<1x1x20x16x4xf32> to vector<1x1x16x16x4xf32>
    %195 = vector.shape_cast %194 : vector<1x1x16x16x4xf32> to vector<1x16x16x4xf32>
    %c3_93 = arith.constant 3 : index
    %c4_94 = arith.constant 4 : index
    %c0_95 = arith.constant 0 : index
    %c0_96 = arith.constant 0 : index
    %196 = vector.load %arg2[%c3_93, %c4_94, %c0_95, %c0_96] : memref<5x5x1x4xf32, #tpu.memory_space<vmem>>, vector<1x1x1x4xf32>
    %197 = vector.shape_cast %196 : vector<1x1x1x4xf32> to vector<1x4xf32>
    %198 = vector.shape_cast %197 : vector<1x4xf32> to vector<1x1x1x4xf32>
    %199 = vector.broadcast %198 : vector<1x1x1x4xf32> to vector<1x16x16x4xf32>
    %200 = arith.mulf %195, %199 : vector<1x16x16x4xf32>
    %201 = arith.addf %193, %200 : vector<1x16x16x4xf32>
    %202 = vector.extract_strided_slice %169 {offsets = [0, 0, 4, 0, 0], sizes = [1, 1, 16, 16, 4], strides = [1, 1, 1, 1, 1]} : vector<1x1x20x16x4xf32> to vector<1x1x16x16x4xf32>
    %203 = vector.shape_cast %202 : vector<1x1x16x16x4xf32> to vector<1x16x16x4xf32>
    %c4_97 = arith.constant 4 : index
    %c4_98 = arith.constant 4 : index
    %c0_99 = arith.constant 0 : index
    %c0_100 = arith.constant 0 : index
    %204 = vector.load %arg2[%c4_97, %c4_98, %c0_99, %c0_100] : memref<5x5x1x4xf32, #tpu.memory_space<vmem>>, vector<1x1x1x4xf32>
    %205 = vector.shape_cast %204 : vector<1x1x1x4xf32> to vector<1x4xf32>
    %206 = vector.shape_cast %205 : vector<1x4xf32> to vector<1x1x1x4xf32>
    %207 = vector.broadcast %206 : vector<1x1x1x4xf32> to vector<1x16x16x4xf32>
    %208 = arith.mulf %203, %207 : vector<1x16x16x4xf32>
    %209 = arith.addf %201, %208 : vector<1x16x16x4xf32>
    %210 = vector.shape_cast %209 : vector<1x16x16x4xf32> to vector<256x4xf32>
    %c0_101 = arith.constant 0 : index
    %c0_102 = arith.constant 0 : index
    %211 = vector.load %arg3[%c0_101, %c0_102] : memref<4x4xf32, #tpu.memory_space<vmem>>, vector<4x4xf32>
    %cst = arith.constant dense<0.000000e+00> : vector<256x4xf32>
    %212 = tpu.matmul %210, %211, %cst {dimension_numbers = #tpu.dot_dimension_numbers<[1], [0], [0], [1], [0, 0, 1, 1], [], []>} : vector<256x4xf32>, vector<4x4xf32>, vector<256x4xf32> -> vector<256x4xf32>
    %c0_103 = arith.constant 0 : index
    %c0_104 = arith.constant 0 : index
    %213 = vector.load %arg4[%c0_103, %c0_104] : memref<1x4xf32, #tpu.memory_space<vmem>>, vector<1x4xf32>
    %214 = vector.broadcast %213 : vector<1x4xf32> to vector<256x4xf32>
    %215 = arith.addf %212, %214 : vector<256x4xf32>
    %216 = vector.extract_strided_slice %0 {offsets = [0, 0, 0, 2, 2, 0], sizes = [1, 1, 1, 16, 16, 4], strides = [1, 1, 1, 1, 1, 1]} : vector<1x1x1x20x20x4xf32> to vector<1x1x1x16x16x4xf32>
    %217 = vector.shape_cast %216 : vector<1x1x1x16x16x4xf32> to vector<1x16x16x4xf32>
    %218 = vector.shape_cast %217 : vector<1x16x16x4xf32> to vector<256x4xf32>
    %219 = arith.addf %215, %218 : vector<256x4xf32>
    %c0_105 = arith.constant 0 : index
    %c0_106 = arith.constant 0 : index
    %220 = vector.load %arg5[%c0_105, %c0_106] : memref<256x4xf32, #tpu.memory_space<vmem>>, vector<256x4xf32>
    tpu.vector_store %arg5[%c0_105, %c0_106], %219 {strides = array<i32>} : memref<256x4xf32, #tpu.memory_space<vmem>>, vector<256x4xf32>,
    return
  }
  func.func @transform_0(%arg0: i32) -> (i32, i32, i32, i32, i32, i32) {
    %c0_i32 = arith.constant 0 : i32
    %c0_i32_0 = arith.constant 0 : i32
    %c0_i32_1 = arith.constant 0 : i32
    %c0_i32_2 = arith.constant 0 : i32
    %c0_i32_3 = arith.constant 0 : i32
    %c0_i32_4 = arith.constant 0 : i32
    return %arg0, %c0_i32, %c0_i32_0, %c0_i32_1, %c0_i32_2, %c0_i32_3 : i32, i32, i32, i32, i32, i32
  }
  func.func @transform_1(%arg0: i32) -> (i32, i32, i32, i32) {
    %c0_i32 = arith.constant 0 : i32
    %c0_i32_0 = arith.constant 0 : i32
    %c0_i32_1 = arith.constant 0 : i32
    %c0_i32_2 = arith.constant 0 : i32
    %c0_i32_3 = arith.constant 0 : i32
    return %c0_i32, %c0_i32_0, %c0_i32_1, %c0_i32_2 : i32, i32, i32, i32
  }
  func.func @transform_2(%arg0: i32) -> (i32, i32) {
    %c0_i32 = arith.constant 0 : i32
    %c0_i32_0 = arith.constant 0 : i32
    %c0_i32_1 = arith.constant 0 : i32
    return %c0_i32, %c0_i32_0 : i32, i32
  }
  func.func @transform_3(%arg0: i32) -> (i32, i32) {
    %c0_i32 = arith.constant 0 : i32
    %c0_i32_0 = arith.constant 0 : i32
    %c0_i32_1 = arith.constant 0 : i32
    return %c0_i32, %c0_i32_0 : i32, i32
  }
  func.func @transform_4(%arg0: i32) -> (i32, i32) {
    %c0_i32 = arith.constant 0 : i32
    %c0_i32_0 = arith.constant 0 : i32
    return %arg0, %c0_i32 : i32, i32
  }
}

</mosaic_0001>

<bundles_post_ra>
// kernel: tpu_custom_call.1
= control target key start
LH: loop header
LB: loop body
LE: loop exit
PB: predicated region body
PF: predicated region fallthrough
CT: control target
= control target key end

     0   :  { %s6695_s15 = smov 0   ;;  %s13955_s0 = inlined_call_operand.vmem [shape: f32[2,1,1,20,20,4], index: 0, kind: input, shape index: {}]   ;;  %s13956_s1 = inlined_call_operand.vmem [shape: f32[5,5,1,4], index: 1, kind: input, shape index: {}]   ;;  %s13957_s2 = inlined_call_operand.vmem [shape: f32[4,4], index: 2, kind: input, shape index: {}]   ;;  %s13958_s3 = inlined_call_operand.vmem [shape: f32[1,4], index: 3, kind: input, shape index: {}]   ;;  %s13959_s4 = inlined_call_operand.vmem [shape: f32[512,4], index: 4, kind: output, shape index: {}]  }
   0x1 LB: > { %s6701_s16 = sadd.s32 4294967295, %s6668_s15   ;;  %p6167_p0 = scmp.ge.s32.totalorder %s6668_s15, 1  ;;  %s6668_s15 = sphi %s6695_s15, %s14_s15  }
   0x2   : > { %p162_p1 = scmp.lt.s32.totalorder %s6668_s15, 3 }
   0x4   : > { %p163_p2 = pnand %p6167_p0, %p162_p1 }
   0x6   : > { %166 = sbr.rel (%p163_p2) target bundleno = 1191 (0x4a7), region = 36 }
   0xb   : > { %vm4413_vm0 = vcmask 1043456   ;;  %v5550_v0 = vld [vmem:[%s13957_s2] sm:$0xf]  ;;  %p188_p3 = scmp.lt.s32.totalorder %s6701_s16, 1  ;;  %v6722_v2 = vld [vmem:[%s13956_s1 + $0x5] ss:$0 sm:$0xff] }
   0xc   : > { %6289 = vmatprep.subr.msk.mxu0 %vm4413_vm0, %v5550_v0  ;;  %6339 = vmatprep.subr.msk.mxu1 %vm4413_vm0, %v5550_v0  ;;  %v6717_v1 = vld [vmem:[%s13956_s1] ss:$0 sm:$0xff]  ;;  %14863 = vst [vmem:[#allocation3_spill] sm:$0xff] %v6722_v2  ;;  %v6727_v3 = vld [vmem:[%s13956_s1 + $0x1] ss:$0 sm:$0xff]  ;;  %vm690_vm1 = vcmask 1046528  }
   0xd   : > { %6290 = vmatpush3.msk.msra.mxu0 %vm4413_vm0, %v5550_v0  ;;  %6340 = vmatpush3.msk.msra.mxu1 %vm4413_vm0, %v5550_v0  ;;  %s189_s19 = scalar_select %p188_p3, %s6701_s16, 1  ;;  %14862 = vst [vmem:[#allocation2_spill] sm:$0xff] %v6717_v1  ;;  %v6737_v4 = vld [vmem:[%s13956_s1 + $0xa] ss:$0 sm:$0xff]  ;;  %v6742_v5 = vld [vmem:[%s13956_s1 + $0xf] ss:$0 sm:$0xff] }
   0xe   : > { %14864 = vst [vmem:[#allocation4_spill] sm:$0xff] %v6737_v4  ;;  %14865 = vst [vmem:[#allocation5_spill] sm:$0xff] %v6742_v5  ;;  %v6747_v6 = vld [vmem:[%s13956_s1 + $0x14] ss:$0 sm:$0xff]  ;;  %v6761_v10 = vld [vmem:[%s13956_s1 + $0x6] ss:$0 sm:$0xff] }
   0xf   : > { %s6341_s20 = smul.u32 480, %s189_s19  ;;  %14866 = vst [vmem:[#allocation6_spill] sm:$0xff] %v6747_v6  ;;  %v6766_v11 = vld [vmem:[%s13956_s1 + $0xb] ss:$0 sm:$0xff]  ;;  %v6816_v31 = vld [vmem:[%s13956_s1 + $0x10] ss:$0 sm:$0xff] }
  0x10   : > { %14868 = vst [vmem:[#allocation8_spill] sm:$0xff] %v6766_v11  ;;  %14876 = vst [vmem:[#allocation16_spill] sm:$0xff] %v6816_v31  ;;  %vm1931_vm2 = vcmask 1045504   ;;  %v6841_v44 = vld [vmem:[%s13956_s1 + $0x15] ss:$0 sm:$0xff]  ;;  %vm3172_vm3 = vcmask 1044480  }
  0x11   : > { %s6732_s29 = scalar_lea.vmem %s13955_s0, %s6341_s20  ;;  %14877 = vst [vmem:[#allocation17_spill] sm:$0xff] %v6841_v44  ;;  %v6847_v49 = vld [vmem:[%s13956_s1 + $0x2] ss:$0 sm:$0xff]  ;;  %v6866_v58 = vld [vmem:[%s13956_s1 + $0x7] ss:$0 sm:$0xff]  ;;  %vm5558_vm4 = vcmask 31744  }
  0x12   : > { %v6750_v7 = vld [vmem:[%s6732_s29] sm:$0xff]  ;;  %v6753_v8 = vld [vmem:[%s6732_s29 + $0x8] sm:$0xff]  ;;  %v6756_v9 = vld [vmem:[%s6732_s29 + $0x18] sm:$0xff]  ;;  %14878 = vst [vmem:[#allocation18_spill] sm:$0xff] %v6847_v49  ;;  %s6169_s28 = sshll.u32 %s6701_s16, 5 }
  0x13   : > { %14867 = vst [vmem:[#allocation7_spill] sm:$0xff] %v6756_v9  ;;  %v6769_v12 = vld [vmem:[%s6732_s29 + $0x20] sm:$0xff]  ;;  %v6772_v13 = vld [vmem:[%s6732_s29 + $0x30] sm:$0xff]  ;;  %v6775_v14 = vld [vmem:[%s6732_s29 + $0x38] sm:$0xff]  ;;  %v266_v15 = vmul.f32 %v6717_v1, %v6750_v7  ;;  %v267_v16 = vmul.f32 %v6717_v1, %v6753_v8  ;;  %v306_v17 = vmul.f32 %v6722_v2, %v6756_v9  ;;  %v594_v18 = vmul.f32 %v6727_v3, %v6750_v7  ;;  %p13648_p4 = scmp.lt.s32.totalorder %s6169_s28, 63 }
  0x14   : > { %14869 = vst [vmem:[#allocation9_spill] sm:$0xff] %v6769_v12  ;;  %14870 = vst [vmem:[#allocation10_spill] sm:$0xff] %v6772_v13  ;;  %v6786_v19 = vld [vmem:[%s6732_s29 + $0x48] sm:$0xff]  ;;  %v6789_v20 = vld [vmem:[%s6732_s29 + $0x50] sm:$0xff]  ;;  %v307_v22 = vmul.f32 %v6722_v2, %v6769_v12  ;;  %v378_v23 = vmul.f32 %v6737_v4, %v6772_v13  ;;  %v379_v24 = vmul.f32 %v6737_v4, %v6775_v14 }
  0x15   : > { %14871 = vst [vmem:[#allocation11_spill] sm:$0xff] %v6775_v14  ;;  %14872 = vst [vmem:[#allocation12_spill] sm:$0xff] %v6786_v19  ;;  %v6792_v21 = vld [vmem:[%s6732_s29 + $0x60] sm:$0xff]  ;;  %v6802_v25 = vmul.f32 %v6727_v3, %v6753_v8  ;;  %v6805_v26 = vld [vmem:[%s6732_s29 + $0x68] sm:$0xff]  ;;  %v338_v27 = vadd.f32 %v306_v17, %v266_v15  ;;  %v450_v28 = vmul.f32 %v6742_v5, %v6786_v19  ;;  %v691_v34 = vrot.slane %v594_v18, 1  ;;  %s16083_s28 = smov (!%p13648_p4, %s6169_s28), 63 }
  0x16   : > { %14873 = vst [vmem:[#allocation13_spill] sm:$0xff] %v6789_v20  ;;  %14874 = vst [vmem:[#allocation14_spill] sm:$0xff] %v6792_v21  ;;  %v451_v29 = vmul.f32 %v6742_v5, %v6789_v20  ;;  %v522_v30 = vmul.f32 %v6747_v6, %v6792_v21  ;;  %v339_v32 = vadd.f32 %v307_v22, %v267_v16  ;;  %v6879_v63 = vld [vmem:[%s13956_s1 + $0xc] ss:$0 sm:$0xff]  ;;  %v6889_v18 = vld [vmem:[%s13956_s1 + $0x11] ss:$0 sm:$0xff] }
  0x17   : > { %14875 = vst [vmem:[#allocation15_spill] sm:$0xff] %v6805_v26  ;;  %v523_v33 = vmul.f32 %v6747_v6, %v6805_v26  ;;  %v13969_v35 = vrot.slane %v6802_v25, 1  ;;  %v410_v36 = vadd.f32 %v378_v23, %v338_v27  ;;  %v843_v37 = vmul.f32 %v6761_v10, %v6756_v9  ;;  %s6170_s16 = sshll.u32 %s16083_s28, 3 }
  0x18   : > { %v6825_v38 = vmul.f32 %v6761_v10, %v6769_v12  ;;  %v1091_v39 = vmul.f32 %v6766_v11, %v6772_v13  ;;  %v411_v40 = vadd.f32 %v379_v24, %v339_v32  ;;  %v6834_v42 = vmul.f32 %v6766_v11, %v6775_v14  ;;  %s13751_s9 = scalar_lea.vmem %s13959_s4, %s6170_s16 }
  0x19   : > { %v693_v41 = vsel %vm690_vm1, %v691_v34, %v13969_v35  ;;  %v1339_v43 = vmul.f32 %v6816_v31, %v6786_v19  ;;  %v482_v45 = vadd.f32 %v450_v28, %v410_v36  ;;  %v939_v46 = vrot.slane %v843_v37, 1  ;;  %v7011_v35 = vld [vmem:[%s13956_s1 + $0x9] ss:$0 sm:$0xff] }
  0x1a   : > { %v13968_v47 = vrot.slane %v6825_v38, 1  ;;  %v1187_v48 = vrot.slane %v1091_v39, 1  ;;  %v483_v50 = vadd.f32 %v451_v29, %v411_v40  ;;  %v13967_v51 = vrot.slane %v6834_v42, 1  ;;  %v6921_v40 = vld [vmem:[%s13956_s1 + $0x3] ss:$0 sm:$0xff] }
  0x1b   : > { %v6852_v52 = vmul.f32 %v6816_v31, %v6789_v20  ;;  %v1435_v53 = vrot.slane %v1339_v43, 1  ;;  %v554_v54 = vadd.f32 %v522_v30, %v482_v45  ;;  %v1587_v56 = vmul.f32 %v6841_v44, %v6792_v21 }
  0x1c   : > { %v941_v55 = vsel %vm690_vm1, %v939_v46, %v13968_v47  ;;  %v6861_v57 = vmul.f32 %v6841_v44, %v6805_v26  ;;  %v6868_v59 = vadd.f32 %v523_v33, %v483_v50  ;;  %v1189_v60 = vsel %vm690_vm1, %v1187_v48, %v13967_v51  ;;  %v6909_v33 = vld [vmem:[%s13956_s1 + $0x16] ss:$0 sm:$0xff]  ;;  %v6933_v48 = vld [vmem:[%s13956_s1 + $0x8] ss:$0 sm:$0xff] }
  0x1d   : > { %v13966_v61 = vrot.slane %v6852_v52, 1  ;;  %v1835_v62 = vmul.f32 %v6847_v49, %v6750_v7  ;;  %v803_v0 = vadd.f32 %v693_v41, %v554_v54  ;;  %v1683_v15 = vrot.slane %v1587_v56, 1 }
  0x1e   : > { %v13964_v16 = vrot.slane %v6861_v57, 1  ;;  %v6884_v17 = vmul.f32 %v6847_v49, %v6753_v8  ;;  %v2084_v24 = vmul.f32 %v6866_v58, %v6756_v9  ;;  %v6898_v27 = vmul.f32 %v6866_v58, %v6769_v12 }
  0x1f   : > { %v1437_v22 = vsel %vm690_vm1, %v1435_v53, %v13966_v61  ;;  %v1932_v23 = vrot.slane %v1835_v62, 2  ;;  %v1051_v28 = vadd.f32 %v941_v55, %v803_v0  ;;  %v2332_v32 = vmul.f32 %v6879_v63, %v6772_v13 }
  0x20   : > { %v1685_v29 = vsel %vm690_vm1, %v1683_v15, %v13964_v16  ;;  %v13962_v30 = vrot.slane %v6884_v17, 2  ;;  %v2180_v34 = vrot.slane %v2084_v24, 2  ;;  %v13961_v36 = vrot.slane %v6898_v27, 2  ;;  %v6951_v15 = vld [vmem:[%s13956_s1 + $0xd] ss:$0 sm:$0xff] }
  0x21   : > { %v6914_v37 = vmul.f32 %v6879_v63, %v6775_v14  ;;  %v2580_v39 = vmul.f32 %v6889_v18, %v6786_v19  ;;  %v1299_v41 = vadd.f32 %v1189_v60, %v1051_v28  ;;  %v2428_v45 = vrot.slane %v2332_v32, 2  ;;  %v6965_v32 = vld [vmem:[%s13956_s1 + $0x12] ss:$0 sm:$0xff] }
  0x22   : > { %v1934_v43 = vsel %vm1931_vm2, %v1932_v23, %v13962_v30  ;;  %v6928_v46 = vmul.f32 %v6889_v18, %v6789_v20  ;;  %v2182_v50 = vsel %vm1931_vm2, %v2180_v34, %v13961_v36  ;;  %v2828_v55 = vmul.f32 %v6909_v33, %v6792_v21 }
  0x23   : > { %v13960_v53 = vrot.slane %v6914_v37, 2  ;;  %v2676_v54 = vrot.slane %v2580_v39, 2  ;;  %v1547_v56 = vadd.f32 %v1437_v22, %v1299_v41  ;;  %v6944_v62 = vmul.f32 %v6909_v33, %v6805_v26 }
  0x24   : > { %14879 = vst [vmem:[#allocation19_spill] sm:$0xff] %v6928_v46  ;;  %v13963_v60 = vrot.slane %v6928_v46, 2  ;;  %v3076_v0 = vmul.f32 %v6921_v40, %v6750_v7  ;;  %v2924_v24 = vrot.slane %v2828_v55, 2  ;;  %v6958_v22 = vmul.f32 %v6921_v40, %v6753_v8  ;;  %v7164_v46 = vld [vmem:[%s6732_s29 + $0x128] sm:$0xff] }
  0x25   : > { %14880 = vst [vmem:[#allocation20_spill] sm:$0xff] %v6944_v62  ;;  %v2430_v23 = vsel %vm1931_vm2, %v2428_v45, %v13960_v53  ;;  %v3325_v28 = vmul.f32 %v6933_v48, %v6756_v9  ;;  %v1795_v34 = vadd.f32 %v1685_v29, %v1547_v56  ;;  %v13965_v41 = vrot.slane %v6944_v62, 2  ;;  %v6981_v29 = vld [vmem:[%s13956_s1 + $0x17] ss:$0 sm:$0xff]  ;;  %14904 = vst [vmem:[#allocation42_spill] sm:$0xff] %v7164_v46 }
  0x26   : > { %14881 = vst [vmem:[#allocation21_spill] sm:$0xff] %v6958_v22  ;;  %v2678_v39 = vsel %vm1931_vm2, %v2676_v54, %v13963_v60  ;;  %v3173_v45 = vrot.slane %v3076_v0, 3  ;;  %v13970_v55 = vrot.slane %v6958_v22, 3  ;;  %v6974_v53 = vmul.f32 %v6933_v48, %v6769_v12  ;;  %v6995_v60 = vld [vmem:[%s13956_s1 + $0x4] ss:$0 sm:$0xff] }
  0x27   : > { %v3421_v36 = vrot.slane %v3325_v28, 3  ;;  %v3573_v30 = vmul.f32 %v6951_v15, %v6772_v13  ;;  %v2044_v56 = vadd.f32 %v1934_v43, %v1795_v34  ;;  %v2926_v54 = vsel %vm1931_vm2, %v2924_v24, %v13965_v41 }
  0x28   : > { %14882 = vst [vmem:[#allocation22_spill] sm:$0xff] %v6974_v53  ;;  %v6988_v0 = vmul.f32 %v6951_v15, %v6775_v14  ;;  %v3821_v28 = vmul.f32 %v6965_v32, %v6786_v19  ;;  %v3175_v43 = vsel %vm3172_vm3, %v3173_v45, %v13970_v55  ;;  %v13972_v34 = vrot.slane %v6974_v53, 3 }
  0x29   : > { %v3669_v16 = vrot.slane %v3573_v30, 3  ;;  %v7003_v24 = vmul.f32 %v6965_v32, %v6789_v20  ;;  %v2292_v41 = vadd.f32 %v2182_v50, %v2044_v56  ;;  %v4069_v47 = vmul.f32 %v6981_v29, %v6792_v21 }
  0x2a   : > { %14883 = vst [vmem:[#allocation23_spill] sm:$0xff] %v6988_v0  ;;  %v13974_v61 = vrot.slane %v6988_v0, 3  ;;  %v3917_v51 = vrot.slane %v3821_v28, 3  ;;  %v3423_v30 = vsel %vm3172_vm3, %v3421_v36, %v13972_v34  ;;  %v7019_v50 = vmul.f32 %v6981_v29, %v6805_v26  ;;  %v7026_v28 = vld [vmem:[%s13956_s1 + $0xe] ss:$0 sm:$0xff] }
  0x2b   : > { %14884 = vst [vmem:[#allocation24_spill] sm:$0xff] %v7003_v24  ;;  %v13976_v45 = vrot.slane %v7003_v24, 3  ;;  %v4317_v56 = vmul.f32 %v6995_v60, %v6750_v7  ;;  %v2540_v55 = vadd.f32 %v2430_v23, %v2292_v41  ;;  %v4165_v36 = vrot.slane %v4069_v47, 3  ;;  %v7038_v7 = vld [vmem:[%s13956_s1 + $0x13] ss:$0 sm:$0xff] }
  0x2c   : > { %14885 = vst [vmem:[#allocation25_spill] sm:$0xff] %v7019_v50  ;;  %v3671_v53 = vsel %vm3172_vm3, %v3669_v16, %v13974_v61  ;;  %v7033_v34 = vmul.f32 %v6995_v60, %v6753_v8  ;;  %v13984_v23 = vrot.slane %v7019_v50, 3  ;;  %v4566_v47 = vmul.f32 %v7011_v35, %v6756_v9  ;;  %v7068_v8 = vld [vmem:[%s6732_s29 + $0xc0] sm:$0xff] }
  0x2d   : > { %v3919_v22 = vsel %vm3172_vm3, %v3917_v51, %v13976_v45  ;;  %v4414_v41 = vrot.slane %v4317_v56, 4  ;;  %v2788_v16 = vadd.f32 %v2678_v39, %v2540_v55  ;;  %v7049_v61 = vmul.f32 %v7011_v35, %v6769_v12  ;;  %v7056_v51 = vld [vmem:[%s13956_s1 + $0x18] ss:$0 sm:$0xff] }
  0x2e   : > { %14886 = vst [vmem:[#allocation26_spill] sm:$0xff] %v7033_v34  ;;  %v4814_v0 = vmul.f32 %v7026_v28, %v6772_v13  ;;  %v4167_v39 = vsel %vm3172_vm3, %v4165_v36, %v13984_v23  ;;  %v4662_v55 = vrot.slane %v4566_v47, 4  ;;  %v7063_v56 = vmul.f32 %v7026_v28, %v6775_v14  ;;  %v7075_v36 = vld [vmem:[%s6732_s29 + $0xd8] sm:$0xff]  ;;  %v7098_v47 = vld [vmem:[%s6732_s29 + $0x120] sm:$0xff] }
  0x2f   : > { %14887 = vst [vmem:[#allocation27_spill] sm:$0xff] %v7049_v61  ;;  %v5062_v45 = vmul.f32 %v7038_v7, %v6786_v19  ;;  %v3036_v12 = vadd.f32 %v2926_v54, %v2788_v16  ;;  %v14889_v13 = vrot.slane %v7033_v34, 4  ;;  %v13991_v50 = vrot.slane %v7049_v61, 4  ;;  %14890 = vst [vmem:[#allocation29_spill] sm:$0xff] %v7075_v36  ;;  %v7085_v54 = vld [vmem:[%s6732_s29 + $0xf0] sm:$0xff]  ;;  %v7088_v16 = vld [vmem:[%s6732_s29 + $0x108] sm:$0xff] }
  0x30   : > { %14888 = vst [vmem:[#allocation28_spill] sm:$0xff] %v7063_v56  ;;  %v4910_v24 = vrot.slane %v4814_v0, 4  ;;  %v7080_v23 = vmul.f32 %v7038_v7, %v6789_v20  ;;  %v5310_v19 = vmul.f32 %v7056_v51, %v6792_v21  ;;  %14892 = vst [vmem:[#allocation31_spill] sm:$0xff] %v7085_v54  ;;  %v14896_v20 = vrot.slane %v7063_v56, 4 }
  0x31   : > { %v4416_v9 = vsel %vm4413_vm0, %v4414_v41, %v14889_v13  ;;  %v5158_v14 = vrot.slane %v5062_v45, 4  ;;  %14893 = vst [vmem:[#allocation32_spill] sm:$0xff] %v7088_v16  ;;  %v3285_v13 = vadd.f32 %v3175_v43, %v3036_v12  ;;  %v4664_v0 = vsel %vm4413_vm0, %v4662_v55, %v13991_v50  ;;  %14895 = vst [vmem:[#allocation34_spill] sm:$0xff] %v7098_v47 }
  0x32   : > { %14891 = vst [vmem:[#allocation30_spill] sm:$0xff] %v7080_v23  ;;  %v7095_v41 = vmul.f32 %v7056_v51, %v6805_v26  ;;  %v282_v45 = vmul.f32 %v6717_v1, %v7068_v8  ;;  %v4912_v21 = vsel %vm4413_vm0, %v4910_v24, %v14896_v20  ;;  %v14001_v12 = vrot.slane %v7080_v23, 4  ;;  %v7117_v24 = vld [vmem:[%s6732_s29 + $0xc8] sm:$0xff] }
  0x33   : > { %v5406_v43 = vrot.slane %v5310_v19, 4  ;;  %v322_v55 = vmul.f32 %v6722_v2, %v7075_v36  ;;  %v3533_v50 = vadd.f32 %v3423_v30, %v3285_v13  ;;  %v394_v61 = vmul.f32 %v6737_v4, %v7085_v54  ;;  %v7150_v2 = vld [vmem:[%s6732_s29 + $0x110] sm:$0xff] }
  0x34   : > { %14894 = vst [vmem:[#allocation33_spill] sm:$0xff] %v7095_v41  ;;  %v14003_v26 = vrot.slane %v7095_v41, 4  ;;  %v466_v1 = vmul.f32 %v6742_v5, %v7088_v16  ;;  %v5160_v20 = vsel %vm4413_vm0, %v5158_v14, %v14001_v12  ;;  %v538_v56 = vmul.f32 %v6747_v6, %v7098_v47  ;;  %v7127_v5 = vld [vmem:[%s6732_s29 + $0xe0] sm:$0xff]  ;;  %14902 = vst [vmem:[#allocation40_spill] sm:$0xff] %v7150_v2 }
  0x35   : > { %v354_v19 = vadd.f32 %v322_v55, %v282_v45  ;;  %v618_v30 = vmul.f32 %v6727_v3, %v7068_v8  ;;  %v3781_v13 = vadd.f32 %v3671_v53, %v3533_v50  ;;  %14897 = vst [vmem:[#allocation35_spill] sm:$0xff] %v7127_v5  ;;  %v7131_v14 = vmul.f32 %v6727_v3, %v7117_v24  ;;  %v7136_v55 = vld [vmem:[%s6732_s29 + $0xf8] sm:$0xff] }
  0x36   : > { %v5408_v4 = vsel %vm4413_vm0, %v5406_v43, %v14003_v26  ;;  %v867_v45 = vmul.f32 %v6761_v10, %v7075_v36  ;;  %14899 = vst [vmem:[#allocation37_spill] sm:$0xff] %v7136_v55  ;;  %v7140_v53 = vmul.f32 %v6761_v10, %v7127_v5  ;;  %v1115_v50 = vmul.f32 %v6766_v11, %v7085_v54 }
  0x37   : > { %14898 = vst [vmem:[#allocation36_spill] sm:$0xff] %v7131_v14  ;;  %v426_v12 = vadd.f32 %v394_v61, %v354_v19  ;;  %v731_v23 = vrot.slane %v618_v30, 1  ;;  %v4029_v43 = vadd.f32 %v3919_v22, %v3781_v13  ;;  %v14012_v26 = vrot.slane %v7131_v14, 1 }
  0x38   : > { %14900 = vst [vmem:[#allocation38_spill] sm:$0xff] %v7140_v53  ;;  %v979_v41 = vrot.slane %v867_v45, 1  ;;  %v7147_v6 = vmul.f32 %v6766_v11, %v7136_v55  ;;  %v14015_v19 = vrot.slane %v7140_v53, 1  ;;  %v1227_v30 = vrot.slane %v1115_v50, 1 }
  0x39   : > { %v498_v61 = vadd.f32 %v466_v1, %v426_v12  ;;  %v1363_v34 = vmul.f32 %v6816_v31, %v7088_v16  ;;  %v4277_v62 = vadd.f32 %v4167_v39, %v4029_v43  ;;  %v733_v22 = vsel %vm690_vm1, %v731_v23, %v14012_v26 }
  0x3a   : > { %14901 = vst [vmem:[#allocation39_spill] sm:$0xff] %v7147_v6  ;;  %v14014_v13 = vrot.slane %v7147_v6, 1  ;;  %v7161_v45 = vmul.f32 %v6816_v31, %v7150_v2  ;;  %v981_v12 = vsel %vm690_vm1, %v979_v41, %v14015_v19  ;;  %v1611_v39 = vmul.f32 %v6841_v44, %v7098_v47 }
  0x3b   : > { %v570_v1 = vadd.f32 %v538_v56, %v498_v61  ;;  %v1475_v50 = vrot.slane %v1363_v34, 1  ;;  %v4526_v43 = vadd.f32 %v4416_v9, %v4277_v62  ;;  %v7177_v14 = vmul.f32 %v6841_v44, %v7164_v46 }
  0x3c   : > { %14903 = vst [vmem:[#allocation41_spill] sm:$0xff] %v7161_v45  ;;  %v1229_v23 = vsel %vm690_vm1, %v1227_v30, %v14014_v13  ;;  %v14017_v26 = vrot.slane %v7161_v45, 1  ;;  %v1723_v61 = vrot.slane %v1611_v39, 1  ;;  %v1859_v41 = vmul.f32 %v6847_v49, %v7068_v8 }
  0x3d   : > { %14905 = vst [vmem:[#allocation43_spill] sm:$0xff] %v7177_v14  ;;  %v819_v56 = vadd.f32 %v733_v22, %v570_v1  ;;  %v7183_v34 = vmul.f32 %v6847_v49, %v7117_v24  ;;  %v4774_v9 = vadd.f32 %v4664_v0, %v4526_v43  ;;  %v14019_v30 = vrot.slane %v7177_v14, 1 }
  0x3e   : > { %v1477_v62 = vsel %vm690_vm1, %v1475_v50, %v14017_v26  ;;  %v2108_v13 = vmul.f32 %v6866_v58, %v7075_v36  ;;  %v1972_v22 = vrot.slane %v1859_v41, 2  ;;  %v7194_v39 = vmul.f32 %v6866_v58, %v7127_v5 }
  0x3f   : > { %14906 = vst [vmem:[#allocation44_spill] sm:$0xff] %v7183_v34  ;;  %v1067_v19 = vadd.f32 %v981_v12, %v819_v56  ;;  %v14018_v1 = vrot.slane %v7183_v34, 2  ;;  %v5022_v6 = vadd.f32 %v4912_v21, %v4774_v9  ;;  %v1725_v0 = vsel %vm690_vm1, %v1723_v61, %v14019_v30 }
  0x40   : > { %14907 = vst [vmem:[#allocation45_spill] sm:$0xff] %v7194_v39  ;;  %v2220_v43 = vrot.slane %v2108_v13, 2  ;;  %v2356_v50 = vmul.f32 %v6879_v63, %v7085_v54  ;;  %v14023_v56 = vrot.slane %v7194_v39, 2  ;;  %v7207_v41 = vmul.f32 %v6879_v63, %v7136_v55 }
  0x41   : > { %v1315_v26 = vadd.f32 %v1229_v23, %v1067_v19  ;;  %v1974_v12 = vsel %vm1931_vm2, %v1972_v22, %v14018_v1  ;;  %v5270_v21 = vadd.f32 %v5160_v20, %v5022_v6  ;;  %v2604_v61 = vmul.f32 %v6889_v18, %v7088_v16 }
  0x42   : > { %14908 = vst [vmem:[#allocation46_spill] sm:$0xff] %v7207_v41  ;;  %v2468_v9 = vrot.slane %v2356_v50, 2  ;;  %v7213_v13 = vmul.f32 %v6889_v18, %v7150_v2  ;;  %v2222_v23 = vsel %vm1931_vm2, %v2220_v43, %v14023_v56  ;;  %v14022_v22 = vrot.slane %v7207_v41, 2 }
  0x43   : > { %v1563_v19 = vadd.f32 %v1477_v62, %v1315_v26  ;;  %v2852_v1 = vmul.f32 %v6909_v33, %v7098_v47  ;;  %v5518_v30 = vadd.f32 %v5408_v4, %v5270_v21  ;;  %v2716_v6 = vrot.slane %v2604_v61, 2 }
  0x44   : > { %14909 = vst [vmem:[#allocation47_spill] sm:$0xff] %v7213_v13  ;;  %v14021_v20 = vrot.slane %v7213_v13, 2  ;;  %v7224_v50 = vmul.f32 %v6909_v33, %v7164_v46  ;;  %v2470_v26 = vsel %vm1931_vm2, %v2468_v9, %v14022_v22  ;;  %v3100_v43 = vmul.f32 %v6921_v40, %v7068_v8 }
  0x45   : > { %v1811_v34 = vadd.f32 %v1725_v0, %v1563_v19  ;;  %v2964_v62 = vrot.slane %v2852_v1, 2  ;;  %6291 = vmatprep.mubr.msk.f32.mxu0 %vm5558_vm4, %v5518_v30  ;;  %v7238_v61 = vmul.f32 %v6921_v40, %v7117_v24  ;;  %v3349_v0 = vmul.f32 %v6933_v48, %v7075_v36 }
  0x46   : > { %14910 = vst [vmem:[#allocation48_spill] sm:$0xff] %v7224_v50  ;;  %v2718_v4 = vsel %vm1931_vm2, %v2716_v6, %v14021_v20  ;;  %v14026_v21 = vrot.slane %v7224_v50, 2  ;;  %v3213_v1 = vrot.slane %v3100_v43, 3  ;;  %v7244_v19 = vmul.f32 %v6933_v48, %v7127_v5 }
  0x47   : > { %14911 = vst [vmem:[#allocation49_spill] sm:$0xff] %v7238_v61  ;;  %v2060_v9 = vadd.f32 %v1974_v12, %v1811_v34  ;;  %v3597_v30 = vmul.f32 %v6951_v15, %v7085_v54  ;;  %v14028_v20 = vrot.slane %v7238_v61, 3  ;;  %v3461_v22 = vrot.slane %v3349_v0, 3 }
  0x48   : > { %14912 = vst [vmem:[#allocation50_spill] sm:$0xff] %v7244_v19  ;;  %v2966_v6 = vsel %vm1931_vm2, %v2964_v62, %v14026_v21  ;;  %v7254_v56 = vmul.f32 %v6951_v15, %v7136_v55  ;;  %v14032_v12 = vrot.slane %v7244_v19, 3  ;;  %v3845_v13 = vmul.f32 %v6965_v32, %v7088_v16 }
  0x49   : > { %v2308_v34 = vadd.f32 %v2222_v23, %v2060_v9  ;;  %v3709_v43 = vrot.slane %v3597_v30, 3  ;;  %v3215_v50 = vsel %vm3172_vm3, %v3213_v1, %v14028_v20  ;;  %v7265_v0 = vmul.f32 %v6965_v32, %v7150_v2 }
  0x4a   : > { %14913 = vst [vmem:[#allocation51_spill] sm:$0xff] %v7254_v56  ;;  %v14031_v62 = vrot.slane %v7254_v56, 3  ;;  %v4093_v21 = vmul.f32 %v6981_v29, %v7098_v47  ;;  %v3463_v9 = vsel %vm3172_vm3, %v3461_v22, %v14032_v12  ;;  %v3957_v30 = vrot.slane %v3845_v13, 3  ;;  %v7340_v56 = vld [vmem:[%s6732_s29 + $0x70] sm:$0xf] }
  0x4b   : > { %14914 = vst [vmem:[#allocation52_spill] sm:$0xff] %v7265_v0  ;;  %v2556_v23 = vadd.f32 %v2470_v26, %v2308_v34  ;;  %v7274_v61 = vmul.f32 %v6981_v29, %v7164_v46  ;;  %v14035_v20 = vrot.slane %v7265_v0, 3  ;;  %v4341_v39 = vmul.f32 %v6995_v60, %v7068_v8  ;;  %14924 = vst [vmem:[#allocation61_spill] sm:$0xff] %v7340_v56 }
  0x4c   : > { %v3711_v1 = vsel %vm3172_vm3, %v3709_v43, %v14031_v62  ;;  %v4205_v41 = vrot.slane %v4093_v21, 3  ;;  %v7285_v13 = vmul.f32 %v6995_v60, %v7117_v24  ;;  %v4590_v22 = vmul.f32 %v7011_v35, %v7075_v36 }
  0x4d   : > { %14915 = vst [vmem:[#allocation53_spill] sm:$0xff] %v7274_v61  ;;  %v2804_v26 = vadd.f32 %v2718_v4, %v2556_v23  ;;  %v14037_v34 = vrot.slane %v7274_v61, 3  ;;  %v3959_v43 = vsel %vm3172_vm3, %v3957_v30, %v14035_v20  ;;  %v4454_v62 = vrot.slane %v4341_v39, 4  ;;  %v7322_v39 = vld [vmem:[%s6732_s29 + $0x28] sm:$0xf] }
  0x4e   : > { %14916 = vst [vmem:[#allocation54_spill] sm:$0xff] %v7285_v13  ;;  %v7294_v8 = vmul.f32 %v7011_v35, %v7127_v5  ;;  %v4838_v4 = vmul.f32 %v7026_v28, %v7085_v54  ;;  %v14042_v12 = vrot.slane %v7285_v13, 4  ;;  %v4702_v36 = vrot.slane %v4590_v22, 4  ;;  %14920 = vst [vmem:[#allocation58_spill] sm:$0xff] %v7322_v39 }
  0x4f   : > { %v3052_v21 = vadd.f32 %v2966_v6, %v2804_v26  ;;  %v4207_v23 = vsel %vm3172_vm3, %v4205_v41, %v14037_v34  ;;  %v7305_v30 = vmul.f32 %v7026_v28, %v7136_v55  ;;  %v5086_v0 = vmul.f32 %v7038_v7, %v7088_v16  ;;  %v7310_v6 = vld [vmem:[%s6732_s29 + $0x10] sm:$0xf] }
  0x50   : > { %14917 = vst [vmem:[#allocation55_spill] sm:$0xff] %v7294_v8  ;;  %v4950_v20 = vrot.slane %v4838_v4, 4  ;;  %v4456_v41 = vsel %vm4413_vm0, %v4454_v62, %v14042_v12  ;;  %v7317_v22 = vmul.f32 %v7038_v7, %v7150_v2  ;;  %v5334_v34 = vmul.f32 %v7056_v51, %v7098_v47  ;;  %v7325_v4 = vld [vmem:[%s6732_s29 + $0x40] sm:$0xf]  ;;  %v7336_v12 = vld [vmem:[%s6732_s29 + $0x58] sm:$0xf] }
  0x51   : > { %14918 = vst [vmem:[#allocation56_spill] sm:$0xff] %v7305_v30  ;;  %v3301_v26 = vadd.f32 %v3215_v50, %v3052_v21  ;;  %14921 = vst [vmem:[#allocation59_spill] sm:$0xff] %v7325_v4  ;;  %v14922_v16 = vrot.slane %v7294_v8, 4  ;;  %v14051_v50 = vrot.slane %v7305_v30, 4  ;;  %v5198_v21 = vrot.slane %v5086_v0, 4 }
  0x52   : > { %14919 = vst [vmem:[#allocation57_spill] sm:$0xff] %v7317_v22  ;;  %v7333_v62 = vmul.f32 %v7056_v51, %v7164_v46  ;;  %14923 = vst [vmem:[#allocation60_spill] sm:$0xff] %v7336_v12  ;;  %v14056_v47 = vrot.slane %v7317_v22, 4  ;;  %v5446_v61 = vrot.slane %v5334_v34, 4  ;;  %v596_v8 = vmul.f32 %v6727_v3, %v7310_v6 }
  0x53   : > { %v4704_v54 = vsel %vm4413_vm0, %v4702_v36, %v14922_v16  ;;  %v3549_v13 = vadd.f32 %v3463_v9, %v3301_v26  ;;  %v4952_v36 = vsel %vm4413_vm0, %v4950_v20, %v14051_v50  ;;  %v845_v0 = vmul.f32 %v6761_v10, %v7322_v39 }
  0x54   : > { %v14057_v16 = vrot.slane %v7333_v62, 4  ;;  %v1093_v9 = vmul.f32 %v6766_v11, %v7325_v4  ;;  %v5200_v34 = vsel %vm4413_vm0, %v5198_v21, %v14056_v47  ;;  %v694_v19 = vrot.slane %v596_v8, 1 }
  0x55   : > { %v3797_v26 = vadd.f32 %v3711_v1, %v3549_v13  ;;  %v1341_v14 = vmul.f32 %v6816_v31, %v7336_v12  ;;  %v942_v50 = vrot.slane %v845_v0, 1  ;;  %v1589_v45 = vmul.f32 %v6841_v44, %v7340_v56 }
  0x56   : > { %v5448_v20 = vsel %vm4413_vm0, %v5446_v61, %v14057_v16  ;;  %v1190_v30 = vrot.slane %v1093_v9, 1  ;;  %v14925_v1 = vrot.slane %v6802_v25, 1  ;;  %v1837_v8 = vmul.f32 %v6847_v49, %v7310_v6 }
  0x57   : > { %v4045_v53 = vadd.f32 %v3959_v43, %v3797_v26  ;;  %v1438_v22 = vrot.slane %v1341_v14, 1  ;;  %v14926_v47 = vrot.slane %v6825_v38, 1  ;;  %v14927_v0 = vrot.slane %v6834_v42, 1 }
  0x58   : > { %v695_v13 = vsel %vm690_vm1, %v14925_v1, %v694_v19  ;;  %v1686_v16 = vrot.slane %v1589_v45, 1  ;;  %v14928_v25 = vrot.slane %v6852_v52, 1  ;;  %v1935_v14 = vrot.slane %v1837_v8, 2 }
  0x59   : > { %v804_v21 = vadd.f32 %v695_v13, %v6868_v59  ;;  %v943_v61 = vsel %vm690_vm1, %v14926_v47, %v942_v50  ;;  %v1191_v9 = vsel %vm690_vm1, %v14927_v0, %v1190_v30  ;;  %v4293_v43 = vadd.f32 %v4207_v23, %v4045_v53 }
  0x5a   : > { %v1439_v19 = vsel %vm690_vm1, %v14928_v25, %v1438_v22  ;;  %v2086_v26 = vmul.f32 %v6866_v58, %v7322_v39  ;;  %v14929_v59 = vrot.slane %v6861_v57, 1  ;;  %v2334_v42 = vmul.f32 %v6879_v63, %v7325_v4 }
  0x5b   : > { %v1052_v1 = vadd.f32 %v943_v61, %v804_v21  ;;  %v2582_v47 = vmul.f32 %v6889_v18, %v7336_v12  ;;  %v4542_v53 = vadd.f32 %v4456_v41, %v4293_v43  ;;  %v14930_v52 = vrot.slane %v6884_v17, 2 }
  0x5c   : > { %v1687_v38 = vsel %vm690_vm1, %v14929_v59, %v1686_v16  ;;  %v2183_v23 = vrot.slane %v2086_v26, 2  ;;  %v2830_v30 = vmul.f32 %v6909_v33, %v7340_v56  ;;  %v2431_v50 = vrot.slane %v2334_v42, 2 }
  0x5d   : > { %v1936_v45 = vsel %vm1931_vm2, %v14930_v52, %v1935_v14  ;;  %v1300_v22 = vadd.f32 %v1191_v9, %v1052_v1  ;;  %v2679_v57 = vrot.slane %v2582_v47, 2  ;;  %v3078_v16 = vmul.f32 %v6921_v40, %v7310_v6  ;;  %v14933_v9 = vld [vmem:[#allocation19_spill] sm:$0xff] }
  0x5e   : > { %v4790_v13 = vadd.f32 %v4704_v54, %v4542_v53  ;;  %v14931_v8 = vrot.slane %v6898_v27, 2  ;;  %v2927_v41 = vrot.slane %v2830_v30, 2  ;;  %v3327_v17 = vmul.f32 %v6933_v48, %v7322_v39  ;;  %v14935_v54 = vld [vmem:[#allocation20_spill] sm:$0xff] }
  0x5f   : > { %v1548_v61 = vadd.f32 %v1439_v19, %v1300_v22  ;;  %v14932_v0 = vrot.slane %v6914_v37, 2  ;;  %v14934_v25 = vrot.slane %v14933_v9, 2  ;;  %v3176_v26 = vrot.slane %v3078_v16, 3  ;;  %v14937_v19 = vld [vmem:[#allocation21_spill] sm:$0xff]  ;;  %v14939_v22 = vld [vmem:[#allocation22_spill] sm:$0xff] }
  0x60   : > { %v2184_v21 = vsel %vm1931_vm2, %v14931_v8, %v2183_v23  ;;  %v5038_v1 = vadd.f32 %v4952_v36, %v4790_v13  ;;  %v14936_v59 = vrot.slane %v14935_v54, 2  ;;  %v3424_v42 = vrot.slane %v3327_v17, 3  ;;  %v14943_v54 = vld [vmem:[#allocation24_spill] sm:$0xff] }
  0x61   : > { %v2432_v43 = vsel %vm1931_vm2, %v14932_v0, %v2431_v50  ;;  %v2680_v14 = vsel %vm1931_vm2, %v14934_v25, %v2679_v57  ;;  %v3575_v47 = vmul.f32 %v6951_v15, %v7325_v4  ;;  %v1796_v53 = vadd.f32 %v1687_v38, %v1548_v61  ;;  %v14941_v0 = vld [vmem:[#allocation23_spill] sm:$0xff] }
  0x62   : > { %v2928_v27 = vsel %vm1931_vm2, %v14936_v59, %v2927_v41  ;;  %v14938_v52 = vrot.slane %v14937_v19, 3  ;;  %v3823_v23 = vmul.f32 %v6965_v32, %v7336_v12  ;;  %v4071_v30 = vmul.f32 %v6981_v29, %v7340_v56  ;;  %v14945_v59 = vld [vmem:[#allocation25_spill] sm:$0xff] }
  0x63   : > { %v5286_v36 = vadd.f32 %v5200_v34, %v5038_v1  ;;  %v14940_v50 = vrot.slane %v14939_v22, 3  ;;  %v3672_v16 = vrot.slane %v3575_v47, 3  ;;  %v4319_v13 = vmul.f32 %v6995_v60, %v7310_v6  ;;  %v14949_v22 = vld [vmem:[#allocation27_spill] sm:$0xff] }
  0x64   : > { %v3177_v37 = vsel %vm3172_vm3, %v14938_v52, %v3176_v26  ;;  %v2045_v38 = vadd.f32 %v1936_v45, %v1796_v53  ;;  %v3920_v8 = vrot.slane %v3823_v23, 3  ;;  %v4168_v41 = vrot.slane %v4071_v30, 3  ;;  %v14947_v53 = vld [vmem:[#allocation26_spill] sm:$0xff] }
  0x65   : > { %v3425_v57 = vsel %vm3172_vm3, %v14940_v50, %v3424_v42  ;;  %v4568_v17 = vmul.f32 %v7011_v35, %v7322_v39  ;;  %v5534_v61 = vadd.f32 %v5448_v20, %v5286_v36  ;;  %v14942_v9 = vrot.slane %v14941_v0, 3  ;;  %v14954_v0 = vld [vmem:[#allocation28_spill] sm:$0xff] }
  0x66   : > { %v4417_v25 = vrot.slane %v4319_v13, 4  ;;  %v4816_v26 = vmul.f32 %v7026_v28, %v7325_v4  ;;  %v2293_v1 = vadd.f32 %v2184_v21, %v2045_v38  ;;  %v14944_v6 = vrot.slane %v14943_v54, 3  ;;  %v7452_v13 = vld [vmem:[%s6732_s29 + $0xd0] sm:$0xf]  ;;  %v7455_v38 = vld [vmem:[%s6732_s29 + $0xe8] sm:$0xf] }
  0x67   : > { %v3673_v34 = vsel %vm3172_vm3, %v14942_v9, %v3672_v16  ;;  %v14946_v42 = vrot.slane %v14945_v59, 3  ;;  %v4665_v20 = vrot.slane %v4568_v17, 4  ;;  %6315 = vmatprep.mubr.msk.f32.mxu1 %vm5558_vm4, %v5534_v61  ;;  %v14948_v19 = vrot.slane %v14947_v53, 4  ;;  %14951 = vst [vmem:[#allocation19_spill] sm:$0xff] %v7455_v38  ;;  %v14953_v17 = vld [vmem:[#allocation3_spill] sm:$0xff]  ;;  %v14960_v53 = vld [vmem:[#allocation5_spill] sm:$0xff] }
  0x68   : > { %v3921_v45 = vsel %vm3172_vm3, %v14944_v6, %v3920_v8  ;;  %v4913_v21 = vrot.slane %v4816_v26, 4  ;;  %v5064_v23 = vmul.f32 %v7038_v7, %v7336_v12  ;;  %v5312_v30 = vmul.f32 %v7056_v51, %v7340_v56  ;;  %v14952_v8 = vld [vmem:[#allocation2_spill] sm:$0xff]  ;;  %v7470_v54 = vld [vmem:[%s6732_s29 + $0x118] sm:$0xf]  ;;  %v14958_v6 = vld [vmem:[#allocation4_spill] sm:$0xff] }
  0x69   : > { %v7434_v47 = vsel %vm3172_vm3, %v14946_v42, %v4168_v41  ;;  %v7440_v52 = vsel %vm4413_vm0, %v14948_v19, %v4417_v25  ;;  %v2541_v36 = vadd.f32 %v2432_v43, %v2293_v1  ;;  %v14950_v50 = vrot.slane %v14949_v22, 4  ;;  %v7467_v1 = vld [vmem:[%s6732_s29 + $0x100] sm:$0xf]  ;;  %14957 = vst [vmem:[#allocation21_spill] sm:$0xff] %v7470_v54 }
  0x6a   : > { %v283_v41 = vmul.f32 %v14952_v8, %v7117_v24  ;;  %v323_v61 = vmul.f32 %v14953_v17, %v7127_v5  ;;  %v14955_v9 = vrot.slane %v14954_v0, 4  ;;  %v5161_v43 = vrot.slane %v5064_v23, 4  ;;  %14956 = vst [vmem:[#allocation20_spill] sm:$0xff] %v7467_v1  ;;  %v14961_v22 = vld [vmem:[#allocation6_spill] sm:$0xff]  ;;  %v14964_v0 = vld [vmem:[#allocation33_spill] sm:$0xff] }
  0x6b   : > { %v7449_v16 = vsel %vm4413_vm0, %v14950_v50, %v4665_v20  ;;  %v5409_v26 = vrot.slane %v5312_v30, 4  ;;  %v395_v59 = vmul.f32 %v14958_v6, %v7136_v55  ;;  %v2789_v42 = vadd.f32 %v2680_v14, %v2541_v36  ;;  %v7475_v20 = vld [vmem:[%s6732_s29 + $0x130] sm:$0xf]  ;;  %v14962_v50 = vld [vmem:[#allocation30_spill] sm:$0xff] }
  0x6c   : > { %v7464_v25 = vsel %vm4413_vm0, %v14955_v9, %v4913_v21  ;;  %14959 = vst [vmem:[#allocation22_spill] sm:$0xff] %v7475_v20  ;;  %v355_v24 = vadd.f32 %v323_v61, %v283_v41  ;;  %v467_v19 = vmul.f32 %v14960_v53, %v7150_v2  ;;  %v539_v21 = vmul.f32 %v14961_v22, %v7164_v46 }
  0x6d   : > { %v14963_v23 = vrot.slane %v14962_v50, 4  ;;  %v14965_v9 = vrot.slane %v14964_v0, 4  ;;  %v620_v14 = vmul.f32 %v6727_v3, %v7452_v13  ;;  %v869_v36 = vmul.f32 %v6761_v10, %v7455_v38 }
  0x6e   : > { %v3037_v41 = vadd.f32 %v2928_v27, %v2789_v42  ;;  %v427_v61 = vadd.f32 %v395_v59, %v355_v24  ;;  %v1117_v12 = vmul.f32 %v6766_v11, %v7467_v1  ;;  %v1861_v0 = vmul.f32 %v6847_v49, %v7452_v13  ;;  %v14966_v27 = vld [vmem:[#allocation36_spill] sm:$0xff]  ;;  %v14968_v24 = vld [vmem:[#allocation38_spill] sm:$0xff] }
  0x6f   : > { %v7484_v30 = vsel %vm4413_vm0, %v14963_v23, %v5161_v43  ;;  %v7489_v56 = vsel %vm4413_vm0, %v14965_v9, %v5409_v26  ;;  %v1365_v43 = vmul.f32 %v6816_v31, %v7470_v54  ;;  %v734_v50 = vrot.slane %v620_v14, 1 }
  0x70   : > { %v982_v23 = vrot.slane %v869_v36, 1  ;;  %v1613_v26 = vmul.f32 %v6841_v44, %v7475_v20  ;;  %v3286_v9 = vadd.f32 %v3177_v37, %v3037_v41  ;;  %v499_v4 = vadd.f32 %v467_v19, %v427_v61  ;;  %v14970_v44 = vld [vmem:[#allocation39_spill] sm:$0xff]  ;;  %v14972_v37 = vld [vmem:[#allocation41_spill] sm:$0xff] }
  0x71   : > { %v1230_v39 = vrot.slane %v1117_v12, 1  ;;  %v1478_v46 = vrot.slane %v1365_v43, 1  ;;  %v14967_v59 = vrot.slane %v14966_v27, 1  ;;  %v14969_v2 = vrot.slane %v14968_v24, 1  ;;  %v14974_v41 = vld [vmem:[#allocation43_spill] sm:$0xff] }
  0x72   : > { %v1726_v14 = vrot.slane %v1613_v26, 1  ;;  %v1975_v36 = vrot.slane %v1861_v0, 2  ;;  %v3534_v5 = vadd.f32 %v3425_v57, %v3286_v9  ;;  %v571_v31 = vadd.f32 %v539_v21, %v499_v4 }
  0x73   : > { %v735_v42 = vsel %vm690_vm1, %v14967_v59, %v734_v50  ;;  %v983_v55 = vsel %vm690_vm1, %v14969_v2, %v982_v23  ;;  %v14971_v11 = vrot.slane %v14970_v44, 1  ;;  %v14973_v19 = vrot.slane %v14972_v37, 1  ;;  %v14976_v50 = vld [vmem:[#allocation44_spill] sm:$0xff] }
  0x74   : > { %v14975_v61 = vrot.slane %v14974_v41, 1  ;;  %v14977_v27 = vrot.slane %v14976_v50, 2  ;;  %v2110_v57 = vmul.f32 %v6866_v58, %v7455_v38  ;;  %v2358_v44 = vmul.f32 %v6879_v63, %v7467_v1 }
  0x75   : > { %v1231_v49 = vsel %vm690_vm1, %v14971_v11, %v1230_v39  ;;  %v1479_v12 = vsel %vm690_vm1, %v14973_v19, %v1478_v46  ;;  %v3782_v4 = vadd.f32 %v3673_v34, %v3534_v5  ;;  %v820_v11 = vadd.f32 %v735_v42, %v571_v31  ;;  %v14978_v5 = vld [vmem:[#allocation45_spill] sm:$0xff]  ;;  %v14980_v42 = vld [vmem:[#allocation46_spill] sm:$0xff] }
  0x76   : > { %v1727_v43 = vsel %vm690_vm1, %v14975_v61, %v1726_v14  ;;  %v1976_v2 = vsel %vm1931_vm2, %v14977_v27, %v1975_v36  ;;  %v2606_v39 = vmul.f32 %v6889_v18, %v7470_v54  ;;  %v2854_v46 = vmul.f32 %v6909_v33, %v7475_v20  ;;  %v14982_v27 = vld [vmem:[#allocation47_spill] sm:$0xff] }
  0x77   : > { %v2223_v21 = vrot.slane %v2110_v57, 2  ;;  %v2471_v23 = vrot.slane %v2358_v44, 2  ;;  %v3102_v26 = vmul.f32 %v6921_v40, %v7452_v13  ;;  %v3351_v0 = vmul.f32 %v6933_v48, %v7455_v38 }
  0x78   : > { %v4030_v9 = vadd.f32 %v3921_v45, %v3782_v4  ;;  %v1068_v59 = vadd.f32 %v983_v55, %v820_v11  ;;  %v2719_v24 = vrot.slane %v2606_v39, 2  ;;  %v2967_v14 = vrot.slane %v2854_v46, 2  ;;  %v14984_v55 = vld [vmem:[#allocation48_spill] sm:$0xff]  ;;  %v14986_v11 = vld [vmem:[#allocation49_spill] sm:$0xff] }
  0x79   : > { %v14979_v31 = vrot.slane %v14978_v5, 2  ;;  %v14981_v36 = vrot.slane %v14980_v42, 2  ;;  %v3216_v19 = vrot.slane %v3102_v26, 3  ;;  %v3464_v41 = vrot.slane %v3351_v0, 3 }
  0x7a   : > { %v4278_v61 = vadd.f32 %v7434_v47, %v4030_v9  ;;  %v1316_v50 = vadd.f32 %v1231_v49, %v1068_v59  ;;  %v14983_v57 = vrot.slane %v14982_v27, 2  ;;  %v14985_v44 = vrot.slane %v14984_v55, 2 }
  0x7b   : > { %v2224_v34 = vsel %vm1931_vm2, %v14979_v31, %v2223_v21  ;;  %v2472_v37 = vsel %vm1931_vm2, %v14981_v36, %v2471_v23  ;;  %v14987_v39 = vrot.slane %v14986_v11, 3  ;;  %v14988_v21 = vld [vmem:[#allocation50_spill] sm:$0xff]  ;;  %v3599_v49 = vmul.f32 %v6951_v15, %v7467_v1 }
  0x7c   : > { %v2720_v45 = vsel %vm1931_vm2, %v14983_v57, %v2719_v24  ;;  %v2968_v4 = vsel %vm1931_vm2, %v14985_v44, %v2967_v14  ;;  %v14989_v5 = vrot.slane %v14988_v21, 3  ;;  %v3847_v47 = vmul.f32 %v6965_v32, %v7470_v54 }
  0x7d   : > { %v3217_v46 = vsel %vm3172_vm3, %v14987_v39, %v3216_v19  ;;  %v4527_v26 = vadd.f32 %v7440_v52, %v4278_v61  ;;  %v1564_v0 = vadd.f32 %v1479_v12, %v1316_v50  ;;  %v4095_v9 = vmul.f32 %v6981_v29, %v7475_v20 }
  0x7e   : > { %v7552_v23 = vsel %vm3172_vm3, %v14989_v5, %v3464_v41  ;;  %v4343_v59 = vmul.f32 %v6995_v60, %v7452_v13  ;;  %v3712_v24 = vrot.slane %v3599_v49, 3  ;;  %v3960_v14 = vrot.slane %v3847_v47, 3  ;;  %v14990_v41 = vld [vmem:[#allocation51_spill] sm:$0xff]  ;;  %v14992_v13 = vld [vmem:[#allocation52_spill] sm:$0xff]  ;;  %v14996_v5 = vld [vmem:[#allocation54_spill] sm:$0xff] }
  0x7f   : > { %v4592_v31 = vmul.f32 %v7011_v35, %v7455_v38  ;;  %v4840_v42 = vmul.f32 %v7026_v28, %v7467_v1  ;;  %v4775_v36 = vadd.f32 %v7449_v16, %v4527_v26  ;;  %v1812_v19 = vadd.f32 %v1727_v43, %v1564_v0  ;;  %v14994_v16 = vld [vmem:[#allocation53_spill] sm:$0xff]  ;;  %v14998_v26 = vld [vmem:[#allocation55_spill] sm:$0xff]  ;;  %v15049_v38 = vld [vmem:[#allocation42_spill] sm:$0xff] }
  0x80   : > { %v4208_v52 = vrot.slane %v4095_v9, 3  ;;  %v4457_v12 = vrot.slane %v4343_v59, 4  ;;  %v14991_v61 = vrot.slane %v14990_v41, 3  ;;  %v14993_v27 = vrot.slane %v14992_v13, 3  ;;  %v15000_v59 = vld [vmem:[#allocation56_spill] sm:$0xff] }
  0x81   : > { %v4705_v55 = vrot.slane %v4592_v31, 4  ;;  %v4953_v44 = vrot.slane %v4840_v42, 4  ;;  %v5023_v11 = vadd.f32 %v7464_v25, %v4775_v36  ;;  %v2061_v39 = vadd.f32 %v1976_v2, %v1812_v19  ;;  %v7604_v31 = vld [vmem:[%s6732_s29 + $0x78] sm:$0xff]  ;;  %v15003_v19 = vld [vmem:[#allocation7_spill] sm:$0xff] }
  0x82   : > { %v7571_v50 = vsel %vm3172_vm3, %v14991_v61, %v3712_v24  ;;  %v7576_v57 = vsel %vm3172_vm3, %v14993_v27, %v3960_v14  ;;  %v14995_v21 = vrot.slane %v14994_v16, 3  ;;  %v14997_v49 = vrot.slane %v14996_v5, 4  ;;  %15002 = vst [vmem:[#allocation23_spill] sm:$0xff] %v7604_v31  ;;  %v15005_v27 = vld [vmem:[#allocation12_spill] sm:$0xff] }
  0x83   : > { %v14999_v0 = vrot.slane %v14998_v26, 4  ;;  %v15001_v24 = vrot.slane %v15000_v59, 4  ;;  %v5088_v2 = vmul.f32 %v7038_v7, %v7470_v54  ;;  %v5336_v14 = vmul.f32 %v7056_v51, %v7475_v20  ;;  %v15046_v54 = vld [vmem:[#allocation40_spill] sm:$0xff] }
  0x84   : > { %v7582_v43 = vsel %vm3172_vm3, %v14995_v21, %v4208_v52  ;;  %v7587_v47 = vsel %vm4413_vm0, %v14997_v49, %v4457_v12  ;;  %v5271_v42 = vadd.f32 %v7484_v30, %v5023_v11  ;;  %v2309_v36 = vadd.f32 %v2224_v34, %v2061_v39  ;;  %v15004_v12 = vld [vmem:[#allocation10_spill] sm:$0xff]  ;;  %v15007_v34 = vld [vmem:[#allocation57_spill] sm:$0xff] }
  0x85   : > { %v7592_v9 = vsel %vm4413_vm0, %v14999_v0, %v4705_v55  ;;  %v7597_v25 = vsel %vm4413_vm0, %v15001_v24, %v4953_v44  ;;  %v268_v52 = vmul.f32 %v14952_v8, %v15003_v19  ;;  %v308_v41 = vmul.f32 %v14953_v17, %v15004_v12  ;;  %v15006_v44 = vld [vmem:[#allocation14_spill] sm:$0xff]  ;;  %v15011_v0 = vld [vmem:[#allocation11_spill] sm:$0xff] }
  0x86   : > { %v5201_v61 = vrot.slane %v5088_v2, 4  ;;  %v5449_v13 = vrot.slane %v5336_v14, 4  ;;  %v380_v55 = vmul.f32 %v14958_v6, %v15005_v27  ;;  %v452_v16 = vmul.f32 %v14960_v53, %v15006_v44  ;;  %v15010_v53 = vld [vmem:[#allocation9_spill] sm:$0xff]  ;;  %v15012_v2 = vld [vmem:[#allocation8_spill] sm:$0xff] }
  0x87   : > { %v5519_v21 = vadd.f32 %v7489_v56, %v5271_v42  ;;  %v2557_v5 = vadd.f32 %v2472_v37, %v2309_v36  ;;  %v340_v49 = vadd.f32 %v308_v41, %v268_v52  ;;  %v524_v30 = vmul.f32 %v14961_v22, %v7604_v31 }
  0x88   : > { %v15008_v8 = vrot.slane %v15007_v34, 4  ;;  %v15009_v17 = vrot.slane %v7333_v62, 4  ;;  %v597_v6 = vmul.f32 %v6727_v3, %v15003_v19  ;;  %v7632_v56 = vmul.f32 %v6727_v3, %v15010_v53  ;;  %v15013_v3 = vld [vmem:[#allocation13_spill] sm:$0xff] }
  0x89   : > { %6292 = vmatmul.mubr.msk.f32.vlgmr.msra.gmra.mxu0 %vm5558_vm4, %v5519_v21  ;;  %v2805_v22 = vadd.f32 %v2720_v45, %v2557_v5  ;;  %v412_v37 = vadd.f32 %v380_v55, %v340_v49  ;;  %v846_v26 = vmul.f32 %v6761_v10, %v15004_v12  ;;  %v7639_v62 = vmul.f32 %v6761_v10, %v15011_v0  ;;  %v7656_v55 = vld [vmem:[%s6732_s29 + $0x80] sm:$0xff]  ;;  %v15016_v21 = vld [vmem:[#allocation15_spill] sm:$0xff]  ;;  %v7677_v53 = vld [vmem:[%s6732_s29 + $0x18] sm:$0xff] }
  0x8a   : > { %v7621_v11 = vsel %vm4413_vm0, %v15008_v8, %v5201_v61  ;;  %v7626_v39 = vsel %vm4413_vm0, %v15009_v17, %v5449_v13  ;;  %v696_v59 = vrot.slane %v597_v6, 1  ;;  %v14100_v24 = vrot.slane %v7632_v56, 1  ;;  %v15014_v61 = vld [vmem:[#allocation16_spill] sm:$0xff]  ;;  %15015 = vst [vmem:[#allocation24_spill] sm:$0xff] %v7656_v55 }
  0x8b   : > { %v1094_v14 = vmul.f32 %v15012_v2, %v15005_v27  ;;  %v7646_v42 = vmul.f32 %v15012_v2, %v15013_v3  ;;  %v3053_v45 = vadd.f32 %v2968_v4, %v2805_v22  ;;  %v484_v36 = vadd.f32 %v452_v16, %v412_v37  ;;  %v15018_v22 = vld [vmem:[#allocation18_spill] sm:$0xff] }
  0x8c   : > { %v944_v19 = vrot.slane %v846_v26, 1  ;;  %v14099_v52 = vrot.slane %v7639_v62, 1  ;;  %v698_v10 = vsel %vm690_vm1, %v696_v59, %v14100_v24  ;;  %v1342_v13 = vmul.f32 %v15014_v61, %v15006_v44  ;;  %v7683_v59 = vld [vmem:[%s6732_s29 + $0x20] sm:$0xff] }
  0x8d   : > { %v1192_v12 = vrot.slane %v1094_v14, 1  ;;  %v14098_v41 = vrot.slane %v7646_v42, 1  ;;  %v3302_v27 = vadd.f32 %v3217_v46, %v3053_v45  ;;  %v556_v4 = vadd.f32 %v524_v30, %v484_v36  ;;  %v15017_v46 = vld [vmem:[#allocation17_spill] sm:$0xff] }
  0x8e   : > { %v946_v16 = vsel %vm690_vm1, %v944_v19, %v14099_v52  ;;  %v7663_v5 = vmul.f32 %v15014_v61, %v15016_v21  ;;  %v1440_v34 = vrot.slane %v1342_v13, 1  ;;  %v1590_v44 = vmul.f32 %v15017_v46, %v7604_v31  ;;  %v7703_v61 = vld [vmem:[%s6732_s29 + $0x38] sm:$0xff]  ;;  %v7918_v52 = vld [vmem:[%s13956_s1 + $0x6] ss:$0 sm:$0xff] }
  0x8f   : > { %v1194_v49 = vsel %vm690_vm1, %v1192_v12, %v14098_v41  ;;  %v7672_v30 = vmul.f32 %v15017_v46, %v7656_v55  ;;  %v3550_v8 = vadd.f32 %v7552_v23, %v3302_v27  ;;  %v805_v17 = vadd.f32 %v698_v10, %v556_v4  ;;  %v7690_v23 = vld [vmem:[%s6732_s29 + $0x30] sm:$0xff]  ;;  %15020 = vst [vmem:[#allocation26_spill] sm:$0xff] %v7703_v61 }
  0x90   : > { %v14097_v6 = vrot.slane %v7663_v5, 1  ;;  %v1838_v37 = vmul.f32 %v7677_v53, %v15018_v22  ;;  %v1688_v26 = vrot.slane %v1590_v44, 1  ;;  %v7687_v2 = vmul.f32 %v7683_v59, %v15018_v22  ;;  %15019 = vst [vmem:[#allocation25_spill] sm:$0xff] %v7690_v23  ;;  %15042 = vst [vmem:[#allocation46_spill] sm:$0xff] %v7918_v52 }
  0x91   : > { %v14096_v0 = vrot.slane %v7672_v30, 1  ;;  %v2087_v14 = vmul.f32 %v7690_v23, %v6866_v58  ;;  %v3798_v3 = vadd.f32 %v7571_v50, %v3550_v8  ;;  %v1053_v45 = vadd.f32 %v946_v16, %v805_v17  ;;  %v7711_v16 = vld [vmem:[%s6732_s29 + $0x48] sm:$0xff]  ;;  %v7727_v8 = vld [vmem:[%s6732_s29 + $0x60] sm:$0xff] }
  0x92   : > { %v1442_v36 = vsel %vm690_vm1, %v1440_v34, %v14097_v6  ;;  %v1937_v19 = vrot.slane %v1838_v37, 2  ;;  %v14082_v12 = vrot.slane %v7687_v2, 2  ;;  %v7707_v13 = vmul.f32 %v7703_v61, %v6866_v58  ;;  %15021 = vst [vmem:[#allocation27_spill] sm:$0xff] %v7711_v16  ;;  %v7716_v34 = vld [vmem:[%s6732_s29 + $0x50] sm:$0xff]  ;;  %15023 = vst [vmem:[#allocation3_spill] sm:$0xff] %v7727_v8  ;;  %v15040_v6 = vld [vmem:[#allocation35_spill] sm:$0xff] }
  0x93   : > { %v1690_v10 = vsel %vm690_vm1, %v1688_v26, %v14096_v0  ;;  %v2185_v50 = vrot.slane %v2087_v14, 2  ;;  %v4046_v27 = vadd.f32 %v7576_v57, %v3798_v3  ;;  %v1301_v4 = vadd.f32 %v1194_v49, %v1053_v45  ;;  %15022 = vst [vmem:[#allocation2_spill] sm:$0xff] %v7716_v34  ;;  %v7732_v49 = vld [vmem:[%s6732_s29 + $0x68] sm:$0xff] }
  0x94   : > { %v2335_v21 = vmul.f32 %v7711_v16, %v6879_v63  ;;  %v7720_v46 = vmul.f32 %v7716_v34, %v6879_v63  ;;  %v1939_v58 = vsel %vm1931_vm2, %v1937_v19, %v14082_v12  ;;  %v14095_v44 = vrot.slane %v7707_v13, 2  ;;  %15024 = vst [vmem:[#allocation28_spill] sm:$0xff] %v7732_v49 }
  0x95   : > { %v2583_v57 = vmul.f32 %v7727_v8, %v6889_v18  ;;  %v7736_v17 = vmul.f32 %v7732_v49, %v6889_v18  ;;  %v4294_v63 = vadd.f32 %v7582_v43, %v4046_v27  ;;  %v1549_v22 = vadd.f32 %v1442_v36, %v1301_v4 }
  0x96   : > { %v2433_v37 = vrot.slane %v2335_v21, 2  ;;  %v14094_v26 = vrot.slane %v7720_v46, 2  ;;  %v2187_v14 = vsel %vm1931_vm2, %v2185_v50, %v14095_v44  ;;  %v2831_v19 = vmul.f32 %v6909_v33, %v7604_v31 }
  0x97   : > { %v2681_v3 = vrot.slane %v2583_v57, 2  ;;  %v14083_v45 = vrot.slane %v7736_v17, 2  ;;  %v4543_v12 = vadd.f32 %v7587_v47, %v4294_v63  ;;  %v1797_v18 = vadd.f32 %v1690_v10, %v1549_v22 }
  0x98   : > { %v2435_v43 = vsel %vm1931_vm2, %v2433_v37, %v14094_v26  ;;  %v7752_v36 = vmul.f32 %v6909_v33, %v7656_v55  ;;  %v2929_v27 = vrot.slane %v2831_v19, 2  ;;  %v3079_v4 = vmul.f32 %v7677_v53, %v6921_v40 }
  0x99   : > { %v2683_v50 = vsel %vm1931_vm2, %v2681_v3, %v14083_v45  ;;  %v7761_v47 = vmul.f32 %v7683_v59, %v6921_v40  ;;  %v4791_v10 = vadd.f32 %v7592_v9, %v4543_v12  ;;  %v2046_v21 = vadd.f32 %v1939_v58, %v1797_v18 }
  0x9a   : > { %v14093_v57 = vrot.slane %v7752_v36, 2  ;;  %v3328_v33 = vmul.f32 %v7690_v23, %v6933_v48  ;;  %v3178_v63 = vrot.slane %v3079_v4, 3  ;;  %v7770_v37 = vmul.f32 %v7703_v61, %v6933_v48 }
  0x9b   : > { %15025 = vst [vmem:[#allocation4_spill] sm:$0xff] %v7761_v47  ;;  %v14092_v22 = vrot.slane %v7761_v47, 3  ;;  %v3576_v3 = vmul.f32 %v7711_v16, %v6951_v15  ;;  %v5039_v40 = vadd.f32 %v7597_v25, %v4791_v10  ;;  %v2294_v19 = vadd.f32 %v2187_v14, %v2046_v21  ;;  %v8129_v47 = vld [vmem:[%s13956_s1 + $0x17] ss:$0 sm:$0xff] }
  0x9c   : > { %15026 = vst [vmem:[#allocation5_spill] sm:$0xff] %v7770_v37  ;;  %v2931_v9 = vsel %vm1931_vm2, %v2929_v27, %v14093_v57  ;;  %v3426_v12 = vrot.slane %v3328_v33, 3  ;;  %v14090_v18 = vrot.slane %v7770_v37, 3  ;;  %v7784_v48 = vmul.f32 %v7716_v34, %v6951_v15  ;;  %v7897_v57 = vld [vmem:[%s13956_s1 + $0x14] ss:$0 sm:$0xff] }
  0x9d   : > { %v3180_v58 = vsel %vm3172_vm3, %v3178_v63, %v14092_v22  ;;  %v3674_v4 = vrot.slane %v3576_v3, 3  ;;  %v5287_v45 = vadd.f32 %v7621_v11, %v5039_v40  ;;  %v2542_v25 = vadd.f32 %v2435_v43, %v2294_v19 }
  0x9e   : > { %15027 = vst [vmem:[#allocation6_spill] sm:$0xff] %v7784_v48  ;;  %v3824_v14 = vmul.f32 %v7727_v8, %v6965_v32  ;;  %v7791_v27 = vmul.f32 %v7732_v49, %v6965_v32  ;;  %v3428_v10 = vsel %vm3172_vm3, %v3426_v12, %v14090_v18  ;;  %v14089_v21 = vrot.slane %v7784_v48, 3 }
  0x9f   : > { %v4072_v15 = vmul.f32 %v6981_v29, %v7604_v31  ;;  %v7801_v11 = vmul.f32 %v6981_v29, %v7656_v55  ;;  %v5535_v43 = vadd.f32 %v7626_v39, %v5287_v45  ;;  %v2790_v33 = vadd.f32 %v2683_v50, %v2542_v25 }
  0xa0   : > { %15028 = vst [vmem:[#allocation30_spill] sm:$0xff] %v7791_v27  ;;  %v3922_v63 = vrot.slane %v3824_v14, 3  ;;  %v14086_v32 = vrot.slane %v7791_v27, 3  ;;  %v3676_v3 = vsel %vm3172_vm3, %v3674_v4, %v14089_v21  ;;  %v4320_v12 = vmul.f32 %v7677_v53, %v6995_v60 }
  0xa1   : > { %15029 = vst [vmem:[#allocation33_spill] sm:$0xff] %v7801_v11  ;;  %v4170_v40 = vrot.slane %v4072_v15, 3  ;;  %v14084_v19 = vrot.slane %v7801_v11, 3  ;;  %6316 = vmatmul.mubr.msk.f32.vlgmr.msra.gmra.mxu1 %vm5558_vm4, %v5535_v43  ;;  %v3038_v29 = vadd.f32 %v2931_v9, %v2790_v33  ;;  %v7817_v45 = vmul.f32 %v7683_v59, %v6995_v60 }
  0xa2   : > { %v3924_v39 = vsel %vm3172_vm3, %v3922_v63, %v14086_v32  ;;  %v4569_v50 = vmul.f32 %v7690_v23, %v7011_v35  ;;  %v4419_v25 = vrot.slane %v4320_v12, 4  ;;  %v7826_v53 = vmul.f32 %v7703_v61, %v7011_v35  ;;  %v7865_v32 = vld [vmem:[%s13956_s1] ss:$0 sm:$0xff] }
  0xa3   : > { %15030 = vst [vmem:[#allocation36_spill] sm:$0xff] %v7817_v45  ;;  %v4172_v4 = vsel %vm3172_vm3, %v4170_v40, %v14084_v19  ;;  %v4817_v9 = vmul.f32 %v7711_v16, %v7026_v28  ;;  %v3287_v14 = vadd.f32 %v3180_v58, %v3038_v29  ;;  %v14085_v60 = vrot.slane %v7817_v45, 4  ;;  %v15043_v16 = vld [vmem:[#allocation37_spill] sm:$0xff]  ;;  %v8104_v45 = vld [vmem:[%s6732_s29 + $0x110] sm:$0xff] }
  0xa4   : > { %15031 = vst [vmem:[#allocation38_spill] sm:$0xff] %v7826_v53  ;;  %v4667_v15 = vrot.slane %v4569_v50, 4  ;;  %v7833_v43 = vmul.f32 %v7716_v34, %v7026_v28  ;;  %v14087_v33 = vrot.slane %v7826_v53, 4  ;;  %v5065_v40 = vmul.f32 %v7727_v8, %v7038_v7  ;;  %15068 = vst [vmem:[#allocation17_spill] sm:$0xff] %v8104_v45 }
  0xa5   : > { %v4915_v63 = vrot.slane %v4817_v9, 4  ;;  %v7840_v35 = vmul.f32 %v7732_v49, %v7038_v7  ;;  %v3535_v12 = vadd.f32 %v3428_v10, %v3287_v14  ;;  %v4421_v58 = vsel %vm4413_vm0, %v4419_v25, %v14085_v60  ;;  %v7857_v10 = vld [vmem:[%s6732_s29 + $0x138] sm:$0xff] }
  0xa6   : > { %15032 = vst [vmem:[#allocation39_spill] sm:$0xff] %v7833_v43  ;;  %v14088_v29 = vrot.slane %v7833_v43, 4  ;;  %v5313_v28 = vmul.f32 %v7056_v51, %v7604_v31  ;;  %v4669_v50 = vsel %vm4413_vm0, %v4667_v15, %v14087_v33  ;;  %v5163_v9 = vrot.slane %v5065_v40, 4  ;;  %15035 = vst [vmem:[#allocation44_spill] sm:$0xff] %v7857_v10  ;;  %v15036_v15 = vld [vmem:[#allocation29_spill] sm:$0xff] }
  0xa7   : > { %15033 = vst [vmem:[#allocation41_spill] sm:$0xff] %v7840_v35  ;;  %v14091_v19 = vrot.slane %v7840_v35, 4  ;;  %v7854_v7 = vmul.f32 %v7056_v51, %v7656_v55  ;;  %v3783_v14 = vadd.f32 %v3676_v3, %v3535_v12  ;;  %v284_v40 = vmul.f32 %v7865_v32, %v15036_v15  ;;  %v7876_v3 = vld [vmem:[%s13956_s1 + $0x5] ss:$0 sm:$0xff] }
  0xa8   : > { %v4917_v25 = vsel %vm4413_vm0, %v4915_v63, %v14088_v29  ;;  %v5411_v60 = vrot.slane %v5313_v28, 4  ;;  %v15037_v63 = vld [vmem:[#allocation31_spill] sm:$0xff]  ;;  %v15038_v29 = vld [vmem:[#allocation32_spill] sm:$0xff]  ;;  %v540_v26 = vmul.f32 %v7897_v57, %v7857_v10  ;;  %v7924_v23 = vmul.f32 %v7918_v52, %v15043_v16 }
  0xa9   : > { %15034 = vst [vmem:[#allocation43_spill] sm:$0xff] %v7854_v7  ;;  %v5165_v51 = vsel %vm4413_vm0, %v5163_v9, %v14091_v19  ;;  %v14109_v33 = vrot.slane %v7854_v7, 4  ;;  %v324_v12 = vmul.f32 %v7876_v3, %v15037_v63  ;;  %v7883_v28 = vld [vmem:[%s13956_s1 + $0xa] ss:$0 sm:$0xff]  ;;  %v4031_v18 = vadd.f32 %v3924_v39, %v3783_v14  ;;  %v7890_v9 = vld [vmem:[%s13956_s1 + $0xf] ss:$0 sm:$0xff] }
  0xaa   : > { %v396_v21 = vmul.f32 %v7883_v28, %v15038_v29  ;;  %v15039_v19 = vld [vmem:[#allocation34_spill] sm:$0xff]  ;;  %v870_v24 = vmul.f32 %v7918_v52, %v15037_v63  ;;  %15044 = vst [vmem:[#allocation47_spill] sm:$0xff] %v7924_v23  ;;  %v7942_v7 = vld [vmem:[%s13956_s1 + $0x10] ss:$0 sm:$0xff]  ;;  %15073 = vst [vmem:[#allocation32_spill] sm:$0xff] %v8129_v47 }
  0xab   : > { %v468_v22 = vmul.f32 %v7890_v9, %v15039_v19  ;;  %v7904_v39 = vld [vmem:[%s13956_s1 + $0x1] ss:$0 sm:$0xff]  ;;  %v5413_v44 = vsel %vm4413_vm0, %v5411_v60, %v14109_v33  ;;  %v356_v0 = vadd.f32 %v324_v12, %v284_v40  ;;  %v4279_v31 = vadd.f32 %v4172_v4, %v4031_v18  ;;  %v7929_v60 = vld [vmem:[%s13956_s1 + $0xb] ss:$0 sm:$0xff]  ;;  %15048 = vst [vmem:[#allocation50_spill] sm:$0xff] %v7942_v7 }
  0xac   : > { %v621_v14 = vmul.f32 %v7904_v39, %v15036_v15  ;;  %v7913_v41 = vmul.f32 %v7904_v39, %v15040_v6  ;;  %15045 = vst [vmem:[#allocation48_spill] sm:$0xff] %v7929_v60  ;;  %v1118_v40 = vmul.f32 %v7929_v60, %v15038_v29  ;;  %v984_v20 = vrot.slane %v870_v24, 1 }
  0xad   : > { %v428_v12 = vadd.f32 %v396_v21, %v356_v0  ;;  %v7936_v18 = vmul.f32 %v7929_v60, %v15046_v54  ;;  %v4528_v4 = vadd.f32 %v4421_v58, %v4279_v31  ;;  %v1366_v29 = vmul.f32 %v7942_v7, %v15039_v19 }
  0xae   : > { %15041 = vst [vmem:[#allocation45_spill] sm:$0xff] %v7913_v41  ;;  %v736_v8 = vrot.slane %v621_v14, 1  ;;  %v14123_v33 = vrot.slane %v7913_v41, 1  ;;  %v14121_v14 = vrot.slane %v7924_v23, 1  ;;  %v1232_v1 = vrot.slane %v1118_v40, 1  ;;  %v7955_v40 = vld [vmem:[%s6732_s29 + $0x140] sm:$0xff] }
  0xaf   : > { %15047 = vst [vmem:[#allocation49_spill] sm:$0xff] %v7936_v18  ;;  %v500_v0 = vadd.f32 %v468_v22, %v428_v12  ;;  %v14122_v21 = vrot.slane %v7936_v18, 1  ;;  %v7952_v31 = vmul.f32 %v7942_v7, %v15049_v38  ;;  %v4776_v58 = vadd.f32 %v4669_v50, %v4528_v4  ;;  %15051 = vst [vmem:[#allocation52_spill] sm:$0xff] %v7955_v40  ;;  %v7963_v22 = vld [vmem:[%s13956_s1 + $0x15] ss:$0 sm:$0xff] }
  0xb0   : > { %v738_v24 = vsel %vm690_vm1, %v736_v8, %v14123_v33  ;;  %v986_v35 = vsel %vm690_vm1, %v984_v20, %v14121_v14  ;;  %v1480_v43 = vrot.slane %v1366_v29, 1  ;;  %15052 = vst [vmem:[#allocation53_spill] sm:$0xff] %v7963_v22  ;;  %v1614_v8 = vmul.f32 %v7963_v22, %v7857_v10  ;;  %v7978_v14 = vld [vmem:[%s13956_s1 + $0x2] ss:$0 sm:$0xff] }
  0xb1   : > { %15050 = vst [vmem:[#allocation51_spill] sm:$0xff] %v7952_v31  ;;  %v572_v19 = vadd.f32 %v540_v26, %v500_v0  ;;  %v1234_v50 = vsel %vm690_vm1, %v1232_v1, %v14122_v21  ;;  %v14124_v12 = vrot.slane %v7952_v31, 1  ;;  %v7973_v4 = vmul.f32 %v7963_v22, %v7955_v40  ;;  %15054 = vst [vmem:[#allocation55_spill] sm:$0xff] %v7978_v14  ;;  %v8008_v31 = vld [vmem:[%s13956_s1 + $0xc] ss:$0 sm:$0xff] }
  0xb2   : > { %v5024_v20 = vadd.f32 %v4917_v25, %v4776_v58  ;;  %v1728_v29 = vrot.slane %v1614_v8, 1  ;;  %v1862_v26 = vmul.f32 %v7978_v14, %v15036_v15  ;;  %v7984_v1 = vmul.f32 %v7978_v14, %v15040_v6  ;;  %v7993_v58 = vld [vmem:[%s13956_s1 + $0x7] ss:$0 sm:$0xff] }
  0xb3   : > { %15053 = vst [vmem:[#allocation54_spill] sm:$0xff] %v7973_v4  ;;  %v821_v0 = vadd.f32 %v738_v24, %v572_v19  ;;  %v1482_v21 = vsel %vm690_vm1, %v1480_v43, %v14124_v12  ;;  %v14126_v25 = vrot.slane %v7973_v4, 1  ;;  %v2111_v8 = vmul.f32 %v7993_v58, %v15037_v63 }
  0xb4   : > { %15055 = vst [vmem:[#allocation56_spill] sm:$0xff] %v7984_v1  ;;  %v5272_v15 = vadd.f32 %v5165_v51, %v5024_v20  ;;  %v1977_v33 = vrot.slane %v1862_v26, 2  ;;  %v14127_v6 = vrot.slane %v7984_v1, 2  ;;  %v8000_v24 = vmul.f32 %v7993_v58, %v15043_v16  ;;  %v8011_v51 = vld [vmem:[%s6732_s29 + $0x108] sm:$0xff] }
  0xb5   : > { %v1069_v43 = vadd.f32 %v986_v35, %v821_v0  ;;  %v1730_v19 = vsel %vm690_vm1, %v1728_v29, %v14126_v25  ;;  %v2225_v12 = vrot.slane %v2111_v8, 2  ;;  %15057 = vst [vmem:[#allocation10_spill] sm:$0xff] %v8011_v51  ;;  %v2359_v63 = vmul.f32 %v8011_v51, %v8008_v31  ;;  %v8026_v8 = vld [vmem:[%s13956_s1 + $0x11] ss:$0 sm:$0xff]  ;;  %v8029_v25 = vld [vmem:[%s6732_s29 + $0x120] sm:$0xff] }
  0xb6   : > { %15056 = vst [vmem:[#allocation7_spill] sm:$0xff] %v8000_v24  ;;  %v5520_v20 = vadd.f32 %v5413_v44, %v5272_v15  ;;  %v1979_v16 = vsel %vm1931_vm2, %v1977_v33, %v14127_v6  ;;  %v14129_v35 = vrot.slane %v8000_v24, 2  ;;  %v8021_v29 = vmul.f32 %v8008_v31, %v15046_v54  ;;  %15059 = vst [vmem:[#allocation14_spill] sm:$0xff] %v8029_v25  ;;  %v8045_v15 = vld [vmem:[%s13956_s1 + $0x16] ss:$0 sm:$0xff] }
  0xb7   : > { %v1317_v26 = vadd.f32 %v1234_v50, %v1069_v43  ;;  %v2473_v0 = vrot.slane %v2359_v63, 2  ;;  %v2607_v44 = vmul.f32 %v8029_v25, %v8026_v8  ;;  %v8035_v33 = vmul.f32 %v8026_v8, %v15049_v38 }
  0xb8   : > { %15058 = vst [vmem:[#allocation12_spill] sm:$0xff] %v8021_v29  ;;  %6294 = vmatprep.mubr.msk.f32.mxu0 %vm5558_vm4, %v5520_v20  ;;  %v2227_v54 = vsel %vm1931_vm2, %v2225_v12, %v14129_v35  ;;  %v2855_v43 = vmul.f32 %v8045_v15, %v7857_v10  ;;  %v8051_v63 = vmul.f32 %v8045_v15, %v7955_v40  ;;  %v8057_v12 = vld [vmem:[%s13956_s1 + $0x3] ss:$0 sm:$0xff]  ;;  %v6376_v35 = vld [vmem:[%s6732_s29 + $0xd8] sm:$0xff]  ;;  %v15062_v1 = vrot.slane %v8021_v29, 2 }
  0xb9   : > { %15060 = vst [vmem:[#allocation57_spill] sm:$0xff] %v8035_v33  ;;  %v1565_v20 = vadd.f32 %v1482_v21, %v1317_v26  ;;  %v2721_v6 = vrot.slane %v2607_v44, 2  ;;  %v14137_v24 = vrot.slane %v8035_v33, 2  ;;  %v3103_v50 = vmul.f32 %v6376_v35, %v8057_v12  ;;  %v8066_v21 = vld [vmem:[%s6732_s29 + $0xe0] sm:$0xff] }
  0xba   : > { %15061 = vst [vmem:[#allocation9_spill] sm:$0xff] %v8051_v63  ;;  %v2475_v4 = vsel %vm1931_vm2, %v2473_v0, %v15062_v1  ;;  %v2969_v18 = vrot.slane %v2855_v43, 2  ;;  %v14141_v23 = vrot.slane %v8051_v63, 2  ;;  %v8070_v26 = vmul.f32 %v8066_v21, %v8057_v12  ;;  %v8078_v1 = vld [vmem:[%s13956_s1 + $0x8] ss:$0 sm:$0xff]  ;;  %v8081_v0 = vld [vmem:[%s6732_s29 + $0xf0] sm:$0xff] }
  0xbb   : > { %v1813_v44 = vadd.f32 %v1730_v19, %v1565_v20  ;;  %v2723_v41 = vsel %vm1931_vm2, %v2721_v6, %v14137_v24  ;;  %v3218_v53 = vrot.slane %v3103_v50, 3  ;;  %15064 = vst [vmem:[#allocation8_spill] sm:$0xff] %v8081_v0  ;;  %v3352_v43 = vmul.f32 %v8081_v0, %v8078_v1  ;;  %v8090_v20 = vld [vmem:[%s6732_s29 + $0xf8] sm:$0xff]  ;;  %v8099_v50 = vld [vmem:[%s13956_s1 + $0xd] ss:$0 sm:$0xff] }
  0xbc   : > { %15063 = vst [vmem:[#allocation11_spill] sm:$0xff] %v8070_v26  ;;  %v2971_v29 = vsel %vm1931_vm2, %v2969_v18, %v14141_v23  ;;  %15065 = vst [vmem:[#allocation13_spill] sm:$0xff] %v8090_v20  ;;  %v8094_v6 = vmul.f32 %v8090_v20, %v8078_v1  ;;  %v3600_v24 = vmul.f32 %v8099_v50, %v8011_v51  ;;  %v8113_v23 = vld [vmem:[%s13956_s1 + $0x12] ss:$0 sm:$0xff]  ;;  %v15071_v11 = vrot.slane %v8070_v26, 3 }
  0xbd   : > { %15067 = vst [vmem:[#allocation15_spill] sm:$0xff] %v8099_v50  ;;  %v2062_v33 = vadd.f32 %v1979_v16, %v1813_v44  ;;  %v3466_v63 = vrot.slane %v3352_v43, 3  ;;  %v8108_v18 = vmul.f32 %v8104_v45, %v8099_v50  ;;  %15070 = vst [vmem:[#allocation29_spill] sm:$0xff] %v8113_v23  ;;  %v3848_v19 = vmul.f32 %v8113_v23, %v8029_v25 }
  0xbe   : > { %15066 = vst [vmem:[#allocation16_spill] sm:$0xff] %v8094_v6  ;;  %v3220_v27 = vsel %vm3172_vm3, %v3218_v53, %v15071_v11  ;;  %v14151_v16 = vrot.slane %v8094_v6, 3  ;;  %v3714_v44 = vrot.slane %v3600_v24, 3  ;;  %v8123_v43 = vmul.f32 %v8113_v23, %v15049_v38  ;;  %v8144_v24 = vld [vmem:[%s13956_s1 + $0x4] ss:$0 sm:$0xff] }
  0xbf   : > { %15069 = vst [vmem:[#allocation18_spill] sm:$0xff] %v8108_v18  ;;  %v2310_v48 = vadd.f32 %v2227_v54, %v2062_v33  ;;  %v14157_v37 = vrot.slane %v8108_v18, 3  ;;  %v3962_v50 = vrot.slane %v3848_v19, 3  ;;  %v4096_v26 = vmul.f32 %v8129_v47, %v7857_v10 }
  0xc0   : > { %15072 = vst [vmem:[#allocation31_spill] sm:$0xff] %v8123_v43  ;;  %v3468_v11 = vsel %vm3172_vm3, %v3466_v63, %v14151_v16  ;;  %v14156_v53 = vrot.slane %v8123_v43, 3  ;;  %v8139_v38 = vmul.f32 %v8129_v47, %v7955_v40  ;;  %v4344_v33 = vmul.f32 %v8144_v24, %v6376_v35  ;;  %v8197_v43 = vld [vmem:[%s6732_s29 + $0x128] sm:$0xff] }
  0xc1   : > { %v2558_v54 = vadd.f32 %v2475_v4, %v2310_v48  ;;  %v3716_v19 = vsel %vm3172_vm3, %v3714_v44, %v14157_v37  ;;  %v4210_v6 = vrot.slane %v4096_v26, 3  ;;  %v8152_v63 = vmul.f32 %v8144_v24, %v8066_v21  ;;  %v8161_v48 = vld [vmem:[%s13956_s1 + $0x9] ss:$0 sm:$0xff]  ;;  %15079 = vst [vmem:[#allocation42_spill] sm:$0xff] %v8197_v43 }
  0xc2   : > { %15074 = vst [vmem:[#allocation34_spill] sm:$0xff] %v8139_v38  ;;  %v3964_v16 = vsel %vm3172_vm3, %v3962_v50, %v14156_v53  ;;  %v14163_v47 = vrot.slane %v8139_v38, 3  ;;  %v4459_v23 = vrot.slane %v4344_v33, 4  ;;  %v4593_v4 = vmul.f32 %v8161_v48, %v8081_v0  ;;  %v8173_v50 = vld [vmem:[%s13956_s1 + $0xe] ss:$0 sm:$0xff] }
  0xc3   : > { %15075 = vst [vmem:[#allocation35_spill] sm:$0xff] %v8152_v63  ;;  %v2806_v35 = vadd.f32 %v2723_v41, %v2558_v54  ;;  %v8168_v44 = vmul.f32 %v8161_v48, %v8090_v20  ;;  %v4841_v33 = vmul.f32 %v8173_v50, %v8011_v51  ;;  %v8182_v41 = vmul.f32 %v8173_v50, %v8104_v45  ;;  %v8187_v54 = vld [vmem:[%s13956_s1 + $0x13] ss:$0 sm:$0xff] }
  0xc4   : > { %v4212_v53 = vsel %vm3172_vm3, %v4210_v6, %v14163_v47  ;;  %v4707_v37 = vrot.slane %v4593_v4, 4  ;;  %v5089_v26 = vmul.f32 %v8187_v54, %v8029_v25  ;;  %v15078_v51 = vrot.slane %v8152_v63, 4 }
  0xc5   : > { %15076 = vst [vmem:[#allocation37_spill] sm:$0xff] %v8168_v44  ;;  %15077 = vst [vmem:[#allocation40_spill] sm:$0xff] %v8182_v41  ;;  %v3054_v0 = vadd.f32 %v2971_v29, %v2806_v35  ;;  %v14173_v6 = vrot.slane %v8168_v44, 4  ;;  %v4955_v4 = vrot.slane %v4841_v33, 4  ;;  %v14176_v47 = vrot.slane %v8182_v41, 4 }
  0xc6   : > { %v4461_v38 = vsel %vm4413_vm0, %v4459_v23, %v15078_v51  ;;  %v8201_v18 = vmul.f32 %v8197_v43, %v8187_v54  ;;  %v5203_v45 = vrot.slane %v5089_v26, 4  ;;  %v8206_v29 = vld [vmem:[%s13956_s1 + $0x18] ss:$0 sm:$0xff]  ;;  %v269_v26 = vmul.f32 %v7865_v32, %v7683_v59 }
  0xc7   : > { %v5337_v23 = vmul.f32 %v8206_v29, %v7857_v10  ;;  %v3303_v51 = vadd.f32 %v3220_v27, %v3054_v0  ;;  %v4709_v35 = vsel %vm4413_vm0, %v4707_v37, %v14173_v6  ;;  %v8215_v33 = vmul.f32 %v8206_v29, %v7955_v40  ;;  %v8227_v6 = vld [vmem:[%s6732_s29 + $0x88] sm:$0xf] }
  0xc8   : > { %15080 = vst [vmem:[#allocation62_spill] sm:$0xff] %v8201_v18  ;;  %v4957_v25 = vsel %vm4413_vm0, %v4955_v4, %v14176_v47  ;;  %v14188_v63 = vrot.slane %v8201_v18, 4  ;;  %v309_v27 = vmul.f32 %v7876_v3, %v7703_v61  ;;  %15082 = vst [vmem:[#allocation64_spill] sm:$0xff] %v8227_v6  ;;  %v381_v10 = vmul.f32 %v7883_v28, %v7716_v34  ;;  %v15083_v61 = vld [vmem:[#allocation58_spill] sm:$0xff]  ;;  %v15084_v34 = vld [vmem:[#allocation59_spill] sm:$0xff] }
  0xc9   : > { %15081 = vst [vmem:[#allocation63_spill] sm:$0xff] %v8215_v33  ;;  %v5451_v43 = vrot.slane %v5337_v23, 4  ;;  %v3551_v0 = vadd.f32 %v3468_v11, %v3303_v51  ;;  %v14191_v37 = vrot.slane %v8215_v33, 4  ;;  %v453_v59 = vmul.f32 %v7890_v9, %v7732_v49  ;;  %v15085_v49 = vld [vmem:[#allocation60_spill] sm:$0xff] }
  0xca   : > { %v5205_v4 = vsel %vm4413_vm0, %v5203_v45, %v14188_v63  ;;  %v341_v47 = vadd.f32 %v309_v27, %v269_v26  ;;  %v525_v23 = vmul.f32 %v7897_v57, %v7656_v55  ;;  %v599_v11 = vmul.f32 %v7904_v39, %v15083_v61  ;;  %v15086_v26 = vld [vmem:[#allocation61_spill] sm:$0xff] }
  0xcb   : > { %v3799_v51 = vadd.f32 %v3716_v19, %v3551_v0  ;;  %v5453_v41 = vsel %vm4413_vm0, %v5451_v43, %v14191_v37  ;;  %v848_v44 = vmul.f32 %v7918_v52, %v15084_v34  ;;  %v1096_v18 = vmul.f32 %v7929_v60, %v15085_v49 }
  0xcc   : > { %v413_v40 = vadd.f32 %v381_v10, %v341_v47  ;;  %v699_v45 = vrot.slane %v599_v11, 1  ;;  %v1344_v27 = vmul.f32 %v7942_v7, %v15086_v26  ;;  %v1592_v63 = vmul.f32 %v7963_v22, %v8227_v6 }
  0xcd   : > { %v4047_v55 = vadd.f32 %v3964_v16, %v3799_v51  ;;  %v947_v19 = vrot.slane %v848_v44, 1  ;;  %v1195_v0 = vrot.slane %v1096_v18, 1  ;;  %v1840_v43 = vmul.f32 %v7978_v14, %v15083_v61 }
  0xce   : > { %v485_v37 = vadd.f32 %v453_v59, %v413_v40  ;;  %v15087_v33 = vrot.slane %v7632_v56, 1  ;;  %v1443_v60 = vrot.slane %v1344_v27, 1  ;;  %v1691_v47 = vrot.slane %v1592_v63, 1 }
  0xcf   : > { %v4295_v10 = vadd.f32 %v4212_v53, %v4047_v55  ;;  %v15088_v11 = vrot.slane %v7639_v62, 1  ;;  %v15089_v22 = vrot.slane %v7646_v42, 1  ;;  %v1940_v18 = vrot.slane %v1840_v43, 2 }
  0xd0   : > { %v700_v52 = vsel %vm690_vm1, %v15087_v33, %v699_v45  ;;  %v557_v44 = vadd.f32 %v525_v23, %v485_v37  ;;  %v15090_v51 = vrot.slane %v7663_v5, 1  ;;  %v15091_v56 = vrot.slane %v7672_v30, 1 }
  0xd1   : > { %v948_v7 = vsel %vm690_vm1, %v15088_v11, %v947_v19  ;;  %v1196_v16 = vsel %vm690_vm1, %v15089_v22, %v1195_v0  ;;  %v2089_v55 = vmul.f32 %v7993_v58, %v15084_v34  ;;  %v4544_v62 = vadd.f32 %v4461_v38, %v4295_v10 }
  0xd2   : > { %v1444_v40 = vsel %vm690_vm1, %v15090_v51, %v1443_v60  ;;  %v1692_v33 = vsel %vm690_vm1, %v15091_v56, %v1691_v47  ;;  %v15092_v53 = vrot.slane %v7687_v2, 2  ;;  %v2337_v22 = vmul.f32 %v8008_v31, %v15085_v49 }
  0xd3   : > { %v2585_v5 = vmul.f32 %v8026_v8, %v15086_v26  ;;  %v806_v63 = vadd.f32 %v700_v52, %v557_v44  ;;  %v2188_v60 = vrot.slane %v2089_v55, 2  ;;  %v2833_v30 = vmul.f32 %v8045_v15, %v8227_v6  ;;  %v15100_v55 = vld [vmem:[#allocation5_spill] sm:$0xff] }
  0xd4   : > { %v1941_v42 = vsel %vm1931_vm2, %v15092_v53, %v1940_v18  ;;  %v3081_v37 = vmul.f32 %v8057_v12, %v15083_v61  ;;  %v4792_v59 = vadd.f32 %v4709_v35, %v4544_v62  ;;  %v2436_v38 = vrot.slane %v2337_v22, 2  ;;  %v15097_v18 = vld [vmem:[#allocation4_spill] sm:$0xff] }
  0xd5   : > { %v2684_v23 = vrot.slane %v2585_v5, 2  ;;  %v3330_v2 = vmul.f32 %v8078_v1, %v15084_v34  ;;  %v1054_v45 = vadd.f32 %v948_v7, %v806_v63  ;;  %v15093_v27 = vrot.slane %v7707_v13, 2  ;;  %v15103_v53 = vld [vmem:[#allocation32_spill] sm:$0xff] }
  0xd6   : > { %v2932_v0 = vrot.slane %v2833_v30, 2  ;;  %v3181_v52 = vrot.slane %v3081_v37, 3  ;;  %v5040_v43 = vadd.f32 %v4957_v25, %v4792_v59  ;;  %v15094_v47 = vrot.slane %v7720_v46, 2  ;;  %v15099_v46 = vld [vmem:[#allocation15_spill] sm:$0xff]  ;;  %v8314_v37 = vld [vmem:[%s6732_s29 + $0x40] sm:$0xf] }
  0xd7   : > { %v2189_v19 = vsel %vm1931_vm2, %v15093_v27, %v2188_v60  ;;  %v15095_v35 = vrot.slane %v7736_v17, 2  ;;  %v3429_v11 = vrot.slane %v3330_v2, 3  ;;  %v1302_v34 = vadd.f32 %v1196_v16, %v1054_v45  ;;  %v15102_v16 = vld [vmem:[#allocation29_spill] sm:$0xff]  ;;  %v6391_v60 = vld [vmem:[%s6732_s29 + $0x28] sm:$0xf]  ;;  %15104 = vst [vmem:[#allocation58_spill] sm:$0xff] %v8314_v37 }
  0xd8   : > { %v2437_v61 = vsel %vm1931_vm2, %v15094_v47, %v2436_v38  ;;  %v15096_v7 = vrot.slane %v7752_v36, 2  ;;  %v15098_v44 = vrot.slane %v15097_v18, 3  ;;  %v3578_v51 = vmul.f32 %v15099_v46, %v15085_v49 }
  0xd9   : > { %v2685_v10 = vsel %vm1931_vm2, %v15095_v35, %v2684_v23  ;;  %v5288_v56 = vadd.f32 %v5205_v4, %v5040_v43  ;;  %v15101_v17 = vrot.slane %v15100_v55, 3  ;;  %v3826_v36 = vmul.f32 %v15102_v16, %v15086_v26  ;;  %v8319_v23 = vld [vmem:[%s6732_s29 + $0x58] sm:$0xf]  ;;  %v15108_v43 = vld [vmem:[#allocation30_spill] sm:$0xff] }
  0xda   : > { %v2933_v13 = vsel %vm1931_vm2, %v15096_v7, %v2932_v0  ;;  %v8298_v25 = vsel %vm3172_vm3, %v15098_v44, %v3181_v52  ;;  %v4074_v22 = vmul.f32 %v15103_v53, %v8227_v6  ;;  %v1550_v5 = vadd.f32 %v1444_v40, %v1302_v34  ;;  %15105 = vst [vmem:[#allocation59_spill] sm:$0xff] %v8319_v23  ;;  %v15106_v40 = vld [vmem:[#allocation6_spill] sm:$0xff]  ;;  %v15110_v35 = vld [vmem:[#allocation33_spill] sm:$0xff]  ;;  %v8340_v7 = vld [vmem:[%s6732_s29 + $0x70] sm:$0xf] }
  0xdb   : > { %v8305_v62 = vsel %vm3172_vm3, %v15101_v17, %v3429_v11  ;;  %v3677_v63 = vrot.slane %v3578_v51, 3  ;;  %v4322_v30 = vmul.f32 %v6391_v60, %v8144_v24  ;;  %v4571_v49 = vmul.f32 %v8314_v37, %v8161_v48  ;;  %15112 = vst [vmem:[#allocation60_spill] sm:$0xff] %v8340_v7  ;;  %v15113_v51 = vld [vmem:[#allocation36_spill] sm:$0xff]  ;;  %v15115_v17 = vld [vmem:[#allocation38_spill] sm:$0xff]  ;;  %v15135_v37 = vld [vmem:[#allocation45_spill] sm:$0xff] }
  0xdc   : > { %v5536_v4 = vadd.f32 %v5453_v41, %v5288_v56  ;;  %v3925_v59 = vrot.slane %v3826_v36, 3  ;;  %v4173_v38 = vrot.slane %v4074_v22, 3  ;;  %v4819_v26 = vmul.f32 %v8319_v23, %v8173_v50 }
  0xdd   : > { %v1798_v2 = vadd.f32 %v1692_v33, %v1550_v5  ;;  %v15107_v45 = vrot.slane %v15106_v40, 3  ;;  %v4422_v0 = vrot.slane %v4322_v30, 4  ;;  %v4670_v52 = vrot.slane %v4571_v49, 4 }
  0xde   : > { %6318 = vmatprep.mubr.msk.f32.mxu1 %vm5558_vm4, %v5536_v4  ;;  %v15109_v47 = vrot.slane %v15108_v43, 3  ;;  %v15111_v11 = vrot.slane %v15110_v35, 3  ;;  %v4918_v33 = vrot.slane %v4819_v26, 4  ;;  %v5067_v18 = vmul.f32 %v8340_v7, %v8187_v54  ;;  %v8366_v26 = vld [vmem:[%s6732_s29 + $0x148] sm:$0xf]  ;;  %v15134_v7 = vld [vmem:[#allocation53_spill] sm:$0xff] }
  0xdf   : > { %v8326_v27 = vsel %vm3172_vm3, %v15107_v45, %v3677_v63  ;;  %v2047_v44 = vadd.f32 %v1941_v42, %v1798_v2  ;;  %v15114_v56 = vrot.slane %v15113_v51, 4  ;;  %v15116_v36 = vrot.slane %v15115_v17, 4  ;;  %v15117_v63 = vld [vmem:[#allocation39_spill] sm:$0xff]  ;;  %15119 = vst [vmem:[#allocation61_spill] sm:$0xff] %v8366_v26  ;;  %v15120_v2 = vld [vmem:[#allocation17_spill] sm:$0xff]  ;;  %v15121_v45 = vld [vmem:[#allocation42_spill] sm:$0xff] }
  0xe0   : > { %v8332_v41 = vsel %vm3172_vm3, %v15109_v47, %v3925_v59  ;;  %v8337_v34 = vsel %vm3172_vm3, %v15111_v11, %v4173_v38  ;;  %v5315_v5 = vmul.f32 %v8206_v29, %v8227_v6  ;;  %v15118_v60 = vrot.slane %v15117_v63, 4  ;;  %v15128_v17 = vld [vmem:[#allocation20_spill] sm:$0xff]  ;;  %v15130_v63 = vld [vmem:[#allocation21_spill] sm:$0xff] }
  0xe1   : > { %v8347_v55 = vsel %vm4413_vm0, %v15114_v56, %v4422_v0  ;;  %v8352_v22 = vsel %vm4413_vm0, %v15116_v36, %v4670_v52  ;;  %v5166_v49 = vrot.slane %v5067_v18, 4  ;;  %v285_v42 = vmul.f32 %v8066_v21, %v7865_v32  ;;  %v15122_v52 = vld [vmem:[#allocation41_spill] sm:$0xff]  ;;  %v15124_v21 = vld [vmem:[#allocation52_spill] sm:$0xff]  ;;  %v15129_v36 = vld [vmem:[#allocation46_spill] sm:$0xff] }
  0xe2   : > { %v8359_v30 = vsel %vm4413_vm0, %v15118_v60, %v4918_v33  ;;  %v325_v4 = vmul.f32 %v8090_v20, %v7876_v3  ;;  %v2295_v59 = vadd.f32 %v2189_v19, %v2047_v44  ;;  %v5414_v38 = vrot.slane %v5315_v5, 4  ;;  %v15125_v33 = vld [vmem:[#allocation19_spill] sm:$0xff]  ;;  %v15131_v60 = vld [vmem:[#allocation48_spill] sm:$0xff] }
  0xe3   : > { %v397_v40 = vmul.f32 %v15120_v2, %v7883_v28  ;;  %v469_v0 = vmul.f32 %v15121_v45, %v7890_v9  ;;  %v15123_v43 = vrot.slane %v15122_v52, 4  ;;  %v541_v11 = vmul.f32 %v7897_v57, %v15124_v21  ;;  %v15126_v44 = vld [vmem:[#allocation43_spill] sm:$0xff] }
  0xe4   : > { %v357_v35 = vadd.f32 %v325_v4, %v285_v42  ;;  %v623_v19 = vmul.f32 %v7904_v39, %v15125_v33  ;;  %v2543_v18 = vadd.f32 %v2437_v61, %v2295_v59  ;;  %v15127_v51 = vrot.slane %v15126_v44, 4  ;;  %v15132_v4 = vld [vmem:[#allocation22_spill] sm:$0xff] }
  0xe5   : > { %v8375_v47 = vsel %vm4413_vm0, %v15123_v43, %v5166_v49  ;;  %v872_v5 = vmul.f32 %v15129_v36, %v15128_v17  ;;  %v1120_v49 = vmul.f32 %v15131_v60, %v15130_v63  ;;  %v15133_v43 = vld [vmem:[#allocation50_spill] sm:$0xff]  ;;  %v1616_v23 = vmul.f32 %v15134_v7, %v8366_v26  ;;  %v15139_v60 = vld [vmem:[#allocation49_spill] sm:$0xff] }
  0xe6   : > { %v8384_v56 = vsel %vm4413_vm0, %v15127_v51, %v5414_v38  ;;  %v429_v52 = vadd.f32 %v397_v40, %v357_v35  ;;  %v739_v42 = vrot.slane %v623_v19, 1  ;;  %v1368_v6 = vmul.f32 %v15133_v43, %v15132_v4  ;;  %v15137_v19 = vld [vmem:[#allocation47_spill] sm:$0xff] }
  0xe7   : > { %v2791_v61 = vadd.f32 %v2685_v10, %v2543_v18  ;;  %v987_v59 = vrot.slane %v872_v5, 1  ;;  %v1235_v44 = vrot.slane %v1120_v49, 1  ;;  %v1864_v38 = vmul.f32 %v7978_v14, %v15125_v33  ;;  %v15141_v49 = vld [vmem:[#allocation51_spill] sm:$0xff] }
  0xe8   : > { %v501_v51 = vadd.f32 %v469_v0, %v429_v52  ;;  %v15136_v21 = vrot.slane %v15135_v37, 1  ;;  %v1483_v2 = vrot.slane %v1368_v6, 1  ;;  %v1731_v40 = vrot.slane %v1616_v23, 1  ;;  %v15143_v37 = vld [vmem:[#allocation54_spill] sm:$0xff] }
  0xe9   : > { %v3039_v35 = vadd.f32 %v2933_v13, %v2791_v61  ;;  %v15138_v20 = vrot.slane %v15137_v19, 1  ;;  %v15140_v7 = vrot.slane %v15139_v60, 1  ;;  %v1980_v18 = vrot.slane %v1864_v38, 2 }
  0xea   : > { %v740_v45 = vsel %vm690_vm1, %v15136_v21, %v739_v42  ;;  %v573_v5 = vadd.f32 %v541_v11, %v501_v51  ;;  %v15142_v14 = vrot.slane %v15141_v49, 1  ;;  %v15144_v52 = vrot.slane %v15143_v37, 1  ;;  %v15149_v49 = vld [vmem:[#allocation12_spill] sm:$0xff] }
  0xeb   : > { %v988_v43 = vsel %vm690_vm1, %v15138_v20, %v987_v59  ;;  %v1236_v10 = vsel %vm690_vm1, %v15140_v7, %v1235_v44  ;;  %v2113_v13 = vmul.f32 %v7993_v58, %v15128_v17  ;;  %v3288_v23 = vadd.f32 %v8298_v25, %v3039_v35  ;;  %v15145_v20 = vld [vmem:[#allocation56_spill] sm:$0xff] }
  0xec   : > { %v1484_v0 = vsel %vm690_vm1, %v15142_v14, %v1483_v2  ;;  %v1732_v6 = vsel %vm690_vm1, %v15144_v52, %v1731_v40  ;;  %v15146_v21 = vrot.slane %v15145_v20, 2  ;;  %v2361_v7 = vmul.f32 %v8008_v31, %v15130_v63  ;;  %v15147_v40 = vld [vmem:[#allocation7_spill] sm:$0xff] }
  0xed   : > { %v2609_v11 = vmul.f32 %v8026_v8, %v15132_v4  ;;  %v822_v14 = vadd.f32 %v740_v45, %v573_v5  ;;  %v2228_v2 = vrot.slane %v2113_v13, 2  ;;  %v2857_v42 = vmul.f32 %v8045_v15, %v8366_v26 }
  0xee   : > { %v1981_v60 = vsel %vm1931_vm2, %v15146_v21, %v1980_v18  ;;  %v3105_v61 = vmul.f32 %v8057_v12, %v15125_v33  ;;  %v3536_v25 = vadd.f32 %v8305_v62, %v3288_v23  ;;  %v2476_v59 = vrot.slane %v2361_v7, 2  ;;  %v15151_v62 = vld [vmem:[#allocation57_spill] sm:$0xff] }
  0xef   : > { %v2724_v44 = vrot.slane %v2609_v11, 2  ;;  %v3354_v38 = vmul.f32 %v8078_v1, %v15128_v17  ;;  %v1070_v51 = vadd.f32 %v988_v43, %v822_v14  ;;  %v15148_v35 = vrot.slane %v15147_v40, 2  ;;  %v15153_v43 = vld [vmem:[#allocation9_spill] sm:$0xff]  ;;  %v15155_v11 = vld [vmem:[#allocation11_spill] sm:$0xff] }
  0xf0   : > { %v2972_v45 = vrot.slane %v2857_v42, 2  ;;  %v3221_v18 = vrot.slane %v3105_v61, 3  ;;  %v3784_v5 = vadd.f32 %v8326_v27, %v3536_v25  ;;  %v15150_v37 = vrot.slane %v15149_v49, 2  ;;  %v15157_v61 = vld [vmem:[#allocation16_spill] sm:$0xff]  ;;  %v6395_v40 = vld [vmem:[%s6732_s29 + $0xe8] sm:$0xf] }
  0xf1   : > { %v2229_v19 = vsel %vm1931_vm2, %v15148_v35, %v2228_v2  ;;  %v15152_v52 = vrot.slane %v15151_v62, 2  ;;  %v3469_v23 = vrot.slane %v3354_v38, 3  ;;  %v1318_v20 = vadd.f32 %v1236_v10, %v1070_v51 }
  0xf2   : > { %v2477_v33 = vsel %vm1931_vm2, %v15150_v37, %v2476_v59  ;;  %v15154_v21 = vrot.slane %v15153_v43, 2  ;;  %v15156_v14 = vrot.slane %v15155_v11, 3  ;;  %v3602_v27 = vmul.f32 %v15099_v46, %v15130_v63 }
  0xf3   : > { %v2725_v13 = vsel %vm1931_vm2, %v15152_v52, %v2724_v44  ;;  %v4032_v42 = vadd.f32 %v8332_v41, %v3784_v5  ;;  %v15158_v25 = vrot.slane %v15157_v61, 3  ;;  %v3850_v10 = vmul.f32 %v15102_v16, %v15132_v4  ;;  %v8464_v5 = vld [vmem:[%s6732_s29 + $0x118] sm:$0xf] }
  0xf4   : > { %v2973_v7 = vsel %vm1931_vm2, %v15154_v21, %v2972_v45  ;;  %v8444_v2 = vsel %vm3172_vm3, %v15156_v14, %v3221_v18  ;;  %v4098_v44 = vmul.f32 %v15103_v53, %v8366_v26  ;;  %v1566_v38 = vadd.f32 %v1484_v0, %v1318_v20  ;;  %15159 = vst [vmem:[#allocation4_spill] sm:$0xff] %v8464_v5  ;;  %v15160_v0 = vld [vmem:[#allocation18_spill] sm:$0xff] }
  0xf5   : > { %v8452_v59 = vsel %vm3172_vm3, %v15158_v25, %v3469_v23  ;;  %v3717_v51 = vrot.slane %v3602_v27, 3  ;;  %v4346_v35 = vmul.f32 %v6395_v40, %v8144_v24  ;;  %v4595_v63 = vmul.f32 %v8161_v48, %v15128_v17  ;;  %v15164_v21 = vld [vmem:[#allocation34_spill] sm:$0xff]  ;;  %v8500_v40 = vld [vmem:[%s6732_s29 + $0x90] sm:$0xff] }
  0xf6   : > { %v4280_v41 = vadd.f32 %v8337_v34, %v4032_v42  ;;  %v3965_v45 = vrot.slane %v3850_v10, 3  ;;  %v4213_v18 = vrot.slane %v4098_v44, 3  ;;  %v4843_v4 = vmul.f32 %v8464_v5, %v8173_v50  ;;  %v15162_v34 = vld [vmem:[#allocation31_spill] sm:$0xff]  ;;  %v15168_v10 = vld [vmem:[#allocation37_spill] sm:$0xff]  ;;  %15171 = vst [vmem:[#allocation5_spill] sm:$0xff] %v8500_v40 }
  0xf7   : > { %v1814_v49 = vadd.f32 %v1732_v6, %v1566_v38  ;;  %v15161_v37 = vrot.slane %v15160_v0, 3  ;;  %v4462_v52 = vrot.slane %v4346_v35, 4  ;;  %v4710_v23 = vrot.slane %v4595_v63, 4  ;;  %v15166_v42 = vld [vmem:[#allocation35_spill] sm:$0xff]  ;;  %v8495_v38 = vld [vmem:[%s6732_s29 + $0x130] sm:$0xf] }
  0xf8   : > { %v4529_v17 = vadd.f32 %v8347_v55, %v4280_v41  ;;  %v15163_v20 = vrot.slane %v15162_v34, 3  ;;  %v15165_v11 = vrot.slane %v15164_v21, 3  ;;  %v4958_v6 = vrot.slane %v4843_v4, 4  ;;  %15170 = vst [vmem:[#allocation15_spill] sm:$0xff] %v8495_v38 }
  0xf9   : > { %v8471_v62 = vsel %vm3172_vm3, %v15161_v37, %v3717_v51  ;;  %v2063_v27 = vadd.f32 %v1981_v60, %v1814_v49  ;;  %v15167_v61 = vrot.slane %v15166_v42, 4  ;;  %v15169_v44 = vrot.slane %v15168_v10, 4  ;;  %v15172_v60 = vld [vmem:[#allocation40_spill] sm:$0xff]  ;;  %v15175_v37 = vld [vmem:[#allocation27_spill] sm:$0xff]  ;;  %v15178_v42 = vld [vmem:[#allocation62_spill] sm:$0xff] }
  0xfa   : > { %v8477_v43 = vsel %vm3172_vm3, %v15163_v20, %v3965_v45  ;;  %v8482_v14 = vsel %vm3172_vm3, %v15165_v11, %v4213_v18  ;;  %v5091_v51 = vmul.f32 %v8495_v38, %v8187_v54  ;;  %v4777_v35 = vadd.f32 %v8352_v22, %v4529_v17  ;;  %v15174_v18 = vld [vmem:[#allocation25_spill] sm:$0xff]  ;;  %v15177_v20 = vld [vmem:[#allocation23_spill] sm:$0xff] }
  0xfb   : > { %v8487_v25 = vsel %vm4413_vm0, %v15167_v61, %v4462_v52  ;;  %v8492_v55 = vsel %vm4413_vm0, %v15169_v44, %v4710_v23  ;;  %v15173_v63 = vrot.slane %v15172_v60, 4  ;;  %v5339_v45 = vmul.f32 %v8206_v29, %v8366_v26  ;;  %v15176_v23 = vld [vmem:[#allocation3_spill] sm:$0xff]  ;;  %v15182_v60 = vld [vmem:[#allocation26_spill] sm:$0xff] }
  0xfc   : > { %v270_v4 = vmul.f32 %v7865_v32, %v15174_v18  ;;  %v2311_v49 = vadd.f32 %v2229_v19, %v2063_v27  ;;  %v5206_v0 = vrot.slane %v5091_v51, 4  ;;  %v310_v52 = vmul.f32 %v7876_v3, %v15175_v37 }
  0xfd   : > { %v8506_v41 = vsel %vm4413_vm0, %v15173_v63, %v4958_v6  ;;  %v382_v34 = vmul.f32 %v7883_v28, %v15176_v23  ;;  %v5025_v22 = vadd.f32 %v8359_v30, %v4777_v35  ;;  %v5454_v17 = vrot.slane %v5339_v45, 4  ;;  %v15180_v30 = vld [vmem:[#allocation63_spill] sm:$0xff] }
  0xfe   : > { %v454_v21 = vmul.f32 %v7890_v9, %v15177_v20  ;;  %v526_v11 = vmul.f32 %v7897_v57, %v8500_v40  ;;  %v2559_v6 = vadd.f32 %v2477_v33, %v2311_v49  ;;  %v15179_v61 = vrot.slane %v15178_v42, 4  ;;  %v15185_v42 = vld [vmem:[#allocation48_spill] sm:$0xff] }
  0xff   : > { %v342_v27 = vadd.f32 %v310_v52, %v270_v4  ;;  %v600_v10 = vmul.f32 %v7904_v39, %v15174_v18  ;;  %v5273_v44 = vadd.f32 %v8375_v47, %v5025_v22  ;;  %v15181_v51 = vrot.slane %v15180_v30, 4 }
 0x100   : > { %v8524_v19 = vsel %vm4413_vm0, %v15179_v61, %v5206_v0  ;;  %v8536_v63 = vmul.f32 %v7904_v39, %v15182_v60  ;;  %v849_v33 = vmul.f32 %v15129_v36, %v15175_v37  ;;  %v2807_v45 = vadd.f32 %v2725_v13, %v2559_v6  ;;  %v15183_v0 = vld [vmem:[#allocation2_spill] sm:$0xff]  ;;  %v15186_v13 = vld [vmem:[#allocation28_spill] sm:$0xff] }
 0x101   : > { %v8532_v35 = vsel %vm4413_vm0, %v15181_v51, %v5454_v17  ;;  %v414_v49 = vadd.f32 %v382_v34, %v342_v27  ;;  %v701_v4 = vrot.slane %v600_v10, 1  ;;  %v8542_v52 = vmul.f32 %v15129_v36, %v15183_v0  ;;  %v15187_v27 = vld [vmem:[#allocation50_spill] sm:$0xff] }
 0x102   : > { %v5521_v47 = vadd.f32 %v8384_v56, %v5273_v44  ;;  %v14215_v22 = vrot.slane %v8536_v63, 1  ;;  %v949_v17 = vrot.slane %v849_v33, 1  ;;  %v1097_v61 = vmul.f32 %v15185_v42, %v15176_v23  ;;  %v15188_v44 = vld [vmem:[#allocation24_spill] sm:$0xff]  ;;  %v8565_v33 = vld [vmem:[%s6732_s29 + $0x98] sm:$0xff] }
 0x103   : > { %15184 = vst [vmem:[#allocation29_spill] sm:$0xff] %v8542_v52  ;;  %v3055_v30 = vadd.f32 %v2973_v7, %v2807_v45  ;;  %v486_v51 = vadd.f32 %v454_v21, %v414_v49  ;;  %v14218_v26 = vrot.slane %v8542_v52, 1  ;;  %v8551_v34 = vmul.f32 %v15185_v42, %v15186_v13  ;;  %15189 = vst [vmem:[#allocation32_spill] sm:$0xff] %v8565_v33 }
 0x104   : > { %6295 = vmatmul.mubr.msk.f32.gmra.mxu0 %vm5558_vm4, %v5521_v47  ;;  %v703_v56 = vsel %vm690_vm1, %v701_v4, %v14215_v22  ;;  %v1197_v6 = vrot.slane %v1097_v61, 1  ;;  %v1345_v10 = vmul.f32 %v15187_v27, %v15177_v20  ;;  %v8561_v7 = vmul.f32 %v15187_v27, %v15188_v44  ;;  %v15190_v20 = vld [vmem:[#allocation53_spill] sm:$0xff] }
 0x105   : > { %v3304_v21 = vadd.f32 %v8444_v2, %v3055_v30  ;;  %v558_v45 = vadd.f32 %v526_v11, %v486_v51  ;;  %v951_v49 = vsel %vm690_vm1, %v949_v17, %v14218_v26  ;;  %v14224_v47 = vrot.slane %v8551_v34, 1  ;;  %v15192_v17 = vld [vmem:[#allocation55_spill] sm:$0xff] }
 0x106   : > { %v1445_v4 = vrot.slane %v1345_v10, 1  ;;  %v14222_v61 = vrot.slane %v8561_v7, 1  ;;  %v1593_v22 = vmul.f32 %v15190_v20, %v8500_v40  ;;  %v8576_v38 = vmul.f32 %v15190_v20, %v8565_v33 }
 0x107   : > { %v3552_v2 = vadd.f32 %v8452_v59, %v3304_v21  ;;  %v807_v30 = vadd.f32 %v703_v56, %v558_v45  ;;  %v1199_v11 = vsel %vm690_vm1, %v1197_v6, %v14224_v47  ;;  %v1841_v51 = vmul.f32 %v15192_v17, %v15174_v18  ;;  %v8615_v47 = vld [vmem:[%s6732_s29 + $0x78] sm:$0xff] }
 0x108   : > { %15191 = vst [vmem:[#allocation6_spill] sm:$0xff] %v8576_v38  ;;  %v1447_v10 = vsel %vm690_vm1, %v1445_v4, %v14222_v61  ;;  %v1693_v26 = vrot.slane %v1593_v22, 1  ;;  %v14223_v5 = vrot.slane %v8576_v38, 1  ;;  %v8590_v52 = vmul.f32 %v15192_v17, %v15182_v60  ;;  %15194 = vst [vmem:[#allocation33_spill] sm:$0xff] %v8615_v47 }
 0x109   : > { %v3800_v59 = vadd.f32 %v8471_v62, %v3552_v2  ;;  %v1055_v56 = vadd.f32 %v951_v49, %v807_v30  ;;  %v1942_v21 = vrot.slane %v1841_v51, 2  ;;  %v2090_v6 = vmul.f32 %v7993_v58, %v15175_v37 }
 0x10a   : > { %v1695_v45 = vsel %vm690_vm1, %v1693_v26, %v14223_v5  ;;  %v14226_v22 = vrot.slane %v8590_v52, 2  ;;  %v8601_v4 = vmul.f32 %v7993_v58, %v15183_v0  ;;  %v2338_v61 = vmul.f32 %v8008_v31, %v15176_v23 }
 0x10b   : > { %v4048_v62 = vadd.f32 %v8477_v43, %v3800_v59  ;;  %v1303_v49 = vadd.f32 %v1199_v11, %v1055_v56  ;;  %v2190_v2 = vrot.slane %v2090_v6, 2  ;;  %v8608_v30 = vmul.f32 %v8008_v31, %v15186_v13 }
 0x10c   : > { %15193 = vst [vmem:[#allocation30_spill] sm:$0xff] %v8601_v4  ;;  %v1944_v26 = vsel %vm1931_vm2, %v1942_v21, %v14226_v22  ;;  %v14227_v51 = vrot.slane %v8601_v4, 2  ;;  %v2438_v5 = vrot.slane %v2338_v61, 2  ;;  %v2586_v38 = vmul.f32 %v8615_v47, %v8026_v8 }
 0x10d   : > { %v4296_v43 = vadd.f32 %v8482_v14, %v4048_v62  ;;  %v1551_v11 = vadd.f32 %v1447_v10, %v1303_v49  ;;  %v14229_v59 = vrot.slane %v8608_v30, 2  ;;  %v8623_v56 = vmul.f32 %v8026_v8, %v15188_v44 }
 0x10e   : > { %v2192_v21 = vsel %vm1931_vm2, %v2190_v2, %v14227_v51  ;;  %v2686_v6 = vrot.slane %v2586_v38, 2  ;;  %v2834_v61 = vmul.f32 %v8045_v15, %v8500_v40  ;;  %v8632_v22 = vmul.f32 %v8045_v15, %v8565_v33 }
 0x10f   : > { %v4545_v14 = vadd.f32 %v8487_v25, %v4296_v43  ;;  %v1799_v10 = vadd.f32 %v1695_v45, %v1551_v11  ;;  %v2440_v44 = vsel %vm1931_vm2, %v2438_v5, %v14229_v59  ;;  %v14232_v62 = vrot.slane %v8623_v56, 2 }
 0x110   : > { %v2934_v49 = vrot.slane %v2834_v61, 2  ;;  %v14230_v2 = vrot.slane %v8632_v22, 2  ;;  %v3082_v38 = vmul.f32 %v8057_v12, %v15174_v18  ;;  %v8644_v51 = vmul.f32 %v8057_v12, %v15182_v60 }
 0x111   : > { %v4793_v4 = vadd.f32 %v8492_v55, %v4545_v14  ;;  %v2048_v25 = vadd.f32 %v1944_v26, %v1799_v10  ;;  %v2688_v45 = vsel %vm1931_vm2, %v2686_v6, %v14232_v62  ;;  %v3331_v5 = vmul.f32 %v8078_v1, %v15175_v37 }
 0x112   : > { %15195 = vst [vmem:[#allocation36_spill] sm:$0xff] %v8644_v51  ;;  %v2936_v43 = vsel %vm1931_vm2, %v2934_v49, %v14230_v2  ;;  %v3183_v11 = vrot.slane %v3082_v38, 3  ;;  %v14231_v61 = vrot.slane %v8644_v51, 3  ;;  %v8658_v59 = vmul.f32 %v8078_v1, %v15183_v0 }
 0x113   : > { %v5041_v55 = vadd.f32 %v8506_v41, %v4793_v4  ;;  %v2296_v26 = vadd.f32 %v2192_v21, %v2048_v25  ;;  %v3431_v14 = vrot.slane %v3331_v5, 3  ;;  %v3579_v6 = vmul.f32 %v15099_v46, %v15176_v23  ;;  %v8675_v25 = vld [vmem:[%s6732_s29 + $0x80] sm:$0xff] }
 0x114   : > { %v3185_v10 = vsel %vm3172_vm3, %v3183_v11, %v14231_v61  ;;  %v14234_v49 = vrot.slane %v8658_v59, 3  ;;  %v8669_v38 = vmul.f32 %v15099_v46, %v15186_v13  ;;  %v3827_v2 = vmul.f32 %v8615_v47, %v15102_v16  ;;  %15196 = vst [vmem:[#allocation38_spill] sm:$0xff] %v8675_v25 }
 0x115   : > { %v5289_v41 = vadd.f32 %v8524_v19, %v5041_v55  ;;  %v2544_v4 = vadd.f32 %v2440_v44, %v2296_v26  ;;  %v3679_v21 = vrot.slane %v3579_v6, 3  ;;  %v8679_v5 = vmul.f32 %v8675_v25, %v15102_v16 }
 0x116   : > { %v3433_v11 = vsel %vm3172_vm3, %v3431_v14, %v14234_v49  ;;  %v14238_v61 = vrot.slane %v8669_v38, 3  ;;  %v3927_v62 = vrot.slane %v3827_v2, 3  ;;  %v4075_v51 = vmul.f32 %v15103_v53, %v8500_v40 }
 0x117   : > { %v5537_v19 = vadd.f32 %v8532_v35, %v5289_v41  ;;  %v2792_v44 = vadd.f32 %v2688_v45, %v2544_v4  ;;  %v14237_v55 = vrot.slane %v8679_v5, 3  ;;  %v8691_v26 = vmul.f32 %v15103_v53, %v8565_v33 }
 0x118   : > { %v3681_v6 = vsel %vm3172_vm3, %v3679_v21, %v14238_v61  ;;  %v4175_v14 = vrot.slane %v4075_v51, 3  ;;  %v4323_v2 = vmul.f32 %v8144_v24, %v15174_v18  ;;  %v8700_v49 = vmul.f32 %v8144_v24, %v15182_v60 }
 0x119   : > { %15197 = vst [vmem:[#allocation39_spill] sm:$0xff] %v8691_v26  ;;  %6319 = vmatmul.mubr.msk.f32.gmra.mxu1 %vm5558_vm4, %v5537_v19  ;;  %v3040_v35 = vadd.f32 %v2936_v43, %v2792_v44  ;;  %v3929_v45 = vsel %vm3172_vm3, %v3927_v62, %v14237_v55  ;;  %v14236_v41 = vrot.slane %v8691_v26, 3  ;;  %v4572_v4 = vmul.f32 %v8161_v48, %v15175_v37 }
 0x11a   : > { %15198 = vst [vmem:[#allocation41_spill] sm:$0xff] %v8700_v49  ;;  %v4424_v51 = vrot.slane %v4323_v2, 4  ;;  %v14235_v21 = vrot.slane %v8700_v49, 4  ;;  %v8712_v18 = vmul.f32 %v8161_v48, %v15183_v0  ;;  %v4820_v60 = vmul.f32 %v8173_v50, %v15176_v23  ;;  %v15207_v49 = vld [vmem:[#allocation44_spill] sm:$0xff] }
 0x11b   : > { %v3289_v43 = vadd.f32 %v3185_v10, %v3040_v35  ;;  %v4177_v62 = vsel %vm3172_vm3, %v4175_v14, %v14236_v41  ;;  %v4672_v19 = vrot.slane %v4572_v4, 4  ;;  %v8721_v37 = vmul.f32 %v8173_v50, %v15186_v13 }
 0x11c   : > { %15199 = vst [vmem:[#allocation19_spill] sm:$0xff] %v8712_v18  ;;  %v4426_v44 = vsel %vm4413_vm0, %v4424_v51, %v14235_v21  ;;  %v14241_v0 = vrot.slane %v8712_v18, 4  ;;  %v4920_v2 = vrot.slane %v4820_v60, 4  ;;  %v5068_v23 = vmul.f32 %v8615_v47, %v8187_v54  ;;  %v8744_v21 = vld [vmem:[%s6732_s29 + $0x150] sm:$0xff]  ;;  %v15206_v47 = vld [vmem:[#allocation14_spill] sm:$0xff] }
 0x11d   : > { %15200 = vst [vmem:[#allocation43_spill] sm:$0xff] %v8721_v37  ;;  %v3537_v10 = vadd.f32 %v3433_v11, %v3289_v43  ;;  %v14247_v35 = vrot.slane %v8721_v37, 4  ;;  %v8732_v14 = vmul.f32 %v8675_v25, %v8187_v54  ;;  %v5316_v13 = vmul.f32 %v8206_v29, %v8500_v40  ;;  %15203 = vst [vmem:[#allocation21_spill] sm:$0xff] %v8744_v21  ;;  %v15204_v11 = vld [vmem:[#allocation8_spill] sm:$0xff]  ;;  %v8798_v37 = vld [vmem:[%s6732_s29 + $0x158] sm:$0xff] }
 0x11e   : > { %v4674_v4 = vsel %vm4413_vm0, %v4672_v19, %v14241_v0  ;;  %v5168_v51 = vrot.slane %v5068_v23, 4  ;;  %v8741_v60 = vmul.f32 %v8206_v29, %v8565_v33  ;;  %v286_v43 = vmul.f32 %v15204_v11, %v7865_v32  ;;  %v15205_v23 = vld [vmem:[#allocation10_spill] sm:$0xff]  ;;  %15212 = vst [vmem:[#allocation22_spill] sm:$0xff] %v8798_v37 }
 0x11f   : > { %15201 = vst [vmem:[#allocation20_spill] sm:$0xff] %v8732_v14  ;;  %v3785_v41 = vadd.f32 %v3681_v6, %v3537_v10  ;;  %v4922_v55 = vsel %vm4413_vm0, %v4920_v2, %v14247_v35  ;;  %v14248_v61 = vrot.slane %v8732_v14, 4  ;;  %v5416_v40 = vrot.slane %v5316_v13, 4 }
 0x120   : > { %15202 = vst [vmem:[#allocation46_spill] sm:$0xff] %v8741_v60  ;;  %v14250_v19 = vrot.slane %v8741_v60, 4  ;;  %v326_v0 = vmul.f32 %v15205_v23, %v7876_v3  ;;  %v398_v18 = vmul.f32 %v15206_v47, %v7883_v28  ;;  %v470_v26 = vmul.f32 %v7890_v9, %v15207_v49  ;;  %v15208_v28 = vld [vmem:[#allocation13_spill] sm:$0xff] }
 0x121   : > { %v4033_v32 = vadd.f32 %v3929_v45, %v3785_v41  ;;  %v5170_v6 = vsel %vm4413_vm0, %v5168_v51, %v14248_v61  ;;  %v542_v2 = vmul.f32 %v7897_v57, %v8744_v21  ;;  %v624_v10 = vmul.f32 %v15204_v11, %v7904_v39  ;;  %v15209_v51 = vld [vmem:[#allocation17_spill] sm:$0xff] }
 0x122   : > { %v5418_v3 = vsel %vm4413_vm0, %v5416_v40, %v14250_v19  ;;  %v358_v13 = vadd.f32 %v326_v0, %v286_v43  ;;  %v8771_v35 = vmul.f32 %v15208_v28, %v7904_v39  ;;  %v873_v9 = vmul.f32 %v15205_v23, %v15129_v36  ;;  %v15210_v39 = vld [vmem:[#allocation42_spill] sm:$0xff] }
 0x123   : > { %v4281_v45 = vadd.f32 %v4177_v62, %v4033_v32  ;;  %v741_v41 = vrot.slane %v624_v10, 1  ;;  %v8777_v57 = vmul.f32 %v15209_v51, %v15129_v36  ;;  %v1121_v61 = vmul.f32 %v15206_v47, %v15185_v42 }
 0x124   : > { %v430_v60 = vadd.f32 %v398_v18, %v358_v13  ;;  %v14270_v40 = vrot.slane %v8771_v35, 1  ;;  %v989_v0 = vrot.slane %v873_v9, 1  ;;  %v8784_v43 = vmul.f32 %v15210_v39, %v15185_v42  ;;  %v15211_v13 = vld [vmem:[#allocation52_spill] sm:$0xff] }
 0x125   : > { %v4530_v19 = vadd.f32 %v4426_v44, %v4281_v45  ;;  %v14269_v62 = vrot.slane %v8777_v57, 1  ;;  %v1237_v32 = vrot.slane %v1121_v61, 1  ;;  %v1369_v10 = vmul.f32 %v15187_v27, %v15207_v49 }
 0x126   : > { %v502_v36 = vadd.f32 %v470_v26, %v430_v60  ;;  %v743_v14 = vsel %vm690_vm1, %v741_v41, %v14270_v40  ;;  %v14253_v18 = vrot.slane %v8784_v43, 1  ;;  %v8795_v9 = vmul.f32 %v15187_v27, %v15211_v13  ;;  %v15232_v40 = vld [vmem:[#allocation58_spill] sm:$0xff] }
 0x127   : > { %v4778_v42 = vadd.f32 %v4674_v4, %v4530_v19  ;;  %v991_v61 = vsel %vm690_vm1, %v989_v0, %v14269_v62  ;;  %v1485_v44 = vrot.slane %v1369_v10, 1  ;;  %v1617_v26 = vmul.f32 %v15190_v20, %v8744_v21  ;;  %v9029_v62 = vld [vmem:[%s13956_s1 + $0x1] ss:$0 sm:$0xff] }
 0x128   : > { %v574_v60 = vadd.f32 %v542_v2, %v502_v36  ;;  %v1239_v45 = vsel %vm690_vm1, %v1237_v32, %v14253_v18  ;;  %v14254_v41 = vrot.slane %v8795_v9, 1  ;;  %v8811_v27 = vmul.f32 %v15190_v20, %v8798_v37 }
 0x129   : > { %v5026_v4 = vadd.f32 %v4922_v55, %v4778_v42  ;;  %v1733_v19 = vrot.slane %v1617_v26, 1  ;;  %v1865_v0 = vmul.f32 %v15204_v11, %v15192_v17  ;;  %v8817_v10 = vmul.f32 %v15208_v28, %v15192_v17 }
 0x12a   : > { %v823_v2 = vadd.f32 %v743_v14, %v574_v60  ;;  %v1487_v32 = vsel %vm690_vm1, %v1485_v44, %v14254_v41  ;;  %v14268_v36 = vrot.slane %v8811_v27, 1  ;;  %v2114_v20 = vmul.f32 %v15205_v23, %v7993_v58 }
 0x12b   : > { %v5274_v18 = vadd.f32 %v5170_v6, %v5026_v4  ;;  %v1982_v55 = vrot.slane %v1865_v0, 2  ;;  %v14259_v42 = vrot.slane %v8817_v10, 2  ;;  %v8828_v26 = vmul.f32 %v15209_v51, %v7993_v58 }
 0x12c   : > { %v1071_v17 = vadd.f32 %v991_v61, %v823_v2  ;;  %v1735_v14 = vsel %vm690_vm1, %v1733_v19, %v14268_v36  ;;  %v2230_v60 = vrot.slane %v2114_v20, 2  ;;  %v2362_v44 = vmul.f32 %v15206_v47, %v8008_v31 }
 0x12d   : > { %15213 = vst [vmem:[#allocation45_spill] sm:$0xff] %v8828_v26  ;;  %v5522_v41 = vadd.f32 %v5418_v3, %v5274_v18  ;;  %v1984_v6 = vsel %vm1931_vm2, %v1982_v55, %v14259_v42  ;;  %v14258_v4 = vrot.slane %v8828_v26, 2  ;;  %v8841_v58 = vmul.f32 %v15210_v39, %v8008_v31 }
 0x12e   : > { %v1319_v61 = vadd.f32 %v1239_v45, %v1071_v17  ;;  %v2478_v0 = vrot.slane %v2362_v44, 2  ;;  %v2610_v19 = vmul.f32 %v8026_v8, %v15207_v49  ;;  %v8847_v2 = vmul.f32 %v8026_v8, %v15211_v13 }
 0x12f   : > { %15214 = vst [vmem:[#allocation47_spill] sm:$0xff] %v8841_v58  ;;  %6297 = vmatprep.mubr.msk.f32.mxu0 %vm5558_vm4, %v5522_v41  ;;  %v2232_v3 = vsel %vm1931_vm2, %v2230_v60, %v14258_v4  ;;  %v14255_v18 = vrot.slane %v8841_v58, 2  ;;  %v2858_v31 = vmul.f32 %v8045_v15, %v8744_v21  ;;  %v8858_v45 = vmul.f32 %v8045_v15, %v8798_v37 }
 0x130   : > { %15215 = vst [vmem:[#allocation49_spill] sm:$0xff] %v8847_v2  ;;  %v1567_v49 = vadd.f32 %v1487_v32, %v1319_v61  ;;  %v2726_v20 = vrot.slane %v2610_v19, 2  ;;  %v14257_v8 = vrot.slane %v8847_v2, 2  ;;  %v3106_v41 = vmul.f32 %v15204_v11, %v8057_v12 }
 0x131   : > { %15216 = vst [vmem:[#allocation51_spill] sm:$0xff] %v8858_v45  ;;  %v2480_v55 = vsel %vm1931_vm2, %v2478_v0, %v14255_v18  ;;  %v2974_v17 = vrot.slane %v2858_v31, 2  ;;  %v14256_v60 = vrot.slane %v8858_v45, 2  ;;  %v8869_v44 = vmul.f32 %v15208_v28, %v8057_v12  ;;  %v15242_v45 = vld [vmem:[#allocation29_spill] sm:$0xff] }
 0x132   : > { %v1815_v15 = vadd.f32 %v1735_v14, %v1567_v49  ;;  %v2728_v32 = vsel %vm1931_vm2, %v2726_v20, %v14257_v8  ;;  %v3223_v61 = vrot.slane %v3106_v41, 3  ;;  %v3355_v19 = vmul.f32 %v8078_v1, %v15205_v23  ;;  %v8891_v41 = vld [vmem:[%s6732_s29 + $0x138] sm:$0xff] }
 0x133   : > { %15217 = vst [vmem:[#allocation54_spill] sm:$0xff] %v8869_v44  ;;  %v2976_v0 = vsel %vm1931_vm2, %v2974_v17, %v14256_v60  ;;  %v14267_v31 = vrot.slane %v8869_v44, 3  ;;  %v8882_v18 = vmul.f32 %v15209_v51, %v8078_v1  ;;  %v3603_v12 = vmul.f32 %v15099_v46, %v15206_v47  ;;  %15220 = vst [vmem:[#allocation12_spill] sm:$0xff] %v8891_v41 }
 0x134   : > { %v2064_v14 = vadd.f32 %v1984_v6, %v1815_v15  ;;  %v3471_v49 = vrot.slane %v3355_v19, 3  ;;  %v8888_v20 = vmul.f32 %v15210_v39, %v15099_v46  ;;  %v3851_v17 = vmul.f32 %v8891_v41, %v15102_v16 }
 0x135   : > { %15218 = vst [vmem:[#allocation56_spill] sm:$0xff] %v8882_v18  ;;  %v3225_v60 = vsel %vm3172_vm3, %v3223_v61, %v14267_v31  ;;  %v14260_v1 = vrot.slane %v8882_v18, 3  ;;  %v3719_v8 = vrot.slane %v3603_v12, 3  ;;  %v8901_v6 = vmul.f32 %v15102_v16, %v15211_v13  ;;  %v9022_v31 = vld [vmem:[%s13956_s1 + $0x14] ss:$0 sm:$0xff] }
 0x136   : > { %15219 = vst [vmem:[#allocation7_spill] sm:$0xff] %v8888_v20  ;;  %v2312_v15 = vadd.f32 %v2232_v3, %v2064_v14  ;;  %v14266_v46 = vrot.slane %v8888_v20, 3  ;;  %v3967_v19 = vrot.slane %v3851_v17, 3  ;;  %v4099_v4 = vmul.f32 %v15103_v53, %v8744_v21 }
 0x137   : > { %15221 = vst [vmem:[#allocation57_spill] sm:$0xff] %v8901_v6  ;;  %v3473_v42 = vsel %vm3172_vm3, %v3471_v49, %v14260_v1  ;;  %v14265_v61 = vrot.slane %v8901_v6, 3  ;;  %v8912_v12 = vmul.f32 %v15103_v53, %v8798_v37  ;;  %v4347_v16 = vmul.f32 %v8144_v24, %v15204_v11 }
 0x138   : > { %v2560_v13 = vadd.f32 %v2480_v55, %v2312_v15  ;;  %v3721_v3 = vsel %vm3172_vm3, %v3719_v8, %v14266_v46  ;;  %v4215_v14 = vrot.slane %v4099_v4, 3  ;;  %v8921_v17 = vmul.f32 %v8144_v24, %v15208_v28 }
 0x139   : > { %15222 = vst [vmem:[#allocation9_spill] sm:$0xff] %v8912_v12  ;;  %v3969_v49 = vsel %vm3172_vm3, %v3967_v19, %v14265_v61  ;;  %v14263_v53 = vrot.slane %v8912_v12, 3  ;;  %v4464_v1 = vrot.slane %v4347_v16, 4  ;;  %v4596_v11 = vmul.f32 %v8161_v48, %v15205_v23  ;;  %v9010_v61 = vld [vmem:[%s13956_s1 + $0xf] ss:$0 sm:$0xff] }
 0x13a   : > { %15223 = vst [vmem:[#allocation11_spill] sm:$0xff] %v8921_v17  ;;  %v2808_v55 = vadd.f32 %v2728_v32, %v2560_v13  ;;  %v14262_v15 = vrot.slane %v8921_v17, 4  ;;  %v8932_v4 = vmul.f32 %v8161_v48, %v15209_v51  ;;  %v4844_v24 = vmul.f32 %v8173_v50, %v15206_v47  ;;  %v8953_v13 = vld [vmem:[%s6732_s29 + $0x140] sm:$0xff] }
 0x13b   : > { %v4217_v28 = vsel %vm3172_vm3, %v4215_v14, %v14263_v53  ;;  %v4712_v8 = vrot.slane %v4596_v11, 4  ;;  %v8941_v19 = vmul.f32 %v15210_v39, %v8173_v50  ;;  %v5092_v23 = vmul.f32 %v8891_v41, %v8187_v54  ;;  %15226 = vst [vmem:[#allocation31_spill] sm:$0xff] %v8953_v13  ;;  %v8995_v53 = vld [vmem:[%s6732_s29 + $0xa0] sm:$0xf] }
 0x13c   : > { %15224 = vst [vmem:[#allocation16_spill] sm:$0xff] %v8932_v4  ;;  %v3056_v32 = vadd.f32 %v2976_v0, %v2808_v55  ;;  %v8948_v48 = vsel %vm4413_vm0, %v4464_v1, %v14262_v15  ;;  %v14261_v47 = vrot.slane %v8932_v4, 4  ;;  %v4960_v51 = vrot.slane %v4844_v24, 4  ;;  %v6403_v55 = vld [vmem:[%s6732_s29 + $0x38] sm:$0xff]  ;;  %15230 = vst [vmem:[#allocation40_spill] sm:$0xff] %v8995_v53 }
 0x13d   : > { %15225 = vst [vmem:[#allocation18_spill] sm:$0xff] %v8941_v19  ;;  %v14264_v16 = vrot.slane %v8941_v19, 4  ;;  %v8957_v50 = vmul.f32 %v8953_v13, %v8187_v54  ;;  %v5208_v39 = vrot.slane %v5092_v23, 4  ;;  %v5340_v0 = vmul.f32 %v8206_v29, %v8744_v21  ;;  %v8973_v54 = vld [vmem:[%s13956_s1] ss:$0 sm:$0xff] }
 0x13e   : > { %v3305_v14 = vadd.f32 %v3225_v60, %v3056_v32  ;;  %v8964_v1 = vsel %vm4413_vm0, %v4712_v8, %v14261_v47  ;;  %v8968_v11 = vmul.f32 %v8206_v29, %v8798_v37  ;;  %v271_v24 = vmul.f32 %v6403_v55, %v8973_v54  ;;  %v8986_v29 = vld [vmem:[%s13956_s1 + $0x5] ss:$0 sm:$0xff]  ;;  %v8989_v32 = vld [vmem:[%s6732_s29 + $0x50] sm:$0xff] }
 0x13f   : > { %15227 = vst [vmem:[#allocation34_spill] sm:$0xff] %v8957_v50  ;;  %v8980_v60 = vsel %vm4413_vm0, %v4960_v51, %v14264_v16  ;;  %v14273_v8 = vrot.slane %v8957_v50, 4  ;;  %v5456_v23 = vrot.slane %v5340_v0, 4  ;;  %15229 = vst [vmem:[#allocation37_spill] sm:$0xff] %v8989_v32  ;;  %v311_v47 = vmul.f32 %v8989_v32, %v8986_v29  ;;  %v9000_v51 = vld [vmem:[%s13956_s1 + $0xa] ss:$0 sm:$0xff] }
 0x140   : > { %15228 = vst [vmem:[#allocation35_spill] sm:$0xff] %v8968_v11  ;;  %v3553_v15 = vadd.f32 %v3473_v42, %v3305_v14  ;;  %v9003_v0 = vld [vmem:[%s6732_s29 + $0x68] sm:$0xff]  ;;  %v455_v42 = vmul.f32 %v9010_v61, %v8675_v25  ;;  %v527_v36 = vmul.f32 %v9022_v31, %v8565_v33  ;;  %v602_v55 = vmul.f32 %v9029_v62, %v15232_v40  ;;  %v15237_v25 = vld [vmem:[#allocation60_spill] sm:$0xff] }
 0x141   : > { %15231 = vst [vmem:[#allocation25_spill] sm:$0xff] %v9003_v0  ;;  %v383_v16 = vmul.f32 %v9003_v0, %v9000_v51  ;;  %v9017_v14 = vsel %vm4413_vm0, %v5208_v39, %v14273_v8  ;;  %v343_v46 = vadd.f32 %v311_v47, %v271_v24  ;;  %v15233_v39 = vrot.slane %v8968_v11, 4  ;;  %v9041_v24 = vld [vmem:[%s13956_s1 + $0x6] ss:$0 sm:$0xff]  ;;  %v15235_v8 = vld [vmem:[#allocation59_spill] sm:$0xff] }
 0x142   : > { %v3801_v21 = vadd.f32 %v3721_v3, %v3553_v15  ;;  %15234 = vst [vmem:[#allocation27_spill] sm:$0xff] %v9041_v24  ;;  %v851_v41 = vmul.f32 %v9041_v24, %v15235_v8  ;;  %v9048_v33 = vld [vmem:[%s13956_s1 + $0xb] ss:$0 sm:$0xff]  ;;  %v704_v0 = vrot.slane %v602_v55, 1  ;;  %v9062_v11 = vld [vmem:[%s13956_s1 + $0x15] ss:$0 sm:$0xff] }
 0x143   : > { %v9036_v47 = vsel %vm4413_vm0, %v5456_v23, %v15233_v39  ;;  %15236 = vst [vmem:[#allocation3_spill] sm:$0xff] %v9048_v33  ;;  %v1099_v3 = vmul.f32 %v9048_v33, %v15237_v25  ;;  %v415_v15 = vadd.f32 %v383_v16, %v343_v46  ;;  %v9055_v23 = vld [vmem:[%s13956_s1 + $0x10] ss:$0 sm:$0xff]  ;;  %15240 = vst [vmem:[#allocation62_spill] sm:$0xff] %v9062_v11  ;;  %v9069_v16 = vld [vmem:[%s13956_s1 + $0x2] ss:$0 sm:$0xff] }
 0x144   : > { %15238 = vst [vmem:[#allocation23_spill] sm:$0xff] %v9055_v23  ;;  %v15239_v39 = vld [vmem:[#allocation64_spill] sm:$0xff]  ;;  %v1595_v50 = vmul.f32 %v9062_v11, %v8995_v53  ;;  %v4049_v19 = vadd.f32 %v3969_v49, %v3801_v21  ;;  %v952_v4 = vrot.slane %v851_v41, 1  ;;  %v1843_v55 = vmul.f32 %v9069_v16, %v15232_v40 }
 0x145   : > { %v1347_v32 = vmul.f32 %v9055_v23, %v15239_v39  ;;  %v1200_v46 = vrot.slane %v1099_v3, 1  ;;  %v487_v17 = vadd.f32 %v455_v42, %v415_v15  ;;  %v15241_v12 = vrot.slane %v8536_v63, 1  ;;  %v15246_v63 = vld [vmem:[#allocation6_spill] sm:$0xff] }
 0x146   : > { %v1696_v18 = vrot.slane %v1595_v50, 1  ;;  %v4297_v44 = vadd.f32 %v4217_v28, %v4049_v19  ;;  %v15243_v21 = vrot.slane %v15242_v45, 1  ;;  %v15244_v49 = vrot.slane %v8551_v34, 1  ;;  %v9091_v45 = vld [vmem:[%s13956_s1 + $0x7] ss:$0 sm:$0xff] }
 0x147   : > { %v705_v6 = vsel %vm690_vm1, %v15241_v12, %v704_v0  ;;  %v1448_v20 = vrot.slane %v1347_v32, 1  ;;  %v1945_v2 = vrot.slane %v1843_v55, 2  ;;  %v559_v58 = vadd.f32 %v527_v36, %v487_v17  ;;  %v9123_v19 = vld [vmem:[%s13956_s1 + $0x3] ss:$0 sm:$0xff]  ;;  %v9131_v32 = vld [vmem:[%s13956_s1 + $0x8] ss:$0 sm:$0xff] }
 0x148   : > { %v953_v41 = vsel %vm690_vm1, %v15243_v21, %v952_v4  ;;  %v1201_v3 = vsel %vm690_vm1, %v15244_v49, %v1200_v46  ;;  %v15245_v26 = vrot.slane %v8561_v7, 1  ;;  %v15247_v15 = vrot.slane %v15246_v63, 1  ;;  %15249 = vst [vmem:[#allocation63_spill] sm:$0xff] %v9131_v32  ;;  %v15250_v55 = vld [vmem:[#allocation30_spill] sm:$0xff] }
 0x149   : > { %v2092_v34 = vmul.f32 %v9091_v45, %v15235_v8  ;;  %v4546_v4 = vadd.f32 %v8948_v48, %v4297_v44  ;;  %v15248_v36 = vrot.slane %v8590_v52, 2  ;;  %v808_v17 = vadd.f32 %v705_v6, %v559_v58 }
 0x14a   : > { %v1449_v42 = vsel %vm690_vm1, %v15245_v26, %v1448_v20  ;;  %v1697_v12 = vsel %vm690_vm1, %v15247_v15, %v1696_v18  ;;  %v9102_v26 = vld [vmem:[%s13956_s1 + $0xc] ss:$0 sm:$0xff]  ;;  %v9109_v20 = vld [vmem:[%s13956_s1 + $0x11] ss:$0 sm:$0xff]  ;;  %v3084_v48 = vmul.f32 %v9123_v19, %v15232_v40  ;;  %v3333_v0 = vmul.f32 %v9131_v32, %v15235_v8 }
 0x14b   : > { %v1946_v7 = vsel %vm1931_vm2, %v15248_v36, %v1945_v2  ;;  %v2340_v18 = vmul.f32 %v9102_v26, %v15237_v25  ;;  %v2588_v44 = vmul.f32 %v9109_v20, %v15239_v39  ;;  %v2193_v52 = vrot.slane %v2092_v34, 2  ;;  %v9116_v2 = vld [vmem:[%s13956_s1 + $0x16] ss:$0 sm:$0xff] }
 0x14c   : > { %v2836_v28 = vmul.f32 %v9116_v2, %v8995_v53  ;;  %v4794_v50 = vadd.f32 %v8964_v1, %v4546_v4  ;;  %v1056_v46 = vadd.f32 %v953_v41, %v808_v17  ;;  %v15251_v21 = vrot.slane %v15250_v55, 2 }
 0x14d   : > { %v2441_v58 = vrot.slane %v2340_v18, 2  ;;  %v2689_v6 = vrot.slane %v2588_v44, 2  ;;  %v3186_v15 = vrot.slane %v3084_v48, 3  ;;  %v15252_v1 = vrot.slane %v8608_v30, 2  ;;  %v9160_v30 = vld [vmem:[%s13956_s1 + $0xd] ss:$0 sm:$0xff] }
 0x14e   : > { %v2194_v49 = vsel %vm1931_vm2, %v15251_v21, %v2193_v52  ;;  %v2937_v63 = vrot.slane %v2836_v28, 2  ;;  %v5042_v34 = vadd.f32 %v8980_v60, %v4794_v50  ;;  %v15253_v36 = vrot.slane %v8623_v56, 2  ;;  %v15255_v52 = vld [vmem:[#allocation36_spill] sm:$0xff] }
 0x14f   : > { %v2442_v4 = vsel %vm1931_vm2, %v15252_v1, %v2441_v58  ;;  %v3434_v44 = vrot.slane %v3333_v0, 3  ;;  %v1304_v32 = vadd.f32 %v1201_v3, %v1056_v46  ;;  %v15254_v41 = vrot.slane %v8632_v22, 2  ;;  %v9173_v50 = vld [vmem:[%s13956_s1 + $0x12] ss:$0 sm:$0xff]  ;;  %v9187_v46 = vld [vmem:[%s13956_s1 + $0x4] ss:$0 sm:$0xff] }
 0x150   : > { %v9145_v18 = vsel %vm1931_vm2, %v15253_v36, %v2689_v6  ;;  %v15256_v28 = vrot.slane %v15255_v52, 3  ;;  %v3581_v56 = vmul.f32 %v9160_v30, %v15237_v25  ;;  %v5290_v3 = vadd.f32 %v9017_v14, %v5042_v34  ;;  %v9180_v6 = vld [vmem:[%s13956_s1 + $0x17] ss:$0 sm:$0xff]  ;;  %v15260_v52 = vld [vmem:[#allocation39_spill] sm:$0xff] }
 0x151   : > { %v9150_v17 = vsel %vm1931_vm2, %v15254_v41, %v2937_v63  ;;  %v15257_v22 = vrot.slane %v8658_v59, 3  ;;  %v3829_v58 = vmul.f32 %v9173_v50, %v15239_v39  ;;  %v4077_v14 = vmul.f32 %v9180_v6, %v8995_v53  ;;  %v9194_v39 = vld [vmem:[%s13956_s1 + $0x9] ss:$0 sm:$0xff] }
 0x152   : > { %v9155_v60 = vsel %vm3172_vm3, %v15256_v28, %v3186_v15  ;;  %v1552_v59 = vadd.f32 %v1449_v42, %v1304_v32  ;;  %v3682_v0 = vrot.slane %v3581_v56, 3  ;;  %v4325_v55 = vmul.f32 %v9187_v46, %v15232_v40  ;;  %v9202_v15 = vld [vmem:[%s13956_s1 + $0xe] ss:$0 sm:$0xff]  ;;  %v9228_v56 = vld [vmem:[%s6732_s29 + $0x88] sm:$0xf] }
 0x153   : > { %v9168_v48 = vsel %vm3172_vm3, %v15257_v22, %v3434_v44  ;;  %v4574_v21 = vmul.f32 %v9194_v39, %v15235_v8  ;;  %v5538_v42 = vadd.f32 %v9036_v47, %v5290_v3  ;;  %v3930_v32 = vrot.slane %v3829_v58, 3  ;;  %15262 = vst [vmem:[#allocation26_spill] sm:$0xff] %v9228_v56  ;;  %v15263_v22 = vld [vmem:[#allocation41_spill] sm:$0xff] }
 0x154   : > { %v4178_v63 = vrot.slane %v4077_v14, 3  ;;  %v4822_v40 = vmul.f32 %v9202_v15, %v15237_v25  ;;  %v1800_v34 = vadd.f32 %v1697_v12, %v1552_v59  ;;  %v15258_v1 = vrot.slane %v8669_v38, 3  ;;  %v9225_v12 = vld [vmem:[%s13956_s1 + $0x13] ss:$0 sm:$0xff]  ;;  %v15265_v59 = vld [vmem:[#allocation19_spill] sm:$0xff] }
 0x155   : > { %v4427_v44 = vrot.slane %v4325_v55, 4  ;;  %v4675_v8 = vrot.slane %v4574_v21, 4  ;;  %6321 = vmatprep.mubr.msk.f32.mxu1 %vm5558_vm4, %v5538_v42  ;;  %v15259_v47 = vrot.slane %v8679_v5, 3  ;;  %v15261_v28 = vrot.slane %v15260_v52, 3  ;;  %v9245_v21 = vld [vmem:[%s13956_s1 + $0x18] ss:$0 sm:$0xff] }
 0x156   : > { %v9209_v36 = vsel %vm3172_vm3, %v15258_v1, %v3682_v0  ;;  %v4923_v38 = vrot.slane %v4822_v40, 4  ;;  %v5070_v5 = vmul.f32 %v9228_v56, %v9225_v12  ;;  %v2049_v3 = vadd.f32 %v1946_v7, %v1800_v34  ;;  %v6431_v34 = vld [vmem:[%s6732_s29 + $0xf8] sm:$0xff] }
 0x157   : > { %v9215_v41 = vsel %vm3172_vm3, %v15259_v47, %v3930_v32  ;;  %v9220_v25 = vsel %vm3172_vm3, %v15261_v28, %v4178_v63  ;;  %v15264_v58 = vrot.slane %v15263_v22, 4  ;;  %v15266_v0 = vrot.slane %v15265_v59, 4  ;;  %v15267_v32 = vld [vmem:[#allocation43_spill] sm:$0xff]  ;;  %v9262_v28 = vld [vmem:[%s6732_s29 + $0x160] sm:$0xf] }
 0x158   : > { %v5318_v42 = vmul.f32 %v9245_v21, %v8995_v53  ;;  %v15268_v7 = vrot.slane %v15267_v32, 4  ;;  %v5171_v40 = vrot.slane %v5070_v5, 4  ;;  %v287_v1 = vmul.f32 %v6431_v34, %v8973_v54  ;;  %15270 = vst [vmem:[#allocation48_spill] sm:$0xff] %v9262_v28  ;;  %v9265_v22 = vld [vmem:[%s6732_s29 + $0x128] sm:$0xff]  ;;  %v15272_v5 = vld [vmem:[#allocation20_spill] sm:$0xff]  ;;  %v15274_v34 = vld [vmem:[#allocation46_spill] sm:$0xff] }
 0x159   : > { %v9235_v14 = vsel %vm4413_vm0, %v15264_v58, %v4427_v44  ;;  %v9240_v55 = vsel %vm4413_vm0, %v15266_v0, %v4675_v8  ;;  %v9257_v44 = vld [vmem:[%s6732_s29 + $0x110] sm:$0xff]  ;;  %v2297_v47 = vadd.f32 %v2194_v49, %v2049_v3  ;;  %15271 = vst [vmem:[#allocation28_spill] sm:$0xff] %v9265_v22  ;;  %v399_v58 = vmul.f32 %v9265_v22, %v9000_v51  ;;  %v6434_v3 = vld [vmem:[%s6732_s29 + $0x100] sm:$0xf] }
 0x15a   : > { %v9252_v63 = vsel %vm4413_vm0, %v15268_v7, %v4923_v38  ;;  %15269 = vst [vmem:[#allocation2_spill] sm:$0xff] %v9257_v44  ;;  %v327_v8 = vmul.f32 %v9257_v44, %v8986_v29  ;;  %v5419_v52 = vrot.slane %v5318_v42, 4  ;;  %v471_v38 = vmul.f32 %v9010_v61, %v8953_v13  ;;  %v15277_v22 = vld [vmem:[#allocation4_spill] sm:$0xff] }
 0x15b   : > { %v15273_v59 = vrot.slane %v15272_v5, 4  ;;  %v543_v49 = vmul.f32 %v9022_v31, %v8798_v37  ;;  %v626_v42 = vmul.f32 %v6434_v3, %v9029_v62  ;;  %v2545_v7 = vadd.f32 %v2442_v4, %v2297_v47  ;;  %v15278_v5 = vld [vmem:[#allocation15_spill] sm:$0xff] }
 0x15c   : > { %v359_v32 = vadd.f32 %v327_v8, %v287_v1  ;;  %v15275_v53 = vrot.slane %v15274_v34, 4  ;;  %v875_v13 = vmul.f32 %v9041_v24, %v15277_v22  ;;  %v15279_v8 = vld [vmem:[#allocation61_spill] sm:$0xff]  ;;  %v1619_v44 = vmul.f32 %v9062_v11, %v9262_v28 }
 0x15d   : > { %v9274_v0 = vsel %vm4413_vm0, %v15273_v59, %v5171_v40  ;;  %v1123_v40 = vmul.f32 %v9048_v33, %v15278_v5  ;;  %v744_v1 = vrot.slane %v626_v42, 1  ;;  %v1371_v37 = vmul.f32 %v9055_v23, %v15279_v8 }
 0x15e   : > { %v9283_v56 = vsel %vm4413_vm0, %v15275_v53, %v5419_v52  ;;  %v431_v59 = vadd.f32 %v399_v58, %v359_v32  ;;  %v2793_v4 = vadd.f32 %v9145_v18, %v2545_v7  ;;  %v992_v47 = vrot.slane %v875_v13, 1 }
 0x15f   : > { %15276 = vst [vmem:[#allocation50_spill] sm:$0xff] %v9283_v56  ;;  %v1240_v34 = vrot.slane %v1123_v40, 1  ;;  %v1867_v53 = vmul.f32 %v6434_v3, %v9069_v16  ;;  %v15280_v56 = vrot.slane %v8771_v35, 1  ;;  %v1488_v33 = vrot.slane %v1371_v37, 1 }
 0x160   : > { %v503_v52 = vadd.f32 %v471_v38, %v431_v59  ;;  %v1736_v58 = vrot.slane %v1619_v44, 1  ;;  %v3041_v32 = vadd.f32 %v9150_v17, %v2793_v4  ;;  %v15281_v42 = vrot.slane %v8777_v57, 1 }
 0x161   : > { %v745_v24 = vsel %vm690_vm1, %v15280_v56, %v744_v1  ;;  %v15282_v11 = vrot.slane %v8784_v43, 1  ;;  %v1985_v18 = vrot.slane %v1867_v53, 2  ;;  %v15283_v38 = vrot.slane %v8795_v9, 1 }
 0x162   : > { %v993_v23 = vsel %vm690_vm1, %v15281_v42, %v992_v47  ;;  %v575_v7 = vadd.f32 %v543_v49, %v503_v52  ;;  %v15284_v56 = vrot.slane %v8811_v27, 1  ;;  %v2116_v17 = vmul.f32 %v9091_v45, %v15277_v22  ;;  %v15289_v42 = vld [vmem:[#allocation47_spill] sm:$0xff] }
 0x163   : > { %v1241_v13 = vsel %vm690_vm1, %v15282_v11, %v1240_v34  ;;  %v1489_v35 = vsel %vm690_vm1, %v15283_v38, %v1488_v33  ;;  %v3290_v57 = vadd.f32 %v9155_v60, %v3041_v32  ;;  %v15285_v44 = vrot.slane %v8817_v10, 2  ;;  %v15286_v10 = vld [vmem:[#allocation63_spill] sm:$0xff]  ;;  %v15287_v34 = vld [vmem:[#allocation45_spill] sm:$0xff] }
 0x164   : > { %v1737_v37 = vsel %vm690_vm1, %v15284_v56, %v1736_v58  ;;  %v2364_v11 = vmul.f32 %v9102_v26, %v15278_v5  ;;  %v2612_v9 = vmul.f32 %v9109_v20, %v15279_v8  ;;  %v824_v33 = vadd.f32 %v745_v24, %v575_v7  ;;  %v15291_v38 = vld [vmem:[#allocation49_spill] sm:$0xff] }
 0x165   : > { %v1986_v43 = vsel %vm1931_vm2, %v15285_v44, %v1985_v18  ;;  %v2233_v49 = vrot.slane %v2116_v17, 2  ;;  %v2860_v27 = vmul.f32 %v9116_v2, %v9262_v28  ;;  %v3108_v40 = vmul.f32 %v6434_v3, %v9123_v19  ;;  %v15293_v44 = vld [vmem:[#allocation51_spill] sm:$0xff] }
 0x166   : > { %v3538_v59 = vadd.f32 %v9168_v48, %v3290_v57  ;;  %v2481_v60 = vrot.slane %v2364_v11, 2  ;;  %v2729_v1 = vrot.slane %v2612_v9, 2  ;;  %v3357_v4 = vmul.f32 %v15286_v10, %v15277_v22  ;;  %v15295_v9 = vld [vmem:[#allocation54_spill] sm:$0xff] }
 0x167   : > { %v1072_v47 = vadd.f32 %v993_v23, %v824_v33  ;;  %v15288_v53 = vrot.slane %v15287_v34, 2  ;;  %v2977_v58 = vrot.slane %v2860_v27, 2  ;;  %v3226_v24 = vrot.slane %v3108_v40, 3  ;;  %v15297_v40 = vld [vmem:[#allocation56_spill] sm:$0xff] }
 0x168   : > { %v3786_v32 = vadd.f32 %v9209_v36, %v3538_v59  ;;  %v15290_v18 = vrot.slane %v15289_v42, 2  ;;  %v15292_v48 = vrot.slane %v15291_v38, 2  ;;  %v3474_v17 = vrot.slane %v3357_v4, 3  ;;  %v15299_v42 = vld [vmem:[#allocation7_spill] sm:$0xff] }
 0x169   : > { %v2234_v52 = vsel %vm1931_vm2, %v15288_v53, %v2233_v49  ;;  %v1320_v57 = vadd.f32 %v1241_v13, %v1072_v47  ;;  %v15294_v23 = vrot.slane %v15293_v44, 2  ;;  %v15296_v33 = vrot.slane %v15295_v9, 3  ;;  %v15305_v9 = vld [vmem:[#allocation11_spill] sm:$0xff] }
 0x16a   : > { %v2482_v7 = vsel %vm1931_vm2, %v15290_v18, %v2481_v60  ;;  %v2730_v56 = vsel %vm1931_vm2, %v15292_v48, %v2729_v1  ;;  %v3605_v36 = vmul.f32 %v9160_v30, %v15278_v5  ;;  %v4034_v27 = vadd.f32 %v9215_v41, %v3786_v32  ;;  %v15301_v48 = vld [vmem:[#allocation57_spill] sm:$0xff] }
 0x16b   : > { %v2978_v11 = vsel %vm1931_vm2, %v15294_v23, %v2977_v58  ;;  %v9343_v49 = vsel %vm3172_vm3, %v15296_v33, %v3226_v24  ;;  %v15298_v59 = vrot.slane %v15297_v40, 3  ;;  %v3853_v13 = vmul.f32 %v9173_v50, %v15279_v8 }
 0x16c   : > { %v4101_v1 = vmul.f32 %v9180_v6, %v9262_v28  ;;  %v1568_v4 = vadd.f32 %v1489_v35, %v1320_v57  ;;  %v3722_v47 = vrot.slane %v3605_v36, 3  ;;  %v4349_v34 = vmul.f32 %v6434_v3, %v9187_v46  ;;  %v15303_v57 = vld [vmem:[#allocation9_spill] sm:$0xff] }
 0x16d   : > { %v9351_v60 = vsel %vm3172_vm3, %v15298_v59, %v3474_v17  ;;  %v4598_v53 = vmul.f32 %v9194_v39, %v15277_v22  ;;  %v4282_v41 = vadd.f32 %v9220_v25, %v4034_v27  ;;  %v3970_v58 = vrot.slane %v3853_v13, 3  ;;  %v15307_v27 = vld [vmem:[#allocation16_spill] sm:$0xff]  ;;  %v9390_v59 = vld [vmem:[%s6732_s29 + $0x148] sm:$0xf] }
 0x16e   : > { %v4218_v24 = vrot.slane %v4101_v1, 3  ;;  %v4846_v32 = vmul.f32 %v9202_v15, %v15278_v5  ;;  %v1816_v8 = vadd.f32 %v1737_v37, %v1568_v4  ;;  %v15300_v18 = vrot.slane %v15299_v42, 3  ;;  %15309 = vst [vmem:[#allocation24_spill] sm:$0xff] %v9390_v59  ;;  %v9395_v1 = vld [vmem:[%s6732_s29 + $0xa8] sm:$0xff]  ;;  %v15314_v42 = vld [vmem:[#allocation33_spill] sm:$0xff] }
 0x16f   : > { %v4467_v3 = vrot.slane %v4349_v34, 4  ;;  %v4715_v38 = vrot.slane %v4598_v53, 4  ;;  %v4531_v22 = vadd.f32 %v9235_v14, %v4282_v41  ;;  %v15302_v17 = vrot.slane %v15301_v48, 3  ;;  %15310 = vst [vmem:[#allocation53_spill] sm:$0xff] %v9395_v1  ;;  %v9406_v41 = vld [vmem:[%s6732_s29 + $0x48] sm:$0xff] }
 0x170   : > { %v9366_v35 = vsel %vm3172_vm3, %v15300_v18, %v3722_v47  ;;  %v15304_v44 = vrot.slane %v15303_v57, 3  ;;  %v4963_v37 = vrot.slane %v4846_v32, 4  ;;  %v2065_v23 = vadd.f32 %v1986_v43, %v1816_v8  ;;  %v15311_v43 = vld [vmem:[#allocation18_spill] sm:$0xff] }
 0x171   : > { %v9372_v25 = vsel %vm3172_vm3, %v15302_v17, %v3970_v58  ;;  %v15306_v33 = vrot.slane %v15305_v9, 4  ;;  %v15308_v14 = vrot.slane %v15307_v27, 4  ;;  %v5094_v13 = vmul.f32 %v9390_v59, %v9225_v12  ;;  %v9411_v8 = vld [vmem:[%s6732_s29 + $0x60] sm:$0xff] }
 0x172   : > { %v9377_v5 = vsel %vm3172_vm3, %v15304_v44, %v4218_v24  ;;  %v4779_v4 = vadd.f32 %v9240_v55, %v4531_v22  ;;  %v15312_v47 = vrot.slane %v15311_v43, 4  ;;  %v5342_v53 = vmul.f32 %v9245_v21, %v9262_v28  ;;  %15313 = vst [vmem:[#allocation55_spill] sm:$0xff] %v9411_v8  ;;  %v15315_v22 = vld [vmem:[#allocation5_spill] sm:$0xff] }
 0x173   : > { %v9382_v36 = vsel %vm4413_vm0, %v15306_v33, %v4467_v3  ;;  %v9387_v40 = vsel %vm4413_vm0, %v15308_v14, %v4715_v38  ;;  %v272_v58 = vmul.f32 %v9406_v41, %v8973_v54  ;;  %v2313_v24 = vadd.f32 %v2234_v52, %v2065_v23  ;;  %v15316_v52 = vld [vmem:[#allocation34_spill] sm:$0xff] }
 0x174   : > { %v9401_v34 = vsel %vm4413_vm0, %v15312_v47, %v4963_v37  ;;  %v5211_v32 = vrot.slane %v5094_v13, 4  ;;  %v312_v55 = vmul.f32 %v9411_v8, %v8986_v29  ;;  %v384_v18 = vmul.f32 %v9000_v51, %v15314_v42  ;;  %v15320_v13 = vld [vmem:[#allocation37_spill] sm:$0xff] }
 0x175   : > { %v5027_v3 = vadd.f32 %v9252_v63, %v4779_v4  ;;  %v5459_v38 = vrot.slane %v5342_v53, 4  ;;  %v456_v48 = vmul.f32 %v9010_v61, %v15315_v22  ;;  %v528_v17 = vmul.f32 %v9022_v31, %v9395_v1  ;;  %v15318_v63 = vld [vmem:[#allocation35_spill] sm:$0xff] }
 0x176   : > { %v2561_v57 = vadd.f32 %v2482_v7, %v2313_v24  ;;  %v15317_v44 = vrot.slane %v15316_v52, 4  ;;  %v344_v23 = vadd.f32 %v312_v55, %v272_v58  ;;  %v603_v9 = vmul.f32 %v9406_v41, %v9029_v62  ;;  %v15322_v7 = vld [vmem:[#allocation27_spill] sm:$0xff]  ;;  %v15323_v24 = vld [vmem:[#allocation25_spill] sm:$0xff] }
 0x177   : > { %v5275_v33 = vadd.f32 %v9274_v0, %v5027_v3  ;;  %v15319_v27 = vrot.slane %v15318_v63, 4  ;;  %v9437_v4 = vmul.f32 %v9029_v62, %v15320_v13  ;;  %v852_v43 = vmul.f32 %v9411_v8, %v15322_v7  ;;  %v15325_v0 = vld [vmem:[#allocation50_spill] sm:$0xff]  ;;  %v15326_v52 = vld [vmem:[#allocation3_spill] sm:$0xff] }
 0x178   : > { %v9425_v37 = vsel %vm4413_vm0, %v15317_v44, %v5211_v32  ;;  %v2809_v47 = vadd.f32 %v2730_v56, %v2561_v57  ;;  %v416_v53 = vadd.f32 %v384_v18, %v344_v23  ;;  %v706_v58 = vrot.slane %v603_v9, 1  ;;  %v15327_v56 = vld [vmem:[#allocation38_spill] sm:$0xff]  ;;  %v15329_v9 = vld [vmem:[#allocation23_spill] sm:$0xff] }
 0x179   : > { %v9433_v14 = vsel %vm4413_vm0, %v15319_v27, %v5459_v38  ;;  %15321 = vst [vmem:[#allocation8_spill] sm:$0xff] %v9437_v4  ;;  %v9443_v32 = vmul.f32 %v15322_v7, %v15323_v24  ;;  %v5523_v55 = vadd.f32 %v15325_v0, %v5275_v33  ;;  %v14322_v3 = vrot.slane %v9437_v4, 1  ;;  %v9705_v4 = vld [vmem:[%s6732_s29 + $0x170] sm:$0xff] }
 0x17a   : > { %v954_v38 = vrot.slane %v852_v43, 1  ;;  %v1100_v44 = vmul.f32 %v15326_v52, %v15314_v42  ;;  %v3057_v63 = vadd.f32 %v2978_v11, %v2809_v47  ;;  %v488_v27 = vadd.f32 %v456_v48, %v416_v53  ;;  %v15330_v43 = vld [vmem:[#allocation32_spill] sm:$0xff]  ;;  %15361 = vst [vmem:[#allocation45_spill] sm:$0xff] %v9705_v4 }
 0x17b   : > { %15324 = vst [vmem:[#allocation10_spill] sm:$0xff] %v9443_v32  ;;  %v14325_v28 = vrot.slane %v9443_v32, 1  ;;  %v9452_v18 = vmul.f32 %v15326_v52, %v15327_v56  ;;  %6298 = vmatmul.mubr.msk.f32.gmra.mxu0 %vm5558_vm4, %v5523_v55  ;;  %v708_v57 = vsel %vm690_vm1, %v706_v58, %v14322_v3  ;;  %v1348_v33 = vmul.f32 %v15329_v9, %v15315_v22  ;;  %v9466_v47 = vld [vmem:[%s6732_s29 + $0xb0] sm:$0xff]  ;;  %v15333_v22 = vld [vmem:[#allocation62_spill] sm:$0xff] }
 0x17c   : > { %v1202_v23 = vrot.slane %v1100_v44, 1  ;;  %v9462_v11 = vmul.f32 %v15329_v9, %v15330_v43  ;;  %v3306_v48 = vadd.f32 %v9343_v49, %v3057_v63  ;;  %15332 = vst [vmem:[#allocation13_spill] sm:$0xff] %v9466_v47  ;;  %v560_v53 = vadd.f32 %v528_v17, %v488_v27 }
 0x17d   : > { %15328 = vst [vmem:[#allocation14_spill] sm:$0xff] %v9452_v18  ;;  %v956_v0 = vsel %vm690_vm1, %v954_v38, %v14325_v28  ;;  %v14329_v55 = vrot.slane %v9452_v18, 1  ;;  %v1450_v58 = vrot.slane %v1348_v33, 1  ;;  %v1596_v3 = vmul.f32 %v15333_v22, %v9395_v1 }
 0x17e   : > { %15331 = vst [vmem:[#allocation44_spill] sm:$0xff] %v9462_v11  ;;  %v14327_v44 = vrot.slane %v9462_v11, 1  ;;  %v9477_v59 = vmul.f32 %v15333_v22, %v9466_v47  ;;  %v3554_v49 = vadd.f32 %v9351_v60, %v3306_v48  ;;  %v809_v63 = vadd.f32 %v708_v57, %v560_v53 }
 0x17f   : > { %v1204_v17 = vsel %vm690_vm1, %v1202_v23, %v14329_v55  ;;  %v1844_v38 = vmul.f32 %v9406_v41, %v9069_v16  ;;  %v1698_v33 = vrot.slane %v1596_v3, 1  ;;  %v9491_v32 = vmul.f32 %v9069_v16, %v15320_v13  ;;  %v9516_v55 = vld [vmem:[%s6732_s29 + $0x90] sm:$0xff] }
 0x180   : > { %15334 = vst [vmem:[#allocation17_spill] sm:$0xff] %v9477_v59  ;;  %v1452_v27 = vsel %vm690_vm1, %v1450_v58, %v14327_v44  ;;  %v14328_v28 = vrot.slane %v9477_v59, 1  ;;  %v3802_v60 = vadd.f32 %v9366_v35, %v3554_v49  ;;  %v1057_v57 = vadd.f32 %v956_v0, %v809_v63  ;;  %15338 = vst [vmem:[#allocation59_spill] sm:$0xff] %v9516_v55 }
 0x181   : > { %15335 = vst [vmem:[#allocation42_spill] sm:$0xff] %v9491_v32  ;;  %v1947_v48 = vrot.slane %v1844_v38, 2  ;;  %v2093_v23 = vmul.f32 %v9411_v8, %v9091_v45  ;;  %v14331_v3 = vrot.slane %v9491_v32, 2  ;;  %v9502_v58 = vmul.f32 %v9091_v45, %v15323_v24 }
 0x182   : > { %v1700_v53 = vsel %vm690_vm1, %v1698_v33, %v14328_v28  ;;  %v2341_v44 = vmul.f32 %v9102_v26, %v15314_v42  ;;  %v4050_v35 = vadd.f32 %v9372_v25, %v3802_v60  ;;  %v1305_v0 = vadd.f32 %v1204_v17, %v1057_v57 }
 0x183   : > { %15336 = vst [vmem:[#allocation52_spill] sm:$0xff] %v9502_v58  ;;  %v2195_v49 = vrot.slane %v2093_v23, 2  ;;  %v9509_v63 = vmul.f32 %v9102_v26, %v15327_v56  ;;  %v1949_v38 = vsel %vm1931_vm2, %v1947_v48, %v14331_v3  ;;  %v14332_v33 = vrot.slane %v9502_v58, 2 }
 0x184   : > { %v2443_v28 = vrot.slane %v2341_v44, 2  ;;  %v2589_v59 = vmul.f32 %v9516_v55, %v9109_v20  ;;  %v4298_v25 = vadd.f32 %v9377_v5, %v4050_v35  ;;  %v1553_v17 = vadd.f32 %v1452_v27, %v1305_v0 }
 0x185   : > { %15337 = vst [vmem:[#allocation58_spill] sm:$0xff] %v9509_v63  ;;  %v14334_v60 = vrot.slane %v9509_v63, 2  ;;  %v9524_v57 = vmul.f32 %v9109_v20, %v15330_v43  ;;  %v2197_v48 = vsel %vm1931_vm2, %v2195_v49, %v14332_v33  ;;  %v2837_v44 = vmul.f32 %v9116_v2, %v9395_v1 }
 0x186   : > { %v2691_v23 = vrot.slane %v2589_v59, 2  ;;  %v9533_v3 = vmul.f32 %v9116_v2, %v9466_v47  ;;  %v4547_v5 = vadd.f32 %v9382_v36, %v4298_v25  ;;  %v1801_v27 = vadd.f32 %v1700_v53, %v1553_v17 }
 0x187   : > { %15339 = vst [vmem:[#allocation60_spill] sm:$0xff] %v9524_v57  ;;  %v2445_v43 = vsel %vm1931_vm2, %v2443_v28, %v14334_v60  ;;  %v14337_v35 = vrot.slane %v9524_v57, 2  ;;  %v2939_v0 = vrot.slane %v2837_v44, 2  ;;  %v3085_v59 = vmul.f32 %v9406_v41, %v9123_v19 }
 0x188   : > { %15340 = vst [vmem:[#allocation64_spill] sm:$0xff] %v9533_v3  ;;  %v14335_v49 = vrot.slane %v9533_v3, 2  ;;  %v9545_v33 = vmul.f32 %v9123_v19, %v15320_v13  ;;  %v4795_v58 = vadd.f32 %v9387_v40, %v4547_v5  ;;  %v2050_v36 = vadd.f32 %v1949_v38, %v1801_v27 }
 0x189   : > { %v2693_v53 = vsel %vm1931_vm2, %v2691_v23, %v14337_v35  ;;  %v3334_v28 = vmul.f32 %v9411_v8, %v15286_v10  ;;  %v3188_v17 = vrot.slane %v3085_v59, 3  ;;  %v9559_v60 = vmul.f32 %v15286_v10, %v15323_v24 }
 0x18a   : > { %15341 = vst [vmem:[#allocation29_spill] sm:$0xff] %v9545_v33  ;;  %v2941_v25 = vsel %vm1931_vm2, %v2939_v0, %v14335_v49  ;;  %v14336_v44 = vrot.slane %v9545_v33, 3  ;;  %v5043_v40 = vadd.f32 %v9401_v34, %v4795_v58  ;;  %v2298_v38 = vadd.f32 %v2197_v48, %v2050_v36  ;;  %v9576_v36 = vld [vmem:[%s6732_s29 + $0x98] sm:$0xff] }
 0x18b   : > { %15342 = vst [vmem:[#allocation6_spill] sm:$0xff] %v9559_v60  ;;  %v3436_v5 = vrot.slane %v3334_v28, 3  ;;  %v3582_v23 = vmul.f32 %v9160_v30, %v15314_v42  ;;  %v14339_v0 = vrot.slane %v9559_v60, 3  ;;  %v9570_v59 = vmul.f32 %v9160_v30, %v15327_v56  ;;  %15344 = vst [vmem:[#allocation36_spill] sm:$0xff] %v9576_v36  ;;  %v15356_v60 = vld [vmem:[#allocation2_spill] sm:$0xff] }
 0x18c   : > { %v3190_v27 = vsel %vm3172_vm3, %v3188_v17, %v14336_v44  ;;  %v3830_v49 = vmul.f32 %v9516_v55, %v9173_v50  ;;  %v5291_v34 = vadd.f32 %v9425_v37, %v5043_v40  ;;  %v2546_v58 = vadd.f32 %v2445_v43, %v2298_v38 }
 0x18d   : > { %15343 = vst [vmem:[#allocation30_spill] sm:$0xff] %v9570_v59  ;;  %v3684_v48 = vrot.slane %v3582_v23, 3  ;;  %v9580_v28 = vmul.f32 %v9576_v36, %v9173_v50  ;;  %v3438_v17 = vsel %vm3172_vm3, %v3436_v5, %v14339_v0  ;;  %v14341_v44 = vrot.slane %v9570_v59, 3 }
 0x18e   : > { %v3932_v35 = vrot.slane %v3830_v49, 3  ;;  %v4078_v33 = vmul.f32 %v9180_v6, %v9395_v1  ;;  %v5539_v37 = vadd.f32 %v9433_v14, %v5291_v34  ;;  %v2794_v43 = vadd.f32 %v2693_v53, %v2546_v58 }
 0x18f   : > { %15345 = vst [vmem:[#allocation39_spill] sm:$0xff] %v9580_v28  ;;  %v14340_v40 = vrot.slane %v9580_v28, 3  ;;  %v9592_v38 = vmul.f32 %v9180_v6, %v9466_v47  ;;  %v3686_v23 = vsel %vm3172_vm3, %v3684_v48, %v14341_v44  ;;  %v4326_v49 = vmul.f32 %v9406_v41, %v9187_v46  ;;  %v15355_v28 = vld [vmem:[#allocation21_spill] sm:$0xff] }
 0x190   : > { %v4180_v5 = vrot.slane %v4078_v33, 3  ;;  %v9601_v0 = vmul.f32 %v9187_v46, %v15320_v13  ;;  %6322 = vmatmul.mubr.msk.f32.gmra.mxu1 %vm5558_vm4, %v5539_v37  ;;  %v3042_v14 = vadd.f32 %v2941_v25, %v2794_v43  ;;  %v4575_v58 = vmul.f32 %v9411_v8, %v9194_v39 }
 0x191   : > { %15346 = vst [vmem:[#allocation41_spill] sm:$0xff] %v9592_v38  ;;  %v3934_v53 = vsel %vm3172_vm3, %v3932_v35, %v14340_v40  ;;  %v14345_v34 = vrot.slane %v9592_v38, 3  ;;  %v4429_v33 = vrot.slane %v4326_v49, 4  ;;  %v9613_v41 = vmul.f32 %v9194_v39, %v15323_v24 }
 0x192   : > { %15347 = vst [vmem:[#allocation19_spill] sm:$0xff] %v9601_v0  ;;  %v14344_v48 = vrot.slane %v9601_v0, 4  ;;  %v4823_v37 = vmul.f32 %v9202_v15, %v15314_v42  ;;  %v3291_v25 = vadd.f32 %v3190_v27, %v3042_v14  ;;  %v4677_v43 = vrot.slane %v4575_v58, 4  ;;  %v15354_v0 = vld [vmem:[#allocation12_spill] sm:$0xff] }
 0x193   : > { %15348 = vst [vmem:[#allocation43_spill] sm:$0xff] %v9613_v41  ;;  %v4182_v35 = vsel %vm3172_vm3, %v4180_v5, %v14345_v34  ;;  %v9622_v49 = vmul.f32 %v9202_v15, %v15327_v56  ;;  %v14350_v44 = vrot.slane %v9613_v41, 4  ;;  %v5071_v42 = vmul.f32 %v9516_v55, %v9225_v12 }
 0x194   : > { %v4431_v40 = vsel %vm4413_vm0, %v4429_v33, %v14344_v48  ;;  %v4925_v8 = vrot.slane %v4823_v37, 4  ;;  %v3539_v27 = vadd.f32 %v3438_v17, %v3291_v25  ;;  %v9633_v5 = vmul.f32 %v9576_v36, %v9225_v12  ;;  %v9645_v48 = vld [vmem:[%s6732_s29 + $0x168] sm:$0xff] }
 0x195   : > { %15349 = vst [vmem:[#allocation20_spill] sm:$0xff] %v9622_v49  ;;  %v14355_v14 = vrot.slane %v9622_v49, 4  ;;  %v5319_v56 = vmul.f32 %v9245_v21, %v9395_v1  ;;  %v4679_v58 = vsel %vm4413_vm0, %v4677_v43, %v14350_v44  ;;  %v5173_v33 = vrot.slane %v5071_v42, 4  ;;  %15352 = vst [vmem:[#allocation15_spill] sm:$0xff] %v9645_v48  ;;  %v9648_v17 = vld [vmem:[%s6732_s29 + $0x108] sm:$0xff]  ;;  %v9658_v44 = vld [vmem:[%s6732_s29 + $0x120] sm:$0xff] }
 0x196   : > { %15350 = vst [vmem:[#allocation46_spill] sm:$0xff] %v9633_v5  ;;  %v9642_v37 = vmul.f32 %v9245_v21, %v9466_v47  ;;  %v288_v25 = vmul.f32 %v9648_v17, %v8973_v54  ;;  %v3787_v34 = vadd.f32 %v3686_v23, %v3539_v27  ;;  %v14360_v55 = vrot.slane %v9633_v5, 4  ;;  %15353 = vst [vmem:[#allocation61_spill] sm:$0xff] %v9658_v44 }
 0x197   : > { %v4927_v1 = vsel %vm4413_vm0, %v4925_v8, %v14355_v14  ;;  %v5421_v43 = vrot.slane %v5319_v56, 4  ;;  %v328_v41 = vmul.f32 %v9658_v44, %v8986_v29  ;;  %v400_v38 = vmul.f32 %v9000_v51, %v15354_v0 }
 0x198   : > { %15351 = vst [vmem:[#allocation4_spill] sm:$0xff] %v9642_v37  ;;  %v14364_v42 = vrot.slane %v9642_v37, 4  ;;  %v472_v23 = vmul.f32 %v9010_v61, %v15355_v28  ;;  %v4035_v27 = vadd.f32 %v3934_v53, %v3787_v34  ;;  %v5175_v8 = vsel %vm4413_vm0, %v5173_v33, %v14360_v55  ;;  %v15357_v55 = vld [vmem:[#allocation28_spill] sm:$0xff] }
 0x199   : > { %v544_v56 = vmul.f32 %v9022_v31, %v9645_v48  ;;  %v627_v14 = vmul.f32 %v9648_v17, %v9029_v62  ;;  %v360_v59 = vadd.f32 %v328_v41, %v288_v25  ;;  %v9678_v3 = vmul.f32 %v15356_v60, %v9029_v62 }
 0x19a   : > { %v5423_v49 = vsel %vm4413_vm0, %v5421_v43, %v14364_v42  ;;  %v876_v53 = vmul.f32 %v9658_v44, %v15322_v7  ;;  %v4283_v34 = vadd.f32 %v4182_v35, %v4035_v27  ;;  %v9684_v5 = vmul.f32 %v15357_v55, %v15322_v7  ;;  %v15358_v43 = vld [vmem:[#allocation31_spill] sm:$0xff] }
 0x19b   : > { %v746_v33 = vrot.slane %v627_v14, 1  ;;  %v1124_v37 = vmul.f32 %v15326_v52, %v15354_v0  ;;  %v432_v57 = vadd.f32 %v400_v38, %v360_v59  ;;  %v14370_v41 = vrot.slane %v9678_v3, 1  ;;  %v15360_v38 = vld [vmem:[#allocation22_spill] sm:$0xff] }
 0x19c   : > { %v994_v25 = vrot.slane %v876_v53, 1  ;;  %v9691_v42 = vmul.f32 %v15326_v52, %v15358_v43  ;;  %v4532_v63 = vadd.f32 %v4431_v40, %v4283_v34  ;;  %v14372_v35 = vrot.slane %v9684_v5, 1 }
 0x19d   : > { %v1242_v14 = vrot.slane %v1124_v37, 1  ;;  %v1372_v27 = vmul.f32 %v15329_v9, %v15355_v28  ;;  %v504_v32 = vadd.f32 %v472_v23, %v432_v57  ;;  %v748_v11 = vsel %vm690_vm1, %v746_v33, %v14370_v41 }
 0x19e   : > { %15359 = vst [vmem:[#allocation63_spill] sm:$0xff] %v9691_v42  ;;  %v14371_v59 = vrot.slane %v9691_v42, 1  ;;  %v9702_v53 = vmul.f32 %v15329_v9, %v15360_v38  ;;  %v4780_v18 = vadd.f32 %v4679_v58, %v4532_v63  ;;  %v996_v40 = vsel %vm690_vm1, %v994_v25, %v14372_v35 }
 0x19f   : > { %v1490_v37 = vrot.slane %v1372_v27, 1  ;;  %v1620_v57 = vmul.f32 %v15333_v22, %v9645_v48  ;;  %v576_v23 = vadd.f32 %v544_v56, %v504_v32  ;;  %v9718_v63 = vmul.f32 %v15333_v22, %v9705_v4 }
 0x1a0   : > { %v1244_v34 = vsel %vm690_vm1, %v1242_v14, %v14371_v59  ;;  %v14374_v33 = vrot.slane %v9702_v53, 1  ;;  %v5028_v58 = vadd.f32 %v4927_v1, %v4780_v18  ;;  %v1868_v25 = vmul.f32 %v9648_v17, %v9069_v16 }
 0x1a1   : > { %v1738_v41 = vrot.slane %v1620_v57, 1  ;;  %v9724_v27 = vmul.f32 %v15356_v60, %v9069_v16  ;;  %v825_v32 = vadd.f32 %v748_v11, %v576_v23  ;;  %v14377_v14 = vrot.slane %v9718_v63, 1 }
 0x1a2   : > { %v1492_v56 = vsel %vm690_vm1, %v1490_v37, %v14374_v33  ;;  %v2117_v59 = vmul.f32 %v9658_v44, %v9091_v45  ;;  %v5276_v35 = vadd.f32 %v5175_v8, %v5028_v58  ;;  %v1987_v1 = vrot.slane %v1868_v25, 2 }
 0x1a3   : > { %15362 = vst [vmem:[#allocation47_spill] sm:$0xff] %v9724_v27  ;;  %v14376_v18 = vrot.slane %v9724_v27, 2  ;;  %v9735_v57 = vmul.f32 %v15357_v55, %v9091_v45  ;;  %v1073_v42 = vadd.f32 %v996_v40, %v825_v32  ;;  %v1740_v11 = vsel %vm690_vm1, %v1738_v41, %v14377_v14 }
 0x1a4   : > { %v2235_v23 = vrot.slane %v2117_v59, 2  ;;  %v2365_v37 = vmul.f32 %v9102_v26, %v15354_v0  ;;  %v5524_v33 = vadd.f32 %v5423_v49, %v5276_v35  ;;  %v9748_v25 = vmul.f32 %v9102_v26, %v15358_v43 }
 0x1a5   : > { %15363 = vst [vmem:[#allocation49_spill] sm:$0xff] %v9735_v57  ;;  %v1989_v8 = vsel %vm1931_vm2, %v1987_v1, %v14376_v18  ;;  %v14375_v58 = vrot.slane %v9735_v57, 2  ;;  %v1321_v40 = vadd.f32 %v1244_v34, %v1073_v42  ;;  %v2613_v41 = vmul.f32 %v9109_v20, %v15355_v28 }
 0x1a6   : > { %15364 = vst [vmem:[#allocation51_spill] sm:$0xff] %v9748_v25  ;;  %v2483_v32 = vrot.slane %v2365_v37, 2  ;;  %v9754_v59 = vmul.f32 %v9109_v20, %v15360_v38  ;;  %6300 = vmatprep.mubr.msk.f32.mxu0 %vm5558_vm4, %v5524_v33  ;;  %v14379_v35 = vrot.slane %v9748_v25, 2  ;;  %v2861_v1 = vmul.f32 %v9116_v2, %v9645_v48 }
 0x1a7   : > { %v2237_v49 = vsel %vm1931_vm2, %v2235_v23, %v14375_v58  ;;  %v9765_v42 = vmul.f32 %v9116_v2, %v9705_v4  ;;  %v1569_v28 = vadd.f32 %v1492_v56, %v1321_v40  ;;  %v2731_v34 = vrot.slane %v2613_v41, 2 }
 0x1a8   : > { %15365 = vst [vmem:[#allocation54_spill] sm:$0xff] %v9754_v59  ;;  %v14382_v37 = vrot.slane %v9754_v59, 2  ;;  %v3109_v33 = vmul.f32 %v9648_v17, %v9123_v19  ;;  %v2485_v23 = vsel %vm1931_vm2, %v2483_v32, %v14379_v35  ;;  %v2979_v58 = vrot.slane %v2861_v1, 2 }
 0x1a9   : > { %15366 = vst [vmem:[#allocation56_spill] sm:$0xff] %v9765_v42  ;;  %v14381_v18 = vrot.slane %v9765_v42, 2  ;;  %v9776_v14 = vmul.f32 %v15356_v60, %v9123_v19  ;;  %v1817_v57 = vadd.f32 %v1740_v11, %v1569_v28  ;;  %v3358_v41 = vmul.f32 %v9658_v44, %v15286_v10 }
 0x1aa   : > { %v2733_v56 = vsel %vm1931_vm2, %v2731_v34, %v14382_v37  ;;  %v3228_v40 = vrot.slane %v3109_v33, 3  ;;  %v9789_v35 = vmul.f32 %v15357_v55, %v15286_v10  ;;  %v3606_v11 = vmul.f32 %v9160_v30, %v15354_v0  ;;  %v9798_v33 = vld [vmem:[%s6732_s29 + $0x150] sm:$0xff] }
 0x1ab   : > { %15367 = vst [vmem:[#allocation7_spill] sm:$0xff] %v9776_v14  ;;  %v2981_v32 = vsel %vm1931_vm2, %v2979_v58, %v14381_v18  ;;  %v14387_v1 = vrot.slane %v9776_v14, 3  ;;  %v2066_v28 = vadd.f32 %v1989_v8, %v1817_v57  ;;  %v3476_v59 = vrot.slane %v3358_v41, 3  ;;  %15369 = vst [vmem:[#allocation9_spill] sm:$0xff] %v9798_v33 }
 0x1ac   : > { %15368 = vst [vmem:[#allocation57_spill] sm:$0xff] %v9789_v35  ;;  %v9795_v34 = vmul.f32 %v9160_v30, %v15358_v43  ;;  %v3854_v58 = vmul.f32 %v9798_v33, %v9173_v50  ;;  %v14388_v37 = vrot.slane %v9789_v35, 3  ;;  %v3724_v42 = vrot.slane %v3606_v11, 3 }
 0x1ad   : > { %v3230_v18 = vsel %vm3172_vm3, %v3228_v40, %v14387_v1  ;;  %v9808_v57 = vmul.f32 %v9173_v50, %v15360_v38  ;;  %v2314_v8 = vadd.f32 %v2237_v49, %v2066_v28  ;;  %v4102_v27 = vmul.f32 %v9180_v6, %v9645_v48 }
 0x1ae   : > { %v14391_v41 = vrot.slane %v9795_v34, 3  ;;  %v3972_v25 = vrot.slane %v3854_v58, 3  ;;  %v3478_v14 = vsel %vm3172_vm3, %v3476_v59, %v14388_v37  ;;  %v9819_v11 = vmul.f32 %v9180_v6, %v9705_v4 }
 0x1af   : > { %v14390_v40 = vrot.slane %v9808_v57, 3  ;;  %v4350_v38 = vmul.f32 %v9648_v17, %v9187_v46  ;;  %v2562_v49 = vadd.f32 %v2485_v23, %v2314_v8  ;;  %v4220_v58 = vrot.slane %v4102_v27, 3 }
 0x1b0   : > { %15370 = vst [vmem:[#allocation11_spill] sm:$0xff] %v9819_v11  ;;  %v3726_v28 = vsel %vm3172_vm3, %v3724_v42, %v14391_v41  ;;  %v9828_v1 = vmul.f32 %v15356_v60, %v9187_v46  ;;  %v14396_v37 = vrot.slane %v9819_v11, 3  ;;  %v4599_v17 = vmul.f32 %v9658_v44, %v9194_v39 }
 0x1b1   : > { %v3974_v59 = vsel %vm3172_vm3, %v3972_v25, %v14390_v40  ;;  %v4469_v35 = vrot.slane %v4350_v38, 4  ;;  %v2810_v23 = vadd.f32 %v2733_v56, %v2562_v49  ;;  %v9839_v27 = vmul.f32 %v15357_v55, %v9194_v39 }
 0x1b2   : > { %v14395_v8 = vrot.slane %v9828_v1, 4  ;;  %v4847_v42 = vmul.f32 %v9202_v15, %v15354_v0  ;;  %v4222_v25 = vsel %vm3172_vm3, %v4220_v58, %v14396_v37  ;;  %v4717_v40 = vrot.slane %v4599_v17, 4  ;;  %v9858_v58 = vld [vmem:[%s6732_s29 + $0x158] sm:$0xff] }
 0x1b3   : > { %15371 = vst [vmem:[#allocation16_spill] sm:$0xff] %v9839_v27  ;;  %v9848_v38 = vmul.f32 %v9202_v15, %v15358_v43  ;;  %v5095_v56 = vmul.f32 %v9798_v33, %v9225_v12  ;;  %v3058_v49 = vadd.f32 %v2981_v32, %v2810_v23  ;;  %v14397_v44 = vrot.slane %v9839_v27, 4  ;;  %15373 = vst [vmem:[#allocation33_spill] sm:$0xff] %v9858_v58  ;;  %v9886_v33 = vld [vmem:[%s6732_s29 + $0x80] sm:$0xff] }
 0x1b4   : > { %v4471_v41 = vsel %vm4413_vm0, %v4469_v35, %v14395_v8  ;;  %v4965_v0 = vrot.slane %v4847_v42, 4  ;;  %v9862_v43 = vmul.f32 %v9858_v58, %v9225_v12  ;;  %v5343_v32 = vmul.f32 %v9245_v21, %v9645_v48  ;;  %v9883_v48 = vld [vmem:[%s6732_s29 + $0xb8] sm:$0xf]  ;;  %15377 = vst [vmem:[#allocation37_spill] sm:$0xff] %v9886_v33 }
 0x1b5   : > { %15372 = vst [vmem:[#allocation18_spill] sm:$0xff] %v9848_v38  ;;  %v14402_v11 = vrot.slane %v9848_v38, 4  ;;  %v5213_v17 = vrot.slane %v5095_v56, 4  ;;  %v3307_v23 = vadd.f32 %v3230_v18, %v3058_v49  ;;  %v4719_v35 = vsel %vm4413_vm0, %v4717_v40, %v14397_v44  ;;  %15376 = vst [vmem:[#allocation35_spill] sm:$0xff] %v9883_v48  ;;  %v15385_v38 = vld [vmem:[#allocation14_spill] sm:$0xff] }
 0x1b6   : > { %15374 = vst [vmem:[#allocation5_spill] sm:$0xff] %v9862_v43  ;;  %v9871_v42 = vmul.f32 %v9245_v21, %v9705_v4  ;;  %v273_v8 = vmul.f32 %v15320_v13, %v8973_v54  ;;  %v14405_v37 = vrot.slane %v9862_v43, 4  ;;  %v5461_v18 = vrot.slane %v5343_v32, 4 }
 0x1b7   : > { %v4967_v56 = vsel %vm4413_vm0, %v4965_v0, %v14402_v11  ;;  %v313_v49 = vmul.f32 %v15323_v24, %v8986_v29  ;;  %v3555_v40 = vadd.f32 %v3478_v14, %v3307_v23  ;;  %v385_v54 = vmul.f32 %v9886_v33, %v9000_v51  ;;  %v6445_v24 = vld [vmem:[%s6732_s29 + $0x58] sm:$0xf]  ;;  %v9903_v51 = vld [vmem:[%s6732_s29 + $0x70] sm:$0xf] }
 0x1b8   : > { %15375 = vst [vmem:[#allocation34_spill] sm:$0xff] %v9871_v42  ;;  %v14408_v44 = vrot.slane %v9871_v42, 4  ;;  %v457_v13 = vmul.f32 %v9576_v36, %v9010_v61  ;;  %v5215_v0 = vsel %vm4413_vm0, %v5213_v17, %v14405_v37  ;;  %v529_v29 = vmul.f32 %v9022_v31, %v9466_v47  ;;  %15378 = vst [vmem:[#allocation27_spill] sm:$0xff] %v9903_v51  ;;  %v15379_v36 = vld [vmem:[#allocation26_spill] sm:$0xff]  ;;  %v15380_v37 = vld [vmem:[#allocation40_spill] sm:$0xff] }
 0x1b9   : > { %v345_v32 = vadd.f32 %v313_v49, %v273_v8  ;;  %v605_v14 = vmul.f32 %v6445_v24, %v9029_v62  ;;  %v3803_v23 = vadd.f32 %v3726_v28, %v3555_v40  ;;  %v854_v61 = vmul.f32 %v9903_v51, %v15322_v7  ;;  %v15381_v33 = vld [vmem:[#allocation8_spill] sm:$0xff] }
 0x1ba   : > { %v5463_v11 = vsel %vm4413_vm0, %v5461_v18, %v14408_v44  ;;  %v1102_v17 = vmul.f32 %v15379_v36, %v15326_v52  ;;  %v1350_v31 = vmul.f32 %v15329_v9, %v15380_v37  ;;  %v1598_v62 = vmul.f32 %v15333_v22, %v9883_v48 }
 0x1bb   : > { %v417_v8 = vadd.f32 %v385_v54, %v345_v32  ;;  %v709_v49 = vrot.slane %v605_v14, 1  ;;  %v4051_v28 = vadd.f32 %v3974_v59, %v3803_v23  ;;  %v957_v40 = vrot.slane %v854_v61, 1  ;;  %v15383_v32 = vld [vmem:[#allocation10_spill] sm:$0xff]  ;;  %v15387_v61 = vld [vmem:[#allocation44_spill] sm:$0xff] }
 0x1bc   : > { %v1205_v47 = vrot.slane %v1102_v17, 1  ;;  %v1846_v18 = vmul.f32 %v6445_v24, %v9069_v16  ;;  %v15382_v42 = vrot.slane %v15381_v33, 1  ;;  %v1453_v43 = vrot.slane %v1350_v31, 1  ;;  %v15389_v33 = vld [vmem:[#allocation17_spill] sm:$0xff] }
 0x1bd   : > { %v489_v44 = vadd.f32 %v457_v13, %v417_v8  ;;  %v1701_v52 = vrot.slane %v1598_v62, 1  ;;  %v4299_v54 = vadd.f32 %v4222_v25, %v4051_v28  ;;  %v15384_v14 = vrot.slane %v15383_v32, 1 }
 0x1be   : > { %v710_v7 = vsel %vm690_vm1, %v15382_v42, %v709_v49  ;;  %v15386_v27 = vrot.slane %v15385_v38, 1  ;;  %v1950_v59 = vrot.slane %v1846_v18, 2  ;;  %v15388_v16 = vrot.slane %v15387_v61, 1  ;;  %v15391_v49 = vld [vmem:[#allocation42_spill] sm:$0xff] }
 0x1bf   : > { %v958_v9 = vsel %vm690_vm1, %v15384_v14, %v957_v40  ;;  %v561_v23 = vadd.f32 %v529_v29, %v489_v44  ;;  %v15390_v17 = vrot.slane %v15389_v33, 1  ;;  %v2095_v25 = vmul.f32 %v9903_v51, %v9091_v45  ;;  %v15395_v14 = vld [vmem:[#allocation58_spill] sm:$0xff] }
 0x1c0   : > { %v1206_v22 = vsel %vm690_vm1, %v15386_v27, %v1205_v47  ;;  %v1454_v13 = vsel %vm690_vm1, %v15388_v16, %v1453_v43  ;;  %v4548_v8 = vadd.f32 %v4471_v41, %v4299_v54  ;;  %v15392_v31 = vrot.slane %v15391_v49, 2 }
 0x1c1   : > { %v1702_v42 = vsel %vm690_vm1, %v15390_v17, %v1701_v52  ;;  %v2343_v47 = vmul.f32 %v15379_v36, %v9102_v26  ;;  %v2591_v44 = vmul.f32 %v9109_v20, %v15380_v37  ;;  %v810_v27 = vadd.f32 %v710_v7, %v561_v23  ;;  %v15393_v52 = vld [vmem:[#allocation52_spill] sm:$0xff]  ;;  %v15401_v17 = vld [vmem:[#allocation29_spill] sm:$0xff] }
 0x1c2   : > { %v1951_v38 = vsel %vm1931_vm2, %v15392_v31, %v1950_v59  ;;  %v2198_v43 = vrot.slane %v2095_v25, 2  ;;  %v2839_v29 = vmul.f32 %v9116_v2, %v9883_v48  ;;  %v3087_v62 = vmul.f32 %v6445_v24, %v9123_v19  ;;  %v15397_v23 = vld [vmem:[#allocation60_spill] sm:$0xff]  ;;  %v15403_v31 = vld [vmem:[#allocation6_spill] sm:$0xff] }
 0x1c3   : > { %v4796_v28 = vadd.f32 %v4719_v35, %v4548_v8  ;;  %v2446_v45 = vrot.slane %v2343_v47, 2  ;;  %v2694_v41 = vrot.slane %v2591_v44, 2  ;;  %v3336_v40 = vmul.f32 %v9903_v51, %v15286_v10  ;;  %v15399_v10 = vld [vmem:[#allocation64_spill] sm:$0xff] }
 0x1c4   : > { %v1058_v18 = vadd.f32 %v958_v9, %v810_v27  ;;  %v15394_v54 = vrot.slane %v15393_v52, 2  ;;  %v2942_v32 = vrot.slane %v2839_v29, 2  ;;  %v3191_v20 = vrot.slane %v3087_v62, 3 }
 0x1c5   : > { %v5044_v7 = vadd.f32 %v4967_v56, %v4796_v28  ;;  %v15396_v59 = vrot.slane %v15395_v14, 2  ;;  %v15398_v19 = vrot.slane %v15397_v23, 2  ;;  %v3439_v61 = vrot.slane %v3336_v40, 3 }
 0x1c6   : > { %v2199_v26 = vsel %vm1931_vm2, %v15394_v54, %v2198_v43  ;;  %v1306_v16 = vadd.f32 %v1206_v22, %v1058_v18  ;;  %v15400_v9 = vrot.slane %v15399_v10, 2  ;;  %v15402_v25 = vrot.slane %v15401_v17, 3  ;;  %v15405_v18 = vld [vmem:[#allocation30_spill] sm:$0xff] }
 0x1c7   : > { %v2447_v2 = vsel %vm1931_vm2, %v15396_v59, %v2446_v45  ;;  %v9952_v35 = vsel %vm1931_vm2, %v15398_v19, %v2694_v41  ;;  %v3584_v8 = vmul.f32 %v15379_v36, %v9160_v30  ;;  %v5292_v49 = vadd.f32 %v5215_v0, %v5044_v7  ;;  %v15414_v59 = vld [vmem:[#allocation43_spill] sm:$0xff] }
 0x1c8   : > { %v9957_v33 = vsel %vm1931_vm2, %v15400_v9, %v2942_v32  ;;  %v9962_v56 = vsel %vm3172_vm3, %v15402_v25, %v3191_v20  ;;  %v15404_v47 = vrot.slane %v15403_v31, 3  ;;  %v3832_v22 = vmul.f32 %v9173_v50, %v15380_v37  ;;  %v15412_v20 = vld [vmem:[#allocation19_spill] sm:$0xff]  ;;  %v10028_v25 = vld [vmem:[%s13956_s1 + $0x5] ss:$0 sm:$0xff]  ;;  %v10033_v31 = vld [vmem:[%s6732_s29 + $0x178] sm:$0xf] }
 0x1c9   : > { %v4080_v27 = vmul.f32 %v9180_v6, %v9883_v48  ;;  %v1554_v43 = vadd.f32 %v1454_v13, %v1306_v16  ;;  %v3687_v29 = vrot.slane %v3584_v8, 3  ;;  %v4328_v62 = vmul.f32 %v6445_v24, %v9187_v46  ;;  %v15407_v46 = vld [vmem:[#allocation39_spill] sm:$0xff]  ;;  %v15416_v16 = vld [vmem:[#allocation20_spill] sm:$0xff]  ;;  %15418 = vst [vmem:[#allocation50_spill] sm:$0xff] %v10033_v31 }
 0x1ca   : > { %v9969_v44 = vsel %vm3172_vm3, %v15404_v47, %v3439_v61  ;;  %v4577_v30 = vmul.f32 %v9903_v51, %v9194_v39  ;;  %v5540_v0 = vadd.f32 %v5463_v11, %v5292_v49  ;;  %v3935_v28 = vrot.slane %v3832_v22, 3  ;;  %v15409_v11 = vld [vmem:[#allocation41_spill] sm:$0xff]  ;;  %v10038_v47 = vld [vmem:[%s13956_s1 + $0xa] ss:$0 sm:$0xff] }
 0x1cb   : > { %v4183_v45 = vrot.slane %v4080_v27, 3  ;;  %v4825_v41 = vmul.f32 %v15379_v36, %v9202_v15  ;;  %v1802_v40 = vadd.f32 %v1702_v42, %v1554_v43  ;;  %v15406_v50 = vrot.slane %v15405_v18, 3  ;;  %v9997_v36 = vld [vmem:[%s6732_s29 + $0xa0] sm:$0xf]  ;;  %v10048_v27 = vld [vmem:[%s13956_s1 + $0xf] ss:$0 sm:$0xff] }
 0x1cc   : > { %v4432_v6 = vrot.slane %v4328_v62, 4  ;;  %v4680_v13 = vrot.slane %v4577_v30, 4  ;;  %6324 = vmatprep.mubr.msk.f32.mxu1 %vm5558_vm4, %v5540_v0  ;;  %v15408_v24 = vrot.slane %v15407_v46, 3  ;;  %v15410_v52 = vrot.slane %v15409_v11, 3  ;;  %15411 = vst [vmem:[#allocation25_spill] sm:$0xff] %v9997_v36  ;;  %v15422_v18 = vld [vmem:[#allocation4_spill] sm:$0xff] }
 0x1cd   : > { %v9983_v37 = vsel %vm3172_vm3, %v15406_v50, %v3687_v29  ;;  %v4928_v15 = vrot.slane %v4825_v41, 4  ;;  %v5073_v42 = vmul.f32 %v9997_v36, %v9225_v12  ;;  %v2051_v32 = vadd.f32 %v1951_v38, %v1802_v40  ;;  %v10021_v38 = vld [vmem:[%s13956_s1] ss:$0 sm:$0xff]  ;;  %v10060_v30 = vld [vmem:[%s13956_s1 + $0x14] ss:$0 sm:$0xff] }
 0x1ce   : > { %v9989_v39 = vsel %vm3172_vm3, %v15408_v24, %v3935_v28  ;;  %v9994_v54 = vsel %vm3172_vm3, %v15410_v52, %v4183_v45  ;;  %v15413_v7 = vrot.slane %v15412_v20, 4  ;;  %v15415_v23 = vrot.slane %v15414_v59, 4  ;;  %v10067_v28 = vld [vmem:[%s13956_s1 + $0x1] ss:$0 sm:$0xff]  ;;  %v10070_v45 = vld [vmem:[%s6732_s29 + $0x118] sm:$0xf] }
 0x1cf   : > { %v5321_v61 = vmul.f32 %v9245_v21, %v9883_v48  ;;  %v15417_v10 = vrot.slane %v15416_v16, 4  ;;  %v5176_v12 = vrot.slane %v5073_v42, 4  ;;  %v289_v17 = vmul.f32 %v10021_v38, %v15356_v60  ;;  %v10041_v60 = vld [vmem:[%s6732_s29 + $0x140] sm:$0xff]  ;;  %v10085_v46 = vld [vmem:[%s6732_s29 + $0x130] sm:$0xf] }
 0x1d0   : > { %v10004_v14 = vsel %vm4413_vm0, %v15413_v7, %v4432_v6  ;;  %v10009_v19 = vsel %vm4413_vm0, %v15415_v23, %v4680_v13  ;;  %v329_v21 = vmul.f32 %v10028_v25, %v15357_v55  ;;  %v2299_v8 = vadd.f32 %v2199_v26, %v2051_v32  ;;  %15419 = vst [vmem:[#allocation3_spill] sm:$0xff] %v10041_v60  ;;  %v15420_v26 = vld [vmem:[#allocation46_spill] sm:$0xff]  ;;  %v10092_v11 = vld [vmem:[%s13956_s1 + $0xb] ss:$0 sm:$0xff]  ;;  %v10099_v32 = vld [vmem:[%s13956_s1 + $0x10] ss:$0 sm:$0xff] }
 0x1d1   : > { %v10016_v9 = vsel %vm4413_vm0, %v15417_v10, %v4928_v15  ;;  %v5424_v49 = vrot.slane %v5321_v61, 4  ;;  %v401_v22 = vmul.f32 %v10041_v60, %v10038_v47  ;;  %v473_v55 = vmul.f32 %v10048_v27, %v9858_v58  ;;  %v10082_v13 = vld [vmem:[%s13956_s1 + $0x6] ss:$0 sm:$0xff]  ;;  %15424 = vst [vmem:[#allocation38_spill] sm:$0xff] %v10085_v46  ;;  %15426 = vst [vmem:[#allocation23_spill] sm:$0xff] %v10099_v32  ;;  %v15427_v20 = vld [vmem:[#allocation48_spill] sm:$0xff] }
 0x1d2   : > { %v15421_v43 = vrot.slane %v15420_v26, 4  ;;  %v361_v62 = vadd.f32 %v329_v21, %v289_v17  ;;  %v545_v0 = vmul.f32 %v10060_v30, %v9705_v4  ;;  %v629_v41 = vmul.f32 %v10070_v45, %v10067_v28  ;;  %v10106_v59 = vld [vmem:[%s13956_s1 + $0x15] ss:$0 sm:$0xff]  ;;  %v10330_v58 = vld [vmem:[%s6732_s29 + $0x68] sm:$0xff] }
 0x1d3   : > { %v2547_v40 = vadd.f32 %v2447_v2, %v2299_v8  ;;  %v15423_v50 = vrot.slane %v15422_v18, 4  ;;  %v878_v24 = vmul.f32 %v10085_v46, %v10082_v13  ;;  %v15425_v2 = vld [vmem:[#allocation24_spill] sm:$0xff]  ;;  %v1374_v7 = vmul.f32 %v10099_v32, %v15427_v20  ;;  %15428 = vst [vmem:[#allocation32_spill] sm:$0xff] %v10106_v59 }
 0x1d4   : > { %v10055_v29 = vsel %vm4413_vm0, %v15421_v43, %v5176_v12  ;;  %v1126_v52 = vmul.f32 %v10092_v11, %v15425_v2  ;;  %v433_v15 = vadd.f32 %v401_v22, %v361_v62  ;;  %v749_v42 = vrot.slane %v629_v41, 1  ;;  %v10114_v12 = vld [vmem:[%s13956_s1 + $0x2] ss:$0 sm:$0xff]  ;;  %v15432_v41 = vld [vmem:[#allocation63_spill] sm:$0xff]  ;;  %v15444_v4 = vld [vmem:[#allocation56_spill] sm:$0xff] }
 0x1d5   : > { %v10077_v6 = vsel %vm4413_vm0, %v15423_v50, %v5424_v49  ;;  %v1622_v23 = vmul.f32 %v10106_v59, %v10033_v31  ;;  %v2795_v61 = vadd.f32 %v9952_v35, %v2547_v40  ;;  %v997_v16 = vrot.slane %v878_v24, 1  ;;  %15429 = vst [vmem:[#allocation62_spill] sm:$0xff] %v10114_v12 }
 0x1d6   : > { %v1245_v10 = vrot.slane %v1126_v52, 1  ;;  %v1870_v17 = vmul.f32 %v10114_v12, %v10070_v45  ;;  %v505_v21 = vadd.f32 %v473_v55, %v433_v15  ;;  %v15430_v8 = vrot.slane %v9678_v3, 1 }
 0x1d7   : > { %v1493_v22 = vrot.slane %v1374_v7, 1  ;;  %v1741_v26 = vrot.slane %v1622_v23, 1  ;;  %v3043_v43 = vadd.f32 %v9957_v33, %v2795_v61  ;;  %v15431_v35 = vrot.slane %v9684_v5, 1  ;;  %v10137_v5 = vld [vmem:[%s13956_s1 + $0x7] ss:$0 sm:$0xff]  ;;  %v15436_v7 = vld [vmem:[#allocation47_spill] sm:$0xff] }
 0x1d8   : > { %v750_v49 = vsel %vm690_vm1, %v15430_v8, %v749_v42  ;;  %v15433_v40 = vrot.slane %v15432_v41, 1  ;;  %v1990_v50 = vrot.slane %v1870_v17, 2  ;;  %v577_v24 = vadd.f32 %v545_v0, %v505_v21  ;;  %v10155_v61 = vld [vmem:[%s13956_s1 + $0x11] ss:$0 sm:$0xff]  ;;  %v10162_v17 = vld [vmem:[%s13956_s1 + $0x16] ss:$0 sm:$0xff] }
 0x1d9   : > { %v998_v62 = vsel %vm690_vm1, %v15431_v35, %v997_v16  ;;  %v15434_v55 = vrot.slane %v9702_v53, 1  ;;  %v15435_v52 = vrot.slane %v9718_v63, 1  ;;  %v2119_v33 = vmul.f32 %v10137_v5, %v10085_v46  ;;  %v10148_v63 = vld [vmem:[%s13956_s1 + $0xc] ss:$0 sm:$0xff]  ;;  %v10169_v8 = vld [vmem:[%s13956_s1 + $0x3] ss:$0 sm:$0xff] }
 0x1da   : > { %v1246_v18 = vsel %vm690_vm1, %v15433_v40, %v1245_v10  ;;  %v3292_v42 = vadd.f32 %v9962_v56, %v3043_v43  ;;  %v15437_v0 = vrot.slane %v15436_v7, 2  ;;  %v2367_v23 = vmul.f32 %v10148_v63, %v15425_v2  ;;  %v10177_v35 = vld [vmem:[%s13956_s1 + $0x8] ss:$0 sm:$0xff] }
 0x1db   : > { %v1494_v3 = vsel %vm690_vm1, %v15434_v55, %v1493_v22  ;;  %v1742_v15 = vsel %vm690_vm1, %v15435_v52, %v1741_v26  ;;  %v2615_v56 = vmul.f32 %v10155_v61, %v15427_v20  ;;  %v826_v16 = vadd.f32 %v750_v49, %v577_v24 }
 0x1dc   : > { %v1991_v53 = vsel %vm1931_vm2, %v15437_v0, %v1990_v50  ;;  %v2238_v10 = vrot.slane %v2119_v33, 2  ;;  %v2863_v21 = vmul.f32 %v10162_v17, %v10033_v31  ;;  %v3111_v22 = vmul.f32 %v10169_v8, %v10070_v45  ;;  %v15438_v50 = vld [vmem:[#allocation49_spill] sm:$0xff] }
 0x1dd   : > { %v3540_v26 = vadd.f32 %v9969_v44, %v3292_v42  ;;  %v2486_v49 = vrot.slane %v2367_v23, 2  ;;  %v2734_v43 = vrot.slane %v2615_v56, 2  ;;  %v3360_v41 = vmul.f32 %v10177_v35, %v10085_v46  ;;  %v15440_v44 = vld [vmem:[#allocation51_spill] sm:$0xff]  ;;  %v15442_v23 = vld [vmem:[#allocation54_spill] sm:$0xff] }
 0x1de   : > { %v1074_v40 = vadd.f32 %v998_v62, %v826_v16  ;;  %v15439_v24 = vrot.slane %v15438_v50, 2  ;;  %v2982_v52 = vrot.slane %v2863_v21, 2  ;;  %v3231_v33 = vrot.slane %v3111_v22, 3  ;;  %v10224_v50 = vld [vmem:[%s13956_s1 + $0x17] ss:$0 sm:$0xff] }
 0x1df   : > { %v3788_v7 = vadd.f32 %v9983_v37, %v3540_v26  ;;  %v15441_v42 = vrot.slane %v15440_v44, 2  ;;  %v15443_v56 = vrot.slane %v15442_v23, 2  ;;  %v3479_v36 = vrot.slane %v3360_v41, 3  ;;  %v10204_v37 = vld [vmem:[%s13956_s1 + $0xd] ss:$0 sm:$0xff] }
 0x1e0   : > { %v2239_v55 = vsel %vm1931_vm2, %v15439_v24, %v2238_v10  ;;  %v1322_v51 = vadd.f32 %v1246_v18, %v1074_v40  ;;  %v15445_v62 = vrot.slane %v15444_v4, 2  ;;  %v15446_v10 = vld [vmem:[#allocation7_spill] sm:$0xff]  ;;  %v3608_v26 = vmul.f32 %v10204_v37, %v15425_v2  ;;  %v10217_v41 = vld [vmem:[%s13956_s1 + $0x12] ss:$0 sm:$0xff] }
 0x1e1   : > { %v2487_v0 = vsel %vm1931_vm2, %v15441_v42, %v2486_v49  ;;  %v2735_v48 = vsel %vm1931_vm2, %v15443_v56, %v2734_v43  ;;  %v15447_v21 = vrot.slane %v15446_v10, 3  ;;  %v4036_v18 = vadd.f32 %v9989_v39, %v3788_v7  ;;  %v15448_v49 = vld [vmem:[#allocation57_spill] sm:$0xff]  ;;  %v10246_v42 = vld [vmem:[%s13956_s1 + $0xe] ss:$0 sm:$0xff] }
 0x1e2   : > { %v10194_v16 = vsel %vm1931_vm2, %v15445_v62, %v2982_v52  ;;  %v15449_v4 = vrot.slane %v15448_v49, 3  ;;  %v3856_v40 = vmul.f32 %v10217_v41, %v15427_v20  ;;  %v4104_v39 = vmul.f32 %v10224_v50, %v10033_v31  ;;  %v10238_v20 = vld [vmem:[%s13956_s1 + $0x9] ss:$0 sm:$0xff] }
 0x1e3   : > { %v10199_v22 = vsel %vm3172_vm3, %v15447_v21, %v3231_v33  ;;  %v1570_v24 = vadd.f32 %v1494_v3, %v1322_v51  ;;  %v3727_v52 = vrot.slane %v3608_v26, 3  ;;  %v4601_v7 = vmul.f32 %v10238_v20, %v10085_v46  ;;  %v15452_v49 = vld [vmem:[#allocation11_spill] sm:$0xff] }
 0x1e4   : > { %v10212_v43 = vsel %vm3172_vm3, %v15449_v4, %v3479_v36  ;;  %v10231_v36 = vld [vmem:[%s13956_s1 + $0x4] ss:$0 sm:$0xff]  ;;  %v4284_v44 = vadd.f32 %v9994_v54, %v4036_v18  ;;  %v3975_v51 = vrot.slane %v3856_v40, 3  ;;  %v4223_v3 = vrot.slane %v4104_v39, 3 }
 0x1e5   : > { %v4352_v33 = vmul.f32 %v10231_v36, %v10070_v45  ;;  %v4849_v45 = vmul.f32 %v10246_v42, %v15425_v2  ;;  %v1818_v23 = vadd.f32 %v1742_v15, %v1570_v24  ;;  %v15450_v56 = vrot.slane %v9795_v34, 3  ;;  %v15455_v24 = vld [vmem:[#allocation16_spill] sm:$0xff] }
 0x1e6   : > { %v4720_v21 = vrot.slane %v4601_v7, 4  ;;  %v4533_v54 = vadd.f32 %v10004_v14, %v4284_v44  ;;  %v15451_v26 = vrot.slane %v9808_v57, 3  ;;  %v15453_v4 = vrot.slane %v15452_v49, 3  ;;  %v15458_v7 = vld [vmem:[#allocation18_spill] sm:$0xff] }
 0x1e7   : > { %v10253_v62 = vsel %vm3172_vm3, %v15450_v56, %v3727_v52  ;;  %v4472_v10 = vrot.slane %v4352_v33, 4  ;;  %v4968_v15 = vrot.slane %v4849_v45, 4  ;;  %v2067_v34 = vadd.f32 %v1991_v53, %v1818_v23  ;;  %v10279_v52 = vld [vmem:[%s13956_s1 + $0x13] ss:$0 sm:$0xff]  ;;  %v10282_v33 = vld [vmem:[%s6732_s29 + $0x160] sm:$0xf] }
 0x1e8   : > { %v10259_v18 = vsel %vm3172_vm3, %v15451_v26, %v3975_v51  ;;  %v10264_v2 = vsel %vm3172_vm3, %v15453_v4, %v4223_v3  ;;  %v15454_v40 = vrot.slane %v9828_v1, 4  ;;  %v15456_v14 = vrot.slane %v15455_v24, 4  ;;  %15457 = vst [vmem:[#allocation12_spill] sm:$0xff] %v10282_v33  ;;  %v10295_v3 = vld [vmem:[%s13956_s1 + $0x18] ss:$0 sm:$0xff]  ;;  %v15460_v23 = vld [vmem:[#allocation55_spill] sm:$0xff] }
 0x1e9   : > { %v5097_v53 = vmul.f32 %v10282_v33, %v10279_v52  ;;  %v4781_v1 = vadd.f32 %v10009_v19, %v4533_v54  ;;  %v15459_v44 = vrot.slane %v15458_v7, 4  ;;  %v5345_v45 = vmul.f32 %v10295_v3, %v10033_v31  ;;  %v10302_v19 = vld [vmem:[%s6732_s29 + $0x78] sm:$0xff]  ;;  %v15462_v26 = vld [vmem:[#allocation59_spill] sm:$0xff] }
 0x1ea   : > { %v10269_v39 = vsel %vm4413_vm0, %v15454_v40, %v4472_v10  ;;  %v10274_v57 = vsel %vm4413_vm0, %v15456_v14, %v4720_v21  ;;  %v274_v56 = vmul.f32 %v10021_v38, %v15460_v23  ;;  %v2315_v10 = vadd.f32 %v2239_v55, %v2067_v34  ;;  %15461 = vst [vmem:[#allocation21_spill] sm:$0xff] %v10302_v19  ;;  %v15463_v40 = vld [vmem:[#allocation53_spill] sm:$0xff]  ;;  %v10312_v14 = vld [vmem:[%s6732_s29 + $0xc0] sm:$0xff] }
 0x1eb   : > { %v10290_v51 = vsel %vm4413_vm0, %v15459_v44, %v4968_v15  ;;  %v5216_v21 = vrot.slane %v5097_v53, 4  ;;  %v314_v54 = vmul.f32 %v10302_v19, %v10028_v25  ;;  %v386_v49 = vmul.f32 %v10038_v47, %v15462_v26  ;;  %15464 = vst [vmem:[#allocation2_spill] sm:$0xff] %v10312_v14  ;;  %v15465_v53 = vld [vmem:[#allocation5_spill] sm:$0xff] }
 0x1ec   : > { %v5029_v4 = vadd.f32 %v10016_v9, %v4781_v1  ;;  %v5464_v15 = vrot.slane %v5345_v45, 4  ;;  %v458_v24 = vmul.f32 %v10048_v27, %v15463_v40  ;;  %v530_v55 = vmul.f32 %v10312_v14, %v10060_v30  ;;  %v15467_v1 = vld [vmem:[#allocation34_spill] sm:$0xff] }
 0x1ed   : > { %v2563_v34 = vadd.f32 %v2487_v0, %v2315_v10  ;;  %v15466_v7 = vrot.slane %v15465_v53, 4  ;;  %v346_v31 = vadd.f32 %v314_v54, %v274_v56  ;;  %v606_v33 = vmul.f32 %v10067_v28, %v15460_v23  ;;  %v15470_v53 = vld [vmem:[#allocation37_spill] sm:$0xff] }
 0x1ee   : > { %v5277_v9 = vadd.f32 %v10055_v29, %v5029_v4  ;;  %v15468_v45 = vrot.slane %v15467_v1, 4  ;;  %v10334_v0 = vmul.f32 %v10330_v58, %v10067_v28  ;;  %v855_v10 = vmul.f32 %v10302_v19, %v10082_v13 }
 0x1ef   : > { %v10319_v44 = vsel %vm4413_vm0, %v15466_v7, %v5216_v21  ;;  %v2811_v56 = vadd.f32 %v2735_v48, %v2563_v34  ;;  %v418_v21 = vadd.f32 %v386_v49, %v346_v31  ;;  %v711_v54 = vrot.slane %v606_v33, 1  ;;  %v15472_v31 = vld [vmem:[#allocation36_spill] sm:$0xff] }
 0x1f0   : > { %v10327_v46 = vsel %vm4413_vm0, %v15468_v45, %v5464_v15  ;;  %15469 = vst [vmem:[#allocation28_spill] sm:$0xff] %v10334_v0  ;;  %v10340_v29 = vmul.f32 %v10082_v13, %v15470_v53  ;;  %v5525_v4 = vadd.f32 %v10077_v6, %v5277_v9  ;;  %v14433_v15 = vrot.slane %v10334_v0, 1  ;;  %v15474_v9 = vld [vmem:[#allocation13_spill] sm:$0xff]  ;;  %v10602_v0 = vld [vmem:[%s6732_s29 + $0x188] sm:$0xff] }
 0x1f1   : > { %v959_v7 = vrot.slane %v855_v10, 1  ;;  %v1103_v1 = vmul.f32 %v10092_v11, %v15462_v26  ;;  %v3059_v45 = vadd.f32 %v10194_v16, %v2811_v56  ;;  %v490_v60 = vadd.f32 %v458_v24, %v418_v21 }
 0x1f2   : > { %15471 = vst [vmem:[#allocation31_spill] sm:$0xff] %v10340_v29  ;;  %v14434_v48 = vrot.slane %v10340_v29, 1  ;;  %v10350_v33 = vmul.f32 %v10092_v11, %v15472_v31  ;;  %6301 = vmatmul.mubr.msk.f32.gmra.mxu0 %vm5558_vm4, %v5525_v4  ;;  %v713_v6 = vsel %vm690_vm1, %v711_v54, %v14433_v15  ;;  %v1351_v34 = vmul.f32 %v10099_v32, %v15463_v40  ;;  %v10371_v40 = vld [vmem:[%s6732_s29 + $0xc8] sm:$0xff] }
 0x1f3   : > { %v1207_v49 = vrot.slane %v1103_v1, 1  ;;  %v10360_v16 = vmul.f32 %v10099_v32, %v15474_v9  ;;  %v3308_v24 = vadd.f32 %v10199_v22, %v3059_v45  ;;  %v562_v10 = vadd.f32 %v530_v55, %v490_v60  ;;  %15476 = vst [vmem:[#allocation40_spill] sm:$0xff] %v10371_v40 }
 0x1f4   : > { %15473 = vst [vmem:[#allocation22_spill] sm:$0xff] %v10350_v33  ;;  %v961_v56 = vsel %vm690_vm1, %v959_v7, %v14434_v48  ;;  %v14438_v21 = vrot.slane %v10350_v33, 1  ;;  %v1455_v4 = vrot.slane %v1351_v34, 1  ;;  %v1599_v1 = vmul.f32 %v10312_v14, %v10106_v59 }
 0x1f5   : > { %15475 = vst [vmem:[#allocation26_spill] sm:$0xff] %v10360_v16  ;;  %v14437_v54 = vrot.slane %v10360_v16, 1  ;;  %v10375_v15 = vmul.f32 %v10371_v40, %v10106_v59  ;;  %v3556_v60 = vadd.f32 %v10212_v43, %v3308_v24  ;;  %v811_v22 = vadd.f32 %v713_v6, %v562_v10 }
 0x1f6   : > { %v1209_v55 = vsel %vm690_vm1, %v1207_v49, %v14438_v21  ;;  %v1847_v7 = vmul.f32 %v10114_v12, %v15460_v23  ;;  %v1703_v34 = vrot.slane %v1599_v1, 1  ;;  %v10389_v29 = vmul.f32 %v10330_v58, %v10114_v12 }
 0x1f7   : > { %15477 = vst [vmem:[#allocation8_spill] sm:$0xff] %v10375_v15  ;;  %v1457_v45 = vsel %vm690_vm1, %v1455_v4, %v14437_v54  ;;  %v14436_v48 = vrot.slane %v10375_v15, 1  ;;  %v3804_v43 = vadd.f32 %v10253_v62, %v3556_v60  ;;  %v1059_v6 = vadd.f32 %v961_v56, %v811_v22  ;;  %v10414_v54 = vld [vmem:[%s6732_s29 + $0xa8] sm:$0xff] }
 0x1f8   : > { %15478 = vst [vmem:[#allocation10_spill] sm:$0xff] %v10389_v29  ;;  %v1952_v24 = vrot.slane %v1847_v7, 2  ;;  %v2096_v49 = vmul.f32 %v10302_v19, %v10137_v5  ;;  %v14439_v10 = vrot.slane %v10389_v29, 2  ;;  %v10400_v4 = vmul.f32 %v10137_v5, %v15470_v53  ;;  %15481 = vst [vmem:[#allocation17_spill] sm:$0xff] %v10414_v54 }
 0x1f9   : > { %v1705_v23 = vsel %vm690_vm1, %v1703_v34, %v14436_v48  ;;  %v2344_v1 = vmul.f32 %v10148_v63, %v15462_v26  ;;  %v4052_v62 = vadd.f32 %v10259_v18, %v3804_v43  ;;  %v1307_v56 = vadd.f32 %v1209_v55, %v1059_v6 }
 0x1fa   : > { %15479 = vst [vmem:[#allocation14_spill] sm:$0xff] %v10400_v4  ;;  %v2200_v60 = vrot.slane %v2096_v49, 2  ;;  %v10407_v22 = vmul.f32 %v10148_v63, %v15472_v31  ;;  %v1954_v7 = vsel %vm1931_vm2, %v1952_v24, %v14439_v10  ;;  %v14441_v34 = vrot.slane %v10400_v4, 2 }
 0x1fb   : > { %v2448_v48 = vrot.slane %v2344_v1, 2  ;;  %v2592_v21 = vmul.f32 %v10414_v54, %v10155_v61  ;;  %v4300_v18 = vadd.f32 %v10264_v2, %v4052_v62  ;;  %v1555_v55 = vadd.f32 %v1457_v45, %v1307_v56 }
 0x1fc   : > { %15480 = vst [vmem:[#allocation44_spill] sm:$0xff] %v10407_v22  ;;  %v14444_v43 = vrot.slane %v10407_v22, 2  ;;  %v10422_v6 = vmul.f32 %v10155_v61, %v15474_v9  ;;  %v2202_v24 = vsel %vm1931_vm2, %v2200_v60, %v14441_v34  ;;  %v2840_v1 = vmul.f32 %v10312_v14, %v10162_v17 }
 0x1fd   : > { %v2696_v49 = vrot.slane %v2592_v21, 2  ;;  %v10431_v10 = vmul.f32 %v10371_v40, %v10162_v17  ;;  %v4549_v2 = vadd.f32 %v10269_v39, %v4300_v18  ;;  %v1803_v45 = vadd.f32 %v1705_v23, %v1555_v55  ;;  %v6482_v21 = vld [vmem:[%s6732_s29 + $0x60] sm:$0xff] }
 0x1fe   : > { %15482 = vst [vmem:[#allocation42_spill] sm:$0xff] %v10422_v6  ;;  %v2450_v62 = vsel %vm1931_vm2, %v2448_v48, %v14444_v43  ;;  %v14447_v56 = vrot.slane %v10422_v6, 2  ;;  %v2944_v4 = vrot.slane %v2840_v1, 2  ;;  %v3088_v34 = vmul.f32 %v6482_v21, %v10169_v8 }
 0x1ff   : > { %15483 = vst [vmem:[#allocation52_spill] sm:$0xff] %v10431_v10  ;;  %v14445_v60 = vrot.slane %v10431_v10, 2  ;;  %v10443_v29 = vmul.f32 %v10330_v58, %v10169_v8  ;;  %v4797_v15 = vadd.f32 %v10274_v57, %v4549_v2  ;;  %v2052_v39 = vadd.f32 %v1954_v7, %v1803_v45 }
 0x200   : > { %v2698_v23 = vsel %vm1931_vm2, %v2696_v49, %v14447_v56  ;;  %v3337_v48 = vmul.f32 %v10302_v19, %v10177_v35  ;;  %v3193_v55 = vrot.slane %v3088_v34, 3  ;;  %v10457_v43 = vmul.f32 %v10177_v35, %v15470_v53 }
 0x201   : > { %15484 = vst [vmem:[#allocation58_spill] sm:$0xff] %v10443_v29  ;;  %v2946_v18 = vsel %vm1931_vm2, %v2944_v4, %v14445_v60  ;;  %v14446_v1 = vrot.slane %v10443_v29, 3  ;;  %v5045_v57 = vadd.f32 %v10290_v51, %v4797_v15  ;;  %v2300_v7 = vadd.f32 %v2202_v24, %v2052_v39 }
 0x202   : > { %15485 = vst [vmem:[#allocation60_spill] sm:$0xff] %v10457_v43  ;;  %v3441_v2 = vrot.slane %v3337_v48, 3  ;;  %v3585_v49 = vmul.f32 %v10204_v37, %v15462_v26  ;;  %v14454_v4 = vrot.slane %v10457_v43, 3  ;;  %v10468_v34 = vmul.f32 %v10204_v37, %v15472_v31 }
 0x203   : > { %v3195_v45 = vsel %vm3172_vm3, %v3193_v55, %v14446_v1  ;;  %v3833_v60 = vmul.f32 %v10414_v54, %v10217_v41  ;;  %v5293_v51 = vadd.f32 %v10319_v44, %v5045_v57  ;;  %v2548_v15 = vadd.f32 %v2450_v62, %v2300_v7 }
 0x204   : > { %15486 = vst [vmem:[#allocation64_spill] sm:$0xff] %v10468_v34  ;;  %v3689_v24 = vrot.slane %v3585_v49, 3  ;;  %v10475_v39 = vmul.f32 %v10217_v41, %v15474_v9  ;;  %v3443_v48 = vsel %vm3172_vm3, %v3441_v2, %v14454_v4  ;;  %v14453_v55 = vrot.slane %v10468_v34, 3 }
 0x205   : > { %v3937_v1 = vrot.slane %v3833_v60, 3  ;;  %v4081_v56 = vmul.f32 %v10312_v14, %v10224_v50  ;;  %v5541_v29 = vadd.f32 %v10327_v46, %v5293_v51  ;;  %v2796_v10 = vadd.f32 %v2698_v23, %v2548_v15 }
 0x206   : > { %15487 = vst [vmem:[#allocation29_spill] sm:$0xff] %v10475_v39  ;;  %v14450_v44 = vrot.slane %v10475_v39, 3  ;;  %v10487_v62 = vmul.f32 %v10371_v40, %v10224_v50  ;;  %v3691_v9 = vsel %vm3172_vm3, %v3689_v24, %v14453_v55  ;;  %v4329_v7 = vmul.f32 %v6482_v21, %v10231_v36  ;;  %v10571_v39 = vld [vmem:[%s6732_s29 + $0x128] sm:$0xff] }
 0x207   : > { %v4185_v57 = vrot.slane %v4081_v56, 3  ;;  %v10495_v60 = vmul.f32 %v10330_v58, %v10231_v36  ;;  %6325 = vmatmul.mubr.msk.f32.gmra.mxu1 %vm5558_vm4, %v5541_v29  ;;  %v3044_v46 = vadd.f32 %v2946_v18, %v2796_v10  ;;  %v4578_v49 = vmul.f32 %v10302_v19, %v10238_v20  ;;  %v15498_v19 = vld [vmem:[#allocation9_spill] sm:$0xff] }
 0x208   : > { %15488 = vst [vmem:[#allocation6_spill] sm:$0xff] %v10487_v62  ;;  %v3939_v23 = vsel %vm3172_vm3, %v3937_v1, %v14450_v44  ;;  %v14452_v2 = vrot.slane %v10487_v62, 3  ;;  %v4434_v56 = vrot.slane %v4329_v7, 4  ;;  %v10507_v51 = vmul.f32 %v10238_v20, %v15470_v53 }
 0x209   : > { %15489 = vst [vmem:[#allocation30_spill] sm:$0xff] %v10495_v60  ;;  %v14451_v21 = vrot.slane %v10495_v60, 4  ;;  %v4826_v29 = vmul.f32 %v10246_v42, %v15462_v26  ;;  %v3293_v10 = vadd.f32 %v3195_v45, %v3044_v46  ;;  %v4682_v1 = vrot.slane %v4578_v49, 4  ;;  %v15499_v60 = vld [vmem:[#allocation15_spill] sm:$0xff] }
 0x20a   : > { %15490 = vst [vmem:[#allocation39_spill] sm:$0xff] %v10507_v51  ;;  %v4187_v18 = vsel %vm3172_vm3, %v4185_v57, %v14452_v2  ;;  %v10516_v15 = vmul.f32 %v10246_v42, %v15472_v31  ;;  %v14459_v7 = vrot.slane %v10507_v51, 4  ;;  %v5074_v26 = vmul.f32 %v10414_v54, %v10279_v52  ;;  %v10526_v57 = vld [vmem:[%s6732_s29 + $0xb0] sm:$0xff] }
 0x20b   : > { %v4436_v24 = vsel %vm4413_vm0, %v4434_v56, %v14451_v21  ;;  %v4930_v44 = vrot.slane %v4826_v29, 4  ;;  %v3541_v45 = vadd.f32 %v3443_v48, %v3293_v10  ;;  %15492 = vst [vmem:[#allocation19_spill] sm:$0xff] %v10526_v57  ;;  %v10530_v31 = vmul.f32 %v10526_v57, %v10279_v52  ;;  %v10542_v48 = vld [vmem:[%s6732_s29 + $0x180] sm:$0xff]  ;;  %v15496_v10 = vld [vmem:[#allocation61_spill] sm:$0xff] }
 0x20c   : > { %15491 = vst [vmem:[#allocation41_spill] sm:$0xff] %v10516_v15  ;;  %v14464_v46 = vrot.slane %v10516_v15, 4  ;;  %v5322_v49 = vmul.f32 %v10312_v14, %v10295_v3  ;;  %v4684_v56 = vsel %vm4413_vm0, %v4682_v1, %v14459_v7  ;;  %v5178_v29 = vrot.slane %v5074_v26, 4  ;;  %15495 = vst [vmem:[#allocation46_spill] sm:$0xff] %v10542_v48  ;;  %v10552_v26 = vld [vmem:[%s6732_s29 + $0x138] sm:$0xff] }
 0x20d   : > { %15493 = vst [vmem:[#allocation43_spill] sm:$0xff] %v10530_v31  ;;  %v10539_v21 = vmul.f32 %v10371_v40, %v10295_v3  ;;  %v290_v2 = vmul.f32 %v10021_v38, %v15496_v10  ;;  %v3789_v55 = vadd.f32 %v3691_v9, %v3541_v45  ;;  %v14468_v14 = vrot.slane %v10530_v31, 4  ;;  %15497 = vst [vmem:[#allocation4_spill] sm:$0xff] %v10552_v26  ;;  %v15501_v31 = vld [vmem:[#allocation3_spill] sm:$0xff] }
 0x20e   : > { %v4932_v4 = vsel %vm4413_vm0, %v4930_v44, %v14464_v46  ;;  %v5426_v54 = vrot.slane %v5322_v49, 4  ;;  %v330_v7 = vmul.f32 %v10552_v26, %v10028_v25  ;;  %v402_v51 = vmul.f32 %v10038_v47, %v15498_v19 }
 0x20f   : > { %15494 = vst [vmem:[#allocation20_spill] sm:$0xff] %v10539_v21  ;;  %v14471_v1 = vrot.slane %v10539_v21, 4  ;;  %v474_v9 = vmul.f32 %v10048_v27, %v15499_v60  ;;  %v4037_v45 = vadd.f32 %v3939_v23, %v3789_v55  ;;  %v5180_v44 = vsel %vm4413_vm0, %v5178_v29, %v14468_v14  ;;  %v15503_v21 = vld [vmem:[#allocation33_spill] sm:$0xff] }
 0x210   : > { %v546_v49 = vmul.f32 %v10060_v30, %v10542_v48  ;;  %v630_v46 = vmul.f32 %v10067_v28, %v15496_v10  ;;  %v362_v62 = vadd.f32 %v330_v7, %v290_v2  ;;  %v10575_v55 = vmul.f32 %v10571_v39, %v10067_v28 }
 0x211   : > { %v5428_v15 = vsel %vm4413_vm0, %v5426_v54, %v14471_v1  ;;  %v879_v23 = vmul.f32 %v10552_v26, %v10082_v13  ;;  %v4285_v29 = vadd.f32 %v4187_v18, %v4037_v45  ;;  %v10581_v34 = vmul.f32 %v10082_v13, %v15501_v31 }
 0x212   : > { %15500 = vst [vmem:[#allocation24_spill] sm:$0xff] %v10575_v55  ;;  %v751_v14 = vrot.slane %v630_v46, 1  ;;  %v1127_v54 = vmul.f32 %v10092_v11, %v15498_v19  ;;  %v434_v2 = vadd.f32 %v402_v51, %v362_v62  ;;  %v14479_v7 = vrot.slane %v10575_v55, 1  ;;  %v15505_v51 = vld [vmem:[#allocation45_spill] sm:$0xff] }
 0x213   : > { %15502 = vst [vmem:[#allocation48_spill] sm:$0xff] %v10581_v34  ;;  %v999_v1 = vrot.slane %v879_v23, 1  ;;  %v10588_v43 = vmul.f32 %v10092_v11, %v15503_v21  ;;  %v4534_v6 = vadd.f32 %v4436_v24, %v4285_v29  ;;  %v14481_v18 = vrot.slane %v10581_v34, 1 }
 0x214   : > { %v1247_v46 = vrot.slane %v1127_v54, 1  ;;  %v1375_v45 = vmul.f32 %v10099_v32, %v15499_v60  ;;  %v506_v22 = vadd.f32 %v474_v9, %v434_v2  ;;  %v753_v16 = vsel %vm690_vm1, %v751_v14, %v14479_v7 }
 0x215   : > { %15504 = vst [vmem:[#allocation63_spill] sm:$0xff] %v10588_v43  ;;  %v14480_v62 = vrot.slane %v10588_v43, 1  ;;  %v10599_v23 = vmul.f32 %v10099_v32, %v15505_v51  ;;  %v4782_v33 = vadd.f32 %v4684_v56, %v4534_v6  ;;  %v1001_v24 = vsel %vm690_vm1, %v999_v1, %v14481_v18  ;;  %v15531_v43 = vld [vmem:[#allocation31_spill] sm:$0xff] }
 0x216   : > { %v1495_v29 = vrot.slane %v1375_v45, 1  ;;  %v1623_v9 = vmul.f32 %v10106_v59, %v10542_v48  ;;  %v578_v54 = vadd.f32 %v546_v49, %v506_v22  ;;  %v10615_v6 = vmul.f32 %v10106_v59, %v10602_v0 }
 0x217   : > { %15506 = vst [vmem:[#allocation47_spill] sm:$0xff] %v10599_v23  ;;  %v1249_v14 = vsel %vm690_vm1, %v1247_v46, %v14480_v62  ;;  %v14482_v2 = vrot.slane %v10599_v23, 1  ;;  %v5030_v56 = vadd.f32 %v4932_v4, %v4782_v33  ;;  %v1871_v1 = vmul.f32 %v10114_v12, %v15496_v10 }
 0x218   : > { %15507 = vst [vmem:[#allocation49_spill] sm:$0xff] %v10615_v6  ;;  %v1743_v7 = vrot.slane %v1623_v9, 1  ;;  %v10621_v45 = vmul.f32 %v10571_v39, %v10114_v12  ;;  %v827_v22 = vadd.f32 %v753_v16, %v578_v54  ;;  %v14485_v46 = vrot.slane %v10615_v6, 1 }
 0x219   : > { %v1497_v49 = vsel %vm690_vm1, %v1495_v29, %v14482_v2  ;;  %v2120_v62 = vmul.f32 %v10552_v26, %v10137_v5  ;;  %v5278_v18 = vadd.f32 %v5180_v44, %v5030_v56  ;;  %v1992_v33 = vrot.slane %v1871_v1, 2 }
 0x21a   : > { %15508 = vst [vmem:[#allocation51_spill] sm:$0xff] %v10621_v45  ;;  %v14483_v4 = vrot.slane %v10621_v45, 2  ;;  %v10632_v10 = vmul.f32 %v10137_v5, %v15501_v31  ;;  %v1075_v9 = vadd.f32 %v1001_v24, %v827_v22  ;;  %v1745_v16 = vsel %vm690_vm1, %v1743_v7, %v14485_v46 }
 0x21b   : > { %v2240_v54 = vrot.slane %v2120_v62, 2  ;;  %v2368_v29 = vmul.f32 %v10148_v63, %v15498_v19  ;;  %v5526_v2 = vadd.f32 %v5428_v15, %v5278_v18  ;;  %v10645_v1 = vmul.f32 %v10148_v63, %v15503_v21 }
 0x21c   : > { %15509 = vst [vmem:[#allocation54_spill] sm:$0xff] %v10632_v10  ;;  %v1994_v44 = vsel %vm1931_vm2, %v1992_v33, %v14483_v4  ;;  %v14484_v56 = vrot.slane %v10632_v10, 2  ;;  %v1323_v24 = vadd.f32 %v1249_v14, %v1075_v9  ;;  %v2616_v7 = vmul.f32 %v10155_v61, %v15499_v60  ;;  %v6486_v4 = vld [vmem:[%s6732_s29 + $0x120] sm:$0xff] }
 0x21d   : > { %15510 = vst [vmem:[#allocation56_spill] sm:$0xff] %v10645_v1  ;;  %v2488_v22 = vrot.slane %v2368_v29, 2  ;;  %v10651_v62 = vmul.f32 %v10155_v61, %v15505_v51  ;;  %6303 = vmatprep.mubr.msk.f32.mxu0 %vm5558_vm4, %v5526_v2  ;;  %v14488_v18 = vrot.slane %v10645_v1, 2  ;;  %v2864_v33 = vmul.f32 %v10162_v17, %v10542_v48 }
 0x21e   : > { %v2242_v15 = vsel %vm1931_vm2, %v2240_v54, %v14484_v56  ;;  %v10662_v14 = vmul.f32 %v10162_v17, %v10602_v0  ;;  %v1571_v60 = vadd.f32 %v1497_v49, %v1323_v24  ;;  %v2736_v9 = vrot.slane %v2616_v7, 2 }
 0x21f   : > { %15511 = vst [vmem:[#allocation7_spill] sm:$0xff] %v10651_v62  ;;  %v14491_v29 = vrot.slane %v10651_v62, 2  ;;  %v3112_v2 = vmul.f32 %v6486_v4, %v10169_v8  ;;  %v2490_v54 = vsel %vm1931_vm2, %v2488_v22, %v14488_v18  ;;  %v2984_v56 = vrot.slane %v2864_v33, 2 }
 0x220   : > { %15512 = vst [vmem:[#allocation57_spill] sm:$0xff] %v10662_v14  ;;  %v14490_v46 = vrot.slane %v10662_v14, 2  ;;  %v10673_v10 = vmul.f32 %v10571_v39, %v10169_v8  ;;  %v1819_v45 = vadd.f32 %v1745_v16, %v1571_v60  ;;  %v3361_v7 = vmul.f32 %v10552_v26, %v10177_v35 }
 0x221   : > { %v2738_v49 = vsel %vm1931_vm2, %v2736_v9, %v14491_v29  ;;  %v3233_v24 = vrot.slane %v3112_v2, 3  ;;  %v10686_v18 = vmul.f32 %v10177_v35, %v15501_v31  ;;  %v3609_v16 = vmul.f32 %v10204_v37, %v15498_v19  ;;  %v10695_v2 = vld [vmem:[%s6732_s29 + $0x168] sm:$0xff] }
 0x222   : > { %15513 = vst [vmem:[#allocation11_spill] sm:$0xff] %v10673_v10  ;;  %v2986_v22 = vsel %vm1931_vm2, %v2984_v56, %v14490_v46  ;;  %v14496_v33 = vrot.slane %v10673_v10, 3  ;;  %v2068_v60 = vadd.f32 %v1994_v44, %v1819_v45  ;;  %v3481_v62 = vrot.slane %v3361_v7, 3  ;;  %15516 = vst [vmem:[#allocation55_spill] sm:$0xff] %v10695_v2 }
 0x223   : > { %15514 = vst [vmem:[#allocation16_spill] sm:$0xff] %v10686_v18  ;;  %v10692_v9 = vmul.f32 %v10204_v37, %v15503_v21  ;;  %v3857_v56 = vmul.f32 %v10695_v2, %v10217_v41  ;;  %v14497_v29 = vrot.slane %v10686_v18, 3  ;;  %v3729_v14 = vrot.slane %v3609_v16, 3 }
 0x224   : > { %v3235_v46 = vsel %vm3172_vm3, %v3233_v24, %v14496_v33  ;;  %v10705_v45 = vmul.f32 %v10217_v41, %v15505_v51  ;;  %v2316_v44 = vadd.f32 %v2242_v15, %v2068_v60  ;;  %v4105_v6 = vmul.f32 %v10224_v50, %v10542_v48 }
 0x225   : > { %15515 = vst [vmem:[#allocation18_spill] sm:$0xff] %v10692_v9  ;;  %v14500_v7 = vrot.slane %v10692_v9, 3  ;;  %v3977_v1 = vrot.slane %v3857_v56, 3  ;;  %v3483_v10 = vsel %vm3172_vm3, %v3481_v62, %v14497_v29  ;;  %v10716_v16 = vmul.f32 %v10224_v50, %v10602_v0 }
 0x226   : > { %15517 = vst [vmem:[#allocation59_spill] sm:$0xff] %v10705_v45  ;;  %v14499_v24 = vrot.slane %v10705_v45, 3  ;;  %v4353_v51 = vmul.f32 %v6486_v4, %v10231_v36  ;;  %v2564_v33 = vadd.f32 %v2490_v54, %v2316_v44  ;;  %v4225_v60 = vrot.slane %v4105_v6, 3  ;;  %v15529_v45 = vld [vmem:[#allocation28_spill] sm:$0xff] }
 0x227   : > { %15518 = vst [vmem:[#allocation53_spill] sm:$0xff] %v10716_v16  ;;  %v3731_v15 = vsel %vm3172_vm3, %v3729_v14, %v14500_v7  ;;  %v10724_v56 = vmul.f32 %v10571_v39, %v10231_v36  ;;  %v14505_v29 = vrot.slane %v10716_v16, 3  ;;  %v4602_v4 = vmul.f32 %v10552_v26, %v10238_v20 }
 0x228   : > { %v3979_v62 = vsel %vm3172_vm3, %v3977_v1, %v14499_v24  ;;  %v4474_v18 = vrot.slane %v4353_v51, 4  ;;  %v2812_v54 = vadd.f32 %v2738_v49, %v2564_v33  ;;  %v10735_v6 = vmul.f32 %v10238_v20, %v15501_v31 }
 0x229   : > { %15519 = vst [vmem:[#allocation5_spill] sm:$0xff] %v10724_v56  ;;  %v14504_v44 = vrot.slane %v10724_v56, 4  ;;  %v4850_v14 = vmul.f32 %v10246_v42, %v15498_v19  ;;  %v4227_v1 = vsel %vm3172_vm3, %v4225_v60, %v14505_v29  ;;  %v4722_v24 = vrot.slane %v4602_v4, 4  ;;  %v10754_v60 = vld [vmem:[%s6732_s29 + $0x170] sm:$0xff] }
 0x22a   : > { %15520 = vst [vmem:[#allocation34_spill] sm:$0xff] %v10735_v6  ;;  %v10744_v51 = vmul.f32 %v10246_v42, %v15503_v21  ;;  %v5098_v49 = vmul.f32 %v10695_v2, %v10279_v52  ;;  %v3060_v33 = vadd.f32 %v2986_v22, %v2812_v54  ;;  %v14508_v26 = vrot.slane %v10735_v6, 4  ;;  %v10805_v6 = vld [vmem:[%s6732_s29 + $0xd0] sm:$0xf] }
 0x22b   : > { %v4476_v7 = vsel %vm4413_vm0, %v4474_v18, %v14504_v44  ;;  %v4970_v19 = vrot.slane %v4850_v14, 4  ;;  %v10758_v21 = vmul.f32 %v10754_v60, %v10279_v52  ;;  %v5346_v22 = vmul.f32 %v10295_v3, %v10542_v48  ;;  %15528 = vst [vmem:[#allocation9_spill] sm:$0xff] %v10805_v6 }
 0x22c   : > { %15521 = vst [vmem:[#allocation37_spill] sm:$0xff] %v10744_v51  ;;  %v14511_v16 = vrot.slane %v10744_v51, 4  ;;  %v5218_v4 = vrot.slane %v5098_v49, 4  ;;  %v3309_v54 = vadd.f32 %v3235_v46, %v3060_v33  ;;  %v4724_v18 = vsel %vm4413_vm0, %v4722_v24, %v14508_v26  ;;  %v10779_v26 = vld [vmem:[%s6732_s29 + $0x98] sm:$0xff] }
 0x22d   : > { %15522 = vst [vmem:[#allocation36_spill] sm:$0xff] %v10758_v21  ;;  %v10767_v14 = vmul.f32 %v10295_v3, %v10602_v0  ;;  %v275_v44 = vmul.f32 %v10330_v58, %v10021_v38  ;;  %v14518_v29 = vrot.slane %v10758_v21, 4  ;;  %v5466_v48 = vrot.slane %v5346_v22, 4  ;;  %15524 = vst [vmem:[#allocation61_spill] sm:$0xff] %v10779_v26  ;;  %v15526_v21 = vld [vmem:[#allocation25_spill] sm:$0xff] }
 0x22e   : > { %v4972_v49 = vsel %vm4413_vm0, %v4970_v19, %v14511_v16  ;;  %v315_v46 = vmul.f32 %v10028_v25, %v15470_v53  ;;  %v3557_v33 = vadd.f32 %v3483_v10, %v3309_v54  ;;  %v387_v58 = vmul.f32 %v10779_v26, %v10038_v47  ;;  %v15525_v10 = vld [vmem:[#allocation27_spill] sm:$0xff] }
 0x22f   : > { %15523 = vst [vmem:[#allocation13_spill] sm:$0xff] %v10767_v14  ;;  %v14522_v24 = vrot.slane %v10767_v14, 4  ;;  %v459_v2 = vmul.f32 %v10526_v57, %v10048_v27  ;;  %v5220_v19 = vsel %vm4413_vm0, %v5218_v4, %v14518_v29  ;;  %v531_v53 = vmul.f32 %v10371_v40, %v10060_v30  ;;  %v10796_v26 = vld [vmem:[%s6732_s29 + $0x88] sm:$0xf] }
 0x230   : > { %v347_v22 = vadd.f32 %v315_v46, %v275_v44  ;;  %v608_v54 = vmul.f32 %v10067_v28, %v15525_v10  ;;  %v3805_v16 = vadd.f32 %v3731_v15, %v3557_v33  ;;  %v857_v57 = vmul.f32 %v10796_v26, %v10082_v13  ;;  %v15527_v29 = vld [vmem:[#allocation35_spill] sm:$0xff] }
 0x231   : > { %v5468_v51 = vsel %vm4413_vm0, %v5466_v48, %v14522_v24  ;;  %v1105_v4 = vmul.f32 %v10092_v11, %v15526_v21  ;;  %v1353_v40 = vmul.f32 %v10099_v32, %v15527_v29  ;;  %v1601_v15 = vmul.f32 %v10805_v6, %v10106_v59  ;;  %v15533_v32 = vld [vmem:[#allocation22_spill] sm:$0xff] }
 0x232   : > { %v419_v44 = vadd.f32 %v387_v58, %v347_v22  ;;  %v714_v46 = vrot.slane %v608_v54, 1  ;;  %v4053_v33 = vadd.f32 %v3979_v62, %v3805_v16  ;;  %v962_v48 = vrot.slane %v857_v57, 1 }
 0x233   : > { %v1210_v24 = vrot.slane %v1105_v4, 1  ;;  %v1849_v14 = vmul.f32 %v10114_v12, %v15525_v10  ;;  %v15530_v9 = vrot.slane %v15529_v45, 1  ;;  %v1458_v22 = vrot.slane %v1353_v40, 1  ;;  %v15535_v4 = vld [vmem:[#allocation26_spill] sm:$0xff]  ;;  %v15537_v45 = vld [vmem:[#allocation8_spill] sm:$0xff] }
 0x234   : > { %v491_v56 = vadd.f32 %v459_v2, %v419_v44  ;;  %v1706_v54 = vrot.slane %v1601_v15, 1  ;;  %v4301_v23 = vadd.f32 %v4227_v1, %v4053_v33  ;;  %v15532_v34 = vrot.slane %v15531_v43, 1  ;;  %v15539_v1 = vld [vmem:[#allocation10_spill] sm:$0xff] }
 0x235   : > { %v715_v58 = vsel %vm690_vm1, %v15530_v9, %v714_v46  ;;  %v15534_v59 = vrot.slane %v15533_v32, 1  ;;  %v1955_v16 = vrot.slane %v1849_v14, 2  ;;  %v15536_v12 = vrot.slane %v15535_v4, 1  ;;  %v15543_v4 = vld [vmem:[#allocation44_spill] sm:$0xff] }
 0x236   : > { %v963_v55 = vsel %vm690_vm1, %v15532_v34, %v962_v48  ;;  %v563_v62 = vadd.f32 %v531_v53, %v491_v56  ;;  %v15538_v44 = vrot.slane %v15537_v45, 1  ;;  %v2098_v9 = vmul.f32 %v10796_v26, %v10137_v5  ;;  %v15541_v48 = vld [vmem:[#allocation14_spill] sm:$0xff] }
 0x237   : > { %v1211_v57 = vsel %vm690_vm1, %v15534_v59, %v1210_v24  ;;  %v1459_v2 = vsel %vm690_vm1, %v15536_v12, %v1458_v22  ;;  %v4550_v43 = vadd.f32 %v4476_v7, %v4301_v23  ;;  %v15540_v34 = vrot.slane %v15539_v1, 2 }
 0x238   : > { %v1707_v40 = vsel %vm690_vm1, %v15538_v44, %v1706_v54  ;;  %v2346_v59 = vmul.f32 %v10148_v63, %v15526_v21  ;;  %v2594_v56 = vmul.f32 %v10155_v61, %v15527_v29  ;;  %v812_v14 = vadd.f32 %v715_v58, %v563_v62 }
 0x239   : > { %v1956_v32 = vsel %vm1931_vm2, %v15540_v34, %v1955_v16  ;;  %v2203_v12 = vrot.slane %v2098_v9, 2  ;;  %v2842_v24 = vmul.f32 %v10805_v6, %v10162_v17  ;;  %v3090_v53 = vmul.f32 %v10169_v8, %v15525_v10  ;;  %v15545_v9 = vld [vmem:[#allocation42_spill] sm:$0xff] }
 0x23a   : > { %v4798_v46 = vadd.f32 %v4724_v18, %v4550_v43  ;;  %v2451_v23 = vrot.slane %v2346_v59, 2  ;;  %v2699_v7 = vrot.slane %v2594_v56, 2  ;;  %v3339_v15 = vmul.f32 %v10796_v26, %v10177_v35  ;;  %v15547_v59 = vld [vmem:[#allocation52_spill] sm:$0xff] }
 0x23b   : > { %v1060_v33 = vadd.f32 %v963_v55, %v812_v14  ;;  %v15542_v22 = vrot.slane %v15541_v48, 2  ;;  %v2947_v16 = vrot.slane %v2842_v24, 2  ;;  %v3196_v58 = vrot.slane %v3090_v53, 3  ;;  %v15549_v14 = vld [vmem:[#allocation58_spill] sm:$0xff]  ;;  %v15551_v53 = vld [vmem:[#allocation60_spill] sm:$0xff] }
 0x23c   : > { %v5046_v62 = vadd.f32 %v4972_v49, %v4798_v46  ;;  %v15544_v45 = vrot.slane %v15543_v4, 2  ;;  %v15546_v1 = vrot.slane %v15545_v9, 2  ;;  %v3444_v43 = vrot.slane %v3339_v15, 3 }
 0x23d   : > { %v2204_v54 = vsel %vm1931_vm2, %v15542_v22, %v2203_v12  ;;  %v1308_v34 = vadd.f32 %v1211_v57, %v1060_v33  ;;  %v15548_v56 = vrot.slane %v15547_v59, 2  ;;  %v15550_v48 = vrot.slane %v15549_v14, 3  ;;  %v15557_v59 = vld [vmem:[#allocation6_spill] sm:$0xff]  ;;  %v10892_v14 = vld [vmem:[%s6732_s29 + $0xb8] sm:$0xf] }
 0x23e   : > { %v2452_v44 = vsel %vm1931_vm2, %v15544_v45, %v2451_v23  ;;  %v2700_v18 = vsel %vm1931_vm2, %v15546_v1, %v2699_v7  ;;  %v3587_v49 = vmul.f32 %v10204_v37, %v15526_v21  ;;  %v5294_v24 = vadd.f32 %v5220_v19, %v5046_v62  ;;  %15559 = vst [vmem:[#allocation15_spill] sm:$0xff] %v10892_v14 }
 0x23f   : > { %v2948_v55 = vsel %vm1931_vm2, %v15548_v56, %v2947_v16  ;;  %v10856_v12 = vsel %vm3172_vm3, %v15550_v48, %v3196_v58  ;;  %v15552_v46 = vrot.slane %v15551_v53, 3  ;;  %v3835_v57 = vmul.f32 %v10217_v41, %v15527_v29  ;;  %v15553_v29 = vld [vmem:[#allocation64_spill] sm:$0xff] }
 0x240   : > { %v4083_v7 = vmul.f32 %v10805_v6, %v10224_v50  ;;  %v1556_v15 = vadd.f32 %v1459_v2, %v1308_v34  ;;  %v3692_v33 = vrot.slane %v3587_v49, 3  ;;  %v4331_v22 = vmul.f32 %v10231_v36, %v15525_v10  ;;  %v15555_v10 = vld [vmem:[#allocation29_spill] sm:$0xff] }
 0x241   : > { %v10863_v23 = vsel %vm3172_vm3, %v15552_v46, %v3444_v43  ;;  %v4580_v19 = vmul.f32 %v10796_v26, %v10238_v20  ;;  %v5542_v16 = vadd.f32 %v5468_v51, %v5294_v24  ;;  %v3940_v58 = vrot.slane %v3835_v57, 3  ;;  %v15560_v24 = vld [vmem:[#allocation30_spill] sm:$0xff]  ;;  %v15562_v57 = vld [vmem:[#allocation39_spill] sm:$0xff] }
 0x242   : > { %v4188_v62 = vrot.slane %v4083_v7, 3  ;;  %v4828_v4 = vmul.f32 %v10246_v42, %v15526_v21  ;;  %v1804_v45 = vadd.f32 %v1707_v40, %v1556_v15  ;;  %v15554_v9 = vrot.slane %v15553_v29, 3  ;;  %v10918_v29 = vld [vmem:[%s6732_s29 + $0x190] sm:$0xf] }
 0x243   : > { %v4437_v2 = vrot.slane %v4331_v22, 4  ;;  %v4685_v43 = vrot.slane %v4580_v19, 4  ;;  %6327 = vmatprep.mubr.msk.f32.mxu1 %vm5558_vm4, %v5542_v16  ;;  %v15556_v34 = vrot.slane %v15555_v10, 3  ;;  %v15558_v56 = vrot.slane %v15557_v59, 3  ;;  %v15564_v22 = vld [vmem:[#allocation41_spill] sm:$0xff]  ;;  %15566 = vst [vmem:[#allocation3_spill] sm:$0xff] %v10918_v29 }
 0x244   : > { %v10878_v1 = vsel %vm3172_vm3, %v15554_v9, %v3692_v33  ;;  %v4933_v40 = vrot.slane %v4828_v4, 4  ;;  %v5076_v48 = vmul.f32 %v10892_v14, %v10279_v52  ;;  %v2053_v49 = vadd.f32 %v1956_v32, %v1804_v45  ;;  %v10921_v9 = vld [vmem:[%s6732_s29 + $0x158] sm:$0xff]  ;;  %v15567_v10 = vld [vmem:[#allocation43_spill] sm:$0xff] }
 0x245   : > { %v10884_v51 = vsel %vm3172_vm3, %v15556_v34, %v3940_v58  ;;  %v10889_v21 = vsel %vm3172_vm3, %v15558_v56, %v4188_v62  ;;  %v15561_v53 = vrot.slane %v15560_v24, 4  ;;  %v15563_v7 = vrot.slane %v15562_v57, 4  ;;  %v15570_v56 = vld [vmem:[#allocation20_spill] sm:$0xff] }
 0x246   : > { %v5324_v33 = vmul.f32 %v10805_v6, %v10295_v3  ;;  %v15565_v19 = vrot.slane %v15564_v22, 4  ;;  %v5181_v32 = vrot.slane %v5076_v48, 4  ;;  %v291_v58 = vmul.f32 %v10571_v39, %v10021_v38  ;;  %v15569_v39 = vld [vmem:[#allocation38_spill] sm:$0xff]  ;;  %v10942_v48 = vld [vmem:[%s6732_s29 + $0x148] sm:$0xf] }
 0x247   : > { %v10899_v46 = vsel %vm4413_vm0, %v15561_v53, %v4437_v2  ;;  %v10904_v15 = vsel %vm4413_vm0, %v15563_v7, %v4685_v43  ;;  %v331_v62 = vmul.f32 %v15501_v31, %v10028_v25  ;;  %v2301_v4 = vadd.f32 %v2204_v54, %v2053_v49  ;;  %15572 = vst [vmem:[#allocation33_spill] sm:$0xff] %v10942_v48  ;;  %v15573_v49 = vld [vmem:[#allocation12_spill] sm:$0xff]  ;;  %v15575_v7 = vld [vmem:[#allocation23_spill] sm:$0xff] }
 0x248   : > { %v10911_v16 = vsel %vm4413_vm0, %v15565_v19, %v4933_v40  ;;  %v5429_v45 = vrot.slane %v5324_v33, 4  ;;  %v403_v2 = vmul.f32 %v10921_v9, %v10038_v47  ;;  %v475_v43 = vmul.f32 %v10754_v60, %v10048_v27 }
 0x249   : > { %v15568_v34 = vrot.slane %v15567_v10, 4  ;;  %v363_v38 = vadd.f32 %v331_v62, %v291_v58  ;;  %v547_v25 = vmul.f32 %v10060_v30, %v10602_v0  ;;  %v632_v31 = vmul.f32 %v15569_v39, %v10067_v28  ;;  %v15574_v30 = vld [vmem:[#allocation50_spill] sm:$0xff]  ;;  %v15576_v28 = vld [vmem:[#allocation32_spill] sm:$0xff] }
 0x24a   : > { %v2549_v54 = vadd.f32 %v2452_v44, %v2301_v4  ;;  %v15571_v40 = vrot.slane %v15570_v56, 4  ;;  %v881_v27 = vmul.f32 %v10942_v48, %v10082_v13  ;;  %v1129_v24 = vmul.f32 %v15573_v49, %v10092_v11  ;;  %v15577_v58 = vld [vmem:[#allocation62_spill] sm:$0xff] }
 0x24b   : > { %v10930_v59 = vsel %vm4413_vm0, %v15568_v34, %v5181_v32  ;;  %v435_v53 = vadd.f32 %v403_v2, %v363_v38  ;;  %v754_v57 = vrot.slane %v632_v31, 1  ;;  %v1377_v33 = vmul.f32 %v15575_v7, %v15574_v30  ;;  %v15580_v38 = vld [vmem:[#allocation48_spill] sm:$0xff] }
 0x24c   : > { %v10939_v47 = vsel %vm4413_vm0, %v15571_v40, %v5429_v45  ;;  %v1625_v44 = vmul.f32 %v15576_v28, %v10918_v29  ;;  %v2797_v22 = vadd.f32 %v2700_v18, %v2549_v54  ;;  %v1002_v19 = vrot.slane %v881_v27, 1  ;;  %v15578_v45 = vld [vmem:[#allocation24_spill] sm:$0xff]  ;;  %v15582_v40 = vld [vmem:[#allocation63_spill] sm:$0xff] }
 0x24d   : > { %v1250_v32 = vrot.slane %v1129_v24, 1  ;;  %v1873_v62 = vmul.f32 %v15577_v58, %v15569_v39  ;;  %v507_v4 = vadd.f32 %v475_v43, %v435_v53  ;;  %v15579_v13 = vrot.slane %v15578_v45, 1  ;;  %v15584_v24 = vld [vmem:[#allocation47_spill] sm:$0xff]  ;;  %v15586_v53 = vld [vmem:[#allocation49_spill] sm:$0xff] }
 0x24e   : > { %v1498_v11 = vrot.slane %v1377_v33, 1  ;;  %v1746_v2 = vrot.slane %v1625_v44, 1  ;;  %v3045_v34 = vadd.f32 %v2948_v55, %v2797_v22  ;;  %v15581_v31 = vrot.slane %v15580_v38, 1  ;;  %v15588_v44 = vld [vmem:[#allocation51_spill] sm:$0xff] }
 0x24f   : > { %v755_v10 = vsel %vm690_vm1, %v15579_v13, %v754_v57  ;;  %v15583_v7 = vrot.slane %v15582_v40, 1  ;;  %v1995_v54 = vrot.slane %v1873_v62, 2  ;;  %v579_v27 = vadd.f32 %v547_v25, %v507_v4 }
 0x250   : > { %v1003_v56 = vsel %vm690_vm1, %v15581_v31, %v1002_v19  ;;  %v15585_v28 = vrot.slane %v15584_v24, 1  ;;  %v15587_v58 = vrot.slane %v15586_v53, 1  ;;  %v2122_v55 = vmul.f32 %v10942_v48, %v10137_v5 }
 0x251   : > { %v1251_v18 = vsel %vm690_vm1, %v15583_v7, %v1250_v32  ;;  %v3294_v33 = vadd.f32 %v10856_v12, %v3045_v34  ;;  %v15589_v22 = vrot.slane %v15588_v44, 2  ;;  %v2370_v25 = vmul.f32 %v15573_v49, %v10148_v63  ;;  %v15590_v63 = vld [vmem:[#allocation54_spill] sm:$0xff] }
 0x252   : > { %v1499_v43 = vsel %vm690_vm1, %v15585_v28, %v1498_v11  ;;  %v1747_v57 = vsel %vm690_vm1, %v15587_v58, %v1746_v2  ;;  %v2618_v32 = vmul.f32 %v10155_v61, %v15574_v30  ;;  %v828_v62 = vadd.f32 %v755_v10, %v579_v27  ;;  %v15598_v58 = vld [vmem:[#allocation11_spill] sm:$0xff] }
 0x253   : > { %v1996_v19 = vsel %vm1931_vm2, %v15589_v22, %v1995_v54  ;;  %v2243_v4 = vrot.slane %v2122_v55, 2  ;;  %v2866_v45 = vmul.f32 %v10162_v17, %v10918_v29  ;;  %v3114_v5 = vmul.f32 %v10169_v8, %v15569_v39  ;;  %v15592_v17 = vld [vmem:[#allocation56_spill] sm:$0xff]  ;;  %v15594_v54 = vld [vmem:[#allocation7_spill] sm:$0xff] }
 0x254   : > { %v3542_v12 = vadd.f32 %v10863_v23, %v3294_v33  ;;  %v2491_v13 = vrot.slane %v2370_v25, 2  ;;  %v2739_v11 = vrot.slane %v2618_v32, 2  ;;  %v3363_v2 = vmul.f32 %v10942_v48, %v10177_v35  ;;  %v15596_v35 = vld [vmem:[#allocation57_spill] sm:$0xff]  ;;  %v15600_v22 = vld [vmem:[#allocation16_spill] sm:$0xff] }
 0x255   : > { %v1076_v34 = vadd.f32 %v1003_v56, %v828_v62  ;;  %v15591_v38 = vrot.slane %v15590_v63, 2  ;;  %v2987_v10 = vrot.slane %v2866_v45, 2  ;;  %v3236_v31 = vrot.slane %v3114_v5, 3 }
 0x256   : > { %v3790_v40 = vadd.f32 %v10878_v1, %v3542_v12  ;;  %v15593_v7 = vrot.slane %v15592_v17, 2  ;;  %v15595_v23 = vrot.slane %v15594_v54, 2  ;;  %v3484_v24 = vrot.slane %v3363_v2, 3  ;;  %v15610_v17 = vld [vmem:[#allocation34_spill] sm:$0xff]  ;;  %v11052_v54 = vld [vmem:[%s6732_s29 + $0x178] sm:$0xf] }
 0x257   : > { %v2244_v61 = vsel %vm1931_vm2, %v15591_v38, %v2243_v4  ;;  %v1324_v28 = vadd.f32 %v1251_v18, %v1076_v34  ;;  %v15597_v56 = vrot.slane %v15596_v35, 2  ;;  %v15599_v55 = vrot.slane %v15598_v58, 3  ;;  %15612 = vst [vmem:[#allocation45_spill] sm:$0xff] %v11052_v54  ;;  %v11067_v58 = vld [vmem:[%s13956_s1] ss:$0 sm:$0xff] }
 0x258   : > { %v2492_v8 = vsel %vm1931_vm2, %v15593_v7, %v2491_v13  ;;  %v2740_v27 = vsel %vm1931_vm2, %v15595_v23, %v2739_v11  ;;  %v3611_v1 = vmul.f32 %v15573_v49, %v10204_v37  ;;  %v4038_v44 = vadd.f32 %v10884_v51, %v3790_v40 }
 0x259   : > { %v10999_v53 = vsel %vm1931_vm2, %v15597_v56, %v2987_v10  ;;  %v11004_v33 = vsel %vm3172_vm3, %v15599_v55, %v3236_v31  ;;  %v15601_v25 = vrot.slane %v15600_v22, 3  ;;  %v3859_v18 = vmul.f32 %v10217_v41, %v15574_v30  ;;  %v15602_v30 = vld [vmem:[#allocation18_spill] sm:$0xff]  ;;  %v15608_v10 = vld [vmem:[#allocation5_spill] sm:$0xff]  ;;  %v11077_v22 = vld [vmem:[%s6732_s29 + $0x90] sm:$0xff] }
 0x25a   : > { %v4107_v62 = vmul.f32 %v10224_v50, %v10918_v29  ;;  %v1572_v4 = vadd.f32 %v1499_v43, %v1324_v28  ;;  %v3732_v45 = vrot.slane %v3611_v1, 3  ;;  %v4355_v5 = vmul.f32 %v10231_v36, %v15569_v39  ;;  %v15604_v39 = vld [vmem:[#allocation59_spill] sm:$0xff]  ;;  %v15613_v28 = vld [vmem:[#allocation37_spill] sm:$0xff]  ;;  %15616 = vst [vmem:[#allocation27_spill] sm:$0xff] %v11077_v22 }
 0x25b   : > { %v11012_v32 = vsel %vm3172_vm3, %v15601_v25, %v3484_v24  ;;  %v4604_v37 = vmul.f32 %v10942_v48, %v10238_v20  ;;  %v4286_v51 = vadd.f32 %v10889_v21, %v4038_v44  ;;  %v3980_v12 = vrot.slane %v3859_v18, 3  ;;  %v15606_v21 = vld [vmem:[#allocation53_spill] sm:$0xff]  ;;  %v11084_v25 = vld [vmem:[%s13956_s1 + $0xa] ss:$0 sm:$0xff] }
 0x25c   : > { %v4228_v13 = vrot.slane %v4107_v62, 3  ;;  %v4852_v11 = vmul.f32 %v15573_v49, %v10246_v42  ;;  %v1820_v41 = vadd.f32 %v1747_v57, %v1572_v4  ;;  %v15603_v2 = vrot.slane %v15602_v30, 3  ;;  %v15615_v55 = vld [vmem:[#allocation21_spill] sm:$0xff] }
 0x25d   : > { %v4477_v43 = vrot.slane %v4355_v5, 4  ;;  %v4725_v34 = vrot.slane %v4604_v37, 4  ;;  %v4535_v36 = vadd.f32 %v10899_v46, %v4286_v51  ;;  %v15605_v20 = vrot.slane %v15604_v39, 3  ;;  %v15617_v18 = vld [vmem:[#allocation17_spill] sm:$0xff]  ;;  %v15618_v5 = vld [vmem:[#allocation2_spill] sm:$0xff] }
 0x25e   : > { %v11028_v50 = vsel %vm3172_vm3, %v15603_v2, %v3732_v45  ;;  %v15607_v38 = vrot.slane %v15606_v21, 3  ;;  %v4973_v49 = vrot.slane %v4852_v11, 4  ;;  %v2069_v57 = vadd.f32 %v1996_v19, %v1820_v41  ;;  %v11092_v45 = vld [vmem:[%s13956_s1 + $0xf] ss:$0 sm:$0xff]  ;;  %v11099_v51 = vld [vmem:[%s13956_s1 + $0x14] ss:$0 sm:$0xff] }
 0x25f   : > { %v11034_v63 = vsel %vm3172_vm3, %v15605_v20, %v3980_v12  ;;  %v15609_v31 = vrot.slane %v15608_v10, 4  ;;  %v15611_v46 = vrot.slane %v15610_v17, 4  ;;  %v5100_v23 = vmul.f32 %v11052_v54, %v10279_v52  ;;  %v11102_v12 = vld [vmem:[%s6732_s29 + $0xd8] sm:$0xff]  ;;  %v15620_v11 = vld [vmem:[#allocation36_spill] sm:$0xff]  ;;  %v11125_v21 = vld [vmem:[%s6732_s29 + $0x80] sm:$0xff] }
 0x260   : > { %v11039_v42 = vsel %vm3172_vm3, %v15607_v38, %v4228_v13  ;;  %v4783_v24 = vadd.f32 %v10904_v15, %v4535_v36  ;;  %v15614_v35 = vrot.slane %v15613_v28, 4  ;;  %v5348_v56 = vmul.f32 %v10295_v3, %v10918_v29  ;;  %v11074_v15 = vld [vmem:[%s13956_s1 + $0x5] ss:$0 sm:$0xff]  ;;  %15619 = vst [vmem:[#allocation25_spill] sm:$0xff] %v11102_v12  ;;  %v15622_v39 = vld [vmem:[#allocation13_spill] sm:$0xff] }
 0x261   : > { %v11044_v40 = vsel %vm4413_vm0, %v15609_v31, %v4477_v43  ;;  %v11049_v7 = vsel %vm4413_vm0, %v15611_v46, %v4725_v34  ;;  %v276_v1 = vmul.f32 %v11067_v58, %v15615_v55  ;;  %v2317_v52 = vadd.f32 %v2244_v61, %v2069_v57  ;;  %v11114_v43 = vld [vmem:[%s13956_s1 + $0x1] ss:$0 sm:$0xff]  ;;  %v15625_v17 = vld [vmem:[#allocation61_spill] sm:$0xff] }
 0x262   : > { %v11060_v19 = vsel %vm4413_vm0, %v15614_v35, %v4973_v49  ;;  %v5221_v44 = vrot.slane %v5100_v23, 4  ;;  %v316_v3 = vmul.f32 %v11077_v22, %v11074_v15  ;;  %v388_v61 = vmul.f32 %v11084_v25, %v15617_v18  ;;  %v11134_v49 = vld [vmem:[%s13956_s1 + $0x6] ss:$0 sm:$0xff]  ;;  %v11147_v35 = vld [vmem:[%s13956_s1 + $0xb] ss:$0 sm:$0xff] }
 0x263   : > { %v5031_v62 = vadd.f32 %v10911_v16, %v4783_v24  ;;  %v5469_v4 = vrot.slane %v5348_v56, 4  ;;  %v460_v37 = vmul.f32 %v11092_v45, %v15618_v5  ;;  %v532_v13 = vmul.f32 %v11102_v12, %v11099_v51  ;;  %15627 = vst [vmem:[#allocation31_spill] sm:$0xff] %v11147_v35 }
 0x264   : > { %v2565_v16 = vadd.f32 %v2492_v8, %v2317_v52  ;;  %v15621_v41 = vrot.slane %v15620_v11, 4  ;;  %v348_v2 = vadd.f32 %v316_v3, %v276_v1  ;;  %v609_v34 = vmul.f32 %v11114_v43, %v15615_v55 }
 0x265   : > { %v5279_v36 = vadd.f32 %v10930_v59, %v5031_v62  ;;  %v15623_v20 = vrot.slane %v15622_v39, 4  ;;  %v11129_v38 = vmul.f32 %v11125_v21, %v11114_v43  ;;  %v858_v57 = vmul.f32 %v11134_v49, %v11077_v22  ;;  %v11164_v62 = vld [vmem:[%s13956_s1 + $0x10] ss:$0 sm:$0xff]  ;;  %v11181_v39 = vld [vmem:[%s13956_s1 + $0x15] ss:$0 sm:$0xff] }
 0x266   : > { %v11109_v30 = vsel %vm4413_vm0, %v15621_v41, %v5221_v44  ;;  %v2813_v59 = vadd.f32 %v2740_v27, %v2565_v16  ;;  %v420_v10 = vadd.f32 %v388_v61, %v348_v2  ;;  %v716_v31 = vrot.slane %v609_v34, 1  ;;  %v15628_v44 = vld [vmem:[#allocation19_spill] sm:$0xff]  ;;  %15630 = vst [vmem:[#allocation26_spill] sm:$0xff] %v11164_v62  ;;  %15633 = vst [vmem:[#allocation10_spill] sm:$0xff] %v11181_v39 }
 0x267   : > { %v11122_v8 = vsel %vm4413_vm0, %v15623_v20, %v5469_v4  ;;  %15624 = vst [vmem:[#allocation35_spill] sm:$0xff] %v11129_v38  ;;  %v11140_v46 = vmul.f32 %v11134_v49, %v15625_v17  ;;  %v5527_v23 = vadd.f32 %v10939_v47, %v5279_v36  ;;  %v14540_v24 = vrot.slane %v11129_v38, 1  ;;  %v15631_v4 = vld [vmem:[#allocation40_spill] sm:$0xff] }
 0x268   : > { %v964_v28 = vrot.slane %v858_v57, 1  ;;  %v1106_v56 = vmul.f32 %v11147_v35, %v15617_v18  ;;  %v3061_v27 = vadd.f32 %v10999_v53, %v2813_v59  ;;  %v492_v1 = vadd.f32 %v460_v37, %v420_v10  ;;  %v11186_v57 = vld [vmem:[%s6732_s29 + $0xe0] sm:$0xff] }
 0x269   : > { %15626 = vst [vmem:[#allocation28_spill] sm:$0xff] %v11140_v46  ;;  %v14539_v52 = vrot.slane %v11140_v46, 1  ;;  %v11155_v47 = vmul.f32 %v11147_v35, %v15628_v44  ;;  %6304 = vmatmul.mubr.msk.f32.gmra.mxu0 %vm5558_vm4, %v5527_v23  ;;  %v718_v3 = vsel %vm690_vm1, %v716_v31, %v14540_v24  ;;  %v1354_v53 = vmul.f32 %v11164_v62, %v15618_v5  ;;  %v11199_v31 = vld [vmem:[%s13956_s1 + $0x2] ss:$0 sm:$0xff]  ;;  %v6516_v24 = vld [vmem:[%s6732_s29 + $0x78] sm:$0xff] }
 0x26a   : > { %v1212_v61 = vrot.slane %v1106_v56, 1  ;;  %v11170_v37 = vmul.f32 %v11164_v62, %v15631_v4  ;;  %v3310_v16 = vadd.f32 %v11004_v33, %v3061_v27  ;;  %v564_v11 = vadd.f32 %v532_v13, %v492_v1  ;;  %15634 = vst [vmem:[#allocation14_spill] sm:$0xff] %v11186_v57  ;;  %15636 = vst [vmem:[#allocation42_spill] sm:$0xff] %v11199_v31  ;;  %v11461_v46 = vld [vmem:[%s6732_s29 + $0x140] sm:$0xff] }
 0x26b   : > { %15629 = vst [vmem:[#allocation22_spill] sm:$0xff] %v11155_v47  ;;  %v966_v41 = vsel %vm690_vm1, %v964_v28, %v14539_v52  ;;  %v14536_v2 = vrot.slane %v11155_v47, 1  ;;  %v1460_v34 = vrot.slane %v1354_v53, 1  ;;  %v1602_v20 = vmul.f32 %v11181_v39, %v11102_v12  ;;  %v11215_v53 = vld [vmem:[%s13956_s1 + $0x7] ss:$0 sm:$0xff] }
 0x26c   : > { %15632 = vst [vmem:[#allocation8_spill] sm:$0xff] %v11170_v37  ;;  %v14535_v36 = vrot.slane %v11170_v37, 1  ;;  %v11190_v33 = vmul.f32 %v11186_v57, %v11181_v39  ;;  %v3558_v13 = vadd.f32 %v11012_v32, %v3310_v16  ;;  %v813_v59 = vadd.f32 %v718_v3, %v564_v11  ;;  %v11279_v52 = vld [vmem:[%s13956_s1 + $0x3] ss:$0 sm:$0xff] }
 0x26d   : > { %v1214_v10 = vsel %vm690_vm1, %v1212_v61, %v14536_v2  ;;  %v1850_v23 = vmul.f32 %v11199_v31, %v15615_v55  ;;  %v1708_v56 = vrot.slane %v1602_v20, 1  ;;  %v11209_v27 = vmul.f32 %v11199_v31, %v11125_v21  ;;  %v11246_v2 = vld [vmem:[%s13956_s1 + $0x11] ss:$0 sm:$0xff]  ;;  %v15660_v37 = vld [vmem:[#allocation46_spill] sm:$0xff] }
 0x26e   : > { %15635 = vst [vmem:[#allocation44_spill] sm:$0xff] %v11190_v33  ;;  %v1462_v28 = vsel %vm690_vm1, %v1460_v34, %v14535_v36  ;;  %v14534_v32 = vrot.slane %v11190_v33, 1  ;;  %v3806_v1 = vadd.f32 %v11028_v50, %v3558_v13  ;;  %v1061_v3 = vadd.f32 %v966_v41, %v813_v59  ;;  %v11230_v50 = vld [vmem:[%s13956_s1 + $0xc] ss:$0 sm:$0xff] }
 0x26f   : > { %15637 = vst [vmem:[#allocation52_spill] sm:$0xff] %v11209_v27  ;;  %v1957_v61 = vrot.slane %v1850_v23, 2  ;;  %v2099_v55 = vmul.f32 %v11215_v53, %v11077_v22  ;;  %v14537_v11 = vrot.slane %v11209_v27, 2  ;;  %v11225_v34 = vmul.f32 %v11215_v53, %v15625_v17  ;;  %v15659_v27 = vld [vmem:[#allocation55_spill] sm:$0xff] }
 0x270   : > { %v1710_v16 = vsel %vm690_vm1, %v1708_v56, %v14534_v32  ;;  %v2347_v41 = vmul.f32 %v11230_v50, %v15617_v18  ;;  %v4054_v20 = vadd.f32 %v11034_v63, %v3806_v1  ;;  %v1309_v13 = vadd.f32 %v1214_v10, %v1061_v3 }
 0x271   : > { %15638 = vst [vmem:[#allocation58_spill] sm:$0xff] %v11225_v34  ;;  %v2205_v59 = vrot.slane %v2099_v55, 2  ;;  %v11237_v23 = vmul.f32 %v11230_v50, %v15628_v44  ;;  %v1959_v56 = vsel %vm1931_vm2, %v1957_v61, %v14537_v11  ;;  %v14538_v32 = vrot.slane %v11225_v34, 2  ;;  %v11262_v11 = vld [vmem:[%s13956_s1 + $0x16] ss:$0 sm:$0xff] }
 0x272   : > { %v2453_v36 = vrot.slane %v2347_v41, 2  ;;  %v2595_v63 = vmul.f32 %v11246_v2, %v15618_v5  ;;  %v4302_v10 = vadd.f32 %v11039_v42, %v4054_v20  ;;  %v1557_v1 = vadd.f32 %v1462_v28, %v1309_v13 }
 0x273   : > { %15639 = vst [vmem:[#allocation60_spill] sm:$0xff] %v11237_v23  ;;  %v14543_v3 = vrot.slane %v11237_v23, 2  ;;  %v11254_v61 = vmul.f32 %v11246_v2, %v15631_v4  ;;  %v2207_v55 = vsel %vm1931_vm2, %v2205_v59, %v14538_v32  ;;  %v2843_v42 = vmul.f32 %v11262_v11, %v11102_v12  ;;  %v11344_v23 = vld [vmem:[%s13956_s1 + $0x17] ss:$0 sm:$0xff] }
 0x274   : > { %v2701_v41 = vrot.slane %v2595_v63, 2  ;;  %v11268_v5 = vmul.f32 %v11262_v11, %v11186_v57  ;;  %v4551_v28 = vadd.f32 %v11044_v40, %v4302_v10  ;;  %v1805_v20 = vadd.f32 %v1710_v16, %v1557_v1  ;;  %v11294_v1 = vld [vmem:[%s13956_s1 + $0x8] ss:$0 sm:$0xff] }
 0x275   : > { %15640 = vst [vmem:[#allocation64_spill] sm:$0xff] %v11254_v61  ;;  %v2455_v13 = vsel %vm1931_vm2, %v2453_v36, %v14543_v3  ;;  %v14546_v59 = vrot.slane %v11254_v61, 2  ;;  %v2949_v63 = vrot.slane %v2843_v42, 2  ;;  %v3091_v29 = vmul.f32 %v6516_v24, %v11279_v52 }
 0x276   : > { %15641 = vst [vmem:[#allocation29_spill] sm:$0xff] %v11268_v5  ;;  %v14549_v32 = vrot.slane %v11268_v5, 2  ;;  %v11285_v40 = vmul.f32 %v11279_v52, %v11125_v21  ;;  %v4799_v16 = vadd.f32 %v11049_v7, %v4551_v28  ;;  %v2054_v36 = vadd.f32 %v1959_v56, %v1805_v20 }
 0x277   : > { %v2703_v10 = vsel %vm1931_vm2, %v2701_v41, %v14546_v59  ;;  %v3340_v42 = vmul.f32 %v11294_v1, %v11077_v22  ;;  %v3198_v54 = vrot.slane %v3091_v29, 3  ;;  %v11304_v56 = vmul.f32 %v11294_v1, %v15625_v17  ;;  %v11310_v59 = vld [vmem:[%s13956_s1 + $0xd] ss:$0 sm:$0xff] }
 0x278   : > { %15642 = vst [vmem:[#allocation6_spill] sm:$0xff] %v11285_v40  ;;  %v2951_v3 = vsel %vm1931_vm2, %v2949_v63, %v14549_v32  ;;  %v14550_v7 = vrot.slane %v11285_v40, 3  ;;  %v5047_v41 = vadd.f32 %v11060_v19, %v4799_v16  ;;  %v2302_v28 = vadd.f32 %v2207_v55, %v2054_v36  ;;  %v11325_v19 = vld [vmem:[%s13956_s1 + $0x12] ss:$0 sm:$0xff]  ;;  %v11328_v55 = vld [vmem:[%s6732_s29 + $0xc0] sm:$0xff] }
 0x279   : > { %15643 = vst [vmem:[#allocation30_spill] sm:$0xff] %v11304_v56  ;;  %v3446_v20 = vrot.slane %v3340_v42, 3  ;;  %v3588_v48 = vmul.f32 %v11310_v59, %v15617_v18  ;;  %v14555_v63 = vrot.slane %v11304_v56, 3  ;;  %v11320_v32 = vmul.f32 %v11310_v59, %v15628_v44  ;;  %15645 = vst [vmem:[#allocation41_spill] sm:$0xff] %v11328_v55 }
 0x27a   : > { %v3200_v29 = vsel %vm3172_vm3, %v3198_v54, %v14550_v7  ;;  %v3836_v16 = vmul.f32 %v11328_v55, %v11325_v19  ;;  %v5295_v36 = vadd.f32 %v11109_v30, %v5047_v41  ;;  %v2550_v42 = vadd.f32 %v2455_v13, %v2302_v28 }
 0x27b   : > { %15644 = vst [vmem:[#allocation39_spill] sm:$0xff] %v11320_v32  ;;  %v3694_v54 = vrot.slane %v3588_v48, 3  ;;  %v11335_v7 = vmul.f32 %v11325_v19, %v15631_v4  ;;  %v3448_v40 = vsel %vm3172_vm3, %v3446_v20, %v14555_v63  ;;  %v14556_v5 = vrot.slane %v11320_v32, 3 }
 0x27c   : > { %v3942_v61 = vrot.slane %v3836_v16, 3  ;;  %v4084_v30 = vmul.f32 %v11344_v23, %v11102_v12  ;;  %v5543_v48 = vadd.f32 %v11122_v8, %v5295_v36  ;;  %v2798_v13 = vadd.f32 %v2703_v10, %v2550_v42  ;;  %v11360_v16 = vld [vmem:[%s13956_s1 + $0x4] ss:$0 sm:$0xff] }
 0x27d   : > { %15646 = vst [vmem:[#allocation43_spill] sm:$0xff] %v11335_v7  ;;  %v14557_v4 = vrot.slane %v11335_v7, 3  ;;  %v11352_v41 = vmul.f32 %v11344_v23, %v11186_v57  ;;  %v3696_v28 = vsel %vm3172_vm3, %v3694_v54, %v14556_v5  ;;  %v4332_v63 = vmul.f32 %v11360_v16, %v6516_v24  ;;  %v11375_v54 = vld [vmem:[%s13956_s1 + $0x9] ss:$0 sm:$0xff] }
 0x27e   : > { %v4190_v20 = vrot.slane %v4084_v30, 3  ;;  %v11365_v8 = vmul.f32 %v11360_v16, %v11125_v21  ;;  %6328 = vmatmul.mubr.msk.f32.gmra.mxu1 %vm5558_vm4, %v5543_v48  ;;  %v3046_v10 = vadd.f32 %v2951_v3, %v2798_v13  ;;  %v4581_v24 = vmul.f32 %v11375_v54, %v11077_v22 }
 0x27f   : > { %15647 = vst [vmem:[#allocation38_spill] sm:$0xff] %v11352_v41  ;;  %v3944_v36 = vsel %vm3172_vm3, %v3942_v61, %v14557_v4  ;;  %v14563_v42 = vrot.slane %v11352_v41, 3  ;;  %v4439_v30 = vrot.slane %v4332_v63, 4  ;;  %v11382_v3 = vmul.f32 %v11375_v54, %v15625_v17  ;;  %v11387_v61 = vld [vmem:[%s13956_s1 + $0xe] ss:$0 sm:$0xff] }
 0x280   : > { %15648 = vst [vmem:[#allocation20_spill] sm:$0xff] %v11365_v8  ;;  %v4829_v48 = vmul.f32 %v11387_v61, %v15617_v18  ;;  %v3295_v13 = vadd.f32 %v3200_v29, %v3046_v10  ;;  %v4687_v4 = vrot.slane %v4581_v24, 4  ;;  %v11396_v5 = vmul.f32 %v11387_v61, %v15628_v44  ;;  %v11405_v18 = vld [vmem:[%s13956_s1 + $0x13] ss:$0 sm:$0xff]  ;;  %v11411_v10 = vld [vmem:[%s6732_s29 + $0xc8] sm:$0xff] }
 0x281   : > { %15649 = vst [vmem:[#allocation12_spill] sm:$0xff] %v11382_v3  ;;  %v4192_v63 = vsel %vm3172_vm3, %v4190_v20, %v14563_v42  ;;  %v15651_v22 = vrot.slane %v11365_v8, 4  ;;  %v14572_v32 = vrot.slane %v11382_v3, 4  ;;  %v5077_v29 = vmul.f32 %v11405_v18, %v11328_v55  ;;  %15652 = vst [vmem:[#allocation23_spill] sm:$0xff] %v11411_v10  ;;  %v11420_v24 = vld [vmem:[%s13956_s1 + $0x18] ss:$0 sm:$0xff] }
 0x282   : > { %15650 = vst [vmem:[#allocation50_spill] sm:$0xff] %v11396_v5  ;;  %v4935_v56 = vrot.slane %v4829_v48, 4  ;;  %v3543_v20 = vadd.f32 %v3448_v40, %v3295_v13  ;;  %v11429_v13 = vmul.f32 %v11420_v24, %v11186_v57  ;;  %v11432_v42 = vld [vmem:[%s6732_s29 + $0x198] sm:$0xff]  ;;  %v15656_v44 = vld [vmem:[#allocation4_spill] sm:$0xff]  ;;  %v15657_v41 = vrot.slane %v11396_v5, 4 }
 0x283   : > { %v4441_v7 = vsel %vm4413_vm0, %v4439_v30, %v15651_v22  ;;  %v11415_v22 = vmul.f32 %v11411_v10, %v11405_v18  ;;  %v5325_v30 = vmul.f32 %v11420_v24, %v11102_v12  ;;  %v4689_v40 = vsel %vm4413_vm0, %v4687_v4, %v14572_v32  ;;  %15655 = vst [vmem:[#allocation24_spill] sm:$0xff] %v11432_v42 }
 0x284   : > { %v5183_v48 = vrot.slane %v5077_v29, 4  ;;  %15654 = vst [vmem:[#allocation62_spill] sm:$0xff] %v11429_v13  ;;  %v292_v55 = vmul.f32 %v11067_v58, %v15656_v44  ;;  %v3791_v8 = vadd.f32 %v3696_v28, %v3543_v20  ;;  %v4937_v12 = vsel %vm4413_vm0, %v4935_v56, %v15657_v41  ;;  %v11442_v29 = vld [vmem:[%s6732_s29 + $0x150] sm:$0xff] }
 0x285   : > { %15653 = vst [vmem:[#allocation32_spill] sm:$0xff] %v11415_v22  ;;  %v14579_v3 = vrot.slane %v11415_v22, 4  ;;  %v5431_v34 = vrot.slane %v5325_v30, 4  ;;  %v14581_v4 = vrot.slane %v11429_v13, 4  ;;  %15658 = vst [vmem:[#allocation48_spill] sm:$0xff] %v11442_v29  ;;  %v332_v32 = vmul.f32 %v11442_v29, %v11074_v15 }
 0x286   : > { %v404_v33 = vmul.f32 %v11084_v25, %v15659_v27  ;;  %v476_v28 = vmul.f32 %v11092_v45, %v15660_v37  ;;  %v4039_v20 = vadd.f32 %v3944_v36, %v3791_v8  ;;  %v548_v41 = vmul.f32 %v11099_v51, %v11432_v42 }
 0x287   : > { %v5185_v56 = vsel %vm4413_vm0, %v5183_v48, %v14579_v3  ;;  %v633_v30 = vmul.f32 %v11114_v43, %v15656_v44  ;;  %v5433_v5 = vsel %vm4413_vm0, %v5431_v34, %v14581_v4  ;;  %v364_v47 = vadd.f32 %v332_v32, %v292_v55 }
 0x288   : > { %v11465_v8 = vmul.f32 %v11461_v46, %v11114_v43  ;;  %v882_v36 = vmul.f32 %v11442_v29, %v11134_v49  ;;  %v4287_v48 = vadd.f32 %v4192_v63, %v4039_v20  ;;  %v11471_v22 = vmul.f32 %v11134_v49, %v10921_v9 }
 0x289   : > { %v756_v3 = vrot.slane %v633_v30, 1  ;;  %v1130_v34 = vmul.f32 %v11147_v35, %v15659_v27  ;;  %v436_v32 = vadd.f32 %v404_v33, %v364_v47  ;;  %v11478_v13 = vmul.f32 %v11147_v35, %v10754_v60  ;;  %v11492_v35 = vld [vmem:[%s6732_s29 + $0x1a0] sm:$0xff] }
 0x28a   : > { %15661 = vst [vmem:[#allocation63_spill] sm:$0xff] %v11465_v8  ;;  %15662 = vst [vmem:[#allocation47_spill] sm:$0xff] %v11471_v22  ;;  %v14590_v55 = vrot.slane %v11465_v8, 1  ;;  %v1004_v4 = vrot.slane %v882_v36, 1  ;;  %v4536_v38 = vadd.f32 %v4441_v7, %v4287_v48  ;;  %v14592_v63 = vrot.slane %v11471_v22, 1 }
 0x28b   : > { %15663 = vst [vmem:[#allocation49_spill] sm:$0xff] %v11478_v13  ;;  %v1252_v20 = vrot.slane %v1130_v34, 1  ;;  %v1378_v30 = vmul.f32 %v11164_v62, %v15660_v37  ;;  %v508_v6 = vadd.f32 %v476_v28, %v436_v32  ;;  %v14591_v47 = vrot.slane %v11478_v13, 1  ;;  %15665 = vst [vmem:[#allocation54_spill] sm:$0xff] %v11492_v35 }
 0x28c   : > { %v758_v14 = vsel %vm690_vm1, %v756_v3, %v14590_v55  ;;  %v11489_v33 = vmul.f32 %v11164_v62, %v10602_v0  ;;  %v4784_v36 = vadd.f32 %v4689_v40, %v4536_v38  ;;  %v1006_v7 = vsel %vm690_vm1, %v1004_v4, %v14592_v63 }
 0x28d   : > { %v1500_v48 = vrot.slane %v1378_v30, 1  ;;  %v1626_v28 = vmul.f32 %v11181_v39, %v11432_v42  ;;  %v580_v34 = vadd.f32 %v548_v41, %v508_v6  ;;  %v1254_v3 = vsel %vm690_vm1, %v1252_v20, %v14591_v47 }
 0x28e   : > { %15664 = vst [vmem:[#allocation51_spill] sm:$0xff] %v11489_v33  ;;  %v14594_v32 = vrot.slane %v11489_v33, 1  ;;  %v11505_v38 = vmul.f32 %v11181_v39, %v11492_v35  ;;  %v5032_v40 = vadd.f32 %v4937_v12, %v4784_v36  ;;  %v1874_v4 = vmul.f32 %v11199_v31, %v15656_v44  ;;  %v15692_v33 = vld [vmem:[#allocation28_spill] sm:$0xff] }
 0x28f   : > { %v1748_v55 = vrot.slane %v1626_v28, 1  ;;  %v11511_v30 = vmul.f32 %v11461_v46, %v11199_v31  ;;  %v829_v6 = vadd.f32 %v758_v14, %v580_v34  ;;  %v2123_v47 = vmul.f32 %v11442_v29, %v11215_v53 }
 0x290   : > { %15666 = vst [vmem:[#allocation56_spill] sm:$0xff] %v11505_v38  ;;  %v1502_v41 = vsel %vm690_vm1, %v1500_v48, %v14594_v32  ;;  %v14597_v20 = vrot.slane %v11505_v38, 1  ;;  %v5280_v63 = vadd.f32 %v5185_v56, %v5032_v40  ;;  %v1997_v12 = vrot.slane %v1874_v4, 2 }
 0x291   : > { %15667 = vst [vmem:[#allocation7_spill] sm:$0xff] %v11511_v30  ;;  %v14596_v36 = vrot.slane %v11511_v30, 2  ;;  %v11522_v28 = vmul.f32 %v11215_v53, %v10921_v9  ;;  %v1077_v13 = vadd.f32 %v1006_v7, %v829_v6  ;;  %v2245_v34 = vrot.slane %v2123_v47, 2 }
 0x292   : > { %v1750_v14 = vsel %vm690_vm1, %v1748_v55, %v14597_v20  ;;  %v2371_v48 = vmul.f32 %v11230_v50, %v15659_v27  ;;  %v5528_v32 = vadd.f32 %v5433_v5, %v5280_v63  ;;  %v11535_v4 = vmul.f32 %v11230_v50, %v10754_v60 }
 0x293   : > { %15668 = vst [vmem:[#allocation57_spill] sm:$0xff] %v11522_v28  ;;  %v1999_v56 = vsel %vm1931_vm2, %v1997_v12, %v14596_v36  ;;  %v14595_v40 = vrot.slane %v11522_v28, 2  ;;  %v1325_v7 = vadd.f32 %v1254_v3, %v1077_v13  ;;  %v2619_v55 = vmul.f32 %v11246_v2, %v15660_v37 }
 0x294   : > { %15669 = vst [vmem:[#allocation11_spill] sm:$0xff] %v11535_v4  ;;  %v2493_v6 = vrot.slane %v2371_v48, 2  ;;  %v11541_v47 = vmul.f32 %v11246_v2, %v10602_v0  ;;  %6306 = vmatprep.mubr.msk.f32.mxu0 %vm5558_vm4, %v5528_v32  ;;  %v14601_v63 = vrot.slane %v11535_v4, 2  ;;  %v2867_v12 = vmul.f32 %v11262_v11, %v11432_v42 }
 0x295   : > { %v2247_v5 = vsel %vm1931_vm2, %v2245_v34, %v14595_v40  ;;  %v11552_v13 = vmul.f32 %v11262_v11, %v11492_v35  ;;  %v1573_v37 = vadd.f32 %v1502_v41, %v1325_v7  ;;  %v2741_v3 = vrot.slane %v2619_v55, 2 }
 0x296   : > { %15670 = vst [vmem:[#allocation16_spill] sm:$0xff] %v11541_v47  ;;  %v14599_v48 = vrot.slane %v11541_v47, 2  ;;  %v3115_v32 = vmul.f32 %v11279_v52, %v15656_v44  ;;  %v2495_v34 = vsel %vm1931_vm2, %v2493_v6, %v14601_v63  ;;  %v2989_v40 = vrot.slane %v2867_v12, 2 }
 0x297   : > { %15671 = vst [vmem:[#allocation18_spill] sm:$0xff] %v11552_v13  ;;  %v14600_v36 = vrot.slane %v11552_v13, 2  ;;  %v11563_v20 = vmul.f32 %v11461_v46, %v11279_v52  ;;  %v1821_v28 = vadd.f32 %v1750_v14, %v1573_v37  ;;  %v3364_v44 = vmul.f32 %v11442_v29, %v11294_v1 }
 0x298   : > { %v2743_v41 = vsel %vm1931_vm2, %v2741_v3, %v14599_v48  ;;  %v3238_v7 = vrot.slane %v3115_v32, 3  ;;  %v11576_v12 = vmul.f32 %v11294_v1, %v10921_v9  ;;  %v3612_v14 = vmul.f32 %v11310_v59, %v15659_v27  ;;  %v11585_v48 = vld [vmem:[%s6732_s29 + $0x180] sm:$0xff] }
 0x299   : > { %15672 = vst [vmem:[#allocation59_spill] sm:$0xff] %v11563_v20  ;;  %v2991_v6 = vsel %vm1931_vm2, %v2989_v40, %v14600_v36  ;;  %v14606_v55 = vrot.slane %v11563_v20, 3  ;;  %v2070_v37 = vadd.f32 %v1999_v56, %v1821_v28  ;;  %v3486_v3 = vrot.slane %v3364_v44, 3  ;;  %15675 = vst [vmem:[#allocation34_spill] sm:$0xff] %v11585_v48 }
 0x29a   : > { %15673 = vst [vmem:[#allocation53_spill] sm:$0xff] %v11576_v12  ;;  %v11582_v32 = vmul.f32 %v11310_v59, %v10754_v60  ;;  %v3860_v40 = vmul.f32 %v11585_v48, %v11325_v19  ;;  %v14608_v63 = vrot.slane %v11576_v12, 3  ;;  %v3734_v13 = vrot.slane %v3612_v14, 3 }
 0x29b   : > { %v3240_v36 = vsel %vm3172_vm3, %v3238_v7, %v14606_v55  ;;  %v11595_v28 = vmul.f32 %v11325_v19, %v10602_v0  ;;  %v2318_v56 = vadd.f32 %v2247_v5, %v2070_v37  ;;  %v4108_v4 = vmul.f32 %v11344_v23, %v11432_v42  ;;  %v6531_v55 = vld [vmem:[%s6732_s29 + $0x138] sm:$0xff] }
 0x29c   : > { %15674 = vst [vmem:[#allocation5_spill] sm:$0xff] %v11582_v32  ;;  %v14611_v44 = vrot.slane %v11582_v32, 3  ;;  %v3982_v47 = vrot.slane %v3860_v40, 3  ;;  %v3488_v20 = vsel %vm3172_vm3, %v3486_v3, %v14608_v63  ;;  %v11606_v14 = vmul.f32 %v11344_v23, %v11492_v35 }
 0x29d   : > { %15676 = vst [vmem:[#allocation37_spill] sm:$0xff] %v11595_v28  ;;  %v14610_v7 = vrot.slane %v11595_v28, 3  ;;  %v4356_v0 = vmul.f32 %v6531_v55, %v11360_v16  ;;  %v2566_v5 = vadd.f32 %v2495_v34, %v2318_v56  ;;  %v4230_v40 = vrot.slane %v4108_v4, 3  ;;  %v15690_v28 = vld [vmem:[#allocation35_spill] sm:$0xff] }
 0x29e   : > { %15677 = vst [vmem:[#allocation21_spill] sm:$0xff] %v11606_v14  ;;  %v3736_v37 = vsel %vm3172_vm3, %v3734_v13, %v14611_v44  ;;  %v11615_v12 = vmul.f32 %v11461_v46, %v11360_v16  ;;  %v14616_v63 = vrot.slane %v11606_v14, 3  ;;  %v4605_v34 = vmul.f32 %v11442_v29, %v11375_v54 }
 0x29f   : > { %v3984_v3 = vsel %vm3172_vm3, %v3982_v47, %v14610_v7  ;;  %v4479_v30 = vrot.slane %v4356_v0, 4  ;;  %v2814_v55 = vadd.f32 %v2743_v41, %v2566_v5  ;;  %v11626_v4 = vmul.f32 %v11375_v54, %v10921_v9 }
 0x2a0   : > { %15678 = vst [vmem:[#allocation17_spill] sm:$0xff] %v11615_v12  ;;  %v14615_v56 = vrot.slane %v11615_v12, 4  ;;  %v4853_v13 = vmul.f32 %v11387_v61, %v15659_v27  ;;  %v4232_v47 = vsel %vm3172_vm3, %v4230_v40, %v14616_v63  ;;  %v4727_v7 = vrot.slane %v4605_v34, 4  ;;  %v11645_v40 = vld [vmem:[%s6732_s29 + $0x188] sm:$0xff] }
 0x2a1   : > { %15679 = vst [vmem:[#allocation2_spill] sm:$0xff] %v11626_v4  ;;  %v11635_v0 = vmul.f32 %v11387_v61, %v10754_v60  ;;  %v5101_v41 = vmul.f32 %v11585_v48, %v11405_v18  ;;  %v3062_v5 = vadd.f32 %v2991_v6, %v2814_v55  ;;  %v14619_v29 = vrot.slane %v11626_v4, 4  ;;  %15681 = vst [vmem:[#allocation13_spill] sm:$0xff] %v11645_v40  ;;  %v11696_v4 = vld [vmem:[%s6732_s29 + $0xe8] sm:$0xf] }
 0x2a2   : > { %v4481_v44 = vsel %vm4413_vm0, %v4479_v30, %v14615_v56  ;;  %v4975_v27 = vrot.slane %v4853_v13, 4  ;;  %v11649_v60 = vmul.f32 %v11645_v40, %v11405_v18  ;;  %v5349_v6 = vmul.f32 %v11420_v24, %v11432_v42  ;;  %15689 = vst [vmem:[#allocation55_spill] sm:$0xff] %v11696_v4 }
 0x2a3   : > { %15680 = vst [vmem:[#allocation36_spill] sm:$0xff] %v11635_v0  ;;  %v14622_v14 = vrot.slane %v11635_v0, 4  ;;  %v5223_v34 = vrot.slane %v5101_v41, 4  ;;  %v3311_v55 = vadd.f32 %v3240_v36, %v3062_v5  ;;  %v4729_v30 = vsel %vm4413_vm0, %v4727_v7, %v14619_v29  ;;  %v11670_v29 = vld [vmem:[%s6732_s29 + $0xb0] sm:$0xff]  ;;  %v15687_v0 = vld [vmem:[#allocation31_spill] sm:$0xff] }
 0x2a4   : > { %15682 = vst [vmem:[#allocation61_spill] sm:$0xff] %v11649_v60  ;;  %v11658_v13 = vmul.f32 %v11420_v24, %v11492_v35  ;;  %v277_v56 = vmul.f32 %v11125_v21, %v11067_v58  ;;  %v14629_v63 = vrot.slane %v11649_v60, 4  ;;  %v5471_v42 = vrot.slane %v5349_v6, 4  ;;  %15684 = vst [vmem:[#allocation40_spill] sm:$0xff] %v11670_v29  ;;  %v15686_v60 = vld [vmem:[#allocation15_spill] sm:$0xff] }
 0x2a5   : > { %v4977_v41 = vsel %vm4413_vm0, %v4975_v27, %v14622_v14  ;;  %v317_v36 = vmul.f32 %v11074_v15, %v15625_v17  ;;  %v3559_v5 = vadd.f32 %v3488_v20, %v3311_v55  ;;  %v389_v21 = vmul.f32 %v11670_v29, %v11084_v25  ;;  %v11687_v29 = vld [vmem:[%s6732_s29 + $0xa0] sm:$0xf] }
 0x2a6   : > { %15683 = vst [vmem:[#allocation19_spill] sm:$0xff] %v11658_v13  ;;  %v14633_v7 = vrot.slane %v11658_v13, 4  ;;  %v461_v48 = vmul.f32 %v11411_v10, %v11092_v45  ;;  %v5225_v27 = vsel %vm4413_vm0, %v5223_v34, %v14629_v63  ;;  %v533_v17 = vmul.f32 %v11186_v57, %v11099_v51  ;;  %15685 = vst [vmem:[#allocation4_spill] sm:$0xff] %v11687_v29  ;;  %v15688_v63 = vld [vmem:[#allocation9_spill] sm:$0xff] }
 0x2a7   : > { %v349_v6 = vadd.f32 %v317_v36, %v277_v56  ;;  %v611_v20 = vmul.f32 %v11114_v43, %v10796_v26  ;;  %v3807_v55 = vadd.f32 %v3736_v37, %v3559_v5  ;;  %v860_v10 = vmul.f32 %v11687_v29, %v11134_v49 }
 0x2a8   : > { %v5473_v14 = vsel %vm4413_vm0, %v5471_v42, %v14633_v7  ;;  %v1108_v34 = vmul.f32 %v15687_v0, %v15686_v60  ;;  %v1356_v57 = vmul.f32 %v11164_v62, %v15688_v63  ;;  %v1604_v37 = vmul.f32 %v11696_v4, %v11181_v39  ;;  %v15694_v62 = vld [vmem:[#allocation22_spill] sm:$0xff] }
 0x2a9   : > { %v421_v56 = vadd.f32 %v389_v21, %v349_v6  ;;  %v719_v36 = vrot.slane %v611_v20, 1  ;;  %v4055_v5 = vadd.f32 %v3984_v3, %v3807_v55  ;;  %v967_v42 = vrot.slane %v860_v10, 1 }
 0x2aa   : > { %v1215_v7 = vrot.slane %v1108_v34, 1  ;;  %v1852_v13 = vmul.f32 %v11199_v31, %v10796_v26  ;;  %v15691_v32 = vrot.slane %v15690_v28, 1  ;;  %v1463_v6 = vrot.slane %v1356_v57, 1  ;;  %v15696_v34 = vld [vmem:[#allocation8_spill] sm:$0xff] }
 0x2ab   : > { %v493_v12 = vadd.f32 %v461_v48, %v421_v56  ;;  %v1711_v20 = vrot.slane %v1604_v37, 1  ;;  %v4303_v38 = vadd.f32 %v4232_v47, %v4055_v5  ;;  %v15693_v22 = vrot.slane %v15692_v33, 1  ;;  %v15698_v28 = vld [vmem:[#allocation44_spill] sm:$0xff] }
 0x2ac   : > { %v720_v21 = vsel %vm690_vm1, %v15691_v32, %v719_v36  ;;  %v15695_v39 = vrot.slane %v15694_v62, 1  ;;  %v1960_v3 = vrot.slane %v1852_v13, 2  ;;  %v15697_v31 = vrot.slane %v15696_v34, 1  ;;  %v15700_v47 = vld [vmem:[#allocation52_spill] sm:$0xff] }
 0x2ad   : > { %v968_v8 = vsel %vm690_vm1, %v15693_v22, %v967_v42  ;;  %v565_v55 = vadd.f32 %v533_v17, %v493_v12  ;;  %v15699_v56 = vrot.slane %v15698_v28, 1  ;;  %v2101_v32 = vmul.f32 %v11687_v29, %v11215_v53  ;;  %v15702_v42 = vld [vmem:[#allocation58_spill] sm:$0xff]  ;;  %v15704_v34 = vld [vmem:[#allocation60_spill] sm:$0xff] }
 0x2ae   : > { %v1216_v10 = vsel %vm690_vm1, %v15695_v39, %v1215_v7  ;;  %v1464_v48 = vsel %vm690_vm1, %v15697_v31, %v1463_v6  ;;  %v4552_v33 = vadd.f32 %v4481_v44, %v4303_v38  ;;  %v15701_v22 = vrot.slane %v15700_v47, 2 }
 0x2af   : > { %v1712_v57 = vsel %vm690_vm1, %v15699_v56, %v1711_v20  ;;  %v2349_v39 = vmul.f32 %v11230_v50, %v15686_v60  ;;  %v2597_v12 = vmul.f32 %v11246_v2, %v15688_v63  ;;  %v814_v13 = vadd.f32 %v720_v21, %v565_v55 }
 0x2b0   : > { %v1961_v62 = vsel %vm1931_vm2, %v15701_v22, %v1960_v3  ;;  %v2208_v31 = vrot.slane %v2101_v32, 2  ;;  %v2845_v7 = vmul.f32 %v11696_v4, %v11262_v11  ;;  %v3093_v17 = vmul.f32 %v11279_v52, %v10796_v26  ;;  %v15706_v32 = vld [vmem:[#allocation64_spill] sm:$0xff] }
 0x2b1   : > { %v4800_v36 = vadd.f32 %v4729_v30, %v4552_v33  ;;  %v2456_v38 = vrot.slane %v2349_v39, 2  ;;  %v2704_v44 = vrot.slane %v2597_v12, 2  ;;  %v3342_v37 = vmul.f32 %v11687_v29, %v11294_v1  ;;  %v15708_v39 = vld [vmem:[#allocation29_spill] sm:$0xff] }
 0x2b2   : > { %v1062_v5 = vadd.f32 %v968_v8, %v814_v13  ;;  %v15703_v6 = vrot.slane %v15702_v42, 2  ;;  %v2952_v3 = vrot.slane %v2845_v7, 2  ;;  %v3201_v21 = vrot.slane %v3093_v17, 3  ;;  %v15710_v13 = vld [vmem:[#allocation6_spill] sm:$0xff] }
 0x2b3   : > { %v5048_v55 = vadd.f32 %v4977_v41, %v4800_v36  ;;  %v15705_v28 = vrot.slane %v15704_v34, 2  ;;  %v15707_v47 = vrot.slane %v15706_v32, 2  ;;  %v3449_v33 = vrot.slane %v3342_v37, 3  ;;  %v15712_v17 = vld [vmem:[#allocation30_spill] sm:$0xff]  ;;  %v15714_v32 = vld [vmem:[#allocation39_spill] sm:$0xff] }
 0x2b4   : > { %v2209_v20 = vsel %vm1931_vm2, %v15703_v6, %v2208_v31  ;;  %v1310_v22 = vadd.f32 %v1216_v10, %v1062_v5  ;;  %v15709_v12 = vrot.slane %v15708_v39, 2  ;;  %v15711_v42 = vrot.slane %v15710_v13, 3 }
 0x2b5   : > { %v2457_v56 = vsel %vm1931_vm2, %v15705_v28, %v2456_v38  ;;  %v2705_v30 = vsel %vm1931_vm2, %v15707_v47, %v2704_v44  ;;  %v3590_v41 = vmul.f32 %v11310_v59, %v15686_v60  ;;  %v5296_v7 = vadd.f32 %v5225_v27, %v5048_v55 }
 0x2b6   : > { %v2953_v8 = vsel %vm1931_vm2, %v15709_v12, %v2952_v3  ;;  %v11747_v31 = vsel %vm3172_vm3, %v15711_v42, %v3201_v21  ;;  %v15713_v36 = vrot.slane %v15712_v17, 3  ;;  %v3838_v10 = vmul.f32 %v11325_v19, %v15688_v63  ;;  %v15718_v12 = vld [vmem:[#allocation38_spill] sm:$0xff] }
 0x2b7   : > { %v4086_v44 = vmul.f32 %v11696_v4, %v11344_v23  ;;  %v1558_v37 = vadd.f32 %v1464_v48, %v1310_v22  ;;  %v3697_v5 = vrot.slane %v3590_v41, 3  ;;  %v4334_v6 = vmul.f32 %v11360_v16, %v10796_v26  ;;  %v15716_v26 = vld [vmem:[#allocation43_spill] sm:$0xff] }
 0x2b8   : > { %v11754_v38 = vsel %vm3172_vm3, %v15713_v36, %v3449_v33  ;;  %v4583_v3 = vmul.f32 %v11687_v29, %v11375_v54  ;;  %v5544_v27 = vadd.f32 %v5473_v14, %v5296_v7  ;;  %v3945_v21 = vrot.slane %v3838_v10, 3  ;;  %v15720_v7 = vld [vmem:[#allocation20_spill] sm:$0xff] }
 0x2b9   : > { %v4193_v55 = vrot.slane %v4086_v44, 3  ;;  %v4831_v34 = vmul.f32 %v11387_v61, %v15686_v60  ;;  %v1806_v28 = vadd.f32 %v1712_v57, %v1558_v37  ;;  %v15715_v47 = vrot.slane %v15714_v32, 3  ;;  %v15722_v10 = vld [vmem:[#allocation12_spill] sm:$0xff] }
 0x2ba   : > { %v4442_v48 = vrot.slane %v4334_v6, 4  ;;  %v4690_v22 = vrot.slane %v4583_v3, 4  ;;  %6330 = vmatprep.mubr.msk.f32.mxu1 %vm5558_vm4, %v5544_v27  ;;  %v15717_v39 = vrot.slane %v15716_v26, 3  ;;  %v15719_v13 = vrot.slane %v15718_v12, 3  ;;  %v15724_v6 = vld [vmem:[#allocation50_spill] sm:$0xff]  ;;  %v11809_v32 = vld [vmem:[%s6732_s29 + $0x170] sm:$0xff] }
 0x2bb   : > { %v11769_v33 = vsel %vm3172_vm3, %v15715_v47, %v3697_v5  ;;  %v4938_v57 = vrot.slane %v4831_v34, 4  ;;  %v5079_v42 = vmul.f32 %v11405_v18, %v15688_v63  ;;  %v2055_v41 = vadd.f32 %v1961_v62, %v1806_v28  ;;  %v11806_v28 = vld [vmem:[%s6732_s29 + $0x1a8] sm:$0xf]  ;;  %15727 = vst [vmem:[#allocation15_spill] sm:$0xff] %v11809_v32 }
 0x2bc   : > { %v11775_v14 = vsel %vm3172_vm3, %v15717_v39, %v3945_v21  ;;  %v11780_v60 = vsel %vm3172_vm3, %v15719_v13, %v4193_v55  ;;  %v15721_v17 = vrot.slane %v15720_v7, 4  ;;  %v15723_v44 = vrot.slane %v15722_v10, 4  ;;  %15726 = vst [vmem:[#allocation46_spill] sm:$0xff] %v11806_v28  ;;  %v11830_v7 = vld [vmem:[%s6732_s29 + $0x160] sm:$0xf]  ;;  %v15734_v10 = vld [vmem:[#allocation45_spill] sm:$0xff] }
 0x2bd   : > { %v5327_v5 = vmul.f32 %v11696_v4, %v11420_v24  ;;  %v15725_v3 = vrot.slane %v15724_v6, 4  ;;  %v5186_v63 = vrot.slane %v5079_v42, 4  ;;  %v293_v62 = vmul.f32 %v11461_v46, %v11067_v58  ;;  %15733 = vst [vmem:[#allocation9_spill] sm:$0xff] %v11830_v7  ;;  %v15739_v4 = vld [vmem:[#allocation63_spill] sm:$0xff] }
 0x2be   : > { %v11787_v36 = vsel %vm4413_vm0, %v15721_v17, %v4442_v48  ;;  %v11792_v37 = vsel %vm4413_vm0, %v15723_v44, %v4690_v22  ;;  %v333_v21 = vmul.f32 %v11074_v15, %v10921_v9  ;;  %v2303_v55 = vadd.f32 %v2209_v20, %v2055_v41  ;;  %v15728_v22 = vld [vmem:[#allocation32_spill] sm:$0xff]  ;;  %v15730_v20 = vld [vmem:[#allocation33_spill] sm:$0xff] }
 0x2bf   : > { %v11799_v27 = vsel %vm4413_vm0, %v15725_v3, %v4938_v57  ;;  %v5434_v34 = vrot.slane %v5327_v5, 4  ;;  %v405_v47 = vmul.f32 %v11809_v32, %v11084_v25  ;;  %v477_v48 = vmul.f32 %v11645_v40, %v11092_v45  ;;  %v15731_v57 = vld [vmem:[#allocation62_spill] sm:$0xff]  ;;  %v15735_v3 = vld [vmem:[#allocation3_spill] sm:$0xff] }
 0x2c0   : > { %v15729_v26 = vrot.slane %v15728_v22, 4  ;;  %v365_v46 = vadd.f32 %v333_v21, %v293_v62  ;;  %v549_v9 = vmul.f32 %v11099_v51, %v11492_v35  ;;  %v635_v12 = vmul.f32 %v11114_v43, %v15730_v20 }
 0x2c1   : > { %v2551_v13 = vadd.f32 %v2457_v56, %v2303_v55  ;;  %v15732_v42 = vrot.slane %v15731_v57, 4  ;;  %v884_v17 = vmul.f32 %v11830_v7, %v11134_v49  ;;  %v1132_v44 = vmul.f32 %v15687_v0, %v15734_v10  ;;  %v15737_v56 = vld [vmem:[#allocation10_spill] sm:$0xff]  ;;  %v15743_v0 = vld [vmem:[#allocation49_spill] sm:$0xff] }
 0x2c2   : > { %v11818_v39 = vsel %vm4413_vm0, %v15729_v26, %v5186_v63  ;;  %v437_v5 = vadd.f32 %v405_v47, %v365_v46  ;;  %v759_v6 = vrot.slane %v635_v12, 1  ;;  %v15736_v63 = vld [vmem:[#allocation26_spill] sm:$0xff]  ;;  %v1628_v21 = vmul.f32 %v15737_v56, %v11806_v28  ;;  %v15741_v12 = vld [vmem:[#allocation47_spill] sm:$0xff] }
 0x2c3   : > { %v11827_v41 = vsel %vm4413_vm0, %v15732_v42, %v5434_v34  ;;  %v1380_v62 = vmul.f32 %v15736_v63, %v15735_v3  ;;  %v2799_v55 = vadd.f32 %v2705_v30, %v2551_v13  ;;  %v1007_v22 = vrot.slane %v884_v17, 1  ;;  %v15738_v26 = vld [vmem:[#allocation42_spill] sm:$0xff] }
 0x2c4   : > { %v1255_v34 = vrot.slane %v1132_v44, 1  ;;  %v1876_v57 = vmul.f32 %v15738_v26, %v15730_v20  ;;  %v509_v42 = vadd.f32 %v477_v48, %v437_v5  ;;  %v15740_v29 = vrot.slane %v15739_v4, 1  ;;  %v15745_v44 = vld [vmem:[#allocation51_spill] sm:$0xff]  ;;  %v15747_v4 = vld [vmem:[#allocation56_spill] sm:$0xff] }
 0x2c5   : > { %v1503_v40 = vrot.slane %v1380_v62, 1  ;;  %v1751_v47 = vrot.slane %v1628_v21, 1  ;;  %v3047_v46 = vadd.f32 %v2953_v8, %v2799_v55  ;;  %v15742_v32 = vrot.slane %v15741_v12, 1 }
 0x2c6   : > { %v760_v35 = vsel %vm690_vm1, %v15740_v29, %v759_v6  ;;  %v15744_v56 = vrot.slane %v15743_v0, 1  ;;  %v2000_v13 = vrot.slane %v1876_v57, 2  ;;  %v581_v17 = vadd.f32 %v549_v9, %v509_v42 }
 0x2c7   : > { %v1008_v63 = vsel %vm690_vm1, %v15742_v32, %v1007_v22  ;;  %v15746_v26 = vrot.slane %v15745_v44, 1  ;;  %v15748_v5 = vrot.slane %v15747_v4, 1  ;;  %v2125_v8 = vmul.f32 %v11830_v7, %v11215_v53  ;;  %v15749_v32 = vld [vmem:[#allocation7_spill] sm:$0xff] }
 0x2c8   : > { %v1256_v30 = vsel %vm690_vm1, %v15744_v56, %v1255_v34  ;;  %v3296_v6 = vadd.f32 %v11747_v31, %v3047_v46  ;;  %v15750_v62 = vrot.slane %v15749_v32, 2  ;;  %v2373_v9 = vmul.f32 %v11230_v50, %v15734_v10  ;;  %v15753_v44 = vld [vmem:[#allocation11_spill] sm:$0xff] }
 0x2c9   : > { %v1504_v48 = vsel %vm690_vm1, %v15746_v26, %v1503_v40  ;;  %v1752_v29 = vsel %vm690_vm1, %v15748_v5, %v1751_v47  ;;  %v2621_v56 = vmul.f32 %v11246_v2, %v15735_v3  ;;  %v830_v40 = vadd.f32 %v760_v35, %v581_v17  ;;  %v15751_v47 = vld [vmem:[#allocation57_spill] sm:$0xff] }
 0x2ca   : > { %v2001_v0 = vsel %vm1931_vm2, %v15750_v62, %v2000_v13  ;;  %v2248_v21 = vrot.slane %v2125_v8, 2  ;;  %v2869_v55 = vmul.f32 %v11262_v11, %v11806_v28  ;;  %v3117_v22 = vmul.f32 %v11279_v52, %v15730_v20  ;;  %v15755_v8 = vld [vmem:[#allocation16_spill] sm:$0xff] }
 0x2cb   : > { %v3544_v31 = vadd.f32 %v11754_v38, %v3296_v6  ;;  %v2496_v34 = vrot.slane %v2373_v9, 2  ;;  %v2744_v26 = vrot.slane %v2621_v56, 2  ;;  %v3366_v57 = vmul.f32 %v11830_v7, %v11294_v1  ;;  %v15757_v9 = vld [vmem:[#allocation18_spill] sm:$0xff] }
 0x2cc   : > { %v1078_v42 = vadd.f32 %v1008_v63, %v830_v40  ;;  %v15752_v46 = vrot.slane %v15751_v47, 2  ;;  %v2992_v35 = vrot.slane %v2869_v55, 2  ;;  %v3241_v13 = vrot.slane %v3117_v22, 3  ;;  %v15759_v40 = vld [vmem:[#allocation59_spill] sm:$0xff] }
 0x2cd   : > { %v3792_v17 = vadd.f32 %v11769_v33, %v3544_v31  ;;  %v15754_v4 = vrot.slane %v15753_v44, 2  ;;  %v15756_v38 = vrot.slane %v15755_v8, 2  ;;  %v3489_v32 = vrot.slane %v3366_v57, 3  ;;  %v15761_v31 = vld [vmem:[#allocation53_spill] sm:$0xff] }
 0x2ce   : > { %v2249_v12 = vsel %vm1931_vm2, %v15752_v46, %v2248_v21  ;;  %v1326_v62 = vadd.f32 %v1256_v30, %v1078_v42  ;;  %v15758_v63 = vrot.slane %v15757_v9, 2  ;;  %v15760_v21 = vrot.slane %v15759_v40, 3 }
 0x2cf   : > { %v2497_v5 = vsel %vm1931_vm2, %v15754_v4, %v2496_v34  ;;  %v2745_v6 = vsel %vm1931_vm2, %v15756_v38, %v2744_v26  ;;  %v3614_v33 = vmul.f32 %v11310_v59, %v15734_v10  ;;  %v4040_v22 = vadd.f32 %v11775_v14, %v3792_v17  ;;  %v15763_v4 = vld [vmem:[#allocation5_spill] sm:$0xff] }
 0x2d0   : > { %v2993_v56 = vsel %vm1931_vm2, %v15758_v63, %v2992_v35  ;;  %v11890_v55 = vsel %vm3172_vm3, %v15760_v21, %v3241_v13  ;;  %v15762_v34 = vrot.slane %v15761_v31, 3  ;;  %v3862_v30 = vmul.f32 %v11325_v19, %v15735_v3  ;;  %v15767_v63 = vld [vmem:[#allocation21_spill] sm:$0xff] }
 0x2d1   : > { %v4110_v57 = vmul.f32 %v11344_v23, %v11806_v28  ;;  %v1574_v42 = vadd.f32 %v1504_v48, %v1326_v62  ;;  %v3737_v47 = vrot.slane %v3614_v33, 3  ;;  %v4358_v46 = vmul.f32 %v11360_v16, %v15730_v20  ;;  %v15765_v62 = vld [vmem:[#allocation37_spill] sm:$0xff] }
 0x2d2   : > { %v11898_v26 = vsel %vm3172_vm3, %v15762_v34, %v3489_v32  ;;  %v4607_v35 = vmul.f32 %v11830_v7, %v11375_v54  ;;  %v4288_v14 = vadd.f32 %v11780_v60, %v4040_v22  ;;  %v3985_v13 = vrot.slane %v3862_v30, 3  ;;  %v15769_v33 = vld [vmem:[#allocation17_spill] sm:$0xff]  ;;  %v15771_v34 = vld [vmem:[#allocation2_spill] sm:$0xff] }
 0x2d3   : > { %v4233_v17 = vrot.slane %v4110_v57, 3  ;;  %v4855_v44 = vmul.f32 %v11387_v61, %v15734_v10  ;;  %v1822_v3 = vadd.f32 %v1752_v29, %v1574_v42  ;;  %v15764_v8 = vrot.slane %v15763_v4, 3  ;;  %v11938_v57 = vld [vmem:[%s6732_s29 + $0x190] sm:$0xf]  ;;  %v11953_v4 = vld [vmem:[%s6732_s29 + $0xa8] sm:$0xff]  ;;  %v15819_v7 = vld [vmem:[#allocation54_spill] sm:$0xff] }
 0x2d4   : > { %v4482_v38 = vrot.slane %v4358_v46, 4  ;;  %v4730_v32 = vrot.slane %v4607_v35, 4  ;;  %v4537_v20 = vadd.f32 %v11787_v36, %v4288_v14  ;;  %v15766_v9 = vrot.slane %v15765_v62, 3  ;;  %15773 = vst [vmem:[#allocation35_spill] sm:$0xff] %v11938_v57  ;;  %v15774_v46 = vld [vmem:[#allocation36_spill] sm:$0xff]  ;;  %15777 = vst [vmem:[#allocation28_spill] sm:$0xff] %v11953_v4 }
 0x2d5   : > { %v11914_v48 = vsel %vm3172_vm3, %v15764_v8, %v3737_v47  ;;  %v15768_v40 = vrot.slane %v15767_v63, 3  ;;  %v4978_v29 = vrot.slane %v4855_v44, 4  ;;  %v2071_v21 = vadd.f32 %v2001_v0, %v1822_v3  ;;  %v15779_v62 = vld [vmem:[#allocation25_spill] sm:$0xff]  ;;  %v11963_v63 = vld [vmem:[%s6732_s29 + $0xf0] sm:$0xff] }
 0x2d6   : > { %v11920_v60 = vsel %vm3172_vm3, %v15766_v9, %v3985_v13  ;;  %v15770_v22 = vrot.slane %v15769_v33, 4  ;;  %v15772_v30 = vrot.slane %v15771_v34, 4  ;;  %v5103_v42 = vmul.f32 %v11938_v57, %v11405_v18  ;;  %v15776_v13 = vld [vmem:[#allocation27_spill] sm:$0xff]  ;;  %15780 = vst [vmem:[#allocation22_spill] sm:$0xff] %v11963_v63  ;;  %v11981_v34 = vld [vmem:[%s6732_s29 + $0x98] sm:$0xff] }
 0x2d7   : > { %v11925_v10 = vsel %vm3172_vm3, %v15768_v40, %v4233_v17  ;;  %v4785_v47 = vadd.f32 %v11792_v37, %v4537_v20  ;;  %v15775_v0 = vrot.slane %v15774_v46, 4  ;;  %v5351_v14 = vmul.f32 %v11420_v24, %v11806_v28  ;;  %v15778_v37 = vld [vmem:[#allocation41_spill] sm:$0xff]  ;;  %v15783_v33 = vld [vmem:[#allocation19_spill] sm:$0xff]  ;;  %v15785_v46 = vld [vmem:[#allocation40_spill] sm:$0xff] }
 0x2d8   : > { %v11930_v31 = vsel %vm4413_vm0, %v15770_v22, %v4482_v38  ;;  %v11935_v36 = vsel %vm4413_vm0, %v15772_v30, %v4730_v32  ;;  %v278_v17 = vmul.f32 %v15776_v13, %v11067_v58  ;;  %v2319_v44 = vadd.f32 %v2249_v12, %v2071_v21  ;;  %v15781_v40 = vld [vmem:[#allocation61_spill] sm:$0xff]  ;;  %v12284_v57 = vld [vmem:[%s13956_s1 + $0x10] ss:$0 sm:$0xff] }
 0x2d9   : > { %v11946_v35 = vsel %vm4413_vm0, %v15775_v0, %v4978_v29  ;;  %v5226_v3 = vrot.slane %v5103_v42, 4  ;;  %v318_v8 = vmul.f32 %v11953_v4, %v11074_v15  ;;  %v390_v38 = vmul.f32 %v15778_v37, %v11084_v25  ;;  %15818 = vst [vmem:[#allocation47_spill] sm:$0xff] %v12284_v57 }
 0x2da   : > { %v5033_v32 = vadd.f32 %v11799_v27, %v4785_v47  ;;  %v5474_v20 = vrot.slane %v5351_v14, 4  ;;  %v462_v9 = vmul.f32 %v15779_v62, %v11092_v45  ;;  %v534_v58 = vmul.f32 %v11963_v63, %v11099_v51 }
 0x2db   : > { %v2567_v12 = vadd.f32 %v2497_v5, %v2319_v44  ;;  %v15782_v29 = vrot.slane %v15781_v40, 4  ;;  %v350_v15 = vadd.f32 %v318_v8, %v278_v17  ;;  %v612_v25 = vmul.f32 %v11114_v43, %v15776_v13  ;;  %v15786_v44 = vld [vmem:[#allocation31_spill] sm:$0xff] }
 0x2dc   : > { %v5281_v27 = vadd.f32 %v11818_v39, %v5033_v32  ;;  %v15784_v22 = vrot.slane %v15783_v33, 4  ;;  %v11985_v51 = vmul.f32 %v11981_v34, %v11114_v43  ;;  %v861_v5 = vmul.f32 %v11953_v4, %v11134_v49 }
 0x2dd   : > { %v11970_v21 = vsel %vm4413_vm0, %v15782_v29, %v5226_v3  ;;  %v2815_v30 = vadd.f32 %v2745_v6, %v2567_v12  ;;  %v422_v42 = vadd.f32 %v390_v38, %v350_v15  ;;  %v721_v47 = vrot.slane %v612_v25, 1  ;;  %v15787_v6 = vld [vmem:[#allocation23_spill] sm:$0xff] }
 0x2de   : > { %v11978_v45 = vsel %vm4413_vm0, %v15784_v22, %v5474_v20  ;;  %v11991_v39 = vmul.f32 %v15785_v46, %v11134_v49  ;;  %v5529_v0 = vadd.f32 %v11827_v41, %v5281_v27  ;;  %v14677_v14 = vrot.slane %v11985_v51, 1  ;;  %v15788_v20 = vld [vmem:[#allocation26_spill] sm:$0xff] }
 0x2df   : > { %v969_v17 = vrot.slane %v861_v5, 1  ;;  %v1109_v3 = vmul.f32 %v15778_v37, %v15786_v44  ;;  %v3063_v43 = vadd.f32 %v2993_v56, %v2815_v30  ;;  %v494_v8 = vadd.f32 %v462_v9, %v422_v42  ;;  %v15789_v56 = vld [vmem:[#allocation14_spill] sm:$0xff]  ;;  %v12021_v30 = vld [vmem:[%s6732_s29 + $0xf8] sm:$0xff] }
 0x2e0   : > { %v14676_v32 = vrot.slane %v11991_v39, 1  ;;  %v12000_v38 = vmul.f32 %v15787_v6, %v15786_v44  ;;  %6307 = vmatmul.mubr.msk.f32.gmra.mxu0 %vm5558_vm4, %v5529_v0  ;;  %v723_v49 = vsel %vm690_vm1, %v721_v47, %v14677_v14  ;;  %v1357_v12 = vmul.f32 %v15788_v20, %v15779_v62  ;;  %v15790_v22 = vld [vmem:[#allocation10_spill] sm:$0xff]  ;;  %15791 = vst [vmem:[#allocation8_spill] sm:$0xff] %v12021_v30  ;;  %v15813_v14 = vld [vmem:[#allocation15_spill] sm:$0xff] }
 0x2e1   : > { %v1217_v41 = vrot.slane %v1109_v3, 1  ;;  %v12010_v40 = vmul.f32 %v15789_v56, %v15788_v20  ;;  %v3312_v9 = vadd.f32 %v11890_v55, %v3063_v43  ;;  %v566_v29 = vadd.f32 %v534_v58, %v494_v8  ;;  %v15792_v0 = vld [vmem:[#allocation42_spill] sm:$0xff] }
 0x2e2   : > { %v971_v15 = vsel %vm690_vm1, %v969_v17, %v14676_v32  ;;  %v14675_v25 = vrot.slane %v12000_v38, 1  ;;  %v1465_v27 = vrot.slane %v1357_v12, 1  ;;  %v1605_v5 = vmul.f32 %v11963_v63, %v15790_v22 }
 0x2e3   : > { %v14674_v33 = vrot.slane %v12010_v40, 1  ;;  %v12025_v42 = vmul.f32 %v12021_v30, %v15790_v22  ;;  %v3560_v55 = vadd.f32 %v11898_v26, %v3312_v9  ;;  %v815_v58 = vadd.f32 %v723_v49, %v566_v29 }
 0x2e4   : > { %v1219_v47 = vsel %vm690_vm1, %v1217_v41, %v14675_v25  ;;  %v1853_v17 = vmul.f32 %v15792_v0, %v15776_v13  ;;  %v1713_v3 = vrot.slane %v1605_v5, 1  ;;  %v12039_v8 = vmul.f32 %v11981_v34, %v15792_v0 }
 0x2e5   : > { %v1467_v44 = vsel %vm690_vm1, %v1465_v27, %v14674_v33  ;;  %v14673_v43 = vrot.slane %v12025_v42, 1  ;;  %v3808_v26 = vadd.f32 %v11914_v48, %v3560_v55  ;;  %v1063_v49 = vadd.f32 %v971_v15, %v815_v58 }
 0x2e6   : > { %v1962_v20 = vrot.slane %v1853_v17, 2  ;;  %v2102_v41 = vmul.f32 %v11953_v4, %v11215_v53  ;;  %v14672_v12 = vrot.slane %v12039_v8, 2  ;;  %v12050_v9 = vmul.f32 %v15785_v46, %v11215_v53 }
 0x2e7   : > { %v1715_v13 = vsel %vm690_vm1, %v1713_v3, %v14673_v43  ;;  %v2350_v29 = vmul.f32 %v15778_v37, %v11230_v50  ;;  %v4056_v48 = vadd.f32 %v11920_v60, %v3808_v26  ;;  %v1311_v15 = vadd.f32 %v1219_v47, %v1063_v49  ;;  %v12260_v43 = vld [vmem:[%s13956_s1 + $0x6] ss:$0 sm:$0xff] }
 0x2e8   : > { %v2210_v27 = vrot.slane %v2102_v41, 2  ;;  %v12057_v22 = vmul.f32 %v15787_v6, %v11230_v50  ;;  %v1964_v5 = vsel %vm1931_vm2, %v1962_v20, %v14672_v12  ;;  %v14670_v55 = vrot.slane %v12050_v9, 2  ;;  %15812 = vst [vmem:[#allocation62_spill] sm:$0xff] %v12260_v43 }
 0x2e9   : > { %v2458_v58 = vrot.slane %v2350_v29, 2  ;;  %v2598_v53 = vmul.f32 %v11246_v2, %v15779_v62  ;;  %v4304_v0 = vadd.f32 %v11925_v10, %v4056_v48  ;;  %v1559_v60 = vadd.f32 %v1467_v44, %v1311_v15  ;;  %v6543_v29 = vld [vmem:[%s6732_s29 + $0x90] sm:$0xff] }
 0x2ea   : > { %v14669_v47 = vrot.slane %v12057_v22, 2  ;;  %v12069_v50 = vmul.f32 %v11246_v2, %v15789_v56  ;;  %v2212_v17 = vsel %vm1931_vm2, %v2210_v27, %v14670_v55  ;;  %v2846_v26 = vmul.f32 %v11963_v63, %v11262_v11  ;;  %v12243_v55 = vld [vmem:[%s13956_s1 + $0x1] ss:$0 sm:$0xff] }
 0x2eb   : > { %v2706_v3 = vrot.slane %v2598_v53, 2  ;;  %v12078_v62 = vmul.f32 %v12021_v30, %v11262_v11  ;;  %v4553_v10 = vadd.f32 %v11930_v31, %v4304_v0  ;;  %v1807_v44 = vadd.f32 %v1715_v13, %v1559_v60  ;;  %15810 = vst [vmem:[#allocation32_spill] sm:$0xff] %v12243_v55 }
 0x2ec   : > { %v2460_v2 = vsel %vm1931_vm2, %v2458_v58, %v14669_v47  ;;  %v14668_v49 = vrot.slane %v12069_v50, 2  ;;  %v2954_v20 = vrot.slane %v2846_v26, 2  ;;  %v3094_v48 = vmul.f32 %v6543_v29, %v11279_v52 }
 0x2ed   : > { %v14660_v41 = vrot.slane %v12078_v62, 2  ;;  %v12090_v15 = vmul.f32 %v11981_v34, %v11279_v52  ;;  %v4801_v11 = vadd.f32 %v11935_v36, %v4553_v10  ;;  %v2056_v31 = vadd.f32 %v1964_v5, %v1807_v44 }
 0x2ee   : > { %v2708_v13 = vsel %vm1931_vm2, %v2706_v3, %v14668_v49  ;;  %v3343_v27 = vmul.f32 %v11953_v4, %v11294_v1  ;;  %v3203_v53 = vrot.slane %v3094_v48, 3  ;;  %v12104_v52 = vmul.f32 %v15785_v46, %v11294_v1  ;;  %v12236_v49 = vld [vmem:[%s13956_s1 + $0x14] ss:$0 sm:$0xff] }
 0x2ef   : > { %v2956_v58 = vsel %vm1931_vm2, %v2954_v20, %v14660_v41  ;;  %v14659_v0 = vrot.slane %v12090_v15, 3  ;;  %v5049_v36 = vadd.f32 %v11946_v35, %v4801_v11  ;;  %v2304_v5 = vadd.f32 %v2212_v17, %v2056_v31  ;;  %v12118_v20 = vld [vmem:[%s6732_s29 + $0xd8] sm:$0xff]  ;;  %15809 = vst [vmem:[#allocation50_spill] sm:$0xff] %v12236_v49 }
 0x2f0   : > { %15793 = vst [vmem:[#allocation44_spill] sm:$0xff] %v12104_v52  ;;  %v3451_v60 = vrot.slane %v3343_v27, 3  ;;  %v3591_v3 = vmul.f32 %v15778_v37, %v11310_v59  ;;  %v14667_v10 = vrot.slane %v12104_v52, 3  ;;  %v12115_v44 = vmul.f32 %v15787_v6, %v11310_v59  ;;  %15795 = vst [vmem:[#allocation58_spill] sm:$0xff] %v12118_v20  ;;  %v12456_v52 = vld [vmem:[%s13956_s1 + $0x17] ss:$0 sm:$0xff] }
 0x2f1   : > { %v3205_v26 = vsel %vm3172_vm3, %v3203_v53, %v14659_v0  ;;  %v3839_v1 = vmul.f32 %v12118_v20, %v11325_v19  ;;  %v5297_v35 = vadd.f32 %v11970_v21, %v5049_v36  ;;  %v2552_v17 = vadd.f32 %v2460_v2, %v2304_v5  ;;  %15838 = vst [vmem:[#allocation41_spill] sm:$0xff] %v12456_v52 }
 0x2f2   : > { %15794 = vst [vmem:[#allocation52_spill] sm:$0xff] %v12115_v44  ;;  %v3699_v48 = vrot.slane %v3591_v3, 3  ;;  %v12125_v11 = vmul.f32 %v11325_v19, %v15789_v56  ;;  %v3453_v31 = vsel %vm3172_vm3, %v3451_v60, %v14667_v10  ;;  %v14666_v59 = vrot.slane %v12115_v44, 3 }
 0x2f3   : > { %v3947_v27 = vrot.slane %v3839_v1, 3  ;;  %v4087_v53 = vmul.f32 %v11963_v63, %v11344_v23  ;;  %v5545_v0 = vadd.f32 %v11978_v45, %v5297_v35  ;;  %v2800_v41 = vadd.f32 %v2708_v13, %v2552_v17 }
 0x2f4   : > { %15796 = vst [vmem:[#allocation60_spill] sm:$0xff] %v12125_v11  ;;  %v14665_v21 = vrot.slane %v12125_v11, 3  ;;  %v12137_v2 = vmul.f32 %v12021_v30, %v11344_v23  ;;  %v3701_v19 = vsel %vm3172_vm3, %v3699_v48, %v14666_v59  ;;  %v4335_v36 = vmul.f32 %v6543_v29, %v11360_v16 }
 0x2f5   : > { %v4195_v56 = vrot.slane %v4087_v53, 3  ;;  %v12145_v5 = vmul.f32 %v11981_v34, %v11360_v16  ;;  %6331 = vmatmul.mubr.msk.f32.gmra.mxu1 %vm5558_vm4, %v5545_v0  ;;  %v3048_v45 = vadd.f32 %v2956_v58, %v2800_v41  ;;  %v4584_v60 = vmul.f32 %v11953_v4, %v11375_v54  ;;  %v12176_v53 = vld [vmem:[%s6732_s29 + $0xe0] sm:$0xff]  ;;  %v15816_v4 = vld [vmem:[#allocation13_spill] sm:$0xff] }
 0x2f6   : > { %15797 = vst [vmem:[#allocation64_spill] sm:$0xff] %v12137_v2  ;;  %v3949_v13 = vsel %vm3172_vm3, %v3947_v27, %v14665_v21  ;;  %v14664_v23 = vrot.slane %v12137_v2, 3  ;;  %v4444_v3 = vrot.slane %v4335_v36, 4  ;;  %v12157_v16 = vmul.f32 %v15785_v46, %v11375_v54  ;;  %15801 = vst [vmem:[#allocation39_spill] sm:$0xff] %v12176_v53 }
 0x2f7   : > { %15798 = vst [vmem:[#allocation29_spill] sm:$0xff] %v12145_v5  ;;  %v14662_v29 = vrot.slane %v12145_v5, 4  ;;  %v4832_v41 = vmul.f32 %v11387_v61, %v15778_v37  ;;  %v3297_v58 = vadd.f32 %v3205_v26, %v3048_v45  ;;  %v4692_v1 = vrot.slane %v4584_v60, 4  ;;  %v12192_v45 = vld [vmem:[%s6732_s29 + $0x1b0] sm:$0xff]  ;;  %v12197_v60 = vld [vmem:[%s13956_s1] ss:$0 sm:$0xff] }
 0x2f8   : > { %15799 = vst [vmem:[#allocation6_spill] sm:$0xff] %v12157_v16  ;;  %v4197_v0 = vsel %vm3172_vm3, %v4195_v56, %v14664_v23  ;;  %v12166_v35 = vmul.f32 %v15787_v6, %v11387_v61  ;;  %v14661_v54 = vrot.slane %v12157_v16, 4  ;;  %v5080_v37 = vmul.f32 %v12118_v20, %v11405_v18  ;;  %15804 = vst [vmem:[#allocation20_spill] sm:$0xff] %v12192_v45  ;;  %v15808_v23 = vld [vmem:[#allocation24_spill] sm:$0xff] }
 0x2f9   : > { %v4446_v17 = vsel %vm4413_vm0, %v4444_v3, %v14662_v29  ;;  %v4940_v48 = vrot.slane %v4832_v41, 4  ;;  %v3545_v26 = vadd.f32 %v3453_v31, %v3297_v58  ;;  %v12180_v61 = vmul.f32 %v12176_v53, %v11405_v18  ;;  %v15805_v18 = vld [vmem:[#allocation48_spill] sm:$0xff]  ;;  %v12212_v29 = vld [vmem:[%s6732_s29 + $0x168] sm:$0xff] }
 0x2fa   : > { %15800 = vst [vmem:[#allocation30_spill] sm:$0xff] %v12166_v35  ;;  %v14663_v27 = vrot.slane %v12166_v35, 4  ;;  %v5328_v6 = vmul.f32 %v11963_v63, %v11420_v24  ;;  %v4694_v56 = vsel %vm4413_vm0, %v4692_v1, %v14661_v54  ;;  %v5188_v36 = vrot.slane %v5080_v37, 4  ;;  %v12209_v54 = vld [vmem:[%s13956_s1 + $0x5] ss:$0 sm:$0xff]  ;;  %15806 = vst [vmem:[#allocation12_spill] sm:$0xff] %v12212_v29 }
 0x2fb   : > { %15802 = vst [vmem:[#allocation43_spill] sm:$0xff] %v12180_v61  ;;  %v12189_v31 = vmul.f32 %v12021_v30, %v11420_v24  ;;  %v294_v3 = vmul.f32 %v12197_v60, %v15805_v18  ;;  %v3793_v41 = vadd.f32 %v3701_v19, %v3545_v26  ;;  %v14671_v1 = vrot.slane %v12180_v61, 4  ;;  %v15807_v26 = vld [vmem:[#allocation34_spill] sm:$0xff] }
 0x2fc   : > { %v4942_v58 = vsel %vm4413_vm0, %v4940_v48, %v14663_v27  ;;  %v5436_v37 = vrot.slane %v5328_v6, 4  ;;  %v334_v19 = vmul.f32 %v12212_v29, %v12209_v54  ;;  %v12219_v48 = vld [vmem:[%s13956_s1 + $0xa] ss:$0 sm:$0xff]  ;;  %v12226_v27 = vld [vmem:[%s13956_s1 + $0xf] ss:$0 sm:$0xff]  ;;  %v550_v47 = vmul.f32 %v12236_v49, %v12192_v45 }
 0x2fd   : > { %15803 = vst [vmem:[#allocation38_spill] sm:$0xff] %v12189_v31  ;;  %v14678_v24 = vrot.slane %v12189_v31, 4  ;;  %v406_v6 = vmul.f32 %v12219_v48, %v15807_v26  ;;  %v478_v21 = vmul.f32 %v12226_v27, %v15808_v23  ;;  %v4041_v59 = vadd.f32 %v3949_v13, %v3793_v41 }
 0x2fe   : > { %v5190_v10 = vsel %vm4413_vm0, %v5188_v36, %v14671_v1  ;;  %v636_v13 = vmul.f32 %v12243_v55, %v15805_v18  ;;  %v366_v41 = vadd.f32 %v334_v19, %v294_v3  ;;  %v12251_v1 = vld [vmem:[%s6732_s29 + $0x158] sm:$0xff]  ;;  %v885_v33 = vmul.f32 %v12260_v43, %v12212_v29  ;;  %v12271_v3 = vld [vmem:[%s13956_s1 + $0xb] ss:$0 sm:$0xff] }
 0x2ff   : > { %v5438_v36 = vsel %vm4413_vm0, %v5436_v37, %v14678_v24  ;;  %v12255_v12 = vmul.f32 %v12251_v1, %v12243_v55  ;;  %v4289_v25 = vadd.f32 %v4197_v0, %v4041_v59  ;;  %v12266_v37 = vmul.f32 %v12260_v43, %v15813_v14  ;;  %15815 = vst [vmem:[#allocation3_spill] sm:$0xff] %v12271_v3 }
 0x300   : > { %v761_v32 = vrot.slane %v636_v13, 1  ;;  %v1133_v19 = vmul.f32 %v12271_v3, %v15807_v26  ;;  %v438_v24 = vadd.f32 %v406_v6, %v366_v41  ;;  %v1009_v20 = vrot.slane %v885_v33, 1 }
 0x301   : > { %15811 = vst [vmem:[#allocation33_spill] sm:$0xff] %v12255_v12  ;;  %15814 = vst [vmem:[#allocation45_spill] sm:$0xff] %v12266_v37  ;;  %v14694_v63 = vrot.slane %v12255_v12, 1  ;;  %v12278_v59 = vmul.f32 %v12271_v3, %v15816_v4  ;;  %v4538_v0 = vadd.f32 %v4446_v17, %v4289_v25  ;;  %v14695_v13 = vrot.slane %v12266_v37, 1 }
 0x302   : > { %v1257_v28 = vrot.slane %v1133_v19, 1  ;;  %v1381_v31 = vmul.f32 %v12284_v57, %v15808_v23  ;;  %v510_v6 = vadd.f32 %v478_v21, %v438_v24  ;;  %v12294_v25 = vmul.f32 %v12284_v57, %v15819_v7  ;;  %v12297_v19 = vld [vmem:[%s6732_s29 + $0x1b8] sm:$0xff]  ;;  %v12305_v21 = vld [vmem:[%s13956_s1 + $0x15] ss:$0 sm:$0xff] }
 0x303   : > { %15817 = vst [vmem:[#allocation63_spill] sm:$0xff] %v12278_v59  ;;  %v763_v33 = vsel %vm690_vm1, %v761_v32, %v14694_v63  ;;  %v14696_v41 = vrot.slane %v12278_v59, 1  ;;  %v4786_v17 = vadd.f32 %v4694_v56, %v4538_v0  ;;  %15821 = vst [vmem:[#allocation51_spill] sm:$0xff] %v12297_v19  ;;  %v1011_v61 = vsel %vm690_vm1, %v1009_v20, %v14695_v13  ;;  %v12320_v13 = vld [vmem:[%s13956_s1 + $0x2] ss:$0 sm:$0xff] }
 0x304   : > { %15820 = vst [vmem:[#allocation49_spill] sm:$0xff] %v12294_v25  ;;  %v1505_v35 = vrot.slane %v1381_v31, 1  ;;  %15822 = vst [vmem:[#allocation56_spill] sm:$0xff] %v12305_v21  ;;  %v1629_v32 = vmul.f32 %v12305_v21, %v12192_v45  ;;  %v582_v24 = vadd.f32 %v550_v47, %v510_v6  ;;  %v14700_v0 = vrot.slane %v12294_v25, 1  ;;  %v12350_v25 = vld [vmem:[%s13956_s1 + $0xc] ss:$0 sm:$0xff] }
 0x305   : > { %v1259_v56 = vsel %vm690_vm1, %v1257_v28, %v14696_v41  ;;  %v12315_v63 = vmul.f32 %v12305_v21, %v12297_v19  ;;  %v5034_v20 = vadd.f32 %v4942_v58, %v4786_v17  ;;  %15824 = vst [vmem:[#allocation57_spill] sm:$0xff] %v12320_v13  ;;  %v1877_v47 = vmul.f32 %v12320_v13, %v15805_v18  ;;  %v12335_v17 = vld [vmem:[%s13956_s1 + $0x7] ss:$0 sm:$0xff] }
 0x306   : > { %v1753_v31 = vrot.slane %v1629_v32, 1  ;;  %v12326_v6 = vmul.f32 %v12320_v13, %v12251_v1  ;;  %v831_v28 = vadd.f32 %v763_v33, %v582_v24  ;;  %v1507_v41 = vsel %vm690_vm1, %v1505_v35, %v14700_v0 }
 0x307   : > { %15823 = vst [vmem:[#allocation7_spill] sm:$0xff] %v12315_v63  ;;  %v14702_v58 = vrot.slane %v12315_v63, 1  ;;  %v2126_v32 = vmul.f32 %v12335_v17, %v12212_v29  ;;  %v5282_v59 = vadd.f32 %v5190_v10, %v5034_v20  ;;  %v2002_v37 = vrot.slane %v1877_v47, 2 }
 0x308   : > { %15825 = vst [vmem:[#allocation11_spill] sm:$0xff] %v12326_v6  ;;  %v14703_v12 = vrot.slane %v12326_v6, 2  ;;  %v12342_v33 = vmul.f32 %v12335_v17, %v15813_v14  ;;  %v1079_v24 = vadd.f32 %v1011_v61, %v831_v28  ;;  %v2374_v10 = vmul.f32 %v12350_v25, %v15807_v26 }
 0x309   : > { %v1755_v35 = vsel %vm690_vm1, %v1753_v31, %v14702_v58  ;;  %v2250_v0 = vrot.slane %v2126_v32, 2  ;;  %v5530_v20 = vadd.f32 %v5438_v36, %v5282_v59  ;;  %v12360_v28 = vmul.f32 %v12350_v25, %v15816_v4  ;;  %v12365_v58 = vld [vmem:[%s13956_s1 + $0x11] ss:$0 sm:$0xff] }
 0x30a   : > { %15826 = vst [vmem:[#allocation16_spill] sm:$0xff] %v12342_v33  ;;  %v2004_v47 = vsel %vm1931_vm2, %v2002_v37, %v14703_v12  ;;  %v14705_v61 = vrot.slane %v12342_v33, 2  ;;  %v1327_v31 = vadd.f32 %v1259_v56, %v1079_v24  ;;  %v2498_v32 = vrot.slane %v2374_v10, 2  ;;  %v12381_v24 = vld [vmem:[%s13956_s1 + $0x16] ss:$0 sm:$0xff] }
 0x30b   : > { %15827 = vst [vmem:[#allocation18_spill] sm:$0xff] %v12360_v28  ;;  %v2622_v36 = vmul.f32 %v12365_v58, %v15808_v23  ;;  %v12371_v59 = vmul.f32 %v12365_v58, %v15819_v7  ;;  %6309 = vmatprep.mubr.msk.f32.mxu0 %vm5558_vm4, %v5530_v20  ;;  %v14710_v56 = vrot.slane %v12360_v28, 2  ;;  %v2870_v23 = vmul.f32 %v12381_v24, %v12192_v45 }
 0x30c   : > { %v2252_v37 = vsel %vm1931_vm2, %v2250_v0, %v14705_v61  ;;  %v12387_v10 = vmul.f32 %v12381_v24, %v12297_v19  ;;  %v1575_v12 = vadd.f32 %v1507_v41, %v1327_v31  ;;  %v12393_v0 = vld [vmem:[%s13956_s1 + $0x3] ss:$0 sm:$0xff] }
 0x30d   : > { %15828 = vst [vmem:[#allocation59_spill] sm:$0xff] %v12371_v59  ;;  %v2746_v20 = vrot.slane %v2622_v36, 2  ;;  %v14711_v33 = vrot.slane %v12371_v59, 2  ;;  %v3118_v61 = vmul.f32 %v12393_v0, %v15805_v18  ;;  %v2500_v6 = vsel %vm1931_vm2, %v2498_v32, %v14710_v56  ;;  %v12411_v18 = vld [vmem:[%s13956_s1 + $0x8] ss:$0 sm:$0xff] }
 0x30e   : > { %15829 = vst [vmem:[#allocation53_spill] sm:$0xff] %v12387_v10  ;;  %v2994_v63 = vrot.slane %v2870_v23, 2  ;;  %v14713_v16 = vrot.slane %v12387_v10, 2  ;;  %v12403_v41 = vmul.f32 %v12393_v0, %v12251_v1  ;;  %v1823_v31 = vadd.f32 %v1755_v35, %v1575_v12  ;;  %v12426_v35 = vld [vmem:[%s13956_s1 + $0xd] ss:$0 sm:$0xff] }
 0x30f   : > { %v2748_v36 = vsel %vm1931_vm2, %v2746_v20, %v14711_v33  ;;  %v3243_v5 = vrot.slane %v3118_v61, 3  ;;  %v3367_v32 = vmul.f32 %v12411_v18, %v12212_v29  ;;  %v12421_v12 = vmul.f32 %v12411_v18, %v15813_v14  ;;  %15832 = vst [vmem:[#allocation21_spill] sm:$0xff] %v12426_v35 }
 0x310   : > { %15830 = vst [vmem:[#allocation5_spill] sm:$0xff] %v12403_v41  ;;  %v2996_v23 = vsel %vm1931_vm2, %v2994_v63, %v14713_v16  ;;  %v3615_v61 = vmul.f32 %v12426_v35, %v15807_v26  ;;  %v2072_v20 = vadd.f32 %v2004_v47, %v1823_v31  ;;  %v12432_v10 = vmul.f32 %v12426_v35, %v15816_v4  ;;  %v12437_v63 = vld [vmem:[%s13956_s1 + $0x12] ss:$0 sm:$0xff]  ;;  %v12440_v16 = vld [vmem:[%s6732_s29 + $0x198] sm:$0xff] }
 0x311   : > { %15831 = vst [vmem:[#allocation37_spill] sm:$0xff] %v12421_v12  ;;  %v3491_v33 = vrot.slane %v3367_v32, 3  ;;  %15834 = vst [vmem:[#allocation2_spill] sm:$0xff] %v12437_v63  ;;  %v3863_v56 = vmul.f32 %v12440_v16, %v12437_v63  ;;  %v15836_v59 = vrot.slane %v12403_v41, 3  ;;  %v14722_v31 = vrot.slane %v12421_v12, 3 }
 0x312   : > { %15833 = vst [vmem:[#allocation17_spill] sm:$0xff] %v12432_v10  ;;  %15835 = vst [vmem:[#allocation36_spill] sm:$0xff] %v12440_v16  ;;  %v3739_v32 = vrot.slane %v3615_v61, 3  ;;  %v12450_v28 = vmul.f32 %v12437_v63, %v15819_v7  ;;  %v2320_v2 = vadd.f32 %v2252_v37, %v2072_v20  ;;  %v14730_v11 = vrot.slane %v12432_v10, 3  ;;  %v12471_v37 = vld [vmem:[%s13956_s1 + $0x4] ss:$0 sm:$0xff] }
 0x313   : > { %v3245_v47 = vsel %vm3172_vm3, %v3243_v5, %v15836_v59  ;;  %v3987_v44 = vrot.slane %v3863_v56, 3  ;;  %v4111_v41 = vmul.f32 %v12456_v52, %v12192_v45  ;;  %v3493_v5 = vsel %vm3172_vm3, %v3491_v33, %v14722_v31  ;;  %v6570_v56 = vld [vmem:[%s6732_s29 + $0x150] sm:$0xff] }
 0x314   : > { %15837 = vst [vmem:[#allocation27_spill] sm:$0xff] %v12450_v28  ;;  %v14729_v59 = vrot.slane %v12450_v28, 3  ;;  %v12466_v7 = vmul.f32 %v12456_v52, %v12297_v19  ;;  %v4359_v61 = vmul.f32 %v6570_v56, %v12471_v37  ;;  %v2568_v20 = vadd.f32 %v2500_v6, %v2320_v2  ;;  %v12489_v2 = vld [vmem:[%s13956_s1 + $0x9] ss:$0 sm:$0xff] }
 0x315   : > { %v3741_v12 = vsel %vm3172_vm3, %v3739_v32, %v14730_v11  ;;  %v4235_v33 = vrot.slane %v4111_v41, 3  ;;  %v12480_v31 = vmul.f32 %v12471_v37, %v12251_v1  ;;  %v4608_v6 = vmul.f32 %v12489_v2, %v12212_v29 }
 0x316   : > { %15839 = vst [vmem:[#allocation25_spill] sm:$0xff] %v12466_v7  ;;  %v3989_v52 = vsel %vm3172_vm3, %v3987_v44, %v14729_v59  ;;  %v14734_v63 = vrot.slane %v12466_v7, 3  ;;  %v4484_v35 = vrot.slane %v4359_v61, 4  ;;  %v2816_v41 = vadd.f32 %v2748_v36, %v2568_v20  ;;  %v12501_v44 = vld [vmem:[%s13956_s1 + $0xe] ss:$0 sm:$0xff] }
 0x317   : > { %15840 = vst [vmem:[#allocation61_spill] sm:$0xff] %v12480_v31  ;;  %v12496_v56 = vmul.f32 %v12489_v2, %v15813_v14  ;;  %v4856_v61 = vmul.f32 %v12501_v44, %v15807_v26  ;;  %v4732_v11 = vrot.slane %v4608_v6, 4  ;;  %v12510_v36 = vmul.f32 %v12501_v44, %v15816_v4  ;;  %v12515_v20 = vld [vmem:[%s13956_s1 + $0x13] ss:$0 sm:$0xff]  ;;  %v12525_v4 = vld [vmem:[%s6732_s29 + $0x1a0] sm:$0xff] }
 0x318   : > { %v4237_v59 = vsel %vm3172_vm3, %v4235_v33, %v14734_v63  ;;  %v5104_v32 = vmul.f32 %v12515_v20, %v12440_v16  ;;  %v3064_v29 = vadd.f32 %v2996_v23, %v2816_v41  ;;  %v15843_v26 = vrot.slane %v12480_v31, 4  ;;  %15844 = vst [vmem:[#allocation31_spill] sm:$0xff] %v12525_v4  ;;  %v12534_v23 = vld [vmem:[%s13956_s1 + $0x18] ss:$0 sm:$0xff] }
 0x319   : > { %15841 = vst [vmem:[#allocation19_spill] sm:$0xff] %v12496_v56  ;;  %15842 = vst [vmem:[#allocation40_spill] sm:$0xff] %v12510_v36  ;;  %v14740_v33 = vrot.slane %v12496_v56, 4  ;;  %v4980_v6 = vrot.slane %v4856_v61, 4  ;;  %v14744_v63 = vrot.slane %v12510_v36, 4  ;;  %v12529_v28 = vmul.f32 %v12525_v4, %v12515_v20 }
 0x31a   : > { %v4486_v7 = vsel %vm4413_vm0, %v4484_v35, %v15843_v26  ;;  %v5228_v10 = vrot.slane %v5104_v32, 4  ;;  %v5352_v35 = vmul.f32 %v12534_v23, %v12192_v45  ;;  %v3313_v41 = vadd.f32 %v3245_v47, %v3064_v29  ;;  %v12555_v45 = vld [vmem:[%s6732_s29 + $0xc8] sm:$0xff] }
 0x31b   : > { %15845 = vst [vmem:[#allocation23_spill] sm:$0xff] %v12529_v28  ;;  %v4734_v61 = vsel %vm4413_vm0, %v4732_v11, %v14740_v33  ;;  %v12543_v26 = vmul.f32 %v12534_v23, %v12297_v19  ;;  %v279_v32 = vmul.f32 %v12197_v60, %v11981_v34  ;;  %v4982_v16 = vsel %vm4413_vm0, %v4980_v6, %v14744_v63 }
 0x31c   : > { %v14751_v31 = vrot.slane %v12529_v28, 4  ;;  %v5476_v29 = vrot.slane %v5352_v35, 4  ;;  %v319_v47 = vmul.f32 %v12209_v54, %v15785_v46  ;;  %v3561_v11 = vadd.f32 %v3493_v5, %v3313_v41  ;;  %15847 = vst [vmem:[#allocation14_spill] sm:$0xff] %v12555_v45  ;;  %v15848_v5 = vld [vmem:[#allocation4_spill] sm:$0xff] }
 0x31d   : > { %15846 = vst [vmem:[#allocation26_spill] sm:$0xff] %v12543_v26  ;;  %v14754_v33 = vrot.slane %v12543_v26, 4  ;;  %v391_v34 = vmul.f32 %v12555_v45, %v12219_v48  ;;  %v463_v36 = vmul.f32 %v12226_v27, %v12176_v53  ;;  %v535_v46 = vmul.f32 %v12236_v49, %v12021_v30  ;;  %v12572_v45 = vld [vmem:[%s6732_s29 + $0xb8] sm:$0xf]  ;;  %v12577_v28 = vld [vmem:[%s6732_s29 + $0xd0] sm:$0xf] }
 0x31e   : > { %v5230_v6 = vsel %vm4413_vm0, %v5228_v10, %v14751_v31  ;;  %v351_v35 = vadd.f32 %v319_v47, %v279_v32  ;;  %v614_v41 = vmul.f32 %v12243_v55, %v15848_v5  ;;  %v3809_v63 = vadd.f32 %v3741_v12, %v3561_v11  ;;  %15849 = vst [vmem:[#allocation10_spill] sm:$0xff] %v12572_v45  ;;  %v15851_v31 = vld [vmem:[#allocation55_spill] sm:$0xff]  ;;  %v12584_v12 = vld [vmem:[%s6732_s29 + $0x100] sm:$0xf] }
 0x31f   : > { %v5478_v56 = vsel %vm4413_vm0, %v5476_v29, %v14754_v33  ;;  %v863_v53 = vmul.f32 %v12572_v45, %v12260_v43  ;;  %15850 = vst [vmem:[#allocation42_spill] sm:$0xff] %v12577_v28  ;;  %v1111_v10 = vmul.f32 %v12577_v28, %v12271_v3  ;;  %v1359_v30 = vmul.f32 %v12284_v57, %v15851_v31 }
 0x320   : > { %v423_v32 = vadd.f32 %v391_v34, %v351_v35  ;;  %v724_v47 = vrot.slane %v614_v41, 1  ;;  %15852 = vst [vmem:[#allocation48_spill] sm:$0xff] %v12584_v12  ;;  %v1607_v29 = vmul.f32 %v12584_v12, %v12305_v21  ;;  %v4057_v11 = vadd.f32 %v3989_v52, %v3809_v63 }
 0x321   : > { %v972_v33 = vrot.slane %v863_v53, 1  ;;  %v1220_v26 = vrot.slane %v1111_v10, 1  ;;  %v1855_v43 = vmul.f32 %v12320_v13, %v15848_v5  ;;  %v15853_v49 = vrot.slane %v11985_v51, 1 }
 0x322   : > { %v495_v55 = vadd.f32 %v463_v36, %v423_v32  ;;  %v1468_v35 = vrot.slane %v1359_v30, 1  ;;  %v1716_v41 = vrot.slane %v1607_v29, 1  ;;  %v4305_v3 = vadd.f32 %v4237_v59, %v4057_v11 }
 0x323   : > { %v725_v34 = vsel %vm690_vm1, %v15853_v49, %v724_v47  ;;  %v15854_v57 = vrot.slane %v11991_v39, 1  ;;  %v15855_v21 = vrot.slane %v12000_v38, 1  ;;  %v1965_v53 = vrot.slane %v1855_v43, 2 }
 0x324   : > { %v567_v63 = vadd.f32 %v535_v46, %v495_v55  ;;  %v15856_v10 = vrot.slane %v12010_v40, 1  ;;  %v15857_v51 = vrot.slane %v12025_v42, 1  ;;  %v2104_v49 = vmul.f32 %v12572_v45, %v12335_v17 }
 0x325   : > { %v973_v19 = vsel %vm690_vm1, %v15854_v57, %v972_v33  ;;  %v1221_v52 = vsel %vm690_vm1, %v15855_v21, %v1220_v26  ;;  %v4554_v39 = vadd.f32 %v4486_v7, %v4305_v3  ;;  %v15858_v57 = vrot.slane %v12039_v8, 2 }
 0x326   : > { %v1469_v36 = vsel %vm690_vm1, %v15856_v10, %v1468_v35  ;;  %v1717_v30 = vsel %vm690_vm1, %v15857_v51, %v1716_v41  ;;  %v2352_v43 = vmul.f32 %v12577_v28, %v12350_v25  ;;  %v2600_v40 = vmul.f32 %v12365_v58, %v15851_v31 }
 0x327   : > { %v1966_v38 = vsel %vm1931_vm2, %v15858_v57, %v1965_v53  ;;  %v816_v55 = vadd.f32 %v725_v34, %v567_v63  ;;  %v2213_v21 = vrot.slane %v2104_v49, 2  ;;  %v2848_v42 = vmul.f32 %v12584_v12, %v12381_v24 }
 0x328   : > { %v3096_v59 = vmul.f32 %v12393_v0, %v15848_v5  ;;  %v4802_v33 = vadd.f32 %v4734_v61, %v4554_v39  ;;  %v2461_v3 = vrot.slane %v2352_v43, 2  ;;  %v2709_v7 = vrot.slane %v2600_v40, 2  ;;  %v15865_v39 = vld [vmem:[#allocation44_spill] sm:$0xff] }
 0x329   : > { %v3345_v8 = vmul.f32 %v12572_v45, %v12411_v18  ;;  %v1064_v26 = vadd.f32 %v973_v19, %v816_v55  ;;  %v15859_v46 = vrot.slane %v12050_v9, 2  ;;  %v2957_v47 = vrot.slane %v2848_v42, 2 }
 0x32a   : > { %v3206_v29 = vrot.slane %v3096_v59, 3  ;;  %v5050_v11 = vadd.f32 %v4982_v16, %v4802_v33  ;;  %v15860_v34 = vrot.slane %v12057_v22, 2  ;;  %v15861_v41 = vrot.slane %v12069_v50, 2  ;;  %v15864_v16 = vld [vmem:[#allocation21_spill] sm:$0xff] }
 0x32b   : > { %v2214_v32 = vsel %vm1931_vm2, %v15859_v46, %v2213_v21  ;;  %v3454_v53 = vrot.slane %v3345_v8, 3  ;;  %v1312_v63 = vadd.f32 %v1221_v52, %v1064_v26  ;;  %v15862_v10 = vrot.slane %v12078_v62, 2  ;;  %v15867_v52 = vld [vmem:[#allocation2_spill] sm:$0xff]  ;;  %v15868_v62 = vld [vmem:[#allocation41_spill] sm:$0xff]  ;;  %v15869_v8 = vld [vmem:[#allocation52_spill] sm:$0xff] }
 0x32c   : > { %v2462_v35 = vsel %vm1931_vm2, %v15860_v34, %v2461_v3  ;;  %v2710_v61 = vsel %vm1931_vm2, %v15861_v41, %v2709_v7  ;;  %v15863_v9 = vrot.slane %v12090_v15, 3  ;;  %v3593_v22 = vmul.f32 %v12577_v28, %v15864_v16 }
 0x32d   : > { %v2958_v19 = vsel %vm1931_vm2, %v15862_v10, %v2957_v47  ;;  %v5298_v49 = vadd.f32 %v5230_v6, %v5050_v11  ;;  %v15866_v57 = vrot.slane %v15865_v39, 3  ;;  %v3841_v43 = vmul.f32 %v15867_v52, %v15851_v31  ;;  %v15873_v11 = vld [vmem:[#allocation64_spill] sm:$0xff]  ;;  %v15875_v10 = vld [vmem:[#allocation29_spill] sm:$0xff] }
 0x32e   : > { %v12635_v51 = vsel %vm3172_vm3, %v15863_v9, %v3206_v29  ;;  %v4089_v40 = vmul.f32 %v12584_v12, %v15868_v62  ;;  %v1560_v55 = vadd.f32 %v1469_v36, %v1312_v63  ;;  %v3702_v15 = vrot.slane %v3593_v22, 3 }
 0x32f   : > { %v12642_v50 = vsel %vm3172_vm3, %v15866_v57, %v3454_v53  ;;  %v4337_v21 = vmul.f32 %v12471_v37, %v15848_v5  ;;  %v4586_v42 = vmul.f32 %v12572_v45, %v12489_v2  ;;  %v5546_v6 = vadd.f32 %v5478_v56, %v5298_v49  ;;  %v15871_v5 = vld [vmem:[#allocation60_spill] sm:$0xff]  ;;  %v15877_v49 = vld [vmem:[#allocation6_spill] sm:$0xff] }
 0x330   : > { %v3950_v59 = vrot.slane %v3841_v43, 3  ;;  %v4198_v33 = vrot.slane %v4089_v40, 3  ;;  %v4834_v3 = vmul.f32 %v12577_v28, %v12501_v44  ;;  %v1808_v7 = vadd.f32 %v1717_v30, %v1560_v55  ;;  %v15879_v40 = vld [vmem:[#allocation30_spill] sm:$0xff]  ;;  %v15898_v28 = vld [vmem:[#allocation33_spill] sm:$0xff] }
 0x331   : > { %v15870_v26 = vrot.slane %v15869_v8, 3  ;;  %v4447_v36 = vrot.slane %v4337_v21, 4  ;;  %v4695_v47 = vrot.slane %v4586_v42, 4  ;;  %6333 = vmatprep.mubr.msk.f32.mxu1 %vm5558_vm4, %v5546_v6  ;;  %v15872_v29 = vrot.slane %v15871_v5, 3  ;;  %v15883_v8 = vld [vmem:[#allocation43_spill] sm:$0xff]  ;;  %v15887_v5 = vld [vmem:[#allocation9_spill] sm:$0xff] }
 0x332   : > { %v15874_v34 = vrot.slane %v15873_v11, 3  ;;  %v4943_v41 = vrot.slane %v4834_v3, 4  ;;  %v5082_v53 = vmul.f32 %v12515_v20, %v15851_v31  ;;  %v2057_v63 = vadd.f32 %v1966_v38, %v1808_v7 }
 0x333   : > { %v12657_v46 = vsel %vm3172_vm3, %v15870_v26, %v3702_v15  ;;  %v12663_v56 = vsel %vm3172_vm3, %v15872_v29, %v3950_v59  ;;  %v15876_v9 = vrot.slane %v15875_v10, 4  ;;  %v15878_v39 = vrot.slane %v15877_v49, 4  ;;  %v12694_v59 = vld [vmem:[%s6732_s29 + $0x1c0] sm:$0xf]  ;;  %v15888_v29 = vld [vmem:[#allocation32_spill] sm:$0xff] }
 0x334   : > { %v12668_v30 = vsel %vm3172_vm3, %v15874_v34, %v4198_v33  ;;  %v5330_v43 = vmul.f32 %v12584_v12, %v12534_v23  ;;  %v15880_v55 = vrot.slane %v15879_v40, 4  ;;  %v5191_v31 = vrot.slane %v5082_v53, 4  ;;  %15881 = vst [vmem:[#allocation34_spill] sm:$0xff] %v12694_v59  ;;  %v12697_v33 = vld [vmem:[%s6732_s29 + $0x188] sm:$0xff]  ;;  %v12718_v10 = vld [vmem:[%s6732_s29 + $0x178] sm:$0xf] }
 0x335   : > { %v12675_v22 = vsel %vm4413_vm0, %v15876_v9, %v4447_v36  ;;  %v12680_v57 = vsel %vm4413_vm0, %v15878_v39, %v4695_v47  ;;  %v295_v38 = vmul.f32 %v12251_v1, %v12197_v60  ;;  %v335_v21 = vmul.f32 %v12209_v54, %v15813_v14  ;;  %15882 = vst [vmem:[#allocation24_spill] sm:$0xff] %v12697_v33  ;;  %v15885_v47 = vld [vmem:[#allocation51_spill] sm:$0xff]  ;;  %v15886_v14 = vld [vmem:[#allocation50_spill] sm:$0xff] }
 0x336   : > { %v12687_v15 = vsel %vm4413_vm0, %v15880_v55, %v4943_v41  ;;  %v2305_v42 = vadd.f32 %v2214_v32, %v2057_v63  ;;  %v5439_v6 = vrot.slane %v5330_v43, 4  ;;  %v407_v3 = vmul.f32 %v12697_v33, %v12219_v48  ;;  %v15889_v41 = vld [vmem:[#allocation38_spill] sm:$0xff]  ;;  %15891 = vst [vmem:[#allocation15_spill] sm:$0xff] %v12718_v10  ;;  %v15893_v39 = vld [vmem:[#allocation35_spill] sm:$0xff] }
 0x337   : > { %v479_v7 = vmul.f32 %v12525_v4, %v12226_v27  ;;  %v15884_v26 = vrot.slane %v15883_v8, 4  ;;  %v367_v1 = vadd.f32 %v335_v21, %v295_v38  ;;  %v551_v32 = vmul.f32 %v15886_v14, %v15885_v47  ;;  %v15892_v9 = vld [vmem:[#allocation62_spill] sm:$0xff]  ;;  %v15894_v43 = vld [vmem:[#allocation3_spill] sm:$0xff] }
 0x338   : > { %v638_v11 = vmul.f32 %v15888_v29, %v15887_v5  ;;  %v2553_v34 = vadd.f32 %v2462_v35, %v2305_v42  ;;  %v15890_v53 = vrot.slane %v15889_v41, 4  ;;  %v887_v49 = vmul.f32 %v12718_v10, %v15892_v9  ;;  %v15895_v38 = vld [vmem:[#allocation46_spill] sm:$0xff]  ;;  %v15896_v21 = vld [vmem:[#allocation47_spill] sm:$0xff]  ;;  %v15897_v35 = vld [vmem:[#allocation56_spill] sm:$0xff] }
 0x339   : > { %v12706_v36 = vsel %vm4413_vm0, %v15884_v26, %v5191_v31  ;;  %v1135_v40 = vmul.f32 %v15894_v43, %v15893_v39  ;;  %v439_v55 = vadd.f32 %v407_v3, %v367_v1  ;;  %v1383_v8 = vmul.f32 %v15896_v21, %v15895_v38  ;;  %v15902_v43 = vld [vmem:[#allocation63_spill] sm:$0xff] }
 0x33a   : > { %v12715_v63 = vsel %vm4413_vm0, %v15890_v53, %v5439_v6  ;;  %v764_v31 = vrot.slane %v638_v11, 1  ;;  %v1631_v42 = vmul.f32 %v15897_v35, %v12694_v59  ;;  %v2801_v26 = vadd.f32 %v2710_v61, %v2553_v34  ;;  %v15900_v11 = vld [vmem:[#allocation45_spill] sm:$0xff] }
 0x33b   : > { %v1012_v41 = vrot.slane %v887_v49, 1  ;;  %v1260_v6 = vrot.slane %v1135_v40, 1  ;;  %v1879_v53 = vmul.f32 %v12320_v13, %v15887_v5  ;;  %v511_v12 = vadd.f32 %v479_v7, %v439_v55  ;;  %v15904_v40 = vld [vmem:[#allocation49_spill] sm:$0xff] }
 0x33c   : > { %v15899_v45 = vrot.slane %v15898_v28, 1  ;;  %v1508_v4 = vrot.slane %v1383_v8, 1  ;;  %v1756_v3 = vrot.slane %v1631_v42, 1  ;;  %v3049_v1 = vadd.f32 %v2958_v19, %v2801_v26  ;;  %v15906_v28 = vld [vmem:[#allocation7_spill] sm:$0xff] }
 0x33d   : > { %v15901_v33 = vrot.slane %v15900_v11, 1  ;;  %v15903_v35 = vrot.slane %v15902_v43, 1  ;;  %v2005_v34 = vrot.slane %v1879_v53, 2  ;;  %v583_v49 = vadd.f32 %v551_v32, %v511_v12 }
 0x33e   : > { %v765_v47 = vsel %vm690_vm1, %v15899_v45, %v764_v31  ;;  %v15905_v13 = vrot.slane %v15904_v40, 1  ;;  %v15907_v55 = vrot.slane %v15906_v28, 1  ;;  %v2128_v19 = vmul.f32 %v12718_v10, %v12335_v17  ;;  %v15912_v40 = vld [vmem:[#allocation18_spill] sm:$0xff] }
 0x33f   : > { %v1013_v21 = vsel %vm690_vm1, %v15901_v33, %v1012_v41  ;;  %v1261_v61 = vsel %vm690_vm1, %v15903_v35, %v1260_v6  ;;  %v3298_v31 = vadd.f32 %v12635_v51, %v3049_v1  ;;  %v15908_v33 = vld [vmem:[#allocation11_spill] sm:$0xff]  ;;  %v2376_v12 = vmul.f32 %v12350_v25, %v15893_v39 }
 0x340   : > { %v1509_v7 = vsel %vm690_vm1, %v15905_v13, %v1508_v4  ;;  %v1757_v45 = vsel %vm690_vm1, %v15907_v55, %v1756_v3  ;;  %v15909_v8 = vrot.slane %v15908_v33, 2  ;;  %v2624_v32 = vmul.f32 %v12365_v58, %v15895_v38  ;;  %v15910_v3 = vld [vmem:[#allocation16_spill] sm:$0xff] }
 0x341   : > { %v832_v13 = vadd.f32 %v765_v47, %v583_v49  ;;  %v2253_v4 = vrot.slane %v2128_v19, 2  ;;  %v2872_v35 = vmul.f32 %v12381_v24, %v12694_v59  ;;  %v3120_v42 = vmul.f32 %v12393_v0, %v15887_v5  ;;  %v15914_v19 = vld [vmem:[#allocation59_spill] sm:$0xff] }
 0x342   : > { %v2006_v43 = vsel %vm1931_vm2, %v15909_v8, %v2005_v34  ;;  %v3546_v51 = vadd.f32 %v12642_v50, %v3298_v31  ;;  %v2501_v26 = vrot.slane %v2376_v12, 2  ;;  %v2749_v41 = vrot.slane %v2624_v32, 2  ;;  %v15916_v12 = vld [vmem:[#allocation53_spill] sm:$0xff] }
 0x343   : > { %v3369_v6 = vmul.f32 %v12718_v10, %v12411_v18  ;;  %v1080_v53 = vadd.f32 %v1013_v21, %v832_v13  ;;  %v15911_v1 = vrot.slane %v15910_v3, 2  ;;  %v2997_v47 = vrot.slane %v2872_v35, 2  ;;  %v15918_v13 = vld [vmem:[#allocation5_spill] sm:$0xff] }
 0x344   : > { %v3246_v34 = vrot.slane %v3120_v42, 3  ;;  %v3794_v49 = vadd.f32 %v12657_v46, %v3546_v51  ;;  %v15913_v28 = vrot.slane %v15912_v40, 2  ;;  %v15915_v50 = vrot.slane %v15914_v19, 2  ;;  %v15920_v51 = vld [vmem:[#allocation37_spill] sm:$0xff] }
 0x345   : > { %v2254_v11 = vsel %vm1931_vm2, %v15911_v1, %v2253_v4  ;;  %v3494_v33 = vrot.slane %v3369_v6, 3  ;;  %v1328_v8 = vadd.f32 %v1261_v61, %v1080_v53  ;;  %v15917_v21 = vrot.slane %v15916_v12, 2 }
 0x346   : > { %v2502_v55 = vsel %vm1931_vm2, %v15913_v28, %v2501_v26  ;;  %v2750_v31 = vsel %vm1931_vm2, %v15915_v50, %v2749_v41  ;;  %v15919_v4 = vrot.slane %v15918_v13, 3  ;;  %v3617_v46 = vmul.f32 %v15864_v16, %v15893_v39  ;;  %v15922_v28 = vld [vmem:[#allocation17_spill] sm:$0xff] }
 0x347   : > { %v2998_v32 = vsel %vm1931_vm2, %v15917_v21, %v2997_v47  ;;  %v4042_v42 = vadd.f32 %v12663_v56, %v3794_v49  ;;  %v15921_v26 = vrot.slane %v15920_v51, 3  ;;  %v3865_v61 = vmul.f32 %v15867_v52, %v15895_v38  ;;  %v15926_v21 = vld [vmem:[#allocation25_spill] sm:$0xff] }
 0x348   : > { %v12778_v35 = vsel %vm3172_vm3, %v15919_v4, %v3246_v34  ;;  %v4113_v6 = vmul.f32 %v15868_v62, %v12694_v59  ;;  %v1576_v53 = vadd.f32 %v1509_v7, %v1328_v8  ;;  %v3742_v3 = vrot.slane %v3617_v46, 3  ;;  %v15924_v8 = vld [vmem:[#allocation27_spill] sm:$0xff]  ;;  %v15928_v46 = vld [vmem:[#allocation61_spill] sm:$0xff] }
 0x349   : > { %v12786_v41 = vsel %vm3172_vm3, %v15921_v26, %v3494_v33  ;;  %v4361_v1 = vmul.f32 %v12471_v37, %v15887_v5  ;;  %v4610_v47 = vmul.f32 %v12718_v10, %v12489_v2  ;;  %v4290_v56 = vadd.f32 %v12668_v30, %v4042_v42  ;;  %v15930_v26 = vld [vmem:[#allocation19_spill] sm:$0xff] }
 0x34a   : > { %v3990_v34 = vrot.slane %v3865_v61, 3  ;;  %v4238_v49 = vrot.slane %v4113_v6, 3  ;;  %v4858_v40 = vmul.f32 %v12501_v44, %v15893_v39  ;;  %v1824_v38 = vadd.f32 %v1757_v45, %v1576_v53  ;;  %v12826_v6 = vld [vmem:[%s6732_s29 + $0x1a8] sm:$0xf] }
 0x34b   : > { %v15923_v19 = vrot.slane %v15922_v28, 3  ;;  %v4487_v50 = vrot.slane %v4361_v1, 4  ;;  %v4735_v33 = vrot.slane %v4610_v47, 4  ;;  %v4539_v5 = vadd.f32 %v12675_v22, %v4290_v56  ;;  %15932 = vst [vmem:[#allocation13_spill] sm:$0xff] %v12826_v6  ;;  %v15933_v1 = vld [vmem:[#allocation40_spill] sm:$0xff]  ;;  %v12841_v28 = vld [vmem:[%s6732_s29 + $0xc0] sm:$0xff] }
 0x34c   : > { %v15925_v12 = vrot.slane %v15924_v8, 3  ;;  %v15927_v13 = vrot.slane %v15926_v21, 3  ;;  %v4983_v45 = vrot.slane %v4858_v40, 4  ;;  %v2073_v4 = vadd.f32 %v2006_v43, %v1824_v38  ;;  %v15937_v8 = vld [vmem:[#allocation22_spill] sm:$0xff]  ;;  %v12851_v21 = vld [vmem:[%s6732_s29 + $0x108] sm:$0xff] }
 0x34d   : > { %v12802_v7 = vsel %vm3172_vm3, %v15923_v19, %v3742_v3  ;;  %v15929_v42 = vrot.slane %v15928_v46, 4  ;;  %v15931_v61 = vrot.slane %v15930_v26, 4  ;;  %v5106_v53 = vmul.f32 %v12826_v6, %v12515_v20  ;;  %15938 = vst [vmem:[#allocation54_spill] sm:$0xff] %v12851_v21  ;;  %v12909_v6 = vld [vmem:[%s6732_s29 + $0x110] sm:$0xff] }
 0x34e   : > { %v12808_v30 = vsel %vm3172_vm3, %v15925_v12, %v3990_v34  ;;  %v12813_v39 = vsel %vm3172_vm3, %v15927_v13, %v4238_v49  ;;  %v4787_v3 = vadd.f32 %v12680_v57, %v4539_v5  ;;  %v15934_v43 = vrot.slane %v15933_v1, 4  ;;  %v15935_v34 = vld [vmem:[#allocation28_spill] sm:$0xff]  ;;  %v15936_v57 = vld [vmem:[#allocation58_spill] sm:$0xff]  ;;  %15952 = vst [vmem:[#allocation44_spill] sm:$0xff] %v12909_v6 }
 0x34f   : > { %v12818_v51 = vsel %vm4413_vm0, %v15929_v42, %v4487_v50  ;;  %v12823_v22 = vsel %vm4413_vm0, %v15931_v61, %v4735_v33  ;;  %v5354_v56 = vmul.f32 %v12534_v23, %v12694_v59  ;;  %v280_v49 = vmul.f32 %v12197_v60, %v15935_v34  ;;  %v15941_v61 = vld [vmem:[#allocation26_spill] sm:$0xff]  ;;  %v12869_v1 = vld [vmem:[%s6732_s29 + $0xb0] sm:$0xff] }
 0x350   : > { %v12834_v47 = vsel %vm4413_vm0, %v15934_v43, %v4983_v45  ;;  %v2321_v40 = vadd.f32 %v2254_v11, %v2073_v4  ;;  %v5231_v38 = vrot.slane %v5106_v53, 4  ;;  %v320_v19 = vmul.f32 %v12841_v28, %v12209_v54  ;;  %v15939_v45 = vld [vmem:[#allocation23_spill] sm:$0xff] }
 0x351   : > { %v392_v50 = vmul.f32 %v12219_v48, %v15936_v57  ;;  %v5035_v33 = vadd.f32 %v12687_v15, %v4787_v3  ;;  %v5479_v5 = vrot.slane %v5354_v56, 4  ;;  %v464_v12 = vmul.f32 %v12226_v27, %v15937_v8 }
 0x352   : > { %v536_v11 = vmul.f32 %v12851_v21, %v15886_v14  ;;  %v2569_v13 = vadd.f32 %v2502_v55, %v2321_v40  ;;  %v15940_v4 = vrot.slane %v15939_v45, 4  ;;  %v352_v42 = vadd.f32 %v320_v19, %v280_v49  ;;  %v15946_v45 = vld [vmem:[#allocation3_spill] sm:$0xff] }
 0x353   : > { %v615_v26 = vmul.f32 %v15888_v29, %v15935_v34  ;;  %v5283_v15 = vadd.f32 %v12706_v36, %v5035_v33  ;;  %v15942_v53 = vrot.slane %v15941_v61, 4  ;;  %v12873_v55 = vmul.f32 %v12869_v1, %v15888_v29 }
 0x354   : > { %v12858_v46 = vsel %vm4413_vm0, %v15940_v4, %v5231_v38  ;;  %v864_v43 = vmul.f32 %v12841_v28, %v15892_v9  ;;  %v2817_v56 = vadd.f32 %v2750_v31, %v2569_v13  ;;  %v424_v49 = vadd.f32 %v392_v50, %v352_v42  ;;  %v15944_v38 = vld [vmem:[#allocation14_spill] sm:$0xff]  ;;  %v15947_v31 = vld [vmem:[#allocation39_spill] sm:$0xff] }
 0x355   : > { %v12866_v3 = vsel %vm4413_vm0, %v15942_v53, %v5479_v5  ;;  %15943 = vst [vmem:[#allocation4_spill] sm:$0xff] %v12873_v55  ;;  %v726_v40 = vrot.slane %v615_v26, 1  ;;  %v12879_v36 = vmul.f32 %v15944_v38, %v15892_v9  ;;  %v5531_v19 = vadd.f32 %v12715_v63, %v5283_v15  ;;  %v15948_v42 = vld [vmem:[#allocation47_spill] sm:$0xff]  ;;  %v15949_v15 = vld [vmem:[#allocation8_spill] sm:$0xff] }
 0x356   : > { %v14784_v33 = vrot.slane %v12873_v55, 1  ;;  %v974_v5 = vrot.slane %v864_v43, 1  ;;  %v1112_v4 = vmul.f32 %v15946_v45, %v15936_v57  ;;  %v3065_v61 = vadd.f32 %v2998_v32, %v2817_v56 }
 0x357   : > { %15945 = vst [vmem:[#allocation55_spill] sm:$0xff] %v12879_v36  ;;  %v496_v53 = vadd.f32 %v464_v12, %v424_v49  ;;  %v14788_v59 = vrot.slane %v12879_v36, 1  ;;  %v12888_v50 = vmul.f32 %v15946_v45, %v15947_v31  ;;  %6310 = vmatmul.mubr.msk.f32.gmra.mxu0 %vm5558_vm4, %v5531_v19  ;;  %v1360_v26 = vmul.f32 %v15948_v42, %v15937_v8 }
 0x358   : > { %v728_v63 = vsel %vm690_vm1, %v726_v40, %v14784_v33  ;;  %v1222_v13 = vrot.slane %v1112_v4, 1  ;;  %v12898_v32 = vmul.f32 %v15948_v42, %v15949_v15  ;;  %v3314_v12 = vadd.f32 %v12778_v35, %v3065_v61  ;;  %v15951_v4 = vld [vmem:[#allocation56_spill] sm:$0xff]  ;;  %v15954_v61 = vld [vmem:[#allocation57_spill] sm:$0xff] }
 0x359   : > { %v568_v43 = vadd.f32 %v536_v11, %v496_v53  ;;  %v976_v56 = vsel %vm690_vm1, %v974_v5, %v14788_v59  ;;  %v14793_v49 = vrot.slane %v12888_v50, 1  ;;  %v1470_v19 = vrot.slane %v1360_v26, 1 }
 0x35a   : > { %15950 = vst [vmem:[#allocation21_spill] sm:$0xff] %v12898_v32  ;;  %v14792_v40 = vrot.slane %v12898_v32, 1  ;;  %v1608_v33 = vmul.f32 %v12851_v21, %v15951_v4  ;;  %v12913_v55 = vmul.f32 %v12909_v6, %v15951_v4  ;;  %v3562_v35 = vadd.f32 %v12786_v41, %v3314_v12 }
 0x35b   : > { %v817_v11 = vadd.f32 %v728_v63, %v568_v43  ;;  %v1224_v5 = vsel %vm690_vm1, %v1222_v13, %v14793_v49  ;;  %v1856_v53 = vmul.f32 %v15954_v61, %v15935_v34  ;;  %v12927_v4 = vmul.f32 %v12869_v1, %v15954_v61 }
 0x35c   : > { %15953 = vst [vmem:[#allocation2_spill] sm:$0xff] %v12913_v55  ;;  %v1472_v26 = vsel %vm690_vm1, %v1470_v19, %v14792_v40  ;;  %v1718_v59 = vrot.slane %v1608_v33, 1  ;;  %v14791_v36 = vrot.slane %v12913_v55, 1  ;;  %v3810_v41 = vadd.f32 %v12802_v7, %v3562_v35 }
 0x35d   : > { %15955 = vst [vmem:[#allocation41_spill] sm:$0xff] %v12927_v4  ;;  %v1065_v63 = vadd.f32 %v976_v56, %v817_v11  ;;  %v1967_v12 = vrot.slane %v1856_v53, 2  ;;  %v2105_v13 = vmul.f32 %v12841_v28, %v12335_v17  ;;  %v14795_v43 = vrot.slane %v12927_v4, 2 }
 0x35e   : > { %v1720_v34 = vsel %vm690_vm1, %v1718_v59, %v14791_v36  ;;  %v12938_v33 = vmul.f32 %v15944_v38, %v12335_v17  ;;  %v2353_v19 = vmul.f32 %v12350_v25, %v15936_v57  ;;  %v4058_v7 = vadd.f32 %v12808_v30, %v3810_v41 }
 0x35f   : > { %v1313_v56 = vadd.f32 %v1224_v5, %v1065_v63  ;;  %v2215_v35 = vrot.slane %v2105_v13, 2  ;;  %v12945_v11 = vmul.f32 %v12350_v25, %v15947_v31  ;;  %v1969_v59 = vsel %vm1931_vm2, %v1967_v12, %v14795_v43 }
 0x360   : > { %15956 = vst [vmem:[#allocation52_spill] sm:$0xff] %v12938_v33  ;;  %v14794_v53 = vrot.slane %v12938_v33, 2  ;;  %v2463_v36 = vrot.slane %v2353_v19, 2  ;;  %v2601_v40 = vmul.f32 %v12365_v58, %v15937_v8  ;;  %v4306_v49 = vadd.f32 %v12813_v39, %v4058_v7  ;;  %v15979_v33 = vld [vmem:[#allocation20_spill] sm:$0xff] }
 0x361   : > { %15957 = vst [vmem:[#allocation60_spill] sm:$0xff] %v12945_v11  ;;  %v1561_v30 = vadd.f32 %v1472_v26, %v1313_v56  ;;  %v14796_v5 = vrot.slane %v12945_v11, 2  ;;  %v12957_v41 = vmul.f32 %v12365_v58, %v15949_v15  ;;  %v2849_v13 = vmul.f32 %v12851_v21, %v12381_v24 }
 0x362   : > { %v2217_v63 = vsel %vm1931_vm2, %v2215_v35, %v14794_v53  ;;  %v2711_v12 = vrot.slane %v2601_v40, 2  ;;  %v12966_v8 = vmul.f32 %v12909_v6, %v12381_v24  ;;  %v4555_v39 = vadd.f32 %v12818_v51, %v4306_v49  ;;  %v6587_v40 = vld [vmem:[%s6732_s29 + $0xa8] sm:$0xff] }
 0x363   : > { %15958 = vst [vmem:[#allocation64_spill] sm:$0xff] %v12957_v41  ;;  %v1809_v26 = vadd.f32 %v1720_v34, %v1561_v30  ;;  %v2465_v19 = vsel %vm1931_vm2, %v2463_v36, %v14796_v5  ;;  %v14800_v7 = vrot.slane %v12957_v41, 2  ;;  %v2959_v56 = vrot.slane %v2849_v13, 2 }
 0x364   : > { %15959 = vst [vmem:[#allocation29_spill] sm:$0xff] %v12966_v8  ;;  %v14798_v35 = vrot.slane %v12966_v8, 2  ;;  %v3097_v53 = vmul.f32 %v6587_v40, %v12393_v0  ;;  %v12978_v43 = vmul.f32 %v12869_v1, %v12393_v0  ;;  %v4803_v51 = vadd.f32 %v12823_v22, %v4555_v39 }
 0x365   : > { %v2058_v49 = vadd.f32 %v1969_v59, %v1809_v26  ;;  %v2713_v36 = vsel %vm1931_vm2, %v2711_v12, %v14800_v7  ;;  %v3346_v34 = vmul.f32 %v12841_v28, %v12411_v18  ;;  %v12992_v11 = vmul.f32 %v15944_v38, %v12411_v18 }
 0x366   : > { %15960 = vst [vmem:[#allocation6_spill] sm:$0xff] %v12978_v43  ;;  %v2961_v30 = vsel %vm1931_vm2, %v2959_v56, %v14798_v35  ;;  %v3208_v13 = vrot.slane %v3097_v53, 3  ;;  %v14799_v5 = vrot.slane %v12978_v43, 3  ;;  %v5051_v22 = vadd.f32 %v12834_v47, %v4803_v51  ;;  %v13006_v35 = vld [vmem:[%s6732_s29 + $0xf0] sm:$0xff] }
 0x367   : > { %15961 = vst [vmem:[#allocation30_spill] sm:$0xff] %v12992_v11  ;;  %v2306_v59 = vadd.f32 %v2217_v63, %v2058_v49  ;;  %v3456_v39 = vrot.slane %v3346_v34, 3  ;;  %v3594_v12 = vmul.f32 %v15864_v16, %v15936_v57  ;;  %v14808_v56 = vrot.slane %v12992_v11, 3  ;;  %15963 = vst [vmem:[#allocation50_spill] sm:$0xff] %v13006_v35 }
 0x368   : > { %v3210_v26 = vsel %vm3172_vm3, %v3208_v13, %v14799_v5  ;;  %v13003_v53 = vmul.f32 %v15864_v16, %v15947_v31  ;;  %v3842_v47 = vmul.f32 %v13006_v35, %v15867_v52  ;;  %v5299_v63 = vadd.f32 %v12858_v46, %v5051_v22 }
 0x369   : > { %v2554_v51 = vadd.f32 %v2465_v19, %v2306_v59  ;;  %v3704_v49 = vrot.slane %v3594_v12, 3  ;;  %v13013_v34 = vmul.f32 %v15867_v52, %v15949_v15  ;;  %v3458_v13 = vsel %vm3172_vm3, %v3456_v39, %v14808_v56 }
 0x36a   : > { %15962 = vst [vmem:[#allocation43_spill] sm:$0xff] %v13003_v53  ;;  %v14807_v5 = vrot.slane %v13003_v53, 3  ;;  %v3952_v7 = vrot.slane %v3842_v47, 3  ;;  %v4090_v43 = vmul.f32 %v12851_v21, %v15868_v62  ;;  %v5547_v8 = vadd.f32 %v12866_v3, %v5299_v63 }
 0x36b   : > { %15964 = vst [vmem:[#allocation9_spill] sm:$0xff] %v13013_v34  ;;  %v2802_v41 = vadd.f32 %v2713_v36, %v2554_v51  ;;  %v14806_v46 = vrot.slane %v13013_v34, 3  ;;  %v13025_v19 = vmul.f32 %v12909_v6, %v15868_v62  ;;  %v4338_v59 = vmul.f32 %v6587_v40, %v12471_v37 }
 0x36c   : > { %v3706_v15 = vsel %vm3172_vm3, %v3704_v49, %v14807_v5  ;;  %v4200_v22 = vrot.slane %v4090_v43, 3  ;;  %v13033_v39 = vmul.f32 %v12869_v1, %v12471_v37  ;;  %6334 = vmatmul.mubr.msk.f32.gmra.mxu1 %vm5558_vm4, %v5547_v8  ;;  %v4587_v47 = vmul.f32 %v12841_v28, %v12489_v2 }
 0x36d   : > { %15965 = vst [vmem:[#allocation32_spill] sm:$0xff] %v13025_v19  ;;  %v3050_v3 = vadd.f32 %v2961_v30, %v2802_v41  ;;  %v3954_v36 = vsel %vm3172_vm3, %v3952_v7, %v14806_v46  ;;  %v14805_v12 = vrot.slane %v13025_v19, 3  ;;  %v4449_v43 = vrot.slane %v4338_v59, 4 }
 0x36e   : > { %15966 = vst [vmem:[#allocation38_spill] sm:$0xff] %v13033_v39  ;;  %v14804_v40 = vrot.slane %v13033_v39, 4  ;;  %v13045_v63 = vmul.f32 %v15944_v38, %v12489_v2  ;;  %v4835_v41 = vmul.f32 %v12501_v44, %v15936_v57  ;;  %v4697_v30 = vrot.slane %v4587_v47, 4  ;;  %v15977_v39 = vld [vmem:[#allocation31_spill] sm:$0xff] }
 0x36f   : > { %v3299_v8 = vadd.f32 %v3210_v26, %v3050_v3  ;;  %v4202_v7 = vsel %vm3172_vm3, %v4200_v22, %v14805_v12  ;;  %v13054_v51 = vmul.f32 %v12501_v44, %v15947_v31  ;;  %v5083_v57 = vmul.f32 %v13006_v35, %v12515_v20  ;;  %v13064_v3 = vld [vmem:[%s6732_s29 + $0xf8] sm:$0xff]  ;;  %v13087_v35 = vld [vmem:[%s6732_s29 + $0x1c8] sm:$0xff] }
 0x370   : > { %15967 = vst [vmem:[#allocation62_spill] sm:$0xff] %v13045_v63  ;;  %v4451_v28 = vsel %vm4413_vm0, %v4449_v43, %v14804_v40  ;;  %v14811_v49 = vrot.slane %v13045_v63, 4  ;;  %v4945_v59 = vrot.slane %v4835_v41, 4  ;;  %15969 = vst [vmem:[#allocation46_spill] sm:$0xff] %v13064_v3  ;;  %v13068_v31 = vmul.f32 %v13064_v3, %v12515_v20  ;;  %v13098_v63 = vld [vmem:[%s6732_s29 + $0x180] sm:$0xff] }
 0x371   : > { %15968 = vst [vmem:[#allocation35_spill] sm:$0xff] %v13054_v51  ;;  %v3547_v26 = vadd.f32 %v3458_v13, %v3299_v8  ;;  %v14813_v22 = vrot.slane %v13054_v51, 4  ;;  %v5331_v47 = vmul.f32 %v12851_v21, %v12534_v23  ;;  %v5193_v41 = vrot.slane %v5083_v57, 4  ;;  %v15972_v8 = vld [vmem:[#allocation12_spill] sm:$0xff]  ;;  %15974 = vst [vmem:[#allocation49_spill] sm:$0xff] %v13098_v63 }
 0x372   : > { %15970 = vst [vmem:[#allocation33_spill] sm:$0xff] %v13068_v31  ;;  %v4699_v43 = vsel %vm4413_vm0, %v4697_v30, %v14811_v49  ;;  %v13077_v13 = vmul.f32 %v12909_v6, %v12534_v23  ;;  %v296_v40 = vmul.f32 %v15972_v8, %v12197_v60  ;;  %v14822_v5 = vrot.slane %v13068_v31, 4  ;;  %v13090_v30 = vld [vmem:[%s6732_s29 + $0x1d0] sm:$0xff] }
 0x373   : > { %v3795_v12 = vadd.f32 %v3706_v15, %v3547_v26  ;;  %v4947_v46 = vsel %vm4413_vm0, %v4945_v59, %v14813_v22  ;;  %v5441_v56 = vrot.slane %v5331_v47, 4  ;;  %v13093_v57 = vld [vmem:[%s6732_s29 + $0x170] sm:$0xff]  ;;  %v336_v15 = vmul.f32 %v13098_v63, %v12209_v54 }
 0x374   : > { %15971 = vst [vmem:[#allocation45_spill] sm:$0xff] %v13077_v13  ;;  %15973 = vst [vmem:[#allocation63_spill] sm:$0xff] %v13093_v57  ;;  %v297_v49 = vmul.f32 %v13093_v57, %v12197_v60  ;;  %v15975_v59 = vld [vmem:[#allocation24_spill] sm:$0xff]  ;;  %v5195_v22 = vsel %vm4413_vm0, %v5193_v41, %v14822_v5  ;;  %v409_v19 = vmul.f32 %v15977_v39, %v12219_v48  ;;  %v15978_v60 = vrot.slane %v13077_v13, 4 }
 0x375   : > { %v337_v26 = vmul.f32 %v15975_v59, %v12209_v54  ;;  %v4043_v47 = vadd.f32 %v3954_v36, %v3795_v12  ;;  %v15976_v21 = vld [vmem:[#allocation36_spill] sm:$0xff]  ;;  %v368_v53 = vadd.f32 %v336_v15, %v296_v40  ;;  %v480_v54 = vmul.f32 %v12226_v27, %v15979_v33  ;;  %v15980_v12 = vld [vmem:[#allocation51_spill] sm:$0xff] }
 0x376   : > { %v408_v51 = vmul.f32 %v15976_v21, %v12219_v48  ;;  %v5443_v34 = vsel %vm4413_vm0, %v5441_v56, %v15978_v60  ;;  %v481_v31 = vmul.f32 %v12226_v27, %v15980_v12  ;;  %v552_v41 = vmul.f32 %v15886_v14, %v13087_v35 }
 0x377   : > { %v369_v11 = vadd.f32 %v337_v26, %v297_v49  ;;  %v4291_v36 = vadd.f32 %v4202_v7, %v4043_v47  ;;  %v553_v48 = vmul.f32 %v15886_v14, %v13090_v30  ;;  %v639_v56 = vmul.f32 %v15888_v29, %v15972_v8  ;;  %v13133_v47 = vld [vmem:[%s6732_s29 + $0x190] sm:$0xf] }
 0x378   : > { %v440_v5 = vadd.f32 %v408_v51, %v368_v53  ;;  %v640_v40 = vmul.f32 %v13093_v57, %v15888_v29  ;;  %v641_v7 = vmul.f32 %v12718_v10, %v15888_v29  ;;  %v888_v27 = vmul.f32 %v13098_v63, %v15892_v9 }
 0x379   : > { %v441_v13 = vadd.f32 %v409_v19, %v369_v11  ;;  %v4540_v49 = vadd.f32 %v4451_v28, %v4291_v36  ;;  %v889_v15 = vmul.f32 %v15975_v59, %v15892_v9  ;;  %v766_v53 = vrot.slane %v639_v56, 1 }
 0x37a   : > { %v512_v26 = vadd.f32 %v480_v54, %v440_v5  ;;  %v767_v11 = vrot.slane %v640_v40, 1  ;;  %v769_v51 = vrot.slane %v641_v7, 1  ;;  %v890_v28 = vmul.f32 %v13133_v47, %v15892_v9 }
 0x37b   : > { %v513_v14 = vadd.f32 %v481_v31, %v441_v13  ;;  %v4788_v19 = vadd.f32 %v4699_v43, %v4540_v49  ;;  %v1014_v60 = vrot.slane %v888_v27, 1  ;;  %v1015_v4 = vrot.slane %v889_v15, 1 }
 0x37c   : > { %v584_v36 = vadd.f32 %v552_v41, %v512_v26  ;;  %v768_v10 = vsel %vm690_vm1, %v766_v53, %v767_v11  ;;  %v770_v32 = vsel %vm690_vm1, %v767_v11, %v769_v51  ;;  %v1017_v5 = vrot.slane %v890_v28, 1 }
 0x37d   : > { %v585_v29 = vadd.f32 %v553_v48, %v513_v14  ;;  %v5036_v55 = vadd.f32 %v4947_v46, %v4788_v19  ;;  %v1136_v31 = vmul.f32 %v15976_v21, %v15946_v45  ;;  %v1016_v54 = vsel %vm690_vm1, %v1014_v60, %v1015_v4 }
 0x37e   : > { %v833_v43 = vadd.f32 %v768_v10, %v584_v36  ;;  %v13144_v9 = vmul.f32 %v15977_v39, %v15946_v45  ;;  %v1018_v48 = vsel %vm690_vm1, %v1015_v4, %v1017_v5  ;;  %v1384_v46 = vmul.f32 %v15948_v42, %v15979_v33  ;;  %v15981_v45 = vld [vmem:[#allocation56_spill] sm:$0xff] }
 0x37f   : > { %v834_v13 = vadd.f32 %v770_v32, %v585_v29  ;;  %v5284_v41 = vadd.f32 %v5195_v22, %v5036_v55  ;;  %v1262_v56 = vrot.slane %v1136_v31, 1  ;;  %v13154_v10 = vmul.f32 %v15948_v42, %v15980_v12  ;;  %v6593_v31 = vld [vmem:[%s6732_s29 + $0x1b0] sm:$0xff] }
 0x380   : > { %v1081_v40 = vadd.f32 %v1016_v54, %v833_v43  ;;  %v14846_v7 = vrot.slane %v13144_v9, 1  ;;  %v1510_v27 = vrot.slane %v1384_v46, 1  ;;  %v1632_v55 = vmul.f32 %v15981_v45, %v13087_v35 }
 0x381   : > { %v13149_v49 = vadd.f32 %v1018_v48, %v834_v13  ;;  %v5532_v32 = vadd.f32 %v5443_v34, %v5284_v41  ;;  %v13160_v4 = vmul.f32 %v15981_v45, %v13090_v30  ;;  %v14845_v22 = vrot.slane %v13154_v10, 1 }
 0x382   : > { %v1264_v33 = vsel %vm690_vm1, %v1262_v56, %v14846_v7  ;;  %v1880_v15 = vmul.f32 %v15954_v61, %v15972_v8  ;;  %v13170_v42 = vmul.f32 %v13093_v57, %v15954_v61  ;;  %v1758_v26 = vrot.slane %v1632_v55, 1 }
 0x383   : > { %6312 = vmatprep.mubr.msk.f32.mxu0 %vm5558_vm4, %v5532_v32  ;;  %v1329_v34 = vadd.f32 %v1264_v33, %v1081_v40  ;;  %v14844_v14 = vrot.slane %v13160_v4, 1  ;;  %v2129_v53 = vmul.f32 %v13098_v63, %v12335_v17  ;;  %v1512_v11 = vsel %vm690_vm1, %v1510_v27, %v14845_v22 }
 0x384   : > { %v2007_v19 = vrot.slane %v1880_v15, 2  ;;  %v14843_v8 = vrot.slane %v13170_v42, 2  ;;  %v13182_v61 = vmul.f32 %v15975_v59, %v12335_v17  ;;  %v2377_v36 = vmul.f32 %v15976_v21, %v12350_v25 }
 0x385   : > { %v1577_v51 = vadd.f32 %v1512_v11, %v1329_v34  ;;  %v1760_v28 = vsel %vm690_vm1, %v1758_v26, %v14844_v14  ;;  %v2255_v60 = vrot.slane %v2129_v53, 2  ;;  %v13195_v17 = vmul.f32 %v15977_v39, %v12350_v25  ;;  %v15998_v14 = vld [vmem:[#allocation21_spill] sm:$0xff] }
 0x386   : > { %v2009_v29 = vsel %vm1931_vm2, %v2007_v19, %v14843_v8  ;;  %v14842_v5 = vrot.slane %v13182_v61, 2  ;;  %v2625_v43 = vmul.f32 %v6593_v31, %v12365_v58  ;;  %v2503_v54 = vrot.slane %v2377_v36, 2 }
 0x387   : > { %v1825_v13 = vadd.f32 %v1760_v28, %v1577_v51  ;;  %v13201_v41 = vmul.f32 %v12365_v58, %v15980_v12  ;;  %v2873_v48 = vmul.f32 %v12381_v24, %v13087_v35  ;;  %v14841_v46 = vrot.slane %v13195_v17, 2  ;;  %v13215_v58 = vld [vmem:[%s6732_s29 + $0x168] sm:$0xff] }
 0x388   : > { %v2257_v56 = vsel %vm1931_vm2, %v2255_v60, %v14842_v5  ;;  %v2751_v25 = vrot.slane %v2625_v43, 2  ;;  %v13211_v40 = vmul.f32 %v12381_v24, %v13090_v30  ;;  %15982 = vst [vmem:[#allocation7_spill] sm:$0xff] %v13215_v58  ;;  %v3121_v12 = vmul.f32 %v13215_v58, %v12393_v0 }
 0x389   : > { %v2074_v32 = vadd.f32 %v2009_v29, %v1825_v13  ;;  %v14840_v27 = vrot.slane %v13201_v41, 2  ;;  %v2999_v45 = vrot.slane %v2873_v48, 2  ;;  %v2505_v55 = vsel %vm1931_vm2, %v2503_v54, %v14841_v46  ;;  %v6595_v54 = vld [vmem:[%s6732_s29 + $0x1b8] sm:$0xff]  ;;  %v15995_v46 = vld [vmem:[#allocation55_spill] sm:$0xff] }
 0x38a   : > { %v14839_v33 = vrot.slane %v13211_v40, 2  ;;  %v13225_v15 = vmul.f32 %v13093_v57, %v12393_v0  ;;  %v3370_v24 = vmul.f32 %v13098_v63, %v12411_v18  ;;  %v3248_v53 = vrot.slane %v3121_v12, 3 }
 0x38b   : > { %v2322_v34 = vadd.f32 %v2257_v56, %v2074_v32  ;;  %v2753_v26 = vsel %vm1931_vm2, %v2751_v25, %v14840_v27  ;;  %v13234_v11 = vmul.f32 %v15975_v59, %v12411_v18  ;;  %v3618_v28 = vmul.f32 %v15976_v21, %v15864_v16 }
 0x38c   : > { %v3001_v19 = vsel %vm1931_vm2, %v2999_v45, %v14839_v33  ;;  %v14838_v0 = vrot.slane %v13225_v15, 3  ;;  %v3496_v51 = vrot.slane %v3370_v24, 3  ;;  %v13245_v29 = vmul.f32 %v15977_v39, %v15864_v16  ;;  %v13385_v33 = vld [vmem:[%s13956_s1 + $0x2] ss:$0 sm:$0xff] }
 0x38d   : > { %v2570_v60 = vadd.f32 %v2505_v55, %v2322_v34  ;;  %v14837_v36 = vrot.slane %v13234_v11, 3  ;;  %v3866_v18 = vmul.f32 %v6593_v31, %v15867_v52  ;;  %v3744_v13 = vrot.slane %v3618_v28, 3 }
 0x38e   : > { %v3250_v43 = vsel %vm3172_vm3, %v3248_v53, %v14838_v0  ;;  %v13253_v48 = vmul.f32 %v6595_v54, %v15867_v52  ;;  %v4114_v56 = vmul.f32 %v15868_v62, %v13087_v35  ;;  %v14836_v32 = vrot.slane %v13245_v29, 3 }
 0x38f   : > { %v2818_v25 = vadd.f32 %v2753_v26, %v2570_v60  ;;  %v3498_v16 = vsel %vm3172_vm3, %v3496_v51, %v14837_v36  ;;  %v3992_v45 = vrot.slane %v3866_v18, 3  ;;  %v13264_v55 = vmul.f32 %v15868_v62, %v13090_v30 }
 0x390   : > { %v14835_v12 = vrot.slane %v13253_v48, 3  ;;  %v4240_v24 = vrot.slane %v4114_v56, 3  ;;  %v4362_v52 = vmul.f32 %v13215_v58, %v12471_v37  ;;  %v3746_v26 = vsel %vm3172_vm3, %v3744_v13, %v14836_v32  ;;  %v16010_v58 = vld [vmem:[#allocation29_spill] sm:$0xff] }
 0x391   : > { %v3066_v34 = vadd.f32 %v3001_v19, %v2818_v25  ;;  %v13273_v53 = vmul.f32 %v13093_v57, %v12471_v37  ;;  %v4611_v51 = vmul.f32 %v13098_v63, %v12489_v2  ;;  %v14834_v28 = vrot.slane %v13264_v55, 3 }
 0x392   : > { %v3994_v62 = vsel %vm3172_vm3, %v3992_v45, %v14835_v12  ;;  %v4489_v60 = vrot.slane %v4362_v52, 4  ;;  %v13283_v19 = vmul.f32 %v15975_v59, %v12489_v2  ;;  %v4859_v37 = vmul.f32 %v12501_v44, %v15976_v21 }
 0x393   : > { %v3315_v18 = vadd.f32 %v3250_v43, %v3066_v34  ;;  %v14833_v13 = vrot.slane %v13273_v53, 4  ;;  %v4737_v56 = vrot.slane %v4611_v51, 4  ;;  %v4242_v25 = vsel %vm3172_vm3, %v4240_v24, %v14834_v28  ;;  %v13378_v28 = vld [vmem:[%s6732_s29 + $0x118] sm:$0xf] }
 0x394   : > { %15983 = vst [vmem:[#allocation11_spill] sm:$0xff] %v13283_v19  ;;  %v14831_v45 = vrot.slane %v13283_v19, 4  ;;  %v13294_v52 = vmul.f32 %v15977_v39, %v12501_v44  ;;  %v5107_v2 = vmul.f32 %v6593_v31, %v12515_v20  ;;  %v4985_v34 = vrot.slane %v4859_v37, 4  ;;  %15992 = vst [vmem:[#allocation37_spill] sm:$0xff] %v13378_v28 }
 0x395   : > { %v3563_v59 = vadd.f32 %v3498_v16, %v3315_v18  ;;  %v4491_v43 = vsel %vm4413_vm0, %v4489_v60, %v14833_v13  ;;  %v13301_v21 = vmul.f32 %v6595_v54, %v12515_v20  ;;  %v5355_v39 = vmul.f32 %v12534_v23, %v13087_v35  ;;  %v6596_v20 = vld [vmem:[%s13956_s1] ss:$0 sm:$0xff]  ;;  %v6597_v35 = vld [vmem:[%s13956_s1 + $0x5] ss:$0 sm:$0xff]  ;;  %v13375_v13 = vld [vmem:[%s13956_s1 + $0x15] ss:$0 sm:$0xff] }
 0x396   : > { %15984 = vst [vmem:[#allocation16_spill] sm:$0xff] %v13294_v52  ;;  %v4739_v24 = vsel %vm4413_vm0, %v4737_v56, %v14831_v45  ;;  %v14830_v51 = vrot.slane %v13294_v52, 4  ;;  %v5233_v44 = vrot.slane %v5107_v2, 4  ;;  %v13312_v60 = vmul.f32 %v12534_v23, %v13090_v30  ;;  %v6598_v23 = vld [vmem:[%s13956_s1 + $0xa] ss:$0 sm:$0xff]  ;;  %v13329_v30 = vld [vmem:[%s6732_s29 + $0xe0] sm:$0xff] }
 0x397   : > { %15985 = vst [vmem:[#allocation18_spill] sm:$0xff] %v13301_v21  ;;  %v3811_v31 = vadd.f32 %v3746_v26, %v3563_v59  ;;  %v14829_v16 = vrot.slane %v13301_v21, 4  ;;  %v281_v54 = vmul.f32 %v6596_v20, %v12869_v1  ;;  %v5481_v56 = vrot.slane %v5355_v39, 4  ;;  %15987 = vst [vmem:[#allocation53_spill] sm:$0xff] %v13329_v30  ;;  %v6601_v20 = vld [vmem:[%s13956_s1 + $0x14] ss:$0 sm:$0xff] }
 0x398   : > { %15986 = vst [vmem:[#allocation59_spill] sm:$0xff] %v13312_v60  ;;  %v4987_v18 = vsel %vm4413_vm0, %v4985_v34, %v14830_v51  ;;  %v321_v26 = vmul.f32 %v6597_v35, %v15944_v38  ;;  %v393_v37 = vmul.f32 %v13329_v30, %v6598_v23  ;;  %v14832_v59 = vrot.slane %v13312_v60, 4  ;;  %v6600_v38 = vld [vmem:[%s13956_s1 + $0xf] ss:$0 sm:$0xff]  ;;  %v6603_v23 = vld [vmem:[%s13956_s1 + $0x6] ss:$0 sm:$0xff] }
 0x399   : > { %v4059_v1 = vadd.f32 %v3994_v62, %v3811_v31  ;;  %v5235_v2 = vsel %vm4413_vm0, %v5233_v44, %v14829_v16  ;;  %v465_v34 = vmul.f32 %v6600_v38, %v13064_v3  ;;  %v537_v35 = vmul.f32 %v6601_v20, %v12909_v6  ;;  %v6602_v62 = vld [vmem:[%s13956_s1 + $0x1] ss:$0 sm:$0xff]  ;;  %v13358_v20 = vld [vmem:[%s13956_s1 + $0xb] ss:$0 sm:$0xff]  ;;  %v13368_v45 = vld [vmem:[%s13956_s1 + $0x10] ss:$0 sm:$0xff] }
 0x39a   : > { %v353_v39 = vadd.f32 %v321_v26, %v281_v54  ;;  %v15988_v44 = vld [vmem:[#allocation10_spill] sm:$0xff]  ;;  %v5483_v26 = vsel %vm4413_vm0, %v5481_v56, %v14832_v59  ;;  %v13361_v51 = vld [vmem:[%s6732_s29 + $0xe8] sm:$0xf]  ;;  %v1610_v12 = vmul.f32 %v13378_v28, %v13375_v13  ;;  %v15996_v5 = vrot.slane %v15995_v46, 1  ;;  %v13545_v3 = vld [vmem:[%s6732_s29 + $0x1d8] sm:$0xf] }
 0x39b   : > { %v617_v31 = vmul.f32 %v6602_v62, %v15988_v44  ;;  %v15989_v16 = vld [vmem:[#allocation42_spill] sm:$0xff]  ;;  %v4307_v54 = vadd.f32 %v4242_v25, %v4059_v1  ;;  %15990 = vst [vmem:[#allocation5_spill] sm:$0xff] %v13361_v51  ;;  %v1114_v62 = vmul.f32 %v13361_v51, %v13358_v20  ;;  %v15991_v25 = vld [vmem:[#allocation48_spill] sm:$0xff]  ;;  %v15999_v22 = vrot.slane %v15998_v14, 1  ;;  %v13414_v14 = vld [vmem:[%s13956_s1 + $0xc] ss:$0 sm:$0xff] }
 0x39c   : > { %v866_v38 = vmul.f32 %v6603_v23, %v15989_v16  ;;  %v1362_v1 = vmul.f32 %v13368_v45, %v15991_v25  ;;  %v425_v23 = vadd.f32 %v393_v37, %v353_v39  ;;  %v1858_v37 = vmul.f32 %v13385_v33, %v15988_v44  ;;  %v16023_v60 = vld [vmem:[#allocation32_spill] sm:$0xff] }
 0x39d   : > { %v729_v56 = vrot.slane %v617_v31, 1  ;;  %v4556_v32 = vadd.f32 %v4491_v43, %v4307_v54  ;;  %v1225_v36 = vrot.slane %v1114_v62, 1  ;;  %v15993_v31 = vld [vmem:[#allocation4_spill] sm:$0xff]  ;;  %v1721_v43 = vrot.slane %v1610_v12, 1 }
 0x39e   : > { %v977_v59 = vrot.slane %v866_v38, 1  ;;  %v1473_v0 = vrot.slane %v1362_v1, 1  ;;  %v497_v39 = vadd.f32 %v465_v34, %v425_v23  ;;  %v15994_v38 = vrot.slane %v15993_v31, 1  ;;  %v16000_v23 = vld [vmem:[#allocation2_spill] sm:$0xff]  ;;  %v13424_v12 = vld [vmem:[%s13956_s1 + $0x11] ss:$0 sm:$0xff] }
 0x39f   : > { %v4804_v54 = vadd.f32 %v4739_v24, %v4556_v32  ;;  %v15997_v62 = vrot.slane %v12888_v50, 1  ;;  %v1970_v30 = vrot.slane %v1858_v37, 2  ;;  %v16001_v31 = vrot.slane %v16000_v23, 1  ;;  %v13445_v23 = vld [vmem:[%s13956_s1 + $0x8] ss:$0 sm:$0xff] }
 0x3a0   : > { %v730_v27 = vsel %vm690_vm1, %v15994_v38, %v729_v56  ;;  %v978_v8 = vsel %vm690_vm1, %v15996_v5, %v977_v59  ;;  %v1474_v7 = vsel %vm690_vm1, %v15999_v22, %v1473_v0  ;;  %v569_v34 = vadd.f32 %v537_v35, %v497_v39  ;;  %v13407_v5 = vld [vmem:[%s13956_s1 + $0x7] ss:$0 sm:$0xff]  ;;  %v16002_v0 = vld [vmem:[#allocation41_spill] sm:$0xff]  ;;  %v13431_v59 = vld [vmem:[%s13956_s1 + $0x16] ss:$0 sm:$0xff] }
 0x3a1   : > { %v1226_v1 = vsel %vm690_vm1, %v15997_v62, %v1225_v36  ;;  %v1722_v56 = vsel %vm690_vm1, %v16001_v31, %v1721_v43  ;;  %v2107_v50 = vmul.f32 %v13407_v5, %v15989_v16  ;;  %v2355_v22 = vmul.f32 %v13414_v14, %v13361_v51  ;;  %v16004_v31 = vld [vmem:[#allocation52_spill] sm:$0xff] }
 0x3a2   : > { %v5052_v46 = vadd.f32 %v4987_v18, %v4804_v54  ;;  %v16003_v36 = vrot.slane %v16002_v0, 2  ;;  %v2603_v24 = vmul.f32 %v13424_v12, %v15991_v25  ;;  %v2851_v18 = vmul.f32 %v13431_v59, %v13378_v28  ;;  %v16006_v0 = vld [vmem:[#allocation60_spill] sm:$0xff] }
 0x3a3   : > { %v818_v35 = vadd.f32 %v730_v27, %v569_v34  ;;  %v2218_v37 = vrot.slane %v2107_v50, 2  ;;  %v2466_v39 = vrot.slane %v2355_v22, 2  ;;  %v3348_v27 = vmul.f32 %v13445_v23, %v15989_v16 }
 0x3a4   : > { %v1971_v32 = vsel %vm1931_vm2, %v16003_v36, %v1970_v30  ;;  %v13438_v30 = vld [vmem:[%s13956_s1 + $0x3] ss:$0 sm:$0xff]  ;;  %v5300_v43 = vadd.f32 %v5235_v2, %v5052_v46  ;;  %v2714_v54 = vrot.slane %v2603_v24, 2  ;;  %v2962_v62 = vrot.slane %v2851_v18, 2  ;;  %v16008_v24 = vld [vmem:[#allocation64_spill] sm:$0xff] }
 0x3a5   : > { %v3099_v38 = vmul.f32 %v13438_v30, %v15988_v44  ;;  %v1066_v34 = vadd.f32 %v978_v8, %v818_v35  ;;  %v16005_v50 = vrot.slane %v16004_v31, 2  ;;  %v16007_v36 = vrot.slane %v16006_v0, 2  ;;  %v13510_v0 = vld [vmem:[%s13956_s1 + $0x9] ss:$0 sm:$0xff] }
 0x3a6   : > { %v5548_v46 = vadd.f32 %v5483_v26, %v5300_v43  ;;  %v16009_v18 = vrot.slane %v16008_v24, 2  ;;  %v16011_v57 = vrot.slane %v16010_v58, 2  ;;  %v3459_v16 = vrot.slane %v3348_v27, 3  ;;  %v13473_v26 = vld [vmem:[%s13956_s1 + $0xd] ss:$0 sm:$0xff] }
 0x3a7   : > { %v2219_v22 = vsel %vm1931_vm2, %v16005_v50, %v2218_v37  ;;  %v2467_v44 = vsel %vm1931_vm2, %v16007_v36, %v2466_v39  ;;  %v3211_v2 = vrot.slane %v3099_v38, 3  ;;  %v1314_v35 = vadd.f32 %v1226_v1, %v1066_v34  ;;  %v16012_v37 = vld [vmem:[#allocation6_spill] sm:$0xff]  ;;  %v13503_v34 = vld [vmem:[%s6732_s29 + $0xb8] sm:$0xf]  ;;  %v13513_v36 = vld [vmem:[%s6732_s29 + $0xd0] sm:$0xf] }
 0x3a8   : > { %v13458_v63 = vsel %vm1931_vm2, %v16009_v18, %v2714_v54  ;;  %v13463_v8 = vsel %vm1931_vm2, %v16011_v57, %v2962_v62  ;;  %v16013_v31 = vrot.slane %v16012_v37, 3  ;;  %v3596_v38 = vmul.f32 %v13473_v26, %v13361_v51  ;;  %v13480_v57 = vld [vmem:[%s13956_s1 + $0x12] ss:$0 sm:$0xff]  ;;  %6336 = vmatprep.mubr.msk.f32.mxu1 %vm5558_vm4, %v5548_v46  ;;  %v16014_v1 = vld [vmem:[#allocation30_spill] sm:$0xff]  ;;  %v13493_v62 = vld [vmem:[%s13956_s1 + $0x17] ss:$0 sm:$0xff] }
 0x3a9   : > { %v3844_v58 = vmul.f32 %v13480_v57, %v15991_v25  ;;  %v16015_v43 = vrot.slane %v16014_v1, 3  ;;  %v4092_v27 = vmul.f32 %v13493_v62, %v13378_v28  ;;  %v13500_v25 = vld [vmem:[%s13956_s1 + $0x4] ss:$0 sm:$0xff]  ;;  %16016 = vst [vmem:[#allocation17_spill] sm:$0xff] %v13503_v34  ;;  %16017 = vst [vmem:[#allocation27_spill] sm:$0xff] %v13513_v36  ;;  %v1562_v46 = vadd.f32 %v1474_v7, %v1314_v35 }
 0x3aa   : > { %v13468_v39 = vsel %vm3172_vm3, %v16013_v31, %v3211_v2  ;;  %v4340_v50 = vmul.f32 %v13503_v34, %v13500_v25  ;;  %v4589_v2 = vmul.f32 %v13513_v36, %v13510_v0  ;;  %v3707_v24 = vrot.slane %v3596_v38, 3  ;;  %v13527_v34 = vld [vmem:[%s13956_s1 + $0x13] ss:$0 sm:$0xff]  ;;  %v13530_v36 = vld [vmem:[%s6732_s29 + $0x100] sm:$0xf]  ;;  %v16019_v38 = vld [vmem:[#allocation43_spill] sm:$0xff] }
 0x3ab   : > { %v13488_v54 = vsel %vm3172_vm3, %v16015_v43, %v3459_v16  ;;  %v3955_v18 = vrot.slane %v3844_v58, 3  ;;  %v13520_v16 = vld [vmem:[%s13956_s1 + $0xe] ss:$0 sm:$0xff]  ;;  %v4203_v31 = vrot.slane %v4092_v27, 3  ;;  %16018 = vst [vmem:[#allocation25_spill] sm:$0xff] %v13530_v36  ;;  %v5085_v7 = vmul.f32 %v13530_v36, %v13527_v34  ;;  %v16025_v36 = vld [vmem:[#allocation38_spill] sm:$0xff] }
 0x3ac   : > { %v4837_v37 = vmul.f32 %v13520_v16, %v13361_v51  ;;  %v4452_v1 = vrot.slane %v4340_v50, 4  ;;  %v4700_v43 = vrot.slane %v4589_v2, 4  ;;  %v1810_v35 = vadd.f32 %v1722_v56, %v1562_v46  ;;  %v16021_v51 = vld [vmem:[#allocation9_spill] sm:$0xff] }
 0x3ad   : > { %v16020_v58 = vrot.slane %v16019_v38, 3  ;;  %v16022_v27 = vrot.slane %v16021_v51, 3  ;;  %v16024_v21 = vrot.slane %v16023_v60, 3  ;;  %v16026_v56 = vrot.slane %v16025_v36, 4  ;;  %v16034_v36 = vld [vmem:[#allocation13_spill] sm:$0xff] }
 0x3ae   : > { %v4948_v2 = vrot.slane %v4837_v37, 4  ;;  %v16031_v37 = vld [vmem:[#allocation35_spill] sm:$0xff] }
 0x3af   : > { %v13537_v6 = vsel %vm3172_vm3, %v16020_v58, %v3707_v24  ;;  %v13542_v50 = vsel %vm3172_vm3, %v16022_v27, %v3955_v18  ;;  %v13550_v52 = vsel %vm3172_vm3, %v16024_v21, %v4203_v31  ;;  %v13555_v46 = vsel %vm4413_vm0, %v16026_v56, %v4452_v1  ;;  %v16028_v24 = vld [vmem:[#allocation62_spill] sm:$0xff]  ;;  %v13570_v21 = vld [vmem:[%s13956_s1 + $0x18] ss:$0 sm:$0xff]  ;;  %v13576_v1 = vpop.f32.mrf.mxu0 }
 0x3b0   : > { %16027 = vst [vmem:[#allocation61_spill] sm:$0xff] %v13555_v46  ;;  %v16029_v38 = vrot.slane %v16028_v24, 4  ;;  %v5196_v18 = vrot.slane %v5085_v7, 4  ;;  %v2059_v58 = vadd.f32 %v1971_v32, %v1810_v35  ;;  %v16032_v27 = vrot.slane %v16031_v37, 4  ;;  %v16038_v35 = vld [vmem:[#allocation34_spill] sm:$0xff]  ;;  %v16039_v24 = vld [vmem:[#allocation15_spill] sm:$0xff]  ;;  %v13589_v37 = vpop.f32.mrf.mxu1 }
 0x3b1   : > { %v5333_v60 = vmul.f32 %v13570_v21, %v13378_v28  ;;  %v1138_v31 = vmul.f32 %v13358_v20, %v16034_v36  ;;  %v1634_v56 = vmul.f32 %v13375_v13, %v13545_v3 }
 0x3b2   : > { %v13560_v51 = vsel %vm4413_vm0, %v16029_v38, %v4700_v43  ;;  %v13565_v19 = vsel %vm4413_vm0, %v16032_v27, %v4948_v2  ;;  %v16035_v43 = vld [vmem:[#allocation33_spill] sm:$0xff]  ;;  %v1386_v2 = vmul.f32 %v13368_v45, %v16038_v35  ;;  %v1882_v38 = vmul.f32 %v13385_v33, %v16039_v24 }
 0x3b3   : > { %16030 = vst [vmem:[#allocation19_spill] sm:$0xff] %v13560_v51  ;;  %16033 = vst [vmem:[#allocation40_spill] sm:$0xff] %v13565_v19  ;;  %v16036_v32 = vrot.slane %v16035_v43, 4  ;;  %v2307_v27 = vadd.f32 %v2219_v22, %v2059_v58  ;;  %v5444_v20 = vrot.slane %v5333_v60, 4  ;;  %v1265_v28 = vrot.slane %v1138_v31, 1  ;;  %v16040_v51 = vld [vmem:[#allocation45_spill] sm:$0xff]  ;;  %v13603_v60 = vpop.f32.mrf.mxu0 }
 0x3b4   : > { %v2131_v43 = vmul.f32 %v13407_v5, %v13133_v47  ;;  %v1513_v19 = vrot.slane %v1386_v2, 1  ;;  %v2379_v45 = vmul.f32 %v13414_v14, %v16034_v36  ;;  %v16041_v13 = vrot.slane %v16040_v51, 4 }
 0x3b5   : > { %v13581_v7 = vsel %vm4413_vm0, %v16036_v32, %v5196_v18  ;;  %v1761_v18 = vrot.slane %v1634_v56, 1  ;;  %v2010_v32 = vrot.slane %v1882_v38, 2  ;;  %v16042_v33 = vrot.slane %v13144_v9, 1  ;;  %v13615_v56 = vpop.f32.mrf.mxu1 }
 0x3b6   : > { %16037 = vst [vmem:[#allocation28_spill] sm:$0xff] %v13581_v7  ;;  %v2555_v7 = vadd.f32 %v2467_v44, %v2307_v27  ;;  %v13598_v46 = vsel %vm4413_vm0, %v16041_v13, %v5444_v20  ;;  %v2258_v58 = vrot.slane %v2131_v43, 2  ;;  %v16043_v31 = vrot.slane %v13154_v10, 1 }
 0x3b7   : > { %v1266_v22 = vsel %vm690_vm1, %v16042_v33, %v1265_v28  ;;  %v16044_v44 = vrot.slane %v13160_v4, 1  ;;  %v16045_v2 = vrot.slane %v13170_v42, 2  ;;  %v16046_v38 = vrot.slane %v13182_v61, 2  ;;  %v13638_v13 = vpop.f32.mrf.mxu1 }
 0x3b8   : > { %v1330_v5 = vadd.f32 %v1266_v22, %v13149_v49  ;;  %v1514_v14 = vsel %vm690_vm1, %v16043_v31, %v1513_v19  ;;  %v2803_v28 = vadd.f32 %v13458_v63, %v2555_v7  ;;  %v2506_v27 = vrot.slane %v2379_v45, 2 }
 0x3b9   : > { %v1762_v51 = vsel %vm690_vm1, %v16044_v44, %v1761_v18  ;;  %v2011_v9 = vsel %vm1931_vm2, %v16045_v2, %v2010_v32  ;;  %v2259_v49 = vsel %vm1931_vm2, %v16046_v38, %v2258_v58  ;;  %v2627_v10 = vmul.f32 %v13424_v12, %v16038_v35  ;;  %v13636_v18 = vpop.f32.mrf.mxu0 }
 0x3ba   : > { %v1578_v19 = vadd.f32 %v1514_v14, %v1330_v5  ;;  %v2875_v4 = vmul.f32 %v13431_v59, %v13545_v3  ;;  %v3123_v42 = vmul.f32 %v13438_v30, %v16039_v24  ;;  %v3372_v20 = vmul.f32 %v13445_v23, %v13133_v47 }
 0x3bb   : > { %v3051_v63 = vadd.f32 %v13463_v8, %v2803_v28  ;;  %v16047_v61 = vrot.slane %v13195_v17, 2  ;;  %v2754_v43 = vrot.slane %v2627_v10, 2  ;;  %v3620_v12 = vmul.f32 %v13473_v26, %v16034_v36 }
 0x3bc   : > { %v1826_v59 = vadd.f32 %v1762_v51, %v1578_v19  ;;  %v3002_v32 = vrot.slane %v2875_v4, 2  ;;  %v3251_v30 = vrot.slane %v3123_v42, 3  ;;  %v3499_v45 = vrot.slane %v3372_v20, 3  ;;  %v13669_v51 = vpop.f32.mrf.mxu0 }
 0x3bd   : > { %v2507_v7 = vsel %vm1931_vm2, %v16047_v61, %v2506_v27  ;;  %v3300_v23 = vadd.f32 %v13468_v39, %v3051_v63  ;;  %v16048_v8 = vrot.slane %v13201_v41, 2  ;;  %v3747_v33 = vrot.slane %v3620_v12, 3 }
 0x3be   : > { %v3868_v22 = vmul.f32 %v13480_v57, %v16038_v35  ;;  %v2075_v26 = vadd.f32 %v2011_v9, %v1826_v59  ;;  %v16050_v58 = vrot.slane %v13211_v40, 2  ;;  %v16051_v39 = vrot.slane %v13225_v15, 3  ;;  %v13706_v42 = vpop.f32.mrf.mxu0 }
 0x3bf   : > { %v2755_v17 = vsel %vm1931_vm2, %v16048_v8, %v2754_v43  ;;  %v16052_v31 = vrot.slane %v13234_v11, 3  ;;  %v3548_v57 = vadd.f32 %v13488_v54, %v3300_v23  ;;  %v16053_v35 = vrot.slane %v13245_v29, 3  ;;  %v13677_v29 = vpop.f32.mrf.mxu1  ;;  %v16059_v43 = vld [vmem:[#allocation16_spill] sm:$0xff] }
 0x3c0   : > { %v3003_v5 = vsel %vm1931_vm2, %v16050_v58, %v3002_v32  ;;  %v3252_v41 = vsel %vm3172_vm3, %v16051_v39, %v3251_v30  ;;  %v3995_v40 = vrot.slane %v3868_v22, 3  ;;  %v4116_v15 = vmul.f32 %v13493_v62, %v13545_v3  ;;  %v6629_v22 = vld [vmem:[%s6732_s29 + $0x40] sm:$0xf] }
 0x3c1   : > { %v3500_v14 = vsel %vm3172_vm3, %v16052_v31, %v3499_v45  ;;  %v13665_v44 = vsel %vm3172_vm3, %v16053_v35, %v3747_v33  ;;  %v2323_v2 = vadd.f32 %v2259_v49, %v2075_v26  ;;  %v4364_v11 = vmul.f32 %v13500_v25, %v16039_v24  ;;  %v6627_v49 = vld [vmem:[%s6732_s29 + $0x1c0] sm:$0xf]  ;;  %v13723_v32 = vpop.f32.mrf.mxu1  ;;  %v16064_v31 = vld [vmem:[#allocation59_spill] sm:$0xff] }
 0x3c2   : > { %v4613_v9 = vmul.f32 %v13510_v0, %v13133_v47  ;;  %v4861_v54 = vmul.f32 %v13520_v16, %v16034_v36  ;;  %v3796_v28 = vadd.f32 %v13537_v6, %v3548_v57  ;;  %v16054_v38 = vrot.slane %v13253_v48, 3  ;;  %v13696_v6 = vld [vmem:[%s13958_s3] ss:$0 sm:$0xff] }
 0x3c3   : > { %v4243_v27 = vrot.slane %v4116_v15, 3  ;;  %v5109_v10 = vmul.f32 %v6627_v49, %v13527_v34  ;;  %v2571_v25 = vadd.f32 %v2507_v7, %v2323_v2  ;;  %v4492_v0 = vrot.slane %v4364_v11, 4  ;;  %v16067_v2 = vld [vmem:[#allocation25_spill] sm:$0xff]  ;;  %v13746_v11 = vpop.f32.mrf.mxu0 }
 0x3c4   : > { %v13683_v62 = vsel %vm3172_vm3, %v16054_v38, %v3995_v40  ;;  %v4740_v16 = vrot.slane %v4613_v9, 4  ;;  %v4988_v36 = vrot.slane %v4861_v54, 4  ;;  %v4044_v48 = vadd.f32 %v13542_v50, %v3796_v28  ;;  %v16057_v50 = vld [vmem:[#allocation11_spill] sm:$0xff]  ;;  %v16066_v40 = vld [vmem:[#allocation46_spill] sm:$0xff]  ;;  %v6630_v54 = vld [vmem:[%s6732_s29 + $0x30] sm:$0xff]  ;;  %v13757_v38 = vpop.f32.mrf.mxu1 }
 0x3c5   : > { %v16055_v24 = vrot.slane %v13264_v55, 3  ;;  %v5236_v19 = vrot.slane %v5109_v10, 4  ;;  %v5357_v4 = vmul.f32 %v13570_v21, %v13545_v3  ;;  %v2819_v20 = vadd.f32 %v2755_v17, %v2571_v25  ;;  %v16061_v21 = vld [vmem:[#allocation18_spill] sm:$0xff]  ;;  %v6628_v17 = vld [vmem:[%s6732_s29 + $0x38] sm:$0xff] }
 0x3c6   : > { %v16056_v63 = vrot.slane %v13273_v53, 4  ;;  %v16058_v7 = vrot.slane %v16057_v50, 4  ;;  %v16060_v12 = vrot.slane %v16059_v43, 4  ;;  %v4292_v3 = vadd.f32 %v13550_v52, %v4044_v48  ;;  %v16063_v52 = vld [vmem:[#allocation61_spill] sm:$0xff] }
 0x3c7   : > { %v13702_v34 = vsel %vm3172_vm3, %v16055_v24, %v4243_v27  ;;  %v16062_v30 = vrot.slane %v16061_v21, 4  ;;  %v5484_v45 = vrot.slane %v5357_v4, 4  ;;  %v5730_v23 = vadd.f32 %v13576_v1, %v13696_v6  ;;  %v16068_v27 = vld [vmem:[#allocation19_spill] sm:$0xff]  ;;  %v16070_v24 = vld [vmem:[#allocation40_spill] sm:$0xff]  ;;  %v6632_v43 = vld [vmem:[%s6732_s29 + $0x58] sm:$0xf]  ;;  %v13778_v21 = vpop.f32.mrf.mxu1 }
 0x3c8   : > { %v13711_v61 = vsel %vm4413_vm0, %v16056_v63, %v4492_v0  ;;  %v13716_v55 = vsel %vm4413_vm0, %v16058_v7, %v4740_v16  ;;  %v13721_v59 = vsel %vm4413_vm0, %v16060_v12, %v4988_v36  ;;  %v3067_v8 = vadd.f32 %v3003_v5, %v2819_v20  ;;  %v6631_v63 = vld [vmem:[%s6732_s29 + $0x50] sm:$0xff]  ;;  %v6302_v7 = vpop.f32.mrf.mxu0 }
 0x3c9   : > { %v13729_v53 = vsel %vm4413_vm0, %v16062_v30, %v5236_v19  ;;  %v5932_v33 = vrot.slane %v6628_v17, 2  ;;  %v5934_v26 = vrot.slane %v6629_v22, 2  ;;  %v5810_v58 = vadd.f32 %v13589_v37, %v13696_v6  ;;  %v16071_v30 = vld [vmem:[#allocation28_spill] sm:$0xff] }
 0x3ca   : > { %v4541_v39 = vadd.f32 %v16063_v52, %v4292_v3  ;;  %v16065_v57 = vrot.slane %v16064_v31, 4  ;;  %v5972_v15 = vrot.slane %v16066_v40, 2  ;;  %v5974_v1 = vrot.slane %v16067_v2, 2  ;;  %v16074_v2 = vld [vmem:[#allocation54_spill] sm:$0xff] }
 0x3cb   : > { %v3316_v5 = vadd.f32 %v3252_v41, %v3067_v8  ;;  %v5935_v37 = vsel %vm1931_vm2, %v5932_v33, %v5934_v26  ;;  %v5725_v9 = vadd.f32 %v13696_v6, %v13603_v60  ;;  %v5931_v28 = vrot.slane %v6630_v54, 2  ;;  %v16069_v60 = vld [vmem:[#allocation50_spill] sm:$0xff] }
 0x3cc   : > { %v13742_v35 = vsel %vm4413_vm0, %v16065_v57, %v5484_v45  ;;  %v4789_v49 = vadd.f32 %v16068_v27, %v4541_v39  ;;  %v6044_v41 = vadd.f32 %v5935_v37, %v5730_v23  ;;  %v5975_v10 = vsel %vm1931_vm2, %v5972_v15, %v5974_v1  ;;  %v16072_v23 = vld [vmem:[#allocation44_spill] sm:$0xff]  ;;  %v5754_v57 = vpop.f32.mrf.mxu0  ;;  %v6634_v37 = vld [vmem:[%s6732_s29 + $0x68] sm:$0xff] }
 0x3cd   : > { %v5805_v25 = vadd.f32 %v13696_v6, %v13615_v56  ;;  %v3564_v0 = vadd.f32 %v3500_v14, %v3316_v5  ;;  %v6060_v16 = vadd.f32 %v5975_v10, %v5810_v58  ;;  %v5933_v36 = vsel %vm1931_vm2, %v5931_v28, %v5932_v33 }
 0x3ce   : > { %v5971_v48 = vrot.slane %v16069_v60, 2  ;;  %v5037_v19 = vadd.f32 %v16070_v24, %v4789_v49  ;;  %6076 = vst.msk [vmem:[%s13751_s9 + $0x8] sm:$0xff] %vm5558_vm4, %v6044_v41  ;;  %v6043_v4 = vadd.f32 %v5933_v36, %v5725_v9  ;;  %v5740_v20 = vadd.f32 %v13636_v18, %v13696_v6  ;;  %v6636_v41 = vld [vmem:[%s6732_s29 + $0x128] sm:$0xff]  ;;  %v6305_v36 = vpop.f32.mrf.mxu0 }
 0x3cf   : > { %v5937_v50 = vrot.slane %v6631_v63, 2  ;;  %v3812_v56 = vadd.f32 %v13665_v44, %v3564_v0  ;;  %6092 = vst.msk [vmem:[%s13751_s9 + $0x88] sm:$0xff] %vm5558_vm4, %v6060_v16  ;;  %v5939_v12 = vrot.slane %v6632_v43, 2  ;;  %v5820_v3 = vadd.f32 %v13638_v13, %v13696_v6  ;;  %v16073_v44 = vld [vmem:[#allocation37_spill] sm:$0xff]  ;;  %v6633_v13 = vld [vmem:[%s6732_s29 + $0x48] sm:$0xff]  ;;  %v6639_v63 = vld [vmem:[%s6732_s29 + $0x120] sm:$0xff] }
 0x3d0   : > { %v5973_v14 = vsel %vm1931_vm2, %v5971_v48, %v5972_v15  ;;  %v5285_v18 = vadd.f32 %v16071_v30, %v5037_v19  ;;  %6075 = vst.msk [vmem:[%s13751_s9] sm:$0xff] %vm5558_vm4, %v6043_v4  ;;  %v5977_v8 = vrot.slane %v16072_v23, 2  ;;  %v5979_v17 = vrot.slane %v16073_v44, 2  ;;  %v6637_v0 = vld [vmem:[%s6732_s29 + $0x130] sm:$0xf]  ;;  %v6638_v48 = vld [vmem:[%s6732_s29 + $0x60] sm:$0xff] }
 0x3d1   : > { %v6059_v45 = vadd.f32 %v5973_v14, %v5805_v25  ;;  %v4060_v33 = vadd.f32 %v13683_v62, %v3812_v56  ;;  %v5940_v22 = vsel %vm1931_vm2, %v5937_v50, %v5939_v12  ;;  %v5735_v26 = vadd.f32 %v13696_v6, %v13669_v51  ;;  %v6640_v56 = vld [vmem:[%s6732_s29 + $0x80] sm:$0xff]  ;;  %v6641_v12 = vld [vmem:[%s6732_s29 + $0x88] sm:$0xf] }
 0x3d2   : > { %v5936_v58 = vrot.slane %v6633_v13, 2  ;;  %v5533_v52 = vadd.f32 %v13598_v46, %v5285_v18  ;;  %v6046_v39 = vadd.f32 %v5940_v22, %v5740_v20  ;;  %v5980_v31 = vsel %vm1931_vm2, %v5977_v8, %v5979_v17  ;;  %v5834_v46 = vpop.f32.mrf.mxu1 }
 0x3d3   : > { %6091 = vst.msk [vmem:[%s13751_s9 + $0x80] sm:$0xff] %vm5558_vm4, %v6059_v45  ;;  %v5815_v62 = vadd.f32 %v13696_v6, %v13677_v29  ;;  %v4308_v40 = vadd.f32 %v13702_v34, %v4060_v33  ;;  %v6062_v15 = vadd.f32 %v5980_v31, %v5820_v3  ;;  %v5976_v1 = vrot.slane %v16074_v2, 2  ;;  %v6635_v34 = vld [vmem:[%s6732_s29 + $0x70] sm:$0xf]  ;;  %v6642_v45 = vld [vmem:[%s6732_s29 + $0x140] sm:$0xff]  ;;  %v6646_v2 = vld [vmem:[%s6732_s29 + $0x98] sm:$0xff] }
 0x3d4   : > { %v5938_v51 = vsel %vm1931_vm2, %v5936_v58, %v5937_v50  ;;  %6313 = vmatmul.mubr.msk.f32.gmra.mxu0 %vm5558_vm4, %v5533_v52  ;;  %6078 = vst.msk [vmem:[%s13751_s9 + $0x18] sm:$0xff] %vm5558_vm4, %v6046_v39  ;;  %v5750_v29 = vadd.f32 %v13706_v42, %v13696_v6  ;;  %v5942_v9 = vrot.slane %v6634_v37, 2  ;;  %v5944_v54 = vrot.slane %v6635_v34, 2  ;;  %v6329_v4 = vpop.f32.mrf.mxu1  ;;  %v6643_v33 = vld [vmem:[%s6732_s29 + $0x148] sm:$0xf]  ;;  %v6644_v58 = vld [vmem:[%s6732_s29 + $0x78] sm:$0xff] }
 0x3d5   : > { %v6045_v5 = vadd.f32 %v5938_v51, %v5735_v26  ;;  %v4557_v28 = vadd.f32 %v13711_v61, %v4308_v40  ;;  %6094 = vst.msk [vmem:[%s13751_s9 + $0x98] sm:$0xff] %vm5558_vm4, %v6062_v15  ;;  %v5978_v27 = vsel %vm1931_vm2, %v5976_v1, %v5977_v8  ;;  %v5830_v49 = vadd.f32 %v13723_v32, %v13696_v6  ;;  %v6648_v34 = vld [vmem:[%s6732_s29 + $0x158] sm:$0xff] }
 0x3d6   : > { %v5982_v10 = vrot.slane %v6636_v41, 2  ;;  %v6061_v42 = vadd.f32 %v5978_v27, %v5815_v62  ;;  %v5945_v25 = vsel %vm1931_vm2, %v5942_v9, %v5944_v54  ;;  %v5984_v16 = vrot.slane %v6637_v0, 2  ;;  %v5844_v26 = vpop.f32.mrf.mxu1  ;;  %v6645_v62 = vld [vmem:[%s6732_s29 + $0x138] sm:$0xff]  ;;  %v6649_v41 = vld [vmem:[%s6732_s29 + $0x160] sm:$0xf]  ;;  %v6650_v0 = vld [vmem:[%s6732_s29 + $0x90] sm:$0xff] }
 0x3d7   : > { %6077 = vst.msk [vmem:[%s13751_s9 + $0x10] sm:$0xff] %vm5558_vm4, %v6045_v5  ;;  %v5745_v61 = vadd.f32 %v13696_v6, %v13746_v11  ;;  %v4805_v60 = vadd.f32 %v13716_v55, %v4557_v28  ;;  %v6048_v32 = vadd.f32 %v5945_v25, %v5750_v29  ;;  %v5941_v24 = vrot.slane %v6638_v48, 2 }
 0x3d8   : > { %v5825_v19 = vadd.f32 %v13696_v6, %v13757_v38  ;;  %6093 = vst.msk [vmem:[%s13751_s9 + $0x90] sm:$0xff] %vm5558_vm4, %v6061_v42  ;;  %v5985_v20 = vsel %vm1931_vm2, %v5982_v10, %v5984_v16  ;;  %v5981_v50 = vrot.slane %v6639_v63, 2  ;;  %v5760_v11 = vadd.f32 %v6302_v7, %v13696_v6  ;;  %v6332_v28 = vpop.f32.mrf.mxu1 }
 0x3d9   : > { %v5947_v55 = vrot.slane %v6640_v56, 2  ;;  %v5053_v14 = vadd.f32 %v13721_v59, %v4805_v60  ;;  %6080 = vst.msk [vmem:[%s13751_s9 + $0x28] sm:$0xff] %vm5558_vm4, %v6048_v32  ;;  %v6064_v43 = vadd.f32 %v5985_v20, %v5830_v49  ;;  %v5943_v38 = vsel %vm1931_vm2, %v5941_v24, %v5942_v9  ;;  %v5764_v59 = vpop.f32.mrf.mxu0  ;;  %v6652_v24 = vld [vmem:[%s6732_s29 + $0xb0] sm:$0xff] }
 0x3da   : > { %v5949_v3 = vrot.slane %v6641_v12, 2  ;;  %v6047_v30 = vadd.f32 %v5943_v38, %v5745_v61  ;;  %v5983_v18 = vsel %vm1931_vm2, %v5981_v50, %v5982_v10  ;;  %v5840_v7 = vadd.f32 %v13778_v21, %v13696_v6 }
 0x3db   : > { %v5987_v23 = vrot.slane %v6642_v45, 2  ;;  %v5301_v8 = vadd.f32 %v13729_v53, %v5053_v14  ;;  %6096 = vst.msk [vmem:[%s13751_s9 + $0xa8] sm:$0xff] %vm5558_vm4, %v6064_v43  ;;  %v6063_v44 = vadd.f32 %v5983_v18, %v5825_v19  ;;  %v5989_v22 = vrot.slane %v6643_v33, 2  ;;  %v6308_v5 = vpop.f32.mrf.mxu0  ;;  %v5854_v14 = vpop.f32.mrf.mxu1 }
 0x3dc   : > { %v5950_v17 = vsel %vm1931_vm2, %v5947_v55, %v5949_v3  ;;  %6079 = vst.msk [vmem:[%s13751_s9 + $0x20] sm:$0xff] %vm5558_vm4, %v6047_v30  ;;  %v5755_v13 = vadd.f32 %v13696_v6, %v5754_v57  ;;  %v5946_v52 = vrot.slane %v6644_v58, 2  ;;  %v5835_v53 = vadd.f32 %v13696_v6, %v5834_v46  ;;  %v6647_v46 = vld [vmem:[%s6732_s29 + $0xa0] sm:$0xf]  ;;  %v16076_v3 = vld [vmem:[#allocation63_spill] sm:$0xff] }
 0x3dd   : > { %v6050_v21 = vadd.f32 %v5950_v17, %v5760_v11  ;;  %v5549_v39 = vadd.f32 %v13742_v35, %v5301_v8  ;;  %6095 = vst.msk [vmem:[%s13751_s9 + $0xa0] sm:$0xff] %vm5558_vm4, %v6063_v44  ;;  %v5990_v31 = vsel %vm1931_vm2, %v5987_v23, %v5989_v22  ;;  %v5986_v40 = vrot.slane %v6645_v62, 2  ;;  %v5774_v63 = vpop.f32.mrf.mxu0  ;;  %v16077_v17 = vld [vmem:[#allocation7_spill] sm:$0xff] }
 0x3de   : > { %v5770_v15 = vadd.f32 %v6305_v36, %v13696_v6  ;;  %v6066_v51 = vadd.f32 %v5990_v31, %v5840_v7  ;;  %v5948_v57 = vsel %vm1931_vm2, %v5946_v52, %v5947_v55  ;;  %v5952_v1 = vrot.slane %v6646_v2, 2  ;;  %v6651_v36 = vld [vmem:[%s6732_s29 + $0x150] sm:$0xff]  ;;  %v6653_v7 = vld [vmem:[%s6732_s29 + $0x178] sm:$0xf]  ;;  %v16078_v31 = vld [vmem:[#allocation27_spill] sm:$0xff] }
 0x3df   : > { %6082 = vst.msk [vmem:[%s13751_s9 + $0x38] sm:$0xff] %vm5558_vm4, %v6050_v21  ;;  %v5954_v35 = vrot.slane %v6647_v46, 2  ;;  %6337 = vmatmul.mubr.msk.f32.gmra.mxu1 %vm5558_vm4, %v5549_v39  ;;  %v6049_v29 = vadd.f32 %v5948_v57, %v5755_v13  ;;  %v5988_v37 = vsel %vm1931_vm2, %v5986_v40, %v5987_v23  ;;  %v5850_v9 = vadd.f32 %v6329_v4, %v13696_v6  ;;  %v16075_v4 = vld [vmem:[#allocation17_spill] sm:$0xff]  ;;  %v6656_v40 = vld [vmem:[%s6732_s29 + $0xc0] sm:$0xff] }
 0x3e0   : > { %v5992_v54 = vrot.slane %v6648_v34, 2  ;;  %6098 = vst.msk [vmem:[%s13751_s9 + $0xb8] sm:$0xff] %vm5558_vm4, %v6066_v51  ;;  %v6065_v27 = vadd.f32 %v5988_v37, %v5835_v53  ;;  %v5994_v10 = vrot.slane %v6649_v41, 2  ;;  %v5765_v42 = vadd.f32 %v13696_v6, %v5764_v59  ;;  %v6654_v59 = vld [vmem:[%s6732_s29 + $0xa8] sm:$0xff] }
 0x3e1   : > { %v5955_v49 = vsel %vm1931_vm2, %v5952_v1, %v5954_v35  ;;  %6081 = vst.msk [vmem:[%s13751_s9 + $0x30] sm:$0xff] %vm5558_vm4, %v6049_v29  ;;  %v5951_v16 = vrot.slane %v6650_v0, 2  ;;  %v5845_v61 = vadd.f32 %v13696_v6, %v5844_v26  ;;  %v5991_v60 = vrot.slane %v6651_v36, 2  ;;  %v6655_v53 = vld [vmem:[%s6732_s29 + $0xc8] sm:$0xff]  ;;  %v16081_v36 = vld [vmem:[#allocation5_spill] sm:$0xff] }
 0x3e2   : > { %v6052_v25 = vadd.f32 %v5955_v49, %v5770_v15  ;;  %6097 = vst.msk [vmem:[%s13751_s9 + $0xb0] sm:$0xff] %vm5558_vm4, %v6065_v27  ;;  %v5995_v32 = vsel %vm1931_vm2, %v5992_v54, %v5994_v10  ;;  %v5780_v48 = vadd.f32 %v6308_v5, %v13696_v6  ;;  %v5957_v19 = vrot.slane %v6652_v24, 2  ;;  %v6657_v37 = vld [vmem:[%s6732_s29 + $0x188] sm:$0xff] }
 0x3e3   : > { %v5959_v20 = vrot.slane %v16075_v4, 2  ;;  %v6068_v50 = vadd.f32 %v5995_v32, %v5850_v9  ;;  %v5953_v11 = vsel %vm1931_vm2, %v5951_v16, %v5952_v1  ;;  %v5993_v56 = vsel %vm1931_vm2, %v5991_v60, %v5992_v54  ;;  %v16079_v54 = vld [vmem:[#allocation49_spill] sm:$0xff] }
 0x3e4   : > { %6084 = vst.msk [vmem:[%s13751_s9 + $0x48] sm:$0xff] %vm5558_vm4, %v6052_v25  ;;  %v5860_v55 = vadd.f32 %v6332_v28, %v13696_v6  ;;  %v6051_v43 = vadd.f32 %v5953_v11, %v5765_v42  ;;  %v6067_v38 = vadd.f32 %v5993_v56, %v5845_v61  ;;  %v5997_v30 = vrot.slane %v16076_v3, 2  ;;  %v6658_v32 = vld [vmem:[%s6732_s29 + $0xd8] sm:$0xff] }
 0x3e5   : > { %v5960_v12 = vsel %vm1931_vm2, %v5957_v19, %v5959_v20  ;;  %6100 = vst.msk [vmem:[%s13751_s9 + $0xc8] sm:$0xff] %vm5558_vm4, %v6068_v50  ;;  %v5999_v45 = vrot.slane %v6653_v7, 2  ;;  %v5775_v23 = vadd.f32 %v13696_v6, %v5774_v63  ;;  %v5956_v8 = vrot.slane %v6654_v59, 2 }
 0x3e6   : > { %v6054_v18 = vadd.f32 %v5960_v12, %v5780_v48  ;;  %6083 = vst.msk [vmem:[%s13751_s9 + $0x40] sm:$0xff] %vm5558_vm4, %v6051_v43  ;;  %6099 = vst.msk [vmem:[%s13751_s9 + $0xc0] sm:$0xff] %vm5558_vm4, %v6067_v38  ;;  %v5855_v44 = vadd.f32 %v13696_v6, %v5854_v14  ;;  %v5996_v33 = vrot.slane %v16077_v17, 2  ;;  %v5962_v39 = vrot.slane %v6655_v53, 2  ;;  %v6660_v43 = vld [vmem:[%s6732_s29 + $0x1a8] sm:$0xf] }
 0x3e7   : > { %v6000_v22 = vsel %vm1931_vm2, %v5997_v30, %v5999_v45  ;;  %v5958_v26 = vsel %vm1931_vm2, %v5956_v8, %v5957_v19  ;;  %v5964_v62 = vrot.slane %v16078_v31, 2  ;;  %v5961_v15 = vrot.slane %v6656_v40, 2  ;;  %v6661_v12 = vld [vmem:[%s6732_s29 + $0x198] sm:$0xff] }
 0x3e8   : > { %6086 = vst.msk [vmem:[%s13751_s9 + $0x58] sm:$0xff] %vm5558_vm4, %v6054_v18  ;;  %v6070_v21 = vadd.f32 %v6000_v22, %v5860_v55  ;;  %v6053_v13 = vadd.f32 %v5958_v26, %v5775_v23  ;;  %v5998_v58 = vsel %vm1931_vm2, %v5996_v33, %v5997_v30  ;;  %v6002_v9 = vrot.slane %v6657_v37, 2  ;;  %v6659_v55 = vld [vmem:[%s6732_s29 + $0x1a0] sm:$0xff] }
 0x3e9   : > { %v6069_v52 = vadd.f32 %v5998_v58, %v5855_v44  ;;  %v5965_v57 = vsel %vm1931_vm2, %v5962_v39, %v5964_v62  ;;  %v5963_v46 = vsel %vm1931_vm2, %v5961_v15, %v5962_v39  ;;  %v6004_v34 = vrot.slane %v13133_v47, 2  ;;  %v16080_v47 = vld [vmem:[#allocation53_spill] sm:$0xff] }
 0x3ea   : > { %6102 = vst.msk [vmem:[%s13751_s9 + $0xd8] sm:$0xff] %vm5558_vm4, %v6070_v21  ;;  %6085 = vst.msk [vmem:[%s13751_s9 + $0x50] sm:$0xff] %vm5558_vm4, %v6053_v13  ;;  %v6001_v28 = vrot.slane %v16079_v54, 2  ;;  %v5967_v61 = vrot.slane %v16080_v47, 2  ;;  %v5969_v60 = vrot.slane %v16081_v36, 2  ;;  %v5966_v48 = vrot.slane %v6658_v32, 2 }
 0x3eb   : > { %6101 = vst.msk [vmem:[%s13751_s9 + $0xd0] sm:$0xff] %vm5558_vm4, %v6069_v52  ;;  %v6005_v49 = vsel %vm1931_vm2, %v6002_v9, %v6004_v34  ;;  %v6007_v14 = vrot.slane %v6659_v55, 2  ;;  %v6009_v38 = vrot.slane %v6660_v43, 2  ;;  %v6006_v3 = vrot.slane %v6661_v12, 2 }
 0x3ec   : > { %v6003_v42 = vsel %vm1931_vm2, %v6001_v28, %v6002_v9  ;;  %v5970_v19 = vsel %vm1931_vm2, %v5967_v61, %v5969_v60  ;;  %v5968_v63 = vsel %vm1931_vm2, %v5966_v48, %v5967_v61 }
 0x3ed   : > { %v6010_v18 = vsel %vm1931_vm2, %v6007_v14, %v6009_v38  ;;  %v6008_v23 = vsel %vm1931_vm2, %v6006_v3, %v6007_v14 }
 0x417   : > { %v6311_v51 = vpop.f32.mrf.mxu0 }
 0x418   : > { %v5790_v2 = vadd.f32 %v6311_v51, %v13696_v6 }
 0x419   : > { %v5784_v1 = vpop.f32.mrf.mxu0 }
 0x41a   : > { %v6056_v35 = vadd.f32 %v5965_v57, %v5790_v2  ;;  %v5785_v5 = vadd.f32 %v13696_v6, %v5784_v1 }
 0x41c   : > { %6088 = vst.msk [vmem:[%s13751_s9 + $0x68] sm:$0xff] %vm5558_vm4, %v6056_v35  ;;  %v6055_v29 = vadd.f32 %v5963_v46, %v5785_v5 }
 0x41e   : > { %6087 = vst.msk [vmem:[%s13751_s9 + $0x60] sm:$0xff] %vm5558_vm4, %v6055_v29 }
 0x42c   : > { %v6335_v27 = vpop.f32.mrf.mxu1 }
 0x42d   : > { %v5870_v41 = vadd.f32 %v6335_v27, %v13696_v6 }
 0x42e   : > { %v5864_v10 = vpop.f32.mrf.mxu1 }
 0x42f   : > { %v6072_v25 = vadd.f32 %v6005_v49, %v5870_v41  ;;  %v5865_v0 = vadd.f32 %v13696_v6, %v5864_v10 }
 0x431   : > { %6104 = vst.msk [vmem:[%s13751_s9 + $0xe8] sm:$0xff] %vm5558_vm4, %v6072_v25  ;;  %v6071_v16 = vadd.f32 %v6003_v42, %v5865_v0 }
 0x433   : > { %6103 = vst.msk [vmem:[%s13751_s9 + $0xe0] sm:$0xff] %vm5558_vm4, %v6071_v16 }
 0x494   : > { %v6314_v24 = vpop.f32.mrf.mxu0 }
 0x495   : > { %v5800_v4 = vadd.f32 %v6314_v24, %v13696_v6 }
 0x496   : > { %v5794_v20 = vpop.f32.mrf.mxu0 }
 0x497   : > { %v6058_v50 = vadd.f32 %v5970_v19, %v5800_v4  ;;  %v5795_v11 = vadd.f32 %v13696_v6, %v5794_v20 }
 0x499   : > { %6090 = vst.msk [vmem:[%s13751_s9 + $0x78] sm:$0xff] %vm5558_vm4, %v6058_v50  ;;  %v6057_v56 = vadd.f32 %v5968_v63, %v5795_v11 }
 0x49b   : > { %6089 = vst.msk [vmem:[%s13751_s9 + $0x70] sm:$0xff] %vm5558_vm4, %v6057_v56 }
 0x49f   : > { %v6338_v30 = vpop.f32.mrf.mxu1 }
 0x4a0   : > { %v5880_v7 = vadd.f32 %v6338_v30, %v13696_v6 }
 0x4a1   : > { %v5874_v45 = vpop.f32.mrf.mxu1 }
 0x4a2   : > { %v6074_v59 = vadd.f32 %v6010_v18, %v5880_v7  ;;  %v5875_v8 = vadd.f32 %v13696_v6, %v5874_v45 }
 0x4a4   : > { %6106 = vst.msk [vmem:[%s13751_s9 + $0xf8] sm:$0xff] %vm5558_vm4, %v6074_v59  ;;  %v6073_v44 = vadd.f32 %v6008_v23, %v5875_v8 }
 0x4a6   : > { %6105 = vst.msk [vmem:[%s13751_s9 + $0xf0] sm:$0xff] %vm5558_vm4, %v6073_v44 }
 0x4a7 PF: > { %s14_s15 = sadd.s32 1, %s6668_s15  }
 0x4a8   : > { %p11_p5 = scmp.ge.s32.totalorder %s14_s15, 4  }
 0x4aa   :  { %13 = sbr.rel (!%p11_p5) target bundleno = 1 (0x1), region = 90 }

</bundles_post_ra>
